<compile_context>
chip_gen: v7x
topology: tpu7x:2x2x1
jax: 0.10.0
libtpu: 0.0.40
codegen_flags: <defaults>
</compile_context>

<pallas_src>
import functools
import math

import jax
import jax.numpy as jnp
import numpy as np
from jax import lax
from jax.experimental import pallas as pl
from jax.experimental.pallas import tpu as pltpu


_LANE = 128
_PROJ_CHUNK_ROWS = 256     # target rows per MXU chunk (projection / MLP head)


def _round_up(x, m):
    return ((x + m - 1) // m) * m


def _largest_divisor_leq(n, cap):
    cap = max(1, min(n, cap))
    for d in range(cap, 0, -1):
        if n % d == 0:
            return d
    return 1


def _aligned(i, m):
    """Alignment hint for pl.ds starts (no-op on static Python ints)."""
    return i if isinstance(i, int) else pl.multiple_of(i, m)


def make_lsmgru_kernel(T, Bb, Din, Hp, Dp, num_layers, mm_dtype, n_sub,
                       unroll_recurrence):
    """Builds a Pallas kernel closed over the static problem sizes.

    Bb: per-program (padded) batch block (multiple of 8, or 16 for bf16).
    Hp: per-gate hidden width padded to a multiple of 128 lanes.
    Dp: output width padded to a multiple of 128 lanes (lane-dense stores).
    """
    H3 = 3 * Hp
    sb = Bb // n_sub                                   # rows per interleaved sub-block
    kt = _largest_divisor_leq(T, max(1, _PROJ_CHUNK_ROWS // Bb))   # time steps / chunk
    n_chunks = T // kt
    rows_c = kt * Bb                                   # rows per projection/head chunk

    def kernel(*args):
        # ---- parse refs: inputs..., output, scratch ----
        x_ref = args[0]                        # (T, Bb, Din)    VMEM, mm_dtype
        idx = 1
        layers = []
        for _ in range(num_layers):
            layers.append(args[idx:idx + 4])   # wih (d,3Hp), whh (Hp,3Hp), bi, bhn (1,3Hp)
            idx += 4
        w1_ref, b1_ref, w2_ref, b2_ref = args[idx:idx + 4]
        out_ref = args[idx + 4]                # (T, Bb, Dp)     VMEM, f32
        gi_ref = args[idx + 5]                 # (T*Bb, 3Hp)     VMEM scratch, mm_dtype
        seq_ref = args[idx + 6]                # (T*Bb, Hp)      VMEM scratch, mm_dtype

        def for_chunks(body):
            if n_chunks == 1:
                body(0)
            else:
                def loop_body(c, carry):
                    body(c)
                    return carry
                lax.fori_loop(0, n_chunks, loop_body, 0)

        # ---- stacked GRU layers ----
        for l in range(num_layers):
            wih_ref, whh_ref, bi_ref, bhn_ref = layers[l]

            # (a) Hoisted, time-independent fused input projection for all 3 gates,
            #     row-chunked to bound live vregs.  bi already holds b_ir+b_hr |
            #     b_iz+b_hz | b_in.
            def proj_chunk(c, l=l, wih_ref=wih_ref, bi_ref=bi_ref):
                t0 = _aligned(c * kt, kt)
                r0 = _aligned(c * rows_c, rows_c)
                if l == 0:
                    # Collapsing (kt, Bb, Din) -> (kt*Bb, Din) preserves (8,128)
                    # tiling since Bb % 8 == 0.
                    inp = x_ref[pl.ds(t0, kt), :, :].reshape(rows_c, Din)
                else:
                    inp = seq_ref[pl.ds(r0, rows_c), :]
                gi = jnp.dot(inp, wih_ref[...],
                             preferred_element_type=jnp.float32) + bi_ref[...]
                gi_ref[pl.ds(r0, rows_c), :] = gi.astype(gi_ref.dtype)

            for_chunks(proj_chunk)

            # (b) Serial recurrence.  Per step / sub-block: one (sb,Hp)x(Hp,3Hp)
            #     matmul + f32 gate math.  h carried in vregs (f32), never through
            #     VMEM; only seq[t] is stored.
            def step(row, h, whh_ref=whh_ref, bhn_ref=bhn_ref):
                gh = jnp.dot(h.astype(mm_dtype), whh_ref[...],
                             preferred_element_type=jnp.float32) + bhn_ref[...]
                g = gi_ref[pl.ds(row, sb), :].astype(jnp.float32)      # (sb, 3Hp)
                r = jax.nn.sigmoid(g[:, :Hp] + gh[:, :Hp])
                z = jax.nn.sigmoid(g[:, Hp:2 * Hp] + gh[:, Hp:2 * Hp])
                n = jnp.tanh(g[:, 2 * Hp:] + r * gh[:, 2 * Hp:])
                h_new = (1.0 - z) * n + z * h
                seq_ref[pl.ds(row, sb), :] = h_new.astype(seq_ref.dtype)
                return h_new

            h0 = tuple(jnp.zeros((sb, Hp), jnp.float32) for _ in range(n_sub))
            if unroll_recurrence:
                # Full static unroll (small T): interleaved independent sub-blocks
                # give the scheduler MXU/EUP/VPU overlap across chains.
                hs = list(h0)
                for t in range(T):
                    hs = [step(t * Bb + s * sb, hs[s]) for s in range(n_sub)]
            else:
                # Large-T: fori_loop carrying h as a value (no per-step VMEM
                # round-trip), small unroll for LLO visibility.
                def body(t, hs):
                    return tuple(
                        step(_aligned(t * Bb + s * sb, sb), hs[s])
                        for s in range(n_sub))
                lax.fori_loop(0, T, body, h0, unroll=min(4, T))

        # ---- MLP head: fused relu(seq@W1+b1)@W2+b2 per row chunk, lane-dense out ----
        def head_chunk(c):
            t0 = _aligned(c * kt, kt)
            r0 = _aligned(c * rows_c, rows_c)
            seq_c = seq_ref[pl.ds(r0, rows_c), :]
            hid = jnp.dot(seq_c, w1_ref[...],
                          preferred_element_type=jnp.float32) + b1_ref[...]
            hid = jnp.maximum(hid, 0.0).astype(mm_dtype)
            y = jnp.dot(hid, w2_ref[...],
                        preferred_element_type=jnp.float32) + b2_ref[...]
            out_ref[pl.ds(t0, kt), :, :] = y.reshape(kt, Bb, Dp)

        for_chunks(head_chunk)

    return kernel


def init_params(key, inp_dim, out_dim, hidden_dim, num_layers):
    """Deterministic init mirroring PyTorch shapes/default uniform init."""
    params = {}
    k_gru = 1.0 / math.sqrt(hidden_dim)
    for l in range(num_layers):
        d = inp_dim if l == 0 else hidden_dim
        key, k1, k2, k3, k4 = jax.random.split(key, 5)
        params[f"w_ih_{l}"] = jax.random.uniform(
            k1, (3 * hidden_dim, d), jnp.float32, -k_gru, k_gru)
        params[f"w_hh_{l}"] = jax.random.uniform(
            k2, (3 * hidden_dim, hidden_dim), jnp.float32, -k_gru, k_gru)
        params[f"b_ih_{l}"] = jax.random.uniform(
            k3, (3 * hidden_dim,), jnp.float32, -k_gru, k_gru)
        params[f"b_hh_{l}"] = jax.random.uniform(
            k4, (3 * hidden_dim,), jnp.float32, -k_gru, k_gru)
    key, k1, k2, k3, k4 = jax.random.split(key, 5)
    k_l1 = 1.0 / math.sqrt(hidden_dim)
    params["w1"] = jax.random.uniform(k1, (hidden_dim, hidden_dim), jnp.float32, -k_l1, k_l1)
    params["b1"] = jax.random.uniform(k2, (hidden_dim,), jnp.float32, -k_l1, k_l1)
    params["w2"] = jax.random.uniform(k3, (out_dim, hidden_dim), jnp.float32, -k_l1, k_l1)
    params["b2"] = jax.random.uniform(k4, (out_dim,), jnp.float32, -k_l1, k_l1)
    return params


@functools.partial(
    jax.jit,
    static_argnames=("hidden_dim", "out_dim", "num_layers", "compute_dtype",
                     "batch_block", "unroll_recurrence"))
def lsmgru_forward_pallas(x, params, *, hidden_dim, out_dim, num_layers,
                          compute_dtype="float32", batch_block=None,
                          unroll_recurrence=None):
    """x: (B, inp_dim, T)  ->  (B, out_dim, T)   (matches PyTorch module I/O)."""
    B, Din, T = x.shape
    H, Dout = hidden_dim, out_dim
    mm_dtype = jnp.dtype(compute_dtype)
    mm_bytes = mm_dtype.itemsize

    Hp = _round_up(H, _LANE)       # per-gate lane padding (r/z/n slices lane-aligned)
    Dp = _round_up(Dout, _LANE)    # lane-dense output stores
    H3 = 3 * Hp

    # bf16 packs two rows per sublane -> require 16-row batch blocks for bf16.
    min_sub = 16 if mm_bytes < 4 else 8

    # --- VMEM budget arithmetic (bytes per program) --------------------------
    #   x block (double-buffered) + out block (double-buffered)
    #   + gi scratch (T*Bb, 3Hp) + seq scratch (T*Bb, Hp)  [both in mm_dtype]
    #   + weights/biases (double-buffered by the pipeline).
    try:
        vmem_cap = int(pltpu.get_tpu_info().vmem_capacity_bytes)
    except Exception:
        vmem_cap = 64 * 1024 * 1024    # v7x-safe fallback (v5e/v6e have 128 MiB)

    weight_bytes = 0
    for l in range(num_layers):
        d_l = Din if l == 0 else Hp
        weight_bytes += (d_l * H3 + Hp * H3) * mm_bytes + 2 * H3 * 4
    weight_bytes += (Hp * Hp + Hp * Dp) * mm_bytes + (Hp + Dp) * 4

    def vmem_need(bb):
        return (2 * T * bb * Din * mm_bytes    # x block, double-buffered
                + 2 * T * bb * Dp * 4          # out block, double-buffered
                + T * bb * H3 * mm_bytes       # gi scratch
                + T * bb * Hp * mm_bytes       # seq scratch
                + 2 * weight_bytes)            # weights, double-buffered

    budget = int(0.8 * (vmem_cap - (4 << 20)))
    if batch_block is None:
        # Target big batch blocks (MXU row utilization); shrink to fit VMEM.
        Bb = _round_up(min(256, _round_up(B, min_sub)), min_sub)
        while Bb > min_sub and vmem_need(Bb) > budget:
            Bb -= min_sub
    else:
        Bb = batch_block
    assert Bb % min_sub == 0, (Bb, min_sub)
    Bpad = _round_up(B, Bb)

    # Interleave 2 independent sub-block recurrences when the block is big enough.
    n_sub = 2 if (Bb >= 2 * min_sub and Bb % (2 * min_sub) == 0) else 1
    if unroll_recurrence is None:
        unroll_recurrence = T <= 32

    # --- weight / bias prep (gate-wise lane padding, bias folding) -----------
    def pad_cols(w, cols):
        return jnp.pad(w, ((0, 0), (0, cols - w.shape[1])))

    def pad_rows(w, rows):
        return jnp.pad(w, ((0, rows - w.shape[0]), (0, 0)))

    def pad_gates_mat(w_t):            # (d, 3H) -> (d, 3Hp), gate blocks r|z|n
        r, z, n = jnp.split(w_t, 3, axis=1)
        return jnp.concatenate(
            [pad_cols(r, Hp), pad_cols(z, Hp), pad_cols(n, Hp)], axis=1)

    def pad_gates_vec(v):              # (3H,) -> (3Hp,)
        r, z, n = jnp.split(v, 3)
        p = lambda u: jnp.pad(u, (0, Hp - H))
        return jnp.concatenate([p(r), p(z), p(n)])

    # x: cast to the matmul dtype in the wrapper (halves HBM->VMEM DMA for bf16).
    x_tbd = jnp.transpose(x, (2, 0, 1)).astype(mm_dtype)     # (T, B, Din)
    if Bpad != B:
        x_tbd = jnp.pad(x_tbd, ((0, 0), (0, Bpad - B), (0, 0)))

    def bcast_spec(shape):
        return pl.BlockSpec(shape, lambda i: (0,) * len(shape))

    inputs = [x_tbd]
    in_specs = [pl.BlockSpec((T, Bb, Din), lambda i: (0, i, 0))]

    for l in range(num_layers):
        d_lp = Din if l == 0 else Hp
        w_ih = params[f"w_ih_{l}"]       # (3H, d), gate order r,z,n
        w_hh = params[f"w_hh_{l}"]       # (3H, H)
        b_ih = params[f"b_ih_{l}"]       # (3H,)
        b_hh = params[f"b_hh_{l}"]       # (3H,)

        wih_t = pad_rows(pad_gates_mat(jnp.transpose(w_ih)), d_lp)    # (d_lp, 3Hp)
        whh_t = pad_rows(pad_gates_mat(jnp.transpose(w_hh)), Hp)      # (Hp, 3Hp)
        # Fold b_hr, b_hz into the input-side bias (lives in gi); keep b_hn on the
        # hidden side (it sits inside the r * (W_hn h + b_hn) term in PyTorch GRU).
        bi = pad_gates_vec(
            b_ih + jnp.concatenate([b_hh[:2 * H], jnp.zeros((H,), jnp.float32)]))
        bhn = jnp.concatenate(
            [jnp.zeros((2 * Hp,), jnp.float32), jnp.pad(b_hh[2 * H:], (0, Hp - H))])

        inputs += [wih_t.astype(mm_dtype), whh_t.astype(mm_dtype),
                   bi.reshape(1, H3).astype(jnp.float32),
                   bhn.reshape(1, H3).astype(jnp.float32)]
        in_specs += [bcast_spec((d_lp, H3)), bcast_spec((Hp, H3)),
                     bcast_spec((1, H3)), bcast_spec((1, H3))]

    w1p = pad_cols(pad_rows(jnp.transpose(params["w1"]), Hp), Hp)     # (Hp, Hp)
    b1p = jnp.pad(params["b1"], (0, Hp - H)).reshape(1, Hp)
    w2p = pad_cols(pad_rows(jnp.transpose(params["w2"]), Hp), Dp)     # (Hp, Dp)
    b2p = jnp.pad(params["b2"], (0, Dp - Dout)).reshape(1, Dp)
    inputs += [w1p.astype(mm_dtype), b1p.astype(jnp.float32),
               w2p.astype(mm_dtype), b2p.astype(jnp.float32)]
    in_specs += [bcast_spec((Hp, Hp)), bcast_spec((1, Hp)),
                 bcast_spec((Hp, Dp)), bcast_spec((1, Dp))]

    grid = (Bpad // Bb,)    # independent batch blocks -> "parallel" (megacore-splittable)
    kernel = make_lsmgru_kernel(T, Bb, Din, Hp, Dp, num_layers, mm_dtype,
                                n_sub, unroll_recurrence)
    vmem_limit = int(min(vmem_cap, max(vmem_need(Bb) + (8 << 20), 32 << 20)))

    out_tbd = pl.pallas_call(
        kernel,
        out_shape=jax.ShapeDtypeStruct((T, Bpad, Dp), jnp.float32),
        grid_spec=pltpu.PrefetchScalarGridSpec(
            num_scalar_prefetch=0,
            grid=grid,
            in_specs=in_specs,
            out_specs=pl.BlockSpec((T, Bb, Dp), lambda i: (0, i, 0)),
            scratch_shapes=[
                pltpu.VMEM((T * Bb, H3), mm_dtype),   # fused input projections
                pltpu.VMEM((T * Bb, Hp), mm_dtype),   # per-layer output sequence
            ]),
        compiler_params=pltpu.CompilerParams(
            dimension_semantics=("parallel",),
            vmem_limit_bytes=vmem_limit),
    )(*inputs)

    return jnp.transpose(out_tbd[:, :B, :Dout], (1, 2, 0))   # (B, Dout, T)


def lsmgru_forward_ref(x, params, *, hidden_dim, out_dim, num_layers):
    """Pure-JAX reference with PyTorch GRU semantics."""
    B, Din, T = x.shape
    H = hidden_dim
    layer_in = jnp.transpose(x, (0, 2, 1)).astype(jnp.float32)   # (B, T, Din)
    for l in range(num_layers):
        w_ih = params[f"w_ih_{l}"]
        w_hh = params[f"w_hh_{l}"]
        b_ih = params[f"b_ih_{l}"]
        b_hh = params[f"b_hh_{l}"]
        h = jnp.zeros((B, H), jnp.float32)
        outs = []
        for t in range(T):
            xt = layer_in[:, t, :]
            gi = xt @ w_ih.T + b_ih
            gh = h @ w_hh.T + b_hh
            i_r, i_z, i_n = jnp.split(gi, 3, axis=-1)
            h_r, h_z, h_n = jnp.split(gh, 3, axis=-1)
            r = jax.nn.sigmoid(i_r + h_r)
            z = jax.nn.sigmoid(i_z + h_z)
            n = jnp.tanh(i_n + r * h_n)
            h = (1.0 - z) * n + z * h
            outs.append(h)
        layer_in = jnp.stack(outs, axis=1)                        # (B, T, H)
    y = jnp.maximum(layer_in @ params["w1"].T + params["b1"], 0.0)
    y = y @ params["w2"].T + params["b2"]
    return jnp.transpose(y, (0, 2, 1))                            # (B, Dout, T)


if __name__ == "__main__":
    inp_dim, out_dim, hidden_dim, num_layers, T = 4, 6, 32, 2, 16

    key = jax.random.PRNGKey(0)
    key, pkey, xkey, xkey2 = jax.random.split(key, 4)
    params = init_params(pkey, inp_dim, out_dim, hidden_dim, num_layers)

    # --- small batch (B=2): auto batch block, fully-unrolled recurrence ------
    x = jax.random.normal(xkey, (2, inp_dim, T), dtype=jnp.float32)
    y_ref = lsmgru_forward_ref(
        x, params, hidden_dim=hidden_dim, out_dim=out_dim, num_layers=num_layers)

    y32 = jax.block_until_ready(lsmgru_forward_pallas(
        x, params, hidden_dim=hidden_dim, out_dim=out_dim, num_layers=num_layers,
        compute_dtype="float32"))
    assert y32.shape == (2, out_dim, T), y32.shape
    np.testing.assert_allclose(np.asarray(y32), np.asarray(y_ref), atol=2e-3, rtol=2e-3)

    # bf16 matmul operands + bf16 gi/seq scratch (fast path on v5e/v6e/v7x;
    # f32 accumulation and f32 gate math).
    ybf = jax.block_until_ready(lsmgru_forward_pallas(
        x, params, hidden_dim=hidden_dim, out_dim=out_dim, num_layers=num_layers,
        compute_dtype="bfloat16"))
    assert ybf.shape == (2, out_dim, T), ybf.shape
    np.testing.assert_allclose(np.asarray(ybf), np.asarray(y_ref), atol=1e-1, rtol=1e-1)

    # --- larger batch: exercises batch padding, interleaved sub-blocks,
    #     fori_loop recurrence and the chunked projection/head loops ----------
    xb = jax.random.normal(xkey2, (20, inp_dim, T), dtype=jnp.float32)
    yb_ref = lsmgru_forward_ref(
        xb, params, hidden_dim=hidden_dim, out_dim=out_dim, num_layers=num_layers)

    yb1 = jax.block_until_ready(lsmgru_forward_pallas(
        xb, params, hidden_dim=hidden_dim, out_dim=out_dim, num_layers=num_layers,
        compute_dtype="float32", batch_block=32, unroll_recurrence=False))
    np.testing.assert_allclose(np.asarray(yb1), np.asarray(yb_ref), atol=2e-3, rtol=2e-3)

    # --- multi-block grid (grid > 1, batch padding inside a block) -----------
    yb2 = jax.block_until_ready(lsmgru_forward_pallas(
        xb, params, hidden_dim=hidden_dim, out_dim=out_dim, num_layers=num_layers,
        compute_dtype="float32", batch_block=8))
    np.testing.assert_allclose(np.asarray(yb2), np.asarray(yb_ref), atol=2e-3, rtol=2e-3)

    print("KERNEL_OK")
</pallas_src>

<mosaic_0001>
module attributes {stable_mosaic.version = 11 : i64} {
  func.func @kernel(%arg0: i32, %arg1: memref<16x8x4xf32, #tpu.memory_space<vmem>>, %arg2: memref<4x384xf32, #tpu.memory_space<vmem>>, %arg3: memref<128x384xf32, #tpu.memory_space<vmem>>, %arg4: memref<1x384xf32, #tpu.memory_space<vmem>>, %arg5: memref<1x384xf32, #tpu.memory_space<vmem>>, %arg6: memref<128x384xf32, #tpu.memory_space<vmem>>, %arg7: memref<128x384xf32, #tpu.memory_space<vmem>>, %arg8: memref<1x384xf32, #tpu.memory_space<vmem>>, %arg9: memref<1x384xf32, #tpu.memory_space<vmem>>, %arg10: memref<128x128xf32, #tpu.memory_space<vmem>>, %arg11: memref<1x128xf32, #tpu.memory_space<vmem>>, %arg12: memref<128x128xf32, #tpu.memory_space<vmem>>, %arg13: memref<1x128xf32, #tpu.memory_space<vmem>>, %arg14: memref<16x8x128xf32, #tpu.memory_space<vmem>>, %arg15: memref<128x384xf32, #tpu.memory_space<vmem>>, %arg16: memref<128x128xf32, #tpu.memory_space<vmem>>) attributes {dimension_semantics = [#tpu.dimension_semantics<parallel>], iteration_bounds = array<i64: 1>, scalar_prefetch = 0 : i64, scratch_operands = 2 : i64, tpu.core_type = #tpu.core_type<tc>, window_params = [{transform_indices = @transform_0, window_bounds = array<i64: 16, 8, 4>}, {pipeline_mode = #tpu.pipeline_mode<synchronous>, transform_indices = @transform_1, window_bounds = array<i64: 4, 384>}, {pipeline_mode = #tpu.pipeline_mode<synchronous>, transform_indices = @transform_2, window_bounds = array<i64: 128, 384>}, {pipeline_mode = #tpu.pipeline_mode<synchronous>, transform_indices = @transform_3, window_bounds = array<i64: 1, 384>}, {pipeline_mode = #tpu.pipeline_mode<synchronous>, transform_indices = @transform_4, window_bounds = array<i64: 1, 384>}, {pipeline_mode = #tpu.pipeline_mode<synchronous>, transform_indices = @transform_5, window_bounds = array<i64: 128, 384>}, {pipeline_mode = #tpu.pipeline_mode<synchronous>, transform_indices = @transform_6, window_bounds = array<i64: 128, 384>}, {pipeline_mode = #tpu.pipeline_mode<synchronous>, transform_indices = @transform_7, window_bounds = array<i64: 1, 384>}, {pipeline_mode = #tpu.pipeline_mode<synchronous>, transform_indices = @transform_8, window_bounds = array<i64: 1, 384>}, {pipeline_mode = #tpu.pipeline_mode<synchronous>, transform_indices = @transform_9, window_bounds = array<i64: 128, 128>}, {pipeline_mode = #tpu.pipeline_mode<synchronous>, transform_indices = @transform_10, window_bounds = array<i64: 1, 128>}, {pipeline_mode = #tpu.pipeline_mode<synchronous>, transform_indices = @transform_11, window_bounds = array<i64: 128, 128>}, {pipeline_mode = #tpu.pipeline_mode<synchronous>, transform_indices = @transform_12, window_bounds = array<i64: 1, 128>}, {transform_indices = @transform_13, window_bounds = array<i64: 16, 8, 128>}]} {
    %c0 = arith.constant 0 : index
    %c0_0 = arith.constant 0 : index
    %c0_1 = arith.constant 0 : index
    %0 = vector.load %arg1[%c0, %c0_0, %c0_1] : memref<16x8x4xf32, #tpu.memory_space<vmem>>, vector<16x8x4xf32>
    %1 = vector.shape_cast %0 : vector<16x8x4xf32> to vector<128x4xf32>
    %c0_2 = arith.constant 0 : index
    %c0_3 = arith.constant 0 : index
    %2 = vector.load %arg2[%c0_2, %c0_3] : memref<4x384xf32, #tpu.memory_space<vmem>>, vector<4x384xf32>
    %cst = arith.constant dense<0.000000e+00> : vector<128x384xf32>
    %3 = tpu.matmul %1, %2, %cst {dimension_numbers = #tpu.dot_dimension_numbers<[1], [0], [0], [1], [0, 0, 1, 1], [], []>} : vector<128x4xf32>, vector<4x384xf32>, vector<128x384xf32> -> vector<128x384xf32>
    %c0_4 = arith.constant 0 : index
    %c0_5 = arith.constant 0 : index
    %4 = vector.load %arg4[%c0_4, %c0_5] : memref<1x384xf32, #tpu.memory_space<vmem>>, vector<1x384xf32>
    %5 = vector.broadcast %4 : vector<1x384xf32> to vector<128x384xf32>
    %6 = arith.addf %3, %5 : vector<128x384xf32>
    %c0_6 = arith.constant 0 : index
    %c0_7 = arith.constant 0 : index
    %7 = vector.load %arg15[%c0_6, %c0_7] : memref<128x384xf32, #tpu.memory_space<vmem>>, vector<128x384xf32>
    tpu.vector_store %arg15[%c0_6, %c0_7], %6 {strides = array<i32>} : memref<128x384xf32, #tpu.memory_space<vmem>>, vector<128x384xf32>,
    %cst_8 = arith.constant 0.000000e+00 : f32
    %8 = vector.broadcast %cst_8 : f32 to vector<8x128xf32>
    %c0_9 = arith.constant 0 : index
    %c0_10 = arith.constant 0 : index
    %9 = vector.load %arg3[%c0_9, %c0_10] : memref<128x384xf32, #tpu.memory_space<vmem>>, vector<128x384xf32>
    %cst_11 = arith.constant dense<0.000000e+00> : vector<8x384xf32>
    %10 = tpu.matmul %8, %9, %cst_11 {dimension_numbers = #tpu.dot_dimension_numbers<[1], [0], [0], [1], [0, 0, 1, 1], [], []>} : vector<8x128xf32>, vector<128x384xf32>, vector<8x384xf32> -> vector<8x384xf32>
    %c0_12 = arith.constant 0 : index
    %c0_13 = arith.constant 0 : index
    %11 = vector.load %arg5[%c0_12, %c0_13] : memref<1x384xf32, #tpu.memory_space<vmem>>, vector<1x384xf32>
    %12 = vector.broadcast %11 : vector<1x384xf32> to vector<8x384xf32>
    %13 = arith.addf %10, %12 : vector<8x384xf32>
    %c0_14 = arith.constant 0 : index
    %c0_15 = arith.constant 0 : index
    %14 = vector.load %arg15[%c0_14, %c0_15] : memref<128x384xf32, #tpu.memory_space<vmem>>, vector<8x384xf32>
    %15 = vector.extract_strided_slice %14 {offsets = [0, 0], sizes = [8, 128], strides = [1, 1]} : vector<8x384xf32> to vector<8x128xf32>
    %16 = vector.extract_strided_slice %13 {offsets = [0, 0], sizes = [8, 128], strides = [1, 1]} : vector<8x384xf32> to vector<8x128xf32>
    %17 = arith.addf %15, %16 : vector<8x128xf32>
    %18 = arith.negf %17 : vector<8x128xf32>
    %19 = math.exp %18 : vector<8x128xf32>
    %cst_16 = arith.constant 1.000000e+00 : f32
    %20 = vector.broadcast %cst_16 : f32 to vector<8x128xf32>
    %21 = arith.addf %20, %19 : vector<8x128xf32>
    %22 = arith.divf %20, %21 : vector<8x128xf32>
    %23 = vector.extract_strided_slice %14 {offsets = [0, 128], sizes = [8, 128], strides = [1, 1]} : vector<8x384xf32> to vector<8x128xf32>
    %24 = vector.extract_strided_slice %13 {offsets = [0, 128], sizes = [8, 128], strides = [1, 1]} : vector<8x384xf32> to vector<8x128xf32>
    %25 = arith.addf %23, %24 : vector<8x128xf32>
    %26 = arith.negf %25 : vector<8x128xf32>
    %27 = math.exp %26 : vector<8x128xf32>
    %cst_17 = arith.constant 1.000000e+00 : f32
    %28 = vector.broadcast %cst_17 : f32 to vector<8x128xf32>
    %29 = arith.addf %28, %27 : vector<8x128xf32>
    %30 = arith.divf %28, %29 : vector<8x128xf32>
    %31 = vector.extract_strided_slice %14 {offsets = [0, 256], sizes = [8, 128], strides = [1, 1]} : vector<8x384xf32> to vector<8x128xf32>
    %32 = vector.extract_strided_slice %13 {offsets = [0, 256], sizes = [8, 128], strides = [1, 1]} : vector<8x384xf32> to vector<8x128xf32>
    %33 = arith.mulf %22, %32 : vector<8x128xf32>
    %34 = arith.addf %31, %33 : vector<8x128xf32>
    %35 = math.tanh %34 : vector<8x128xf32>
    %cst_18 = arith.constant 1.000000e+00 : f32
    %36 = vector.broadcast %cst_18 : f32 to vector<8x128xf32>
    %37 = arith.subf %36, %30 : vector<8x128xf32>
    %38 = arith.mulf %37, %35 : vector<8x128xf32>
    %39 = arith.mulf %30, %8 : vector<8x128xf32>
    %40 = arith.addf %38, %39 : vector<8x128xf32>
    %c0_19 = arith.constant 0 : index
    %c0_20 = arith.constant 0 : index
    %41 = vector.load %arg16[%c0_19, %c0_20] : memref<128x128xf32, #tpu.memory_space<vmem>>, vector<8x128xf32>
    tpu.vector_store %arg16[%c0_19, %c0_20], %40 {strides = array<i32>} : memref<128x128xf32, #tpu.memory_space<vmem>>, vector<8x128xf32>,
    %c0_21 = arith.constant 0 : index
    %c0_22 = arith.constant 0 : index
    %42 = vector.load %arg3[%c0_21, %c0_22] : memref<128x384xf32, #tpu.memory_space<vmem>>, vector<128x384xf32>
    %cst_23 = arith.constant dense<0.000000e+00> : vector<8x384xf32>
    %43 = tpu.matmul %40, %42, %cst_23 {dimension_numbers = #tpu.dot_dimension_numbers<[1], [0], [0], [1], [0, 0, 1, 1], [], []>} : vector<8x128xf32>, vector<128x384xf32>, vector<8x384xf32> -> vector<8x384xf32>
    %c0_24 = arith.constant 0 : index
    %c0_25 = arith.constant 0 : index
    %44 = vector.load %arg5[%c0_24, %c0_25] : memref<1x384xf32, #tpu.memory_space<vmem>>, vector<1x384xf32>
    %45 = vector.broadcast %44 : vector<1x384xf32> to vector<8x384xf32>
    %46 = arith.addf %43, %45 : vector<8x384xf32>
    %c8 = arith.constant 8 : index
    %c0_26 = arith.constant 0 : index
    %47 = vector.load %arg15[%c8, %c0_26] : memref<128x384xf32, #tpu.memory_space<vmem>>, vector<8x384xf32>
    %48 = vector.extract_strided_slice %47 {offsets = [0, 0], sizes = [8, 128], strides = [1, 1]} : vector<8x384xf32> to vector<8x128xf32>
    %49 = vector.extract_strided_slice %46 {offsets = [0, 0], sizes = [8, 128], strides = [1, 1]} : vector<8x384xf32> to vector<8x128xf32>
    %50 = arith.addf %48, %49 : vector<8x128xf32>
    %51 = arith.negf %50 : vector<8x128xf32>
    %52 = math.exp %51 : vector<8x128xf32>
    %cst_27 = arith.constant 1.000000e+00 : f32
    %53 = vector.broadcast %cst_27 : f32 to vector<8x128xf32>
    %54 = arith.addf %53, %52 : vector<8x128xf32>
    %55 = arith.divf %53, %54 : vector<8x128xf32>
    %56 = vector.extract_strided_slice %47 {offsets = [0, 128], sizes = [8, 128], strides = [1, 1]} : vector<8x384xf32> to vector<8x128xf32>
    %57 = vector.extract_strided_slice %46 {offsets = [0, 128], sizes = [8, 128], strides = [1, 1]} : vector<8x384xf32> to vector<8x128xf32>
    %58 = arith.addf %56, %57 : vector<8x128xf32>
    %59 = arith.negf %58 : vector<8x128xf32>
    %60 = math.exp %59 : vector<8x128xf32>
    %cst_28 = arith.constant 1.000000e+00 : f32
    %61 = vector.broadcast %cst_28 : f32 to vector<8x128xf32>
    %62 = arith.addf %61, %60 : vector<8x128xf32>
    %63 = arith.divf %61, %62 : vector<8x128xf32>
    %64 = vector.extract_strided_slice %47 {offsets = [0, 256], sizes = [8, 128], strides = [1, 1]} : vector<8x384xf32> to vector<8x128xf32>
    %65 = vector.extract_strided_slice %46 {offsets = [0, 256], sizes = [8, 128], strides = [1, 1]} : vector<8x384xf32> to vector<8x128xf32>
    %66 = arith.mulf %55, %65 : vector<8x128xf32>
    %67 = arith.addf %64, %66 : vector<8x128xf32>
    %68 = math.tanh %67 : vector<8x128xf32>
    %cst_29 = arith.constant 1.000000e+00 : f32
    %69 = vector.broadcast %cst_29 : f32 to vector<8x128xf32>
    %70 = arith.subf %69, %63 : vector<8x128xf32>
    %71 = arith.mulf %70, %68 : vector<8x128xf32>
    %72 = arith.mulf %63, %40 : vector<8x128xf32>
    %73 = arith.addf %71, %72 : vector<8x128xf32>
    %c8_30 = arith.constant 8 : index
    %c0_31 = arith.constant 0 : index
    %74 = vector.load %arg16[%c8_30, %c0_31] : memref<128x128xf32, #tpu.memory_space<vmem>>, vector<8x128xf32>
    tpu.vector_store %arg16[%c8_30, %c0_31], %73 {strides = array<i32>} : memref<128x128xf32, #tpu.memory_space<vmem>>, vector<8x128xf32>,
    %c0_32 = arith.constant 0 : index
    %c0_33 = arith.constant 0 : index
    %75 = vector.load %arg3[%c0_32, %c0_33] : memref<128x384xf32, #tpu.memory_space<vmem>>, vector<128x384xf32>
    %cst_34 = arith.constant dense<0.000000e+00> : vector<8x384xf32>
    %76 = tpu.matmul %73, %75, %cst_34 {dimension_numbers = #tpu.dot_dimension_numbers<[1], [0], [0], [1], [0, 0, 1, 1], [], []>} : vector<8x128xf32>, vector<128x384xf32>, vector<8x384xf32> -> vector<8x384xf32>
    %c0_35 = arith.constant 0 : index
    %c0_36 = arith.constant 0 : index
    %77 = vector.load %arg5[%c0_35, %c0_36] : memref<1x384xf32, #tpu.memory_space<vmem>>, vector<1x384xf32>
    %78 = vector.broadcast %77 : vector<1x384xf32> to vector<8x384xf32>
    %79 = arith.addf %76, %78 : vector<8x384xf32>
    %c16 = arith.constant 16 : index
    %c0_37 = arith.constant 0 : index
    %80 = vector.load %arg15[%c16, %c0_37] : memref<128x384xf32, #tpu.memory_space<vmem>>, vector<8x384xf32>
    %81 = vector.extract_strided_slice %80 {offsets = [0, 0], sizes = [8, 128], strides = [1, 1]} : vector<8x384xf32> to vector<8x128xf32>
    %82 = vector.extract_strided_slice %79 {offsets = [0, 0], sizes = [8, 128], strides = [1, 1]} : vector<8x384xf32> to vector<8x128xf32>
    %83 = arith.addf %81, %82 : vector<8x128xf32>
    %84 = arith.negf %83 : vector<8x128xf32>
    %85 = math.exp %84 : vector<8x128xf32>
    %cst_38 = arith.constant 1.000000e+00 : f32
    %86 = vector.broadcast %cst_38 : f32 to vector<8x128xf32>
    %87 = arith.addf %86, %85 : vector<8x128xf32>
    %88 = arith.divf %86, %87 : vector<8x128xf32>
    %89 = vector.extract_strided_slice %80 {offsets = [0, 128], sizes = [8, 128], strides = [1, 1]} : vector<8x384xf32> to vector<8x128xf32>
    %90 = vector.extract_strided_slice %79 {offsets = [0, 128], sizes = [8, 128], strides = [1, 1]} : vector<8x384xf32> to vector<8x128xf32>
    %91 = arith.addf %89, %90 : vector<8x128xf32>
    %92 = arith.negf %91 : vector<8x128xf32>
    %93 = math.exp %92 : vector<8x128xf32>
    %cst_39 = arith.constant 1.000000e+00 : f32
    %94 = vector.broadcast %cst_39 : f32 to vector<8x128xf32>
    %95 = arith.addf %94, %93 : vector<8x128xf32>
    %96 = arith.divf %94, %95 : vector<8x128xf32>
    %97 = vector.extract_strided_slice %80 {offsets = [0, 256], sizes = [8, 128], strides = [1, 1]} : vector<8x384xf32> to vector<8x128xf32>
    %98 = vector.extract_strided_slice %79 {offsets = [0, 256], sizes = [8, 128], strides = [1, 1]} : vector<8x384xf32> to vector<8x128xf32>
    %99 = arith.mulf %88, %98 : vector<8x128xf32>
    %100 = arith.addf %97, %99 : vector<8x128xf32>
    %101 = math.tanh %100 : vector<8x128xf32>
    %cst_40 = arith.constant 1.000000e+00 : f32
    %102 = vector.broadcast %cst_40 : f32 to vector<8x128xf32>
    %103 = arith.subf %102, %96 : vector<8x128xf32>
    %104 = arith.mulf %103, %101 : vector<8x128xf32>
    %105 = arith.mulf %96, %73 : vector<8x128xf32>
    %106 = arith.addf %104, %105 : vector<8x128xf32>
    %c16_41 = arith.constant 16 : index
    %c0_42 = arith.constant 0 : index
    %107 = vector.load %arg16[%c16_41, %c0_42] : memref<128x128xf32, #tpu.memory_space<vmem>>, vector<8x128xf32>
    tpu.vector_store %arg16[%c16_41, %c0_42], %106 {strides = array<i32>} : memref<128x128xf32, #tpu.memory_space<vmem>>, vector<8x128xf32>,
    %c0_43 = arith.constant 0 : index
    %c0_44 = arith.constant 0 : index
    %108 = vector.load %arg3[%c0_43, %c0_44] : memref<128x384xf32, #tpu.memory_space<vmem>>, vector<128x384xf32>
    %cst_45 = arith.constant dense<0.000000e+00> : vector<8x384xf32>
    %109 = tpu.matmul %106, %108, %cst_45 {dimension_numbers = #tpu.dot_dimension_numbers<[1], [0], [0], [1], [0, 0, 1, 1], [], []>} : vector<8x128xf32>, vector<128x384xf32>, vector<8x384xf32> -> vector<8x384xf32>
    %c0_46 = arith.constant 0 : index
    %c0_47 = arith.constant 0 : index
    %110 = vector.load %arg5[%c0_46, %c0_47] : memref<1x384xf32, #tpu.memory_space<vmem>>, vector<1x384xf32>
    %111 = vector.broadcast %110 : vector<1x384xf32> to vector<8x384xf32>
    %112 = arith.addf %109, %111 : vector<8x384xf32>
    %c24 = arith.constant 24 : index
    %c0_48 = arith.constant 0 : index
    %113 = vector.load %arg15[%c24, %c0_48] : memref<128x384xf32, #tpu.memory_space<vmem>>, vector<8x384xf32>
    %114 = vector.extract_strided_slice %113 {offsets = [0, 0], sizes = [8, 128], strides = [1, 1]} : vector<8x384xf32> to vector<8x128xf32>
    %115 = vector.extract_strided_slice %112 {offsets = [0, 0], sizes = [8, 128], strides = [1, 1]} : vector<8x384xf32> to vector<8x128xf32>
    %116 = arith.addf %114, %115 : vector<8x128xf32>
    %117 = arith.negf %116 : vector<8x128xf32>
    %118 = math.exp %117 : vector<8x128xf32>
    %cst_49 = arith.constant 1.000000e+00 : f32
    %119 = vector.broadcast %cst_49 : f32 to vector<8x128xf32>
    %120 = arith.addf %119, %118 : vector<8x128xf32>
    %121 = arith.divf %119, %120 : vector<8x128xf32>
    %122 = vector.extract_strided_slice %113 {offsets = [0, 128], sizes = [8, 128], strides = [1, 1]} : vector<8x384xf32> to vector<8x128xf32>
    %123 = vector.extract_strided_slice %112 {offsets = [0, 128], sizes = [8, 128], strides = [1, 1]} : vector<8x384xf32> to vector<8x128xf32>
    %124 = arith.addf %122, %123 : vector<8x128xf32>
    %125 = arith.negf %124 : vector<8x128xf32>
    %126 = math.exp %125 : vector<8x128xf32>
    %cst_50 = arith.constant 1.000000e+00 : f32
    %127 = vector.broadcast %cst_50 : f32 to vector<8x128xf32>
    %128 = arith.addf %127, %126 : vector<8x128xf32>
    %129 = arith.divf %127, %128 : vector<8x128xf32>
    %130 = vector.extract_strided_slice %113 {offsets = [0, 256], sizes = [8, 128], strides = [1, 1]} : vector<8x384xf32> to vector<8x128xf32>
    %131 = vector.extract_strided_slice %112 {offsets = [0, 256], sizes = [8, 128], strides = [1, 1]} : vector<8x384xf32> to vector<8x128xf32>
    %132 = arith.mulf %121, %131 : vector<8x128xf32>
    %133 = arith.addf %130, %132 : vector<8x128xf32>
    %134 = math.tanh %133 : vector<8x128xf32>
    %cst_51 = arith.constant 1.000000e+00 : f32
    %135 = vector.broadcast %cst_51 : f32 to vector<8x128xf32>
    %136 = arith.subf %135, %129 : vector<8x128xf32>
    %137 = arith.mulf %136, %134 : vector<8x128xf32>
    %138 = arith.mulf %129, %106 : vector<8x128xf32>
    %139 = arith.addf %137, %138 : vector<8x128xf32>
    %c24_52 = arith.constant 24 : index
    %c0_53 = arith.constant 0 : index
    %140 = vector.load %arg16[%c24_52, %c0_53] : memref<128x128xf32, #tpu.memory_space<vmem>>, vector<8x128xf32>
    tpu.vector_store %arg16[%c24_52, %c0_53], %139 {strides = array<i32>} : memref<128x128xf32, #tpu.memory_space<vmem>>, vector<8x128xf32>,
    %c0_54 = arith.constant 0 : index
    %c0_55 = arith.constant 0 : index
    %141 = vector.load %arg3[%c0_54, %c0_55] : memref<128x384xf32, #tpu.memory_space<vmem>>, vector<128x384xf32>
    %cst_56 = arith.constant dense<0.000000e+00> : vector<8x384xf32>
    %142 = tpu.matmul %139, %141, %cst_56 {dimension_numbers = #tpu.dot_dimension_numbers<[1], [0], [0], [1], [0, 0, 1, 1], [], []>} : vector<8x128xf32>, vector<128x384xf32>, vector<8x384xf32> -> vector<8x384xf32>
    %c0_57 = arith.constant 0 : index
    %c0_58 = arith.constant 0 : index
    %143 = vector.load %arg5[%c0_57, %c0_58] : memref<1x384xf32, #tpu.memory_space<vmem>>, vector<1x384xf32>
    %144 = vector.broadcast %143 : vector<1x384xf32> to vector<8x384xf32>
    %145 = arith.addf %142, %144 : vector<8x384xf32>
    %c32 = arith.constant 32 : index
    %c0_59 = arith.constant 0 : index
    %146 = vector.load %arg15[%c32, %c0_59] : memref<128x384xf32, #tpu.memory_space<vmem>>, vector<8x384xf32>
    %147 = vector.extract_strided_slice %146 {offsets = [0, 0], sizes = [8, 128], strides = [1, 1]} : vector<8x384xf32> to vector<8x128xf32>
    %148 = vector.extract_strided_slice %145 {offsets = [0, 0], sizes = [8, 128], strides = [1, 1]} : vector<8x384xf32> to vector<8x128xf32>
    %149 = arith.addf %147, %148 : vector<8x128xf32>
    %150 = arith.negf %149 : vector<8x128xf32>
    %151 = math.exp %150 : vector<8x128xf32>
    %cst_60 = arith.constant 1.000000e+00 : f32
    %152 = vector.broadcast %cst_60 : f32 to vector<8x128xf32>
    %153 = arith.addf %152, %151 : vector<8x128xf32>
    %154 = arith.divf %152, %153 : vector<8x128xf32>
    %155 = vector.extract_strided_slice %146 {offsets = [0, 128], sizes = [8, 128], strides = [1, 1]} : vector<8x384xf32> to vector<8x128xf32>
    %156 = vector.extract_strided_slice %145 {offsets = [0, 128], sizes = [8, 128], strides = [1, 1]} : vector<8x384xf32> to vector<8x128xf32>
    %157 = arith.addf %155, %156 : vector<8x128xf32>
    %158 = arith.negf %157 : vector<8x128xf32>
    %159 = math.exp %158 : vector<8x128xf32>
    %cst_61 = arith.constant 1.000000e+00 : f32
    %160 = vector.broadcast %cst_61 : f32 to vector<8x128xf32>
    %161 = arith.addf %160, %159 : vector<8x128xf32>
    %162 = arith.divf %160, %161 : vector<8x128xf32>
    %163 = vector.extract_strided_slice %146 {offsets = [0, 256], sizes = [8, 128], strides = [1, 1]} : vector<8x384xf32> to vector<8x128xf32>
    %164 = vector.extract_strided_slice %145 {offsets = [0, 256], sizes = [8, 128], strides = [1, 1]} : vector<8x384xf32> to vector<8x128xf32>
    %165 = arith.mulf %154, %164 : vector<8x128xf32>
    %166 = arith.addf %163, %165 : vector<8x128xf32>
    %167 = math.tanh %166 : vector<8x128xf32>
    %cst_62 = arith.constant 1.000000e+00 : f32
    %168 = vector.broadcast %cst_62 : f32 to vector<8x128xf32>
    %169 = arith.subf %168, %162 : vector<8x128xf32>
    %170 = arith.mulf %169, %167 : vector<8x128xf32>
    %171 = arith.mulf %162, %139 : vector<8x128xf32>
    %172 = arith.addf %170, %171 : vector<8x128xf32>
    %c32_63 = arith.constant 32 : index
    %c0_64 = arith.constant 0 : index
    %173 = vector.load %arg16[%c32_63, %c0_64] : memref<128x128xf32, #tpu.memory_space<vmem>>, vector<8x128xf32>
    tpu.vector_store %arg16[%c32_63, %c0_64], %172 {strides = array<i32>} : memref<128x128xf32, #tpu.memory_space<vmem>>, vector<8x128xf32>,
    %c0_65 = arith.constant 0 : index
    %c0_66 = arith.constant 0 : index
    %174 = vector.load %arg3[%c0_65, %c0_66] : memref<128x384xf32, #tpu.memory_space<vmem>>, vector<128x384xf32>
    %cst_67 = arith.constant dense<0.000000e+00> : vector<8x384xf32>
    %175 = tpu.matmul %172, %174, %cst_67 {dimension_numbers = #tpu.dot_dimension_numbers<[1], [0], [0], [1], [0, 0, 1, 1], [], []>} : vector<8x128xf32>, vector<128x384xf32>, vector<8x384xf32> -> vector<8x384xf32>
    %c0_68 = arith.constant 0 : index
    %c0_69 = arith.constant 0 : index
    %176 = vector.load %arg5[%c0_68, %c0_69] : memref<1x384xf32, #tpu.memory_space<vmem>>, vector<1x384xf32>
    %177 = vector.broadcast %176 : vector<1x384xf32> to vector<8x384xf32>
    %178 = arith.addf %175, %177 : vector<8x384xf32>
    %c40 = arith.constant 40 : index
    %c0_70 = arith.constant 0 : index
    %179 = vector.load %arg15[%c40, %c0_70] : memref<128x384xf32, #tpu.memory_space<vmem>>, vector<8x384xf32>
    %180 = vector.extract_strided_slice %179 {offsets = [0, 0], sizes = [8, 128], strides = [1, 1]} : vector<8x384xf32> to vector<8x128xf32>
    %181 = vector.extract_strided_slice %178 {offsets = [0, 0], sizes = [8, 128], strides = [1, 1]} : vector<8x384xf32> to vector<8x128xf32>
    %182 = arith.addf %180, %181 : vector<8x128xf32>
    %183 = arith.negf %182 : vector<8x128xf32>
    %184 = math.exp %183 : vector<8x128xf32>
    %cst_71 = arith.constant 1.000000e+00 : f32
    %185 = vector.broadcast %cst_71 : f32 to vector<8x128xf32>
    %186 = arith.addf %185, %184 : vector<8x128xf32>
    %187 = arith.divf %185, %186 : vector<8x128xf32>
    %188 = vector.extract_strided_slice %179 {offsets = [0, 128], sizes = [8, 128], strides = [1, 1]} : vector<8x384xf32> to vector<8x128xf32>
    %189 = vector.extract_strided_slice %178 {offsets = [0, 128], sizes = [8, 128], strides = [1, 1]} : vector<8x384xf32> to vector<8x128xf32>
    %190 = arith.addf %188, %189 : vector<8x128xf32>
    %191 = arith.negf %190 : vector<8x128xf32>
    %192 = math.exp %191 : vector<8x128xf32>
    %cst_72 = arith.constant 1.000000e+00 : f32
    %193 = vector.broadcast %cst_72 : f32 to vector<8x128xf32>
    %194 = arith.addf %193, %192 : vector<8x128xf32>
    %195 = arith.divf %193, %194 : vector<8x128xf32>
    %196 = vector.extract_strided_slice %179 {offsets = [0, 256], sizes = [8, 128], strides = [1, 1]} : vector<8x384xf32> to vector<8x128xf32>
    %197 = vector.extract_strided_slice %178 {offsets = [0, 256], sizes = [8, 128], strides = [1, 1]} : vector<8x384xf32> to vector<8x128xf32>
    %198 = arith.mulf %187, %197 : vector<8x128xf32>
    %199 = arith.addf %196, %198 : vector<8x128xf32>
    %200 = math.tanh %199 : vector<8x128xf32>
    %cst_73 = arith.constant 1.000000e+00 : f32
    %201 = vector.broadcast %cst_73 : f32 to vector<8x128xf32>
    %202 = arith.subf %201, %195 : vector<8x128xf32>
    %203 = arith.mulf %202, %200 : vector<8x128xf32>
    %204 = arith.mulf %195, %172 : vector<8x128xf32>
    %205 = arith.addf %203, %204 : vector<8x128xf32>
    %c40_74 = arith.constant 40 : index
    %c0_75 = arith.constant 0 : index
    %206 = vector.load %arg16[%c40_74, %c0_75] : memref<128x128xf32, #tpu.memory_space<vmem>>, vector<8x128xf32>
    tpu.vector_store %arg16[%c40_74, %c0_75], %205 {strides = array<i32>} : memref<128x128xf32, #tpu.memory_space<vmem>>, vector<8x128xf32>,
    %c0_76 = arith.constant 0 : index
    %c0_77 = arith.constant 0 : index
    %207 = vector.load %arg3[%c0_76, %c0_77] : memref<128x384xf32, #tpu.memory_space<vmem>>, vector<128x384xf32>
    %cst_78 = arith.constant dense<0.000000e+00> : vector<8x384xf32>
    %208 = tpu.matmul %205, %207, %cst_78 {dimension_numbers = #tpu.dot_dimension_numbers<[1], [0], [0], [1], [0, 0, 1, 1], [], []>} : vector<8x128xf32>, vector<128x384xf32>, vector<8x384xf32> -> vector<8x384xf32>
    %c0_79 = arith.constant 0 : index
    %c0_80 = arith.constant 0 : index
    %209 = vector.load %arg5[%c0_79, %c0_80] : memref<1x384xf32, #tpu.memory_space<vmem>>, vector<1x384xf32>
    %210 = vector.broadcast %209 : vector<1x384xf32> to vector<8x384xf32>
    %211 = arith.addf %208, %210 : vector<8x384xf32>
    %c48 = arith.constant 48 : index
    %c0_81 = arith.constant 0 : index
    %212 = vector.load %arg15[%c48, %c0_81] : memref<128x384xf32, #tpu.memory_space<vmem>>, vector<8x384xf32>
    %213 = vector.extract_strided_slice %212 {offsets = [0, 0], sizes = [8, 128], strides = [1, 1]} : vector<8x384xf32> to vector<8x128xf32>
    %214 = vector.extract_strided_slice %211 {offsets = [0, 0], sizes = [8, 128], strides = [1, 1]} : vector<8x384xf32> to vector<8x128xf32>
    %215 = arith.addf %213, %214 : vector<8x128xf32>
    %216 = arith.negf %215 : vector<8x128xf32>
    %217 = math.exp %216 : vector<8x128xf32>
    %cst_82 = arith.constant 1.000000e+00 : f32
    %218 = vector.broadcast %cst_82 : f32 to vector<8x128xf32>
    %219 = arith.addf %218, %217 : vector<8x128xf32>
    %220 = arith.divf %218, %219 : vector<8x128xf32>
    %221 = vector.extract_strided_slice %212 {offsets = [0, 128], sizes = [8, 128], strides = [1, 1]} : vector<8x384xf32> to vector<8x128xf32>
    %222 = vector.extract_strided_slice %211 {offsets = [0, 128], sizes = [8, 128], strides = [1, 1]} : vector<8x384xf32> to vector<8x128xf32>
    %223 = arith.addf %221, %222 : vector<8x128xf32>
    %224 = arith.negf %223 : vector<8x128xf32>
    %225 = math.exp %224 : vector<8x128xf32>
    %cst_83 = arith.constant 1.000000e+00 : f32
    %226 = vector.broadcast %cst_83 : f32 to vector<8x128xf32>
    %227 = arith.addf %226, %225 : vector<8x128xf32>
    %228 = arith.divf %226, %227 : vector<8x128xf32>
    %229 = vector.extract_strided_slice %212 {offsets = [0, 256], sizes = [8, 128], strides = [1, 1]} : vector<8x384xf32> to vector<8x128xf32>
    %230 = vector.extract_strided_slice %211 {offsets = [0, 256], sizes = [8, 128], strides = [1, 1]} : vector<8x384xf32> to vector<8x128xf32>
    %231 = arith.mulf %220, %230 : vector<8x128xf32>
    %232 = arith.addf %229, %231 : vector<8x128xf32>
    %233 = math.tanh %232 : vector<8x128xf32>
    %cst_84 = arith.constant 1.000000e+00 : f32
    %234 = vector.broadcast %cst_84 : f32 to vector<8x128xf32>
    %235 = arith.subf %234, %228 : vector<8x128xf32>
    %236 = arith.mulf %235, %233 : vector<8x128xf32>
    %237 = arith.mulf %228, %205 : vector<8x128xf32>
    %238 = arith.addf %236, %237 : vector<8x128xf32>
    %c48_85 = arith.constant 48 : index
    %c0_86 = arith.constant 0 : index
    %239 = vector.load %arg16[%c48_85, %c0_86] : memref<128x128xf32, #tpu.memory_space<vmem>>, vector<8x128xf32>
    tpu.vector_store %arg16[%c48_85, %c0_86], %238 {strides = array<i32>} : memref<128x128xf32, #tpu.memory_space<vmem>>, vector<8x128xf32>,
    %c0_87 = arith.constant 0 : index
    %c0_88 = arith.constant 0 : index
    %240 = vector.load %arg3[%c0_87, %c0_88] : memref<128x384xf32, #tpu.memory_space<vmem>>, vector<128x384xf32>
    %cst_89 = arith.constant dense<0.000000e+00> : vector<8x384xf32>
    %241 = tpu.matmul %238, %240, %cst_89 {dimension_numbers = #tpu.dot_dimension_numbers<[1], [0], [0], [1], [0, 0, 1, 1], [], []>} : vector<8x128xf32>, vector<128x384xf32>, vector<8x384xf32> -> vector<8x384xf32>
    %c0_90 = arith.constant 0 : index
    %c0_91 = arith.constant 0 : index
    %242 = vector.load %arg5[%c0_90, %c0_91] : memref<1x384xf32, #tpu.memory_space<vmem>>, vector<1x384xf32>
    %243 = vector.broadcast %242 : vector<1x384xf32> to vector<8x384xf32>
    %244 = arith.addf %241, %243 : vector<8x384xf32>
    %c56 = arith.constant 56 : index
    %c0_92 = arith.constant 0 : index
    %245 = vector.load %arg15[%c56, %c0_92] : memref<128x384xf32, #tpu.memory_space<vmem>>, vector<8x384xf32>
    %246 = vector.extract_strided_slice %245 {offsets = [0, 0], sizes = [8, 128], strides = [1, 1]} : vector<8x384xf32> to vector<8x128xf32>
    %247 = vector.extract_strided_slice %244 {offsets = [0, 0], sizes = [8, 128], strides = [1, 1]} : vector<8x384xf32> to vector<8x128xf32>
    %248 = arith.addf %246, %247 : vector<8x128xf32>
    %249 = arith.negf %248 : vector<8x128xf32>
    %250 = math.exp %249 : vector<8x128xf32>
    %cst_93 = arith.constant 1.000000e+00 : f32
    %251 = vector.broadcast %cst_93 : f32 to vector<8x128xf32>
    %252 = arith.addf %251, %250 : vector<8x128xf32>
    %253 = arith.divf %251, %252 : vector<8x128xf32>
    %254 = vector.extract_strided_slice %245 {offsets = [0, 128], sizes = [8, 128], strides = [1, 1]} : vector<8x384xf32> to vector<8x128xf32>
    %255 = vector.extract_strided_slice %244 {offsets = [0, 128], sizes = [8, 128], strides = [1, 1]} : vector<8x384xf32> to vector<8x128xf32>
    %256 = arith.addf %254, %255 : vector<8x128xf32>
    %257 = arith.negf %256 : vector<8x128xf32>
    %258 = math.exp %257 : vector<8x128xf32>
    %cst_94 = arith.constant 1.000000e+00 : f32
    %259 = vector.broadcast %cst_94 : f32 to vector<8x128xf32>
    %260 = arith.addf %259, %258 : vector<8x128xf32>
    %261 = arith.divf %259, %260 : vector<8x128xf32>
    %262 = vector.extract_strided_slice %245 {offsets = [0, 256], sizes = [8, 128], strides = [1, 1]} : vector<8x384xf32> to vector<8x128xf32>
    %263 = vector.extract_strided_slice %244 {offsets = [0, 256], sizes = [8, 128], strides = [1, 1]} : vector<8x384xf32> to vector<8x128xf32>
    %264 = arith.mulf %253, %263 : vector<8x128xf32>
    %265 = arith.addf %262, %264 : vector<8x128xf32>
    %266 = math.tanh %265 : vector<8x128xf32>
    %cst_95 = arith.constant 1.000000e+00 : f32
    %267 = vector.broadcast %cst_95 : f32 to vector<8x128xf32>
    %268 = arith.subf %267, %261 : vector<8x128xf32>
    %269 = arith.mulf %268, %266 : vector<8x128xf32>
    %270 = arith.mulf %261, %238 : vector<8x128xf32>
    %271 = arith.addf %269, %270 : vector<8x128xf32>
    %c56_96 = arith.constant 56 : index
    %c0_97 = arith.constant 0 : index
    %272 = vector.load %arg16[%c56_96, %c0_97] : memref<128x128xf32, #tpu.memory_space<vmem>>, vector<8x128xf32>
    tpu.vector_store %arg16[%c56_96, %c0_97], %271 {strides = array<i32>} : memref<128x128xf32, #tpu.memory_space<vmem>>, vector<8x128xf32>,
    %c0_98 = arith.constant 0 : index
    %c0_99 = arith.constant 0 : index
    %273 = vector.load %arg3[%c0_98, %c0_99] : memref<128x384xf32, #tpu.memory_space<vmem>>, vector<128x384xf32>
    %cst_100 = arith.constant dense<0.000000e+00> : vector<8x384xf32>
    %274 = tpu.matmul %271, %273, %cst_100 {dimension_numbers = #tpu.dot_dimension_numbers<[1], [0], [0], [1], [0, 0, 1, 1], [], []>} : vector<8x128xf32>, vector<128x384xf32>, vector<8x384xf32> -> vector<8x384xf32>
    %c0_101 = arith.constant 0 : index
    %c0_102 = arith.constant 0 : index
    %275 = vector.load %arg5[%c0_101, %c0_102] : memref<1x384xf32, #tpu.memory_space<vmem>>, vector<1x384xf32>
    %276 = vector.broadcast %275 : vector<1x384xf32> to vector<8x384xf32>
    %277 = arith.addf %274, %276 : vector<8x384xf32>
    %c64 = arith.constant 64 : index
    %c0_103 = arith.constant 0 : index
    %278 = vector.load %arg15[%c64, %c0_103] : memref<128x384xf32, #tpu.memory_space<vmem>>, vector<8x384xf32>
    %279 = vector.extract_strided_slice %278 {offsets = [0, 0], sizes = [8, 128], strides = [1, 1]} : vector<8x384xf32> to vector<8x128xf32>
    %280 = vector.extract_strided_slice %277 {offsets = [0, 0], sizes = [8, 128], strides = [1, 1]} : vector<8x384xf32> to vector<8x128xf32>
    %281 = arith.addf %279, %280 : vector<8x128xf32>
    %282 = arith.negf %281 : vector<8x128xf32>
    %283 = math.exp %282 : vector<8x128xf32>
    %cst_104 = arith.constant 1.000000e+00 : f32
    %284 = vector.broadcast %cst_104 : f32 to vector<8x128xf32>
    %285 = arith.addf %284, %283 : vector<8x128xf32>
    %286 = arith.divf %284, %285 : vector<8x128xf32>
    %287 = vector.extract_strided_slice %278 {offsets = [0, 128], sizes = [8, 128], strides = [1, 1]} : vector<8x384xf32> to vector<8x128xf32>
    %288 = vector.extract_strided_slice %277 {offsets = [0, 128], sizes = [8, 128], strides = [1, 1]} : vector<8x384xf32> to vector<8x128xf32>
    %289 = arith.addf %287, %288 : vector<8x128xf32>
    %290 = arith.negf %289 : vector<8x128xf32>
    %291 = math.exp %290 : vector<8x128xf32>
    %cst_105 = arith.constant 1.000000e+00 : f32
    %292 = vector.broadcast %cst_105 : f32 to vector<8x128xf32>
    %293 = arith.addf %292, %291 : vector<8x128xf32>
    %294 = arith.divf %292, %293 : vector<8x128xf32>
    %295 = vector.extract_strided_slice %278 {offsets = [0, 256], sizes = [8, 128], strides = [1, 1]} : vector<8x384xf32> to vector<8x128xf32>
    %296 = vector.extract_strided_slice %277 {offsets = [0, 256], sizes = [8, 128], strides = [1, 1]} : vector<8x384xf32> to vector<8x128xf32>
    %297 = arith.mulf %286, %296 : vector<8x128xf32>
    %298 = arith.addf %295, %297 : vector<8x128xf32>
    %299 = math.tanh %298 : vector<8x128xf32>
    %cst_106 = arith.constant 1.000000e+00 : f32
    %300 = vector.broadcast %cst_106 : f32 to vector<8x128xf32>
    %301 = arith.subf %300, %294 : vector<8x128xf32>
    %302 = arith.mulf %301, %299 : vector<8x128xf32>
    %303 = arith.mulf %294, %271 : vector<8x128xf32>
    %304 = arith.addf %302, %303 : vector<8x128xf32>
    %c64_107 = arith.constant 64 : index
    %c0_108 = arith.constant 0 : index
    %305 = vector.load %arg16[%c64_107, %c0_108] : memref<128x128xf32, #tpu.memory_space<vmem>>, vector<8x128xf32>
    tpu.vector_store %arg16[%c64_107, %c0_108], %304 {strides = array<i32>} : memref<128x128xf32, #tpu.memory_space<vmem>>, vector<8x128xf32>,
    %c0_109 = arith.constant 0 : index
    %c0_110 = arith.constant 0 : index
    %306 = vector.load %arg3[%c0_109, %c0_110] : memref<128x384xf32, #tpu.memory_space<vmem>>, vector<128x384xf32>
    %cst_111 = arith.constant dense<0.000000e+00> : vector<8x384xf32>
    %307 = tpu.matmul %304, %306, %cst_111 {dimension_numbers = #tpu.dot_dimension_numbers<[1], [0], [0], [1], [0, 0, 1, 1], [], []>} : vector<8x128xf32>, vector<128x384xf32>, vector<8x384xf32> -> vector<8x384xf32>
    %c0_112 = arith.constant 0 : index
    %c0_113 = arith.constant 0 : index
    %308 = vector.load %arg5[%c0_112, %c0_113] : memref<1x384xf32, #tpu.memory_space<vmem>>, vector<1x384xf32>
    %309 = vector.broadcast %308 : vector<1x384xf32> to vector<8x384xf32>
    %310 = arith.addf %307, %309 : vector<8x384xf32>
    %c72 = arith.constant 72 : index
    %c0_114 = arith.constant 0 : index
    %311 = vector.load %arg15[%c72, %c0_114] : memref<128x384xf32, #tpu.memory_space<vmem>>, vector<8x384xf32>
    %312 = vector.extract_strided_slice %311 {offsets = [0, 0], sizes = [8, 128], strides = [1, 1]} : vector<8x384xf32> to vector<8x128xf32>
    %313 = vector.extract_strided_slice %310 {offsets = [0, 0], sizes = [8, 128], strides = [1, 1]} : vector<8x384xf32> to vector<8x128xf32>
    %314 = arith.addf %312, %313 : vector<8x128xf32>
    %315 = arith.negf %314 : vector<8x128xf32>
    %316 = math.exp %315 : vector<8x128xf32>
    %cst_115 = arith.constant 1.000000e+00 : f32
    %317 = vector.broadcast %cst_115 : f32 to vector<8x128xf32>
    %318 = arith.addf %317, %316 : vector<8x128xf32>
    %319 = arith.divf %317, %318 : vector<8x128xf32>
    %320 = vector.extract_strided_slice %311 {offsets = [0, 128], sizes = [8, 128], strides = [1, 1]} : vector<8x384xf32> to vector<8x128xf32>
    %321 = vector.extract_strided_slice %310 {offsets = [0, 128], sizes = [8, 128], strides = [1, 1]} : vector<8x384xf32> to vector<8x128xf32>
    %322 = arith.addf %320, %321 : vector<8x128xf32>
    %323 = arith.negf %322 : vector<8x128xf32>
    %324 = math.exp %323 : vector<8x128xf32>
    %cst_116 = arith.constant 1.000000e+00 : f32
    %325 = vector.broadcast %cst_116 : f32 to vector<8x128xf32>
    %326 = arith.addf %325, %324 : vector<8x128xf32>
    %327 = arith.divf %325, %326 : vector<8x128xf32>
    %328 = vector.extract_strided_slice %311 {offsets = [0, 256], sizes = [8, 128], strides = [1, 1]} : vector<8x384xf32> to vector<8x128xf32>
    %329 = vector.extract_strided_slice %310 {offsets = [0, 256], sizes = [8, 128], strides = [1, 1]} : vector<8x384xf32> to vector<8x128xf32>
    %330 = arith.mulf %319, %329 : vector<8x128xf32>
    %331 = arith.addf %328, %330 : vector<8x128xf32>
    %332 = math.tanh %331 : vector<8x128xf32>
    %cst_117 = arith.constant 1.000000e+00 : f32
    %333 = vector.broadcast %cst_117 : f32 to vector<8x128xf32>
    %334 = arith.subf %333, %327 : vector<8x128xf32>
    %335 = arith.mulf %334, %332 : vector<8x128xf32>
    %336 = arith.mulf %327, %304 : vector<8x128xf32>
    %337 = arith.addf %335, %336 : vector<8x128xf32>
    %c72_118 = arith.constant 72 : index
    %c0_119 = arith.constant 0 : index
    %338 = vector.load %arg16[%c72_118, %c0_119] : memref<128x128xf32, #tpu.memory_space<vmem>>, vector<8x128xf32>
    tpu.vector_store %arg16[%c72_118, %c0_119], %337 {strides = array<i32>} : memref<128x128xf32, #tpu.memory_space<vmem>>, vector<8x128xf32>,
    %c0_120 = arith.constant 0 : index
    %c0_121 = arith.constant 0 : index
    %339 = vector.load %arg3[%c0_120, %c0_121] : memref<128x384xf32, #tpu.memory_space<vmem>>, vector<128x384xf32>
    %cst_122 = arith.constant dense<0.000000e+00> : vector<8x384xf32>
    %340 = tpu.matmul %337, %339, %cst_122 {dimension_numbers = #tpu.dot_dimension_numbers<[1], [0], [0], [1], [0, 0, 1, 1], [], []>} : vector<8x128xf32>, vector<128x384xf32>, vector<8x384xf32> -> vector<8x384xf32>
    %c0_123 = arith.constant 0 : index
    %c0_124 = arith.constant 0 : index
    %341 = vector.load %arg5[%c0_123, %c0_124] : memref<1x384xf32, #tpu.memory_space<vmem>>, vector<1x384xf32>
    %342 = vector.broadcast %341 : vector<1x384xf32> to vector<8x384xf32>
    %343 = arith.addf %340, %342 : vector<8x384xf32>
    %c80 = arith.constant 80 : index
    %c0_125 = arith.constant 0 : index
    %344 = vector.load %arg15[%c80, %c0_125] : memref<128x384xf32, #tpu.memory_space<vmem>>, vector<8x384xf32>
    %345 = vector.extract_strided_slice %344 {offsets = [0, 0], sizes = [8, 128], strides = [1, 1]} : vector<8x384xf32> to vector<8x128xf32>
    %346 = vector.extract_strided_slice %343 {offsets = [0, 0], sizes = [8, 128], strides = [1, 1]} : vector<8x384xf32> to vector<8x128xf32>
    %347 = arith.addf %345, %346 : vector<8x128xf32>
    %348 = arith.negf %347 : vector<8x128xf32>
    %349 = math.exp %348 : vector<8x128xf32>
    %cst_126 = arith.constant 1.000000e+00 : f32
    %350 = vector.broadcast %cst_126 : f32 to vector<8x128xf32>
    %351 = arith.addf %350, %349 : vector<8x128xf32>
    %352 = arith.divf %350, %351 : vector<8x128xf32>
    %353 = vector.extract_strided_slice %344 {offsets = [0, 128], sizes = [8, 128], strides = [1, 1]} : vector<8x384xf32> to vector<8x128xf32>
    %354 = vector.extract_strided_slice %343 {offsets = [0, 128], sizes = [8, 128], strides = [1, 1]} : vector<8x384xf32> to vector<8x128xf32>
    %355 = arith.addf %353, %354 : vector<8x128xf32>
    %356 = arith.negf %355 : vector<8x128xf32>
    %357 = math.exp %356 : vector<8x128xf32>
    %cst_127 = arith.constant 1.000000e+00 : f32
    %358 = vector.broadcast %cst_127 : f32 to vector<8x128xf32>
    %359 = arith.addf %358, %357 : vector<8x128xf32>
    %360 = arith.divf %358, %359 : vector<8x128xf32>
    %361 = vector.extract_strided_slice %344 {offsets = [0, 256], sizes = [8, 128], strides = [1, 1]} : vector<8x384xf32> to vector<8x128xf32>
    %362 = vector.extract_strided_slice %343 {offsets = [0, 256], sizes = [8, 128], strides = [1, 1]} : vector<8x384xf32> to vector<8x128xf32>
    %363 = arith.mulf %352, %362 : vector<8x128xf32>
    %364 = arith.addf %361, %363 : vector<8x128xf32>
    %365 = math.tanh %364 : vector<8x128xf32>
    %cst_128 = arith.constant 1.000000e+00 : f32
    %366 = vector.broadcast %cst_128 : f32 to vector<8x128xf32>
    %367 = arith.subf %366, %360 : vector<8x128xf32>
    %368 = arith.mulf %367, %365 : vector<8x128xf32>
    %369 = arith.mulf %360, %337 : vector<8x128xf32>
    %370 = arith.addf %368, %369 : vector<8x128xf32>
    %c80_129 = arith.constant 80 : index
    %c0_130 = arith.constant 0 : index
    %371 = vector.load %arg16[%c80_129, %c0_130] : memref<128x128xf32, #tpu.memory_space<vmem>>, vector<8x128xf32>
    tpu.vector_store %arg16[%c80_129, %c0_130], %370 {strides = array<i32>} : memref<128x128xf32, #tpu.memory_space<vmem>>, vector<8x128xf32>,
    %c0_131 = arith.constant 0 : index
    %c0_132 = arith.constant 0 : index
    %372 = vector.load %arg3[%c0_131, %c0_132] : memref<128x384xf32, #tpu.memory_space<vmem>>, vector<128x384xf32>
    %cst_133 = arith.constant dense<0.000000e+00> : vector<8x384xf32>
    %373 = tpu.matmul %370, %372, %cst_133 {dimension_numbers = #tpu.dot_dimension_numbers<[1], [0], [0], [1], [0, 0, 1, 1], [], []>} : vector<8x128xf32>, vector<128x384xf32>, vector<8x384xf32> -> vector<8x384xf32>
    %c0_134 = arith.constant 0 : index
    %c0_135 = arith.constant 0 : index
    %374 = vector.load %arg5[%c0_134, %c0_135] : memref<1x384xf32, #tpu.memory_space<vmem>>, vector<1x384xf32>
    %375 = vector.broadcast %374 : vector<1x384xf32> to vector<8x384xf32>
    %376 = arith.addf %373, %375 : vector<8x384xf32>
    %c88 = arith.constant 88 : index
    %c0_136 = arith.constant 0 : index
    %377 = vector.load %arg15[%c88, %c0_136] : memref<128x384xf32, #tpu.memory_space<vmem>>, vector<8x384xf32>
    %378 = vector.extract_strided_slice %377 {offsets = [0, 0], sizes = [8, 128], strides = [1, 1]} : vector<8x384xf32> to vector<8x128xf32>
    %379 = vector.extract_strided_slice %376 {offsets = [0, 0], sizes = [8, 128], strides = [1, 1]} : vector<8x384xf32> to vector<8x128xf32>
    %380 = arith.addf %378, %379 : vector<8x128xf32>
    %381 = arith.negf %380 : vector<8x128xf32>
    %382 = math.exp %381 : vector<8x128xf32>
    %cst_137 = arith.constant 1.000000e+00 : f32
    %383 = vector.broadcast %cst_137 : f32 to vector<8x128xf32>
    %384 = arith.addf %383, %382 : vector<8x128xf32>
    %385 = arith.divf %383, %384 : vector<8x128xf32>
    %386 = vector.extract_strided_slice %377 {offsets = [0, 128], sizes = [8, 128], strides = [1, 1]} : vector<8x384xf32> to vector<8x128xf32>
    %387 = vector.extract_strided_slice %376 {offsets = [0, 128], sizes = [8, 128], strides = [1, 1]} : vector<8x384xf32> to vector<8x128xf32>
    %388 = arith.addf %386, %387 : vector<8x128xf32>
    %389 = arith.negf %388 : vector<8x128xf32>
    %390 = math.exp %389 : vector<8x128xf32>
    %cst_138 = arith.constant 1.000000e+00 : f32
    %391 = vector.broadcast %cst_138 : f32 to vector<8x128xf32>
    %392 = arith.addf %391, %390 : vector<8x128xf32>
    %393 = arith.divf %391, %392 : vector<8x128xf32>
    %394 = vector.extract_strided_slice %377 {offsets = [0, 256], sizes = [8, 128], strides = [1, 1]} : vector<8x384xf32> to vector<8x128xf32>
    %395 = vector.extract_strided_slice %376 {offsets = [0, 256], sizes = [8, 128], strides = [1, 1]} : vector<8x384xf32> to vector<8x128xf32>
    %396 = arith.mulf %385, %395 : vector<8x128xf32>
    %397 = arith.addf %394, %396 : vector<8x128xf32>
    %398 = math.tanh %397 : vector<8x128xf32>
    %cst_139 = arith.constant 1.000000e+00 : f32
    %399 = vector.broadcast %cst_139 : f32 to vector<8x128xf32>
    %400 = arith.subf %399, %393 : vector<8x128xf32>
    %401 = arith.mulf %400, %398 : vector<8x128xf32>
    %402 = arith.mulf %393, %370 : vector<8x128xf32>
    %403 = arith.addf %401, %402 : vector<8x128xf32>
    %c88_140 = arith.constant 88 : index
    %c0_141 = arith.constant 0 : index
    %404 = vector.load %arg16[%c88_140, %c0_141] : memref<128x128xf32, #tpu.memory_space<vmem>>, vector<8x128xf32>
    tpu.vector_store %arg16[%c88_140, %c0_141], %403 {strides = array<i32>} : memref<128x128xf32, #tpu.memory_space<vmem>>, vector<8x128xf32>,
    %c0_142 = arith.constant 0 : index
    %c0_143 = arith.constant 0 : index
    %405 = vector.load %arg3[%c0_142, %c0_143] : memref<128x384xf32, #tpu.memory_space<vmem>>, vector<128x384xf32>
    %cst_144 = arith.constant dense<0.000000e+00> : vector<8x384xf32>
    %406 = tpu.matmul %403, %405, %cst_144 {dimension_numbers = #tpu.dot_dimension_numbers<[1], [0], [0], [1], [0, 0, 1, 1], [], []>} : vector<8x128xf32>, vector<128x384xf32>, vector<8x384xf32> -> vector<8x384xf32>
    %c0_145 = arith.constant 0 : index
    %c0_146 = arith.constant 0 : index
    %407 = vector.load %arg5[%c0_145, %c0_146] : memref<1x384xf32, #tpu.memory_space<vmem>>, vector<1x384xf32>
    %408 = vector.broadcast %407 : vector<1x384xf32> to vector<8x384xf32>
    %409 = arith.addf %406, %408 : vector<8x384xf32>
    %c96 = arith.constant 96 : index
    %c0_147 = arith.constant 0 : index
    %410 = vector.load %arg15[%c96, %c0_147] : memref<128x384xf32, #tpu.memory_space<vmem>>, vector<8x384xf32>
    %411 = vector.extract_strided_slice %410 {offsets = [0, 0], sizes = [8, 128], strides = [1, 1]} : vector<8x384xf32> to vector<8x128xf32>
    %412 = vector.extract_strided_slice %409 {offsets = [0, 0], sizes = [8, 128], strides = [1, 1]} : vector<8x384xf32> to vector<8x128xf32>
    %413 = arith.addf %411, %412 : vector<8x128xf32>
    %414 = arith.negf %413 : vector<8x128xf32>
    %415 = math.exp %414 : vector<8x128xf32>
    %cst_148 = arith.constant 1.000000e+00 : f32
    %416 = vector.broadcast %cst_148 : f32 to vector<8x128xf32>
    %417 = arith.addf %416, %415 : vector<8x128xf32>
    %418 = arith.divf %416, %417 : vector<8x128xf32>
    %419 = vector.extract_strided_slice %410 {offsets = [0, 128], sizes = [8, 128], strides = [1, 1]} : vector<8x384xf32> to vector<8x128xf32>
    %420 = vector.extract_strided_slice %409 {offsets = [0, 128], sizes = [8, 128], strides = [1, 1]} : vector<8x384xf32> to vector<8x128xf32>
    %421 = arith.addf %419, %420 : vector<8x128xf32>
    %422 = arith.negf %421 : vector<8x128xf32>
    %423 = math.exp %422 : vector<8x128xf32>
    %cst_149 = arith.constant 1.000000e+00 : f32
    %424 = vector.broadcast %cst_149 : f32 to vector<8x128xf32>
    %425 = arith.addf %424, %423 : vector<8x128xf32>
    %426 = arith.divf %424, %425 : vector<8x128xf32>
    %427 = vector.extract_strided_slice %410 {offsets = [0, 256], sizes = [8, 128], strides = [1, 1]} : vector<8x384xf32> to vector<8x128xf32>
    %428 = vector.extract_strided_slice %409 {offsets = [0, 256], sizes = [8, 128], strides = [1, 1]} : vector<8x384xf32> to vector<8x128xf32>
    %429 = arith.mulf %418, %428 : vector<8x128xf32>
    %430 = arith.addf %427, %429 : vector<8x128xf32>
    %431 = math.tanh %430 : vector<8x128xf32>
    %cst_150 = arith.constant 1.000000e+00 : f32
    %432 = vector.broadcast %cst_150 : f32 to vector<8x128xf32>
    %433 = arith.subf %432, %426 : vector<8x128xf32>
    %434 = arith.mulf %433, %431 : vector<8x128xf32>
    %435 = arith.mulf %426, %403 : vector<8x128xf32>
    %436 = arith.addf %434, %435 : vector<8x128xf32>
    %c96_151 = arith.constant 96 : index
    %c0_152 = arith.constant 0 : index
    %437 = vector.load %arg16[%c96_151, %c0_152] : memref<128x128xf32, #tpu.memory_space<vmem>>, vector<8x128xf32>
    tpu.vector_store %arg16[%c96_151, %c0_152], %436 {strides = array<i32>} : memref<128x128xf32, #tpu.memory_space<vmem>>, vector<8x128xf32>,
    %c0_153 = arith.constant 0 : index
    %c0_154 = arith.constant 0 : index
    %438 = vector.load %arg3[%c0_153, %c0_154] : memref<128x384xf32, #tpu.memory_space<vmem>>, vector<128x384xf32>
    %cst_155 = arith.constant dense<0.000000e+00> : vector<8x384xf32>
    %439 = tpu.matmul %436, %438, %cst_155 {dimension_numbers = #tpu.dot_dimension_numbers<[1], [0], [0], [1], [0, 0, 1, 1], [], []>} : vector<8x128xf32>, vector<128x384xf32>, vector<8x384xf32> -> vector<8x384xf32>
    %c0_156 = arith.constant 0 : index
    %c0_157 = arith.constant 0 : index
    %440 = vector.load %arg5[%c0_156, %c0_157] : memref<1x384xf32, #tpu.memory_space<vmem>>, vector<1x384xf32>
    %441 = vector.broadcast %440 : vector<1x384xf32> to vector<8x384xf32>
    %442 = arith.addf %439, %441 : vector<8x384xf32>
    %c104 = arith.constant 104 : index
    %c0_158 = arith.constant 0 : index
    %443 = vector.load %arg15[%c104, %c0_158] : memref<128x384xf32, #tpu.memory_space<vmem>>, vector<8x384xf32>
    %444 = vector.extract_strided_slice %443 {offsets = [0, 0], sizes = [8, 128], strides = [1, 1]} : vector<8x384xf32> to vector<8x128xf32>
    %445 = vector.extract_strided_slice %442 {offsets = [0, 0], sizes = [8, 128], strides = [1, 1]} : vector<8x384xf32> to vector<8x128xf32>
    %446 = arith.addf %444, %445 : vector<8x128xf32>
    %447 = arith.negf %446 : vector<8x128xf32>
    %448 = math.exp %447 : vector<8x128xf32>
    %cst_159 = arith.constant 1.000000e+00 : f32
    %449 = vector.broadcast %cst_159 : f32 to vector<8x128xf32>
    %450 = arith.addf %449, %448 : vector<8x128xf32>
    %451 = arith.divf %449, %450 : vector<8x128xf32>
    %452 = vector.extract_strided_slice %443 {offsets = [0, 128], sizes = [8, 128], strides = [1, 1]} : vector<8x384xf32> to vector<8x128xf32>
    %453 = vector.extract_strided_slice %442 {offsets = [0, 128], sizes = [8, 128], strides = [1, 1]} : vector<8x384xf32> to vector<8x128xf32>
    %454 = arith.addf %452, %453 : vector<8x128xf32>
    %455 = arith.negf %454 : vector<8x128xf32>
    %456 = math.exp %455 : vector<8x128xf32>
    %cst_160 = arith.constant 1.000000e+00 : f32
    %457 = vector.broadcast %cst_160 : f32 to vector<8x128xf32>
    %458 = arith.addf %457, %456 : vector<8x128xf32>
    %459 = arith.divf %457, %458 : vector<8x128xf32>
    %460 = vector.extract_strided_slice %443 {offsets = [0, 256], sizes = [8, 128], strides = [1, 1]} : vector<8x384xf32> to vector<8x128xf32>
    %461 = vector.extract_strided_slice %442 {offsets = [0, 256], sizes = [8, 128], strides = [1, 1]} : vector<8x384xf32> to vector<8x128xf32>
    %462 = arith.mulf %451, %461 : vector<8x128xf32>
    %463 = arith.addf %460, %462 : vector<8x128xf32>
    %464 = math.tanh %463 : vector<8x128xf32>
    %cst_161 = arith.constant 1.000000e+00 : f32
    %465 = vector.broadcast %cst_161 : f32 to vector<8x128xf32>
    %466 = arith.subf %465, %459 : vector<8x128xf32>
    %467 = arith.mulf %466, %464 : vector<8x128xf32>
    %468 = arith.mulf %459, %436 : vector<8x128xf32>
    %469 = arith.addf %467, %468 : vector<8x128xf32>
    %c104_162 = arith.constant 104 : index
    %c0_163 = arith.constant 0 : index
    %470 = vector.load %arg16[%c104_162, %c0_163] : memref<128x128xf32, #tpu.memory_space<vmem>>, vector<8x128xf32>
    tpu.vector_store %arg16[%c104_162, %c0_163], %469 {strides = array<i32>} : memref<128x128xf32, #tpu.memory_space<vmem>>, vector<8x128xf32>,
    %c0_164 = arith.constant 0 : index
    %c0_165 = arith.constant 0 : index
    %471 = vector.load %arg3[%c0_164, %c0_165] : memref<128x384xf32, #tpu.memory_space<vmem>>, vector<128x384xf32>
    %cst_166 = arith.constant dense<0.000000e+00> : vector<8x384xf32>
    %472 = tpu.matmul %469, %471, %cst_166 {dimension_numbers = #tpu.dot_dimension_numbers<[1], [0], [0], [1], [0, 0, 1, 1], [], []>} : vector<8x128xf32>, vector<128x384xf32>, vector<8x384xf32> -> vector<8x384xf32>
    %c0_167 = arith.constant 0 : index
    %c0_168 = arith.constant 0 : index
    %473 = vector.load %arg5[%c0_167, %c0_168] : memref<1x384xf32, #tpu.memory_space<vmem>>, vector<1x384xf32>
    %474 = vector.broadcast %473 : vector<1x384xf32> to vector<8x384xf32>
    %475 = arith.addf %472, %474 : vector<8x384xf32>
    %c112 = arith.constant 112 : index
    %c0_169 = arith.constant 0 : index
    %476 = vector.load %arg15[%c112, %c0_169] : memref<128x384xf32, #tpu.memory_space<vmem>>, vector<8x384xf32>
    %477 = vector.extract_strided_slice %476 {offsets = [0, 0], sizes = [8, 128], strides = [1, 1]} : vector<8x384xf32> to vector<8x128xf32>
    %478 = vector.extract_strided_slice %475 {offsets = [0, 0], sizes = [8, 128], strides = [1, 1]} : vector<8x384xf32> to vector<8x128xf32>
    %479 = arith.addf %477, %478 : vector<8x128xf32>
    %480 = arith.negf %479 : vector<8x128xf32>
    %481 = math.exp %480 : vector<8x128xf32>
    %cst_170 = arith.constant 1.000000e+00 : f32
    %482 = vector.broadcast %cst_170 : f32 to vector<8x128xf32>
    %483 = arith.addf %482, %481 : vector<8x128xf32>
    %484 = arith.divf %482, %483 : vector<8x128xf32>
    %485 = vector.extract_strided_slice %476 {offsets = [0, 128], sizes = [8, 128], strides = [1, 1]} : vector<8x384xf32> to vector<8x128xf32>
    %486 = vector.extract_strided_slice %475 {offsets = [0, 128], sizes = [8, 128], strides = [1, 1]} : vector<8x384xf32> to vector<8x128xf32>
    %487 = arith.addf %485, %486 : vector<8x128xf32>
    %488 = arith.negf %487 : vector<8x128xf32>
    %489 = math.exp %488 : vector<8x128xf32>
    %cst_171 = arith.constant 1.000000e+00 : f32
    %490 = vector.broadcast %cst_171 : f32 to vector<8x128xf32>
    %491 = arith.addf %490, %489 : vector<8x128xf32>
    %492 = arith.divf %490, %491 : vector<8x128xf32>
    %493 = vector.extract_strided_slice %476 {offsets = [0, 256], sizes = [8, 128], strides = [1, 1]} : vector<8x384xf32> to vector<8x128xf32>
    %494 = vector.extract_strided_slice %475 {offsets = [0, 256], sizes = [8, 128], strides = [1, 1]} : vector<8x384xf32> to vector<8x128xf32>
    %495 = arith.mulf %484, %494 : vector<8x128xf32>
    %496 = arith.addf %493, %495 : vector<8x128xf32>
    %497 = math.tanh %496 : vector<8x128xf32>
    %cst_172 = arith.constant 1.000000e+00 : f32
    %498 = vector.broadcast %cst_172 : f32 to vector<8x128xf32>
    %499 = arith.subf %498, %492 : vector<8x128xf32>
    %500 = arith.mulf %499, %497 : vector<8x128xf32>
    %501 = arith.mulf %492, %469 : vector<8x128xf32>
    %502 = arith.addf %500, %501 : vector<8x128xf32>
    %c112_173 = arith.constant 112 : index
    %c0_174 = arith.constant 0 : index
    %503 = vector.load %arg16[%c112_173, %c0_174] : memref<128x128xf32, #tpu.memory_space<vmem>>, vector<8x128xf32>
    tpu.vector_store %arg16[%c112_173, %c0_174], %502 {strides = array<i32>} : memref<128x128xf32, #tpu.memory_space<vmem>>, vector<8x128xf32>,
    %c0_175 = arith.constant 0 : index
    %c0_176 = arith.constant 0 : index
    %504 = vector.load %arg3[%c0_175, %c0_176] : memref<128x384xf32, #tpu.memory_space<vmem>>, vector<128x384xf32>
    %cst_177 = arith.constant dense<0.000000e+00> : vector<8x384xf32>
    %505 = tpu.matmul %502, %504, %cst_177 {dimension_numbers = #tpu.dot_dimension_numbers<[1], [0], [0], [1], [0, 0, 1, 1], [], []>} : vector<8x128xf32>, vector<128x384xf32>, vector<8x384xf32> -> vector<8x384xf32>
    %c0_178 = arith.constant 0 : index
    %c0_179 = arith.constant 0 : index
    %506 = vector.load %arg5[%c0_178, %c0_179] : memref<1x384xf32, #tpu.memory_space<vmem>>, vector<1x384xf32>
    %507 = vector.broadcast %506 : vector<1x384xf32> to vector<8x384xf32>
    %508 = arith.addf %505, %507 : vector<8x384xf32>
    %c120 = arith.constant 120 : index
    %c0_180 = arith.constant 0 : index
    %509 = vector.load %arg15[%c120, %c0_180] : memref<128x384xf32, #tpu.memory_space<vmem>>, vector<8x384xf32>
    %510 = vector.extract_strided_slice %509 {offsets = [0, 0], sizes = [8, 128], strides = [1, 1]} : vector<8x384xf32> to vector<8x128xf32>
    %511 = vector.extract_strided_slice %508 {offsets = [0, 0], sizes = [8, 128], strides = [1, 1]} : vector<8x384xf32> to vector<8x128xf32>
    %512 = arith.addf %510, %511 : vector<8x128xf32>
    %513 = arith.negf %512 : vector<8x128xf32>
    %514 = math.exp %513 : vector<8x128xf32>
    %cst_181 = arith.constant 1.000000e+00 : f32
    %515 = vector.broadcast %cst_181 : f32 to vector<8x128xf32>
    %516 = arith.addf %515, %514 : vector<8x128xf32>
    %517 = arith.divf %515, %516 : vector<8x128xf32>
    %518 = vector.extract_strided_slice %509 {offsets = [0, 128], sizes = [8, 128], strides = [1, 1]} : vector<8x384xf32> to vector<8x128xf32>
    %519 = vector.extract_strided_slice %508 {offsets = [0, 128], sizes = [8, 128], strides = [1, 1]} : vector<8x384xf32> to vector<8x128xf32>
    %520 = arith.addf %518, %519 : vector<8x128xf32>
    %521 = arith.negf %520 : vector<8x128xf32>
    %522 = math.exp %521 : vector<8x128xf32>
    %cst_182 = arith.constant 1.000000e+00 : f32
    %523 = vector.broadcast %cst_182 : f32 to vector<8x128xf32>
    %524 = arith.addf %523, %522 : vector<8x128xf32>
    %525 = arith.divf %523, %524 : vector<8x128xf32>
    %526 = vector.extract_strided_slice %509 {offsets = [0, 256], sizes = [8, 128], strides = [1, 1]} : vector<8x384xf32> to vector<8x128xf32>
    %527 = vector.extract_strided_slice %508 {offsets = [0, 256], sizes = [8, 128], strides = [1, 1]} : vector<8x384xf32> to vector<8x128xf32>
    %528 = arith.mulf %517, %527 : vector<8x128xf32>
    %529 = arith.addf %526, %528 : vector<8x128xf32>
    %530 = math.tanh %529 : vector<8x128xf32>
    %cst_183 = arith.constant 1.000000e+00 : f32
    %531 = vector.broadcast %cst_183 : f32 to vector<8x128xf32>
    %532 = arith.subf %531, %525 : vector<8x128xf32>
    %533 = arith.mulf %532, %530 : vector<8x128xf32>
    %534 = arith.mulf %525, %502 : vector<8x128xf32>
    %535 = arith.addf %533, %534 : vector<8x128xf32>
    %c120_184 = arith.constant 120 : index
    %c0_185 = arith.constant 0 : index
    %536 = vector.load %arg16[%c120_184, %c0_185] : memref<128x128xf32, #tpu.memory_space<vmem>>, vector<8x128xf32>
    tpu.vector_store %arg16[%c120_184, %c0_185], %535 {strides = array<i32>} : memref<128x128xf32, #tpu.memory_space<vmem>>, vector<8x128xf32>,
    %c0_186 = arith.constant 0 : index
    %c0_187 = arith.constant 0 : index
    %537 = vector.load %arg16[%c0_186, %c0_187] : memref<128x128xf32, #tpu.memory_space<vmem>>, vector<128x128xf32>
    %c0_188 = arith.constant 0 : index
    %c0_189 = arith.constant 0 : index
    %538 = vector.load %arg6[%c0_188, %c0_189] : memref<128x384xf32, #tpu.memory_space<vmem>>, vector<128x384xf32>
    %cst_190 = arith.constant dense<0.000000e+00> : vector<128x384xf32>
    %539 = tpu.matmul %537, %538, %cst_190 {dimension_numbers = #tpu.dot_dimension_numbers<[1], [0], [0], [1], [0, 0, 1, 1], [], []>} : vector<128x128xf32>, vector<128x384xf32>, vector<128x384xf32> -> vector<128x384xf32>
    %c0_191 = arith.constant 0 : index
    %c0_192 = arith.constant 0 : index
    %540 = vector.load %arg8[%c0_191, %c0_192] : memref<1x384xf32, #tpu.memory_space<vmem>>, vector<1x384xf32>
    %541 = vector.broadcast %540 : vector<1x384xf32> to vector<128x384xf32>
    %542 = arith.addf %539, %541 : vector<128x384xf32>
    %c0_193 = arith.constant 0 : index
    %c0_194 = arith.constant 0 : index
    %543 = vector.load %arg15[%c0_193, %c0_194] : memref<128x384xf32, #tpu.memory_space<vmem>>, vector<128x384xf32>
    tpu.vector_store %arg15[%c0_193, %c0_194], %542 {strides = array<i32>} : memref<128x384xf32, #tpu.memory_space<vmem>>, vector<128x384xf32>,
    %cst_195 = arith.constant 0.000000e+00 : f32
    %544 = vector.broadcast %cst_195 : f32 to vector<8x128xf32>
    %c0_196 = arith.constant 0 : index
    %c0_197 = arith.constant 0 : index
    %545 = vector.load %arg7[%c0_196, %c0_197] : memref<128x384xf32, #tpu.memory_space<vmem>>, vector<128x384xf32>
    %cst_198 = arith.constant dense<0.000000e+00> : vector<8x384xf32>
    %546 = tpu.matmul %544, %545, %cst_198 {dimension_numbers = #tpu.dot_dimension_numbers<[1], [0], [0], [1], [0, 0, 1, 1], [], []>} : vector<8x128xf32>, vector<128x384xf32>, vector<8x384xf32> -> vector<8x384xf32>
    %c0_199 = arith.constant 0 : index
    %c0_200 = arith.constant 0 : index
    %547 = vector.load %arg9[%c0_199, %c0_200] : memref<1x384xf32, #tpu.memory_space<vmem>>, vector<1x384xf32>
    %548 = vector.broadcast %547 : vector<1x384xf32> to vector<8x384xf32>
    %549 = arith.addf %546, %548 : vector<8x384xf32>
    %c0_201 = arith.constant 0 : index
    %c0_202 = arith.constant 0 : index
    %550 = vector.load %arg15[%c0_201, %c0_202] : memref<128x384xf32, #tpu.memory_space<vmem>>, vector<8x384xf32>
    %551 = vector.extract_strided_slice %550 {offsets = [0, 0], sizes = [8, 128], strides = [1, 1]} : vector<8x384xf32> to vector<8x128xf32>
    %552 = vector.extract_strided_slice %549 {offsets = [0, 0], sizes = [8, 128], strides = [1, 1]} : vector<8x384xf32> to vector<8x128xf32>
    %553 = arith.addf %551, %552 : vector<8x128xf32>
    %554 = arith.negf %553 : vector<8x128xf32>
    %555 = math.exp %554 : vector<8x128xf32>
    %cst_203 = arith.constant 1.000000e+00 : f32
    %556 = vector.broadcast %cst_203 : f32 to vector<8x128xf32>
    %557 = arith.addf %556, %555 : vector<8x128xf32>
    %558 = arith.divf %556, %557 : vector<8x128xf32>
    %559 = vector.extract_strided_slice %550 {offsets = [0, 128], sizes = [8, 128], strides = [1, 1]} : vector<8x384xf32> to vector<8x128xf32>
    %560 = vector.extract_strided_slice %549 {offsets = [0, 128], sizes = [8, 128], strides = [1, 1]} : vector<8x384xf32> to vector<8x128xf32>
    %561 = arith.addf %559, %560 : vector<8x128xf32>
    %562 = arith.negf %561 : vector<8x128xf32>
    %563 = math.exp %562 : vector<8x128xf32>
    %cst_204 = arith.constant 1.000000e+00 : f32
    %564 = vector.broadcast %cst_204 : f32 to vector<8x128xf32>
    %565 = arith.addf %564, %563 : vector<8x128xf32>
    %566 = arith.divf %564, %565 : vector<8x128xf32>
    %567 = vector.extract_strided_slice %550 {offsets = [0, 256], sizes = [8, 128], strides = [1, 1]} : vector<8x384xf32> to vector<8x128xf32>
    %568 = vector.extract_strided_slice %549 {offsets = [0, 256], sizes = [8, 128], strides = [1, 1]} : vector<8x384xf32> to vector<8x128xf32>
    %569 = arith.mulf %558, %568 : vector<8x128xf32>
    %570 = arith.addf %567, %569 : vector<8x128xf32>
    %571 = math.tanh %570 : vector<8x128xf32>
    %cst_205 = arith.constant 1.000000e+00 : f32
    %572 = vector.broadcast %cst_205 : f32 to vector<8x128xf32>
    %573 = arith.subf %572, %566 : vector<8x128xf32>
    %574 = arith.mulf %573, %571 : vector<8x128xf32>
    %575 = arith.mulf %566, %544 : vector<8x128xf32>
    %576 = arith.addf %574, %575 : vector<8x128xf32>
    %c0_206 = arith.constant 0 : index
    %c0_207 = arith.constant 0 : index
    %577 = vector.load %arg16[%c0_206, %c0_207] : memref<128x128xf32, #tpu.memory_space<vmem>>, vector<8x128xf32>
    tpu.vector_store %arg16[%c0_206, %c0_207], %576 {strides = array<i32>} : memref<128x128xf32, #tpu.memory_space<vmem>>, vector<8x128xf32>,
    %c0_208 = arith.constant 0 : index
    %c0_209 = arith.constant 0 : index
    %578 = vector.load %arg7[%c0_208, %c0_209] : memref<128x384xf32, #tpu.memory_space<vmem>>, vector<128x384xf32>
    %cst_210 = arith.constant dense<0.000000e+00> : vector<8x384xf32>
    %579 = tpu.matmul %576, %578, %cst_210 {dimension_numbers = #tpu.dot_dimension_numbers<[1], [0], [0], [1], [0, 0, 1, 1], [], []>} : vector<8x128xf32>, vector<128x384xf32>, vector<8x384xf32> -> vector<8x384xf32>
    %c0_211 = arith.constant 0 : index
    %c0_212 = arith.constant 0 : index
    %580 = vector.load %arg9[%c0_211, %c0_212] : memref<1x384xf32, #tpu.memory_space<vmem>>, vector<1x384xf32>
    %581 = vector.broadcast %580 : vector<1x384xf32> to vector<8x384xf32>
    %582 = arith.addf %579, %581 : vector<8x384xf32>
    %c8_213 = arith.constant 8 : index
    %c0_214 = arith.constant 0 : index
    %583 = vector.load %arg15[%c8_213, %c0_214] : memref<128x384xf32, #tpu.memory_space<vmem>>, vector<8x384xf32>
    %584 = vector.extract_strided_slice %583 {offsets = [0, 0], sizes = [8, 128], strides = [1, 1]} : vector<8x384xf32> to vector<8x128xf32>
    %585 = vector.extract_strided_slice %582 {offsets = [0, 0], sizes = [8, 128], strides = [1, 1]} : vector<8x384xf32> to vector<8x128xf32>
    %586 = arith.addf %584, %585 : vector<8x128xf32>
    %587 = arith.negf %586 : vector<8x128xf32>
    %588 = math.exp %587 : vector<8x128xf32>
    %cst_215 = arith.constant 1.000000e+00 : f32
    %589 = vector.broadcast %cst_215 : f32 to vector<8x128xf32>
    %590 = arith.addf %589, %588 : vector<8x128xf32>
    %591 = arith.divf %589, %590 : vector<8x128xf32>
    %592 = vector.extract_strided_slice %583 {offsets = [0, 128], sizes = [8, 128], strides = [1, 1]} : vector<8x384xf32> to vector<8x128xf32>
    %593 = vector.extract_strided_slice %582 {offsets = [0, 128], sizes = [8, 128], strides = [1, 1]} : vector<8x384xf32> to vector<8x128xf32>
    %594 = arith.addf %592, %593 : vector<8x128xf32>
    %595 = arith.negf %594 : vector<8x128xf32>
    %596 = math.exp %595 : vector<8x128xf32>
    %cst_216 = arith.constant 1.000000e+00 : f32
    %597 = vector.broadcast %cst_216 : f32 to vector<8x128xf32>
    %598 = arith.addf %597, %596 : vector<8x128xf32>
    %599 = arith.divf %597, %598 : vector<8x128xf32>
    %600 = vector.extract_strided_slice %583 {offsets = [0, 256], sizes = [8, 128], strides = [1, 1]} : vector<8x384xf32> to vector<8x128xf32>
    %601 = vector.extract_strided_slice %582 {offsets = [0, 256], sizes = [8, 128], strides = [1, 1]} : vector<8x384xf32> to vector<8x128xf32>
    %602 = arith.mulf %591, %601 : vector<8x128xf32>
    %603 = arith.addf %600, %602 : vector<8x128xf32>
    %604 = math.tanh %603 : vector<8x128xf32>
    %cst_217 = arith.constant 1.000000e+00 : f32
    %605 = vector.broadcast %cst_217 : f32 to vector<8x128xf32>
    %606 = arith.subf %605, %599 : vector<8x128xf32>
    %607 = arith.mulf %606, %604 : vector<8x128xf32>
    %608 = arith.mulf %599, %576 : vector<8x128xf32>
    %609 = arith.addf %607, %608 : vector<8x128xf32>
    %c8_218 = arith.constant 8 : index
    %c0_219 = arith.constant 0 : index
    %610 = vector.load %arg16[%c8_218, %c0_219] : memref<128x128xf32, #tpu.memory_space<vmem>>, vector<8x128xf32>
    tpu.vector_store %arg16[%c8_218, %c0_219], %609 {strides = array<i32>} : memref<128x128xf32, #tpu.memory_space<vmem>>, vector<8x128xf32>,
    %c0_220 = arith.constant 0 : index
    %c0_221 = arith.constant 0 : index
    %611 = vector.load %arg7[%c0_220, %c0_221] : memref<128x384xf32, #tpu.memory_space<vmem>>, vector<128x384xf32>
    %cst_222 = arith.constant dense<0.000000e+00> : vector<8x384xf32>
    %612 = tpu.matmul %609, %611, %cst_222 {dimension_numbers = #tpu.dot_dimension_numbers<[1], [0], [0], [1], [0, 0, 1, 1], [], []>} : vector<8x128xf32>, vector<128x384xf32>, vector<8x384xf32> -> vector<8x384xf32>
    %c0_223 = arith.constant 0 : index
    %c0_224 = arith.constant 0 : index
    %613 = vector.load %arg9[%c0_223, %c0_224] : memref<1x384xf32, #tpu.memory_space<vmem>>, vector<1x384xf32>
    %614 = vector.broadcast %613 : vector<1x384xf32> to vector<8x384xf32>
    %615 = arith.addf %612, %614 : vector<8x384xf32>
    %c16_225 = arith.constant 16 : index
    %c0_226 = arith.constant 0 : index
    %616 = vector.load %arg15[%c16_225, %c0_226] : memref<128x384xf32, #tpu.memory_space<vmem>>, vector<8x384xf32>
    %617 = vector.extract_strided_slice %616 {offsets = [0, 0], sizes = [8, 128], strides = [1, 1]} : vector<8x384xf32> to vector<8x128xf32>
    %618 = vector.extract_strided_slice %615 {offsets = [0, 0], sizes = [8, 128], strides = [1, 1]} : vector<8x384xf32> to vector<8x128xf32>
    %619 = arith.addf %617, %618 : vector<8x128xf32>
    %620 = arith.negf %619 : vector<8x128xf32>
    %621 = math.exp %620 : vector<8x128xf32>
    %cst_227 = arith.constant 1.000000e+00 : f32
    %622 = vector.broadcast %cst_227 : f32 to vector<8x128xf32>
    %623 = arith.addf %622, %621 : vector<8x128xf32>
    %624 = arith.divf %622, %623 : vector<8x128xf32>
    %625 = vector.extract_strided_slice %616 {offsets = [0, 128], sizes = [8, 128], strides = [1, 1]} : vector<8x384xf32> to vector<8x128xf32>
    %626 = vector.extract_strided_slice %615 {offsets = [0, 128], sizes = [8, 128], strides = [1, 1]} : vector<8x384xf32> to vector<8x128xf32>
    %627 = arith.addf %625, %626 : vector<8x128xf32>
    %628 = arith.negf %627 : vector<8x128xf32>
    %629 = math.exp %628 : vector<8x128xf32>
    %cst_228 = arith.constant 1.000000e+00 : f32
    %630 = vector.broadcast %cst_228 : f32 to vector<8x128xf32>
    %631 = arith.addf %630, %629 : vector<8x128xf32>
    %632 = arith.divf %630, %631 : vector<8x128xf32>
    %633 = vector.extract_strided_slice %616 {offsets = [0, 256], sizes = [8, 128], strides = [1, 1]} : vector<8x384xf32> to vector<8x128xf32>
    %634 = vector.extract_strided_slice %615 {offsets = [0, 256], sizes = [8, 128], strides = [1, 1]} : vector<8x384xf32> to vector<8x128xf32>
    %635 = arith.mulf %624, %634 : vector<8x128xf32>
    %636 = arith.addf %633, %635 : vector<8x128xf32>
    %637 = math.tanh %636 : vector<8x128xf32>
    %cst_229 = arith.constant 1.000000e+00 : f32
    %638 = vector.broadcast %cst_229 : f32 to vector<8x128xf32>
    %639 = arith.subf %638, %632 : vector<8x128xf32>
    %640 = arith.mulf %639, %637 : vector<8x128xf32>
    %641 = arith.mulf %632, %609 : vector<8x128xf32>
    %642 = arith.addf %640, %641 : vector<8x128xf32>
    %c16_230 = arith.constant 16 : index
    %c0_231 = arith.constant 0 : index
    %643 = vector.load %arg16[%c16_230, %c0_231] : memref<128x128xf32, #tpu.memory_space<vmem>>, vector<8x128xf32>
    tpu.vector_store %arg16[%c16_230, %c0_231], %642 {strides = array<i32>} : memref<128x128xf32, #tpu.memory_space<vmem>>, vector<8x128xf32>,
    %c0_232 = arith.constant 0 : index
    %c0_233 = arith.constant 0 : index
    %644 = vector.load %arg7[%c0_232, %c0_233] : memref<128x384xf32, #tpu.memory_space<vmem>>, vector<128x384xf32>
    %cst_234 = arith.constant dense<0.000000e+00> : vector<8x384xf32>
    %645 = tpu.matmul %642, %644, %cst_234 {dimension_numbers = #tpu.dot_dimension_numbers<[1], [0], [0], [1], [0, 0, 1, 1], [], []>} : vector<8x128xf32>, vector<128x384xf32>, vector<8x384xf32> -> vector<8x384xf32>
    %c0_235 = arith.constant 0 : index
    %c0_236 = arith.constant 0 : index
    %646 = vector.load %arg9[%c0_235, %c0_236] : memref<1x384xf32, #tpu.memory_space<vmem>>, vector<1x384xf32>
    %647 = vector.broadcast %646 : vector<1x384xf32> to vector<8x384xf32>
    %648 = arith.addf %645, %647 : vector<8x384xf32>
    %c24_237 = arith.constant 24 : index
    %c0_238 = arith.constant 0 : index
    %649 = vector.load %arg15[%c24_237, %c0_238] : memref<128x384xf32, #tpu.memory_space<vmem>>, vector<8x384xf32>
    %650 = vector.extract_strided_slice %649 {offsets = [0, 0], sizes = [8, 128], strides = [1, 1]} : vector<8x384xf32> to vector<8x128xf32>
    %651 = vector.extract_strided_slice %648 {offsets = [0, 0], sizes = [8, 128], strides = [1, 1]} : vector<8x384xf32> to vector<8x128xf32>
    %652 = arith.addf %650, %651 : vector<8x128xf32>
    %653 = arith.negf %652 : vector<8x128xf32>
    %654 = math.exp %653 : vector<8x128xf32>
    %cst_239 = arith.constant 1.000000e+00 : f32
    %655 = vector.broadcast %cst_239 : f32 to vector<8x128xf32>
    %656 = arith.addf %655, %654 : vector<8x128xf32>
    %657 = arith.divf %655, %656 : vector<8x128xf32>
    %658 = vector.extract_strided_slice %649 {offsets = [0, 128], sizes = [8, 128], strides = [1, 1]} : vector<8x384xf32> to vector<8x128xf32>
    %659 = vector.extract_strided_slice %648 {offsets = [0, 128], sizes = [8, 128], strides = [1, 1]} : vector<8x384xf32> to vector<8x128xf32>
    %660 = arith.addf %658, %659 : vector<8x128xf32>
    %661 = arith.negf %660 : vector<8x128xf32>
    %662 = math.exp %661 : vector<8x128xf32>
    %cst_240 = arith.constant 1.000000e+00 : f32
    %663 = vector.broadcast %cst_240 : f32 to vector<8x128xf32>
    %664 = arith.addf %663, %662 : vector<8x128xf32>
    %665 = arith.divf %663, %664 : vector<8x128xf32>
    %666 = vector.extract_strided_slice %649 {offsets = [0, 256], sizes = [8, 128], strides = [1, 1]} : vector<8x384xf32> to vector<8x128xf32>
    %667 = vector.extract_strided_slice %648 {offsets = [0, 256], sizes = [8, 128], strides = [1, 1]} : vector<8x384xf32> to vector<8x128xf32>
    %668 = arith.mulf %657, %667 : vector<8x128xf32>
    %669 = arith.addf %666, %668 : vector<8x128xf32>
    %670 = math.tanh %669 : vector<8x128xf32>
    %cst_241 = arith.constant 1.000000e+00 : f32
    %671 = vector.broadcast %cst_241 : f32 to vector<8x128xf32>
    %672 = arith.subf %671, %665 : vector<8x128xf32>
    %673 = arith.mulf %672, %670 : vector<8x128xf32>
    %674 = arith.mulf %665, %642 : vector<8x128xf32>
    %675 = arith.addf %673, %674 : vector<8x128xf32>
    %c24_242 = arith.constant 24 : index
    %c0_243 = arith.constant 0 : index
    %676 = vector.load %arg16[%c24_242, %c0_243] : memref<128x128xf32, #tpu.memory_space<vmem>>, vector<8x128xf32>
    tpu.vector_store %arg16[%c24_242, %c0_243], %675 {strides = array<i32>} : memref<128x128xf32, #tpu.memory_space<vmem>>, vector<8x128xf32>,
    %c0_244 = arith.constant 0 : index
    %c0_245 = arith.constant 0 : index
    %677 = vector.load %arg7[%c0_244, %c0_245] : memref<128x384xf32, #tpu.memory_space<vmem>>, vector<128x384xf32>
    %cst_246 = arith.constant dense<0.000000e+00> : vector<8x384xf32>
    %678 = tpu.matmul %675, %677, %cst_246 {dimension_numbers = #tpu.dot_dimension_numbers<[1], [0], [0], [1], [0, 0, 1, 1], [], []>} : vector<8x128xf32>, vector<128x384xf32>, vector<8x384xf32> -> vector<8x384xf32>
    %c0_247 = arith.constant 0 : index
    %c0_248 = arith.constant 0 : index
    %679 = vector.load %arg9[%c0_247, %c0_248] : memref<1x384xf32, #tpu.memory_space<vmem>>, vector<1x384xf32>
    %680 = vector.broadcast %679 : vector<1x384xf32> to vector<8x384xf32>
    %681 = arith.addf %678, %680 : vector<8x384xf32>
    %c32_249 = arith.constant 32 : index
    %c0_250 = arith.constant 0 : index
    %682 = vector.load %arg15[%c32_249, %c0_250] : memref<128x384xf32, #tpu.memory_space<vmem>>, vector<8x384xf32>
    %683 = vector.extract_strided_slice %682 {offsets = [0, 0], sizes = [8, 128], strides = [1, 1]} : vector<8x384xf32> to vector<8x128xf32>
    %684 = vector.extract_strided_slice %681 {offsets = [0, 0], sizes = [8, 128], strides = [1, 1]} : vector<8x384xf32> to vector<8x128xf32>
    %685 = arith.addf %683, %684 : vector<8x128xf32>
    %686 = arith.negf %685 : vector<8x128xf32>
    %687 = math.exp %686 : vector<8x128xf32>
    %cst_251 = arith.constant 1.000000e+00 : f32
    %688 = vector.broadcast %cst_251 : f32 to vector<8x128xf32>
    %689 = arith.addf %688, %687 : vector<8x128xf32>
    %690 = arith.divf %688, %689 : vector<8x128xf32>
    %691 = vector.extract_strided_slice %682 {offsets = [0, 128], sizes = [8, 128], strides = [1, 1]} : vector<8x384xf32> to vector<8x128xf32>
    %692 = vector.extract_strided_slice %681 {offsets = [0, 128], sizes = [8, 128], strides = [1, 1]} : vector<8x384xf32> to vector<8x128xf32>
    %693 = arith.addf %691, %692 : vector<8x128xf32>
    %694 = arith.negf %693 : vector<8x128xf32>
    %695 = math.exp %694 : vector<8x128xf32>
    %cst_252 = arith.constant 1.000000e+00 : f32
    %696 = vector.broadcast %cst_252 : f32 to vector<8x128xf32>
    %697 = arith.addf %696, %695 : vector<8x128xf32>
    %698 = arith.divf %696, %697 : vector<8x128xf32>
    %699 = vector.extract_strided_slice %682 {offsets = [0, 256], sizes = [8, 128], strides = [1, 1]} : vector<8x384xf32> to vector<8x128xf32>
    %700 = vector.extract_strided_slice %681 {offsets = [0, 256], sizes = [8, 128], strides = [1, 1]} : vector<8x384xf32> to vector<8x128xf32>
    %701 = arith.mulf %690, %700 : vector<8x128xf32>
    %702 = arith.addf %699, %701 : vector<8x128xf32>
    %703 = math.tanh %702 : vector<8x128xf32>
    %cst_253 = arith.constant 1.000000e+00 : f32
    %704 = vector.broadcast %cst_253 : f32 to vector<8x128xf32>
    %705 = arith.subf %704, %698 : vector<8x128xf32>
    %706 = arith.mulf %705, %703 : vector<8x128xf32>
    %707 = arith.mulf %698, %675 : vector<8x128xf32>
    %708 = arith.addf %706, %707 : vector<8x128xf32>
    %c32_254 = arith.constant 32 : index
    %c0_255 = arith.constant 0 : index
    %709 = vector.load %arg16[%c32_254, %c0_255] : memref<128x128xf32, #tpu.memory_space<vmem>>, vector<8x128xf32>
    tpu.vector_store %arg16[%c32_254, %c0_255], %708 {strides = array<i32>} : memref<128x128xf32, #tpu.memory_space<vmem>>, vector<8x128xf32>,
    %c0_256 = arith.constant 0 : index
    %c0_257 = arith.constant 0 : index
    %710 = vector.load %arg7[%c0_256, %c0_257] : memref<128x384xf32, #tpu.memory_space<vmem>>, vector<128x384xf32>
    %cst_258 = arith.constant dense<0.000000e+00> : vector<8x384xf32>
    %711 = tpu.matmul %708, %710, %cst_258 {dimension_numbers = #tpu.dot_dimension_numbers<[1], [0], [0], [1], [0, 0, 1, 1], [], []>} : vector<8x128xf32>, vector<128x384xf32>, vector<8x384xf32> -> vector<8x384xf32>
    %c0_259 = arith.constant 0 : index
    %c0_260 = arith.constant 0 : index
    %712 = vector.load %arg9[%c0_259, %c0_260] : memref<1x384xf32, #tpu.memory_space<vmem>>, vector<1x384xf32>
    %713 = vector.broadcast %712 : vector<1x384xf32> to vector<8x384xf32>
    %714 = arith.addf %711, %713 : vector<8x384xf32>
    %c40_261 = arith.constant 40 : index
    %c0_262 = arith.constant 0 : index
    %715 = vector.load %arg15[%c40_261, %c0_262] : memref<128x384xf32, #tpu.memory_space<vmem>>, vector<8x384xf32>
    %716 = vector.extract_strided_slice %715 {offsets = [0, 0], sizes = [8, 128], strides = [1, 1]} : vector<8x384xf32> to vector<8x128xf32>
    %717 = vector.extract_strided_slice %714 {offsets = [0, 0], sizes = [8, 128], strides = [1, 1]} : vector<8x384xf32> to vector<8x128xf32>
    %718 = arith.addf %716, %717 : vector<8x128xf32>
    %719 = arith.negf %718 : vector<8x128xf32>
    %720 = math.exp %719 : vector<8x128xf32>
    %cst_263 = arith.constant 1.000000e+00 : f32
    %721 = vector.broadcast %cst_263 : f32 to vector<8x128xf32>
    %722 = arith.addf %721, %720 : vector<8x128xf32>
    %723 = arith.divf %721, %722 : vector<8x128xf32>
    %724 = vector.extract_strided_slice %715 {offsets = [0, 128], sizes = [8, 128], strides = [1, 1]} : vector<8x384xf32> to vector<8x128xf32>
    %725 = vector.extract_strided_slice %714 {offsets = [0, 128], sizes = [8, 128], strides = [1, 1]} : vector<8x384xf32> to vector<8x128xf32>
    %726 = arith.addf %724, %725 : vector<8x128xf32>
    %727 = arith.negf %726 : vector<8x128xf32>
    %728 = math.exp %727 : vector<8x128xf32>
    %cst_264 = arith.constant 1.000000e+00 : f32
    %729 = vector.broadcast %cst_264 : f32 to vector<8x128xf32>
    %730 = arith.addf %729, %728 : vector<8x128xf32>
    %731 = arith.divf %729, %730 : vector<8x128xf32>
    %732 = vector.extract_strided_slice %715 {offsets = [0, 256], sizes = [8, 128], strides = [1, 1]} : vector<8x384xf32> to vector<8x128xf32>
    %733 = vector.extract_strided_slice %714 {offsets = [0, 256], sizes = [8, 128], strides = [1, 1]} : vector<8x384xf32> to vector<8x128xf32>
    %734 = arith.mulf %723, %733 : vector<8x128xf32>
    %735 = arith.addf %732, %734 : vector<8x128xf32>
    %736 = math.tanh %735 : vector<8x128xf32>
    %cst_265 = arith.constant 1.000000e+00 : f32
    %737 = vector.broadcast %cst_265 : f32 to vector<8x128xf32>
    %738 = arith.subf %737, %731 : vector<8x128xf32>
    %739 = arith.mulf %738, %736 : vector<8x128xf32>
    %740 = arith.mulf %731, %708 : vector<8x128xf32>
    %741 = arith.addf %739, %740 : vector<8x128xf32>
    %c40_266 = arith.constant 40 : index
    %c0_267 = arith.constant 0 : index
    %742 = vector.load %arg16[%c40_266, %c0_267] : memref<128x128xf32, #tpu.memory_space<vmem>>, vector<8x128xf32>
    tpu.vector_store %arg16[%c40_266, %c0_267], %741 {strides = array<i32>} : memref<128x128xf32, #tpu.memory_space<vmem>>, vector<8x128xf32>,
    %c0_268 = arith.constant 0 : index
    %c0_269 = arith.constant 0 : index
    %743 = vector.load %arg7[%c0_268, %c0_269] : memref<128x384xf32, #tpu.memory_space<vmem>>, vector<128x384xf32>
    %cst_270 = arith.constant dense<0.000000e+00> : vector<8x384xf32>
    %744 = tpu.matmul %741, %743, %cst_270 {dimension_numbers = #tpu.dot_dimension_numbers<[1], [0], [0], [1], [0, 0, 1, 1], [], []>} : vector<8x128xf32>, vector<128x384xf32>, vector<8x384xf32> -> vector<8x384xf32>
    %c0_271 = arith.constant 0 : index
    %c0_272 = arith.constant 0 : index
    %745 = vector.load %arg9[%c0_271, %c0_272] : memref<1x384xf32, #tpu.memory_space<vmem>>, vector<1x384xf32>
    %746 = vector.broadcast %745 : vector<1x384xf32> to vector<8x384xf32>
    %747 = arith.addf %744, %746 : vector<8x384xf32>
    %c48_273 = arith.constant 48 : index
    %c0_274 = arith.constant 0 : index
    %748 = vector.load %arg15[%c48_273, %c0_274] : memref<128x384xf32, #tpu.memory_space<vmem>>, vector<8x384xf32>
    %749 = vector.extract_strided_slice %748 {offsets = [0, 0], sizes = [8, 128], strides = [1, 1]} : vector<8x384xf32> to vector<8x128xf32>
    %750 = vector.extract_strided_slice %747 {offsets = [0, 0], sizes = [8, 128], strides = [1, 1]} : vector<8x384xf32> to vector<8x128xf32>
    %751 = arith.addf %749, %750 : vector<8x128xf32>
    %752 = arith.negf %751 : vector<8x128xf32>
    %753 = math.exp %752 : vector<8x128xf32>
    %cst_275 = arith.constant 1.000000e+00 : f32
    %754 = vector.broadcast %cst_275 : f32 to vector<8x128xf32>
    %755 = arith.addf %754, %753 : vector<8x128xf32>
    %756 = arith.divf %754, %755 : vector<8x128xf32>
    %757 = vector.extract_strided_slice %748 {offsets = [0, 128], sizes = [8, 128], strides = [1, 1]} : vector<8x384xf32> to vector<8x128xf32>
    %758 = vector.extract_strided_slice %747 {offsets = [0, 128], sizes = [8, 128], strides = [1, 1]} : vector<8x384xf32> to vector<8x128xf32>
    %759 = arith.addf %757, %758 : vector<8x128xf32>
    %760 = arith.negf %759 : vector<8x128xf32>
    %761 = math.exp %760 : vector<8x128xf32>
    %cst_276 = arith.constant 1.000000e+00 : f32
    %762 = vector.broadcast %cst_276 : f32 to vector<8x128xf32>
    %763 = arith.addf %762, %761 : vector<8x128xf32>
    %764 = arith.divf %762, %763 : vector<8x128xf32>
    %765 = vector.extract_strided_slice %748 {offsets = [0, 256], sizes = [8, 128], strides = [1, 1]} : vector<8x384xf32> to vector<8x128xf32>
    %766 = vector.extract_strided_slice %747 {offsets = [0, 256], sizes = [8, 128], strides = [1, 1]} : vector<8x384xf32> to vector<8x128xf32>
    %767 = arith.mulf %756, %766 : vector<8x128xf32>
    %768 = arith.addf %765, %767 : vector<8x128xf32>
    %769 = math.tanh %768 : vector<8x128xf32>
    %cst_277 = arith.constant 1.000000e+00 : f32
    %770 = vector.broadcast %cst_277 : f32 to vector<8x128xf32>
    %771 = arith.subf %770, %764 : vector<8x128xf32>
    %772 = arith.mulf %771, %769 : vector<8x128xf32>
    %773 = arith.mulf %764, %741 : vector<8x128xf32>
    %774 = arith.addf %772, %773 : vector<8x128xf32>
    %c48_278 = arith.constant 48 : index
    %c0_279 = arith.constant 0 : index
    %775 = vector.load %arg16[%c48_278, %c0_279] : memref<128x128xf32, #tpu.memory_space<vmem>>, vector<8x128xf32>
    tpu.vector_store %arg16[%c48_278, %c0_279], %774 {strides = array<i32>} : memref<128x128xf32, #tpu.memory_space<vmem>>, vector<8x128xf32>,
    %c0_280 = arith.constant 0 : index
    %c0_281 = arith.constant 0 : index
    %776 = vector.load %arg7[%c0_280, %c0_281] : memref<128x384xf32, #tpu.memory_space<vmem>>, vector<128x384xf32>
    %cst_282 = arith.constant dense<0.000000e+00> : vector<8x384xf32>
    %777 = tpu.matmul %774, %776, %cst_282 {dimension_numbers = #tpu.dot_dimension_numbers<[1], [0], [0], [1], [0, 0, 1, 1], [], []>} : vector<8x128xf32>, vector<128x384xf32>, vector<8x384xf32> -> vector<8x384xf32>
    %c0_283 = arith.constant 0 : index
    %c0_284 = arith.constant 0 : index
    %778 = vector.load %arg9[%c0_283, %c0_284] : memref<1x384xf32, #tpu.memory_space<vmem>>, vector<1x384xf32>
    %779 = vector.broadcast %778 : vector<1x384xf32> to vector<8x384xf32>
    %780 = arith.addf %777, %779 : vector<8x384xf32>
    %c56_285 = arith.constant 56 : index
    %c0_286 = arith.constant 0 : index
    %781 = vector.load %arg15[%c56_285, %c0_286] : memref<128x384xf32, #tpu.memory_space<vmem>>, vector<8x384xf32>
    %782 = vector.extract_strided_slice %781 {offsets = [0, 0], sizes = [8, 128], strides = [1, 1]} : vector<8x384xf32> to vector<8x128xf32>
    %783 = vector.extract_strided_slice %780 {offsets = [0, 0], sizes = [8, 128], strides = [1, 1]} : vector<8x384xf32> to vector<8x128xf32>
    %784 = arith.addf %782, %783 : vector<8x128xf32>
    %785 = arith.negf %784 : vector<8x128xf32>
    %786 = math.exp %785 : vector<8x128xf32>
    %cst_287 = arith.constant 1.000000e+00 : f32
    %787 = vector.broadcast %cst_287 : f32 to vector<8x128xf32>
    %788 = arith.addf %787, %786 : vector<8x128xf32>
    %789 = arith.divf %787, %788 : vector<8x128xf32>
    %790 = vector.extract_strided_slice %781 {offsets = [0, 128], sizes = [8, 128], strides = [1, 1]} : vector<8x384xf32> to vector<8x128xf32>
    %791 = vector.extract_strided_slice %780 {offsets = [0, 128], sizes = [8, 128], strides = [1, 1]} : vector<8x384xf32> to vector<8x128xf32>
    %792 = arith.addf %790, %791 : vector<8x128xf32>
    %793 = arith.negf %792 : vector<8x128xf32>
    %794 = math.exp %793 : vector<8x128xf32>
    %cst_288 = arith.constant 1.000000e+00 : f32
    %795 = vector.broadcast %cst_288 : f32 to vector<8x128xf32>
    %796 = arith.addf %795, %794 : vector<8x128xf32>
    %797 = arith.divf %795, %796 : vector<8x128xf32>
    %798 = vector.extract_strided_slice %781 {offsets = [0, 256], sizes = [8, 128], strides = [1, 1]} : vector<8x384xf32> to vector<8x128xf32>
    %799 = vector.extract_strided_slice %780 {offsets = [0, 256], sizes = [8, 128], strides = [1, 1]} : vector<8x384xf32> to vector<8x128xf32>
    %800 = arith.mulf %789, %799 : vector<8x128xf32>
    %801 = arith.addf %798, %800 : vector<8x128xf32>
    %802 = math.tanh %801 : vector<8x128xf32>
    %cst_289 = arith.constant 1.000000e+00 : f32
    %803 = vector.broadcast %cst_289 : f32 to vector<8x128xf32>
    %804 = arith.subf %803, %797 : vector<8x128xf32>
    %805 = arith.mulf %804, %802 : vector<8x128xf32>
    %806 = arith.mulf %797, %774 : vector<8x128xf32>
    %807 = arith.addf %805, %806 : vector<8x128xf32>
    %c56_290 = arith.constant 56 : index
    %c0_291 = arith.constant 0 : index
    %808 = vector.load %arg16[%c56_290, %c0_291] : memref<128x128xf32, #tpu.memory_space<vmem>>, vector<8x128xf32>
    tpu.vector_store %arg16[%c56_290, %c0_291], %807 {strides = array<i32>} : memref<128x128xf32, #tpu.memory_space<vmem>>, vector<8x128xf32>,
    %c0_292 = arith.constant 0 : index
    %c0_293 = arith.constant 0 : index
    %809 = vector.load %arg7[%c0_292, %c0_293] : memref<128x384xf32, #tpu.memory_space<vmem>>, vector<128x384xf32>
    %cst_294 = arith.constant dense<0.000000e+00> : vector<8x384xf32>
    %810 = tpu.matmul %807, %809, %cst_294 {dimension_numbers = #tpu.dot_dimension_numbers<[1], [0], [0], [1], [0, 0, 1, 1], [], []>} : vector<8x128xf32>, vector<128x384xf32>, vector<8x384xf32> -> vector<8x384xf32>
    %c0_295 = arith.constant 0 : index
    %c0_296 = arith.constant 0 : index
    %811 = vector.load %arg9[%c0_295, %c0_296] : memref<1x384xf32, #tpu.memory_space<vmem>>, vector<1x384xf32>
    %812 = vector.broadcast %811 : vector<1x384xf32> to vector<8x384xf32>
    %813 = arith.addf %810, %812 : vector<8x384xf32>
    %c64_297 = arith.constant 64 : index
    %c0_298 = arith.constant 0 : index
    %814 = vector.load %arg15[%c64_297, %c0_298] : memref<128x384xf32, #tpu.memory_space<vmem>>, vector<8x384xf32>
    %815 = vector.extract_strided_slice %814 {offsets = [0, 0], sizes = [8, 128], strides = [1, 1]} : vector<8x384xf32> to vector<8x128xf32>
    %816 = vector.extract_strided_slice %813 {offsets = [0, 0], sizes = [8, 128], strides = [1, 1]} : vector<8x384xf32> to vector<8x128xf32>
    %817 = arith.addf %815, %816 : vector<8x128xf32>
    %818 = arith.negf %817 : vector<8x128xf32>
    %819 = math.exp %818 : vector<8x128xf32>
    %cst_299 = arith.constant 1.000000e+00 : f32
    %820 = vector.broadcast %cst_299 : f32 to vector<8x128xf32>
    %821 = arith.addf %820, %819 : vector<8x128xf32>
    %822 = arith.divf %820, %821 : vector<8x128xf32>
    %823 = vector.extract_strided_slice %814 {offsets = [0, 128], sizes = [8, 128], strides = [1, 1]} : vector<8x384xf32> to vector<8x128xf32>
    %824 = vector.extract_strided_slice %813 {offsets = [0, 128], sizes = [8, 128], strides = [1, 1]} : vector<8x384xf32> to vector<8x128xf32>
    %825 = arith.addf %823, %824 : vector<8x128xf32>
    %826 = arith.negf %825 : vector<8x128xf32>
    %827 = math.exp %826 : vector<8x128xf32>
    %cst_300 = arith.constant 1.000000e+00 : f32
    %828 = vector.broadcast %cst_300 : f32 to vector<8x128xf32>
    %829 = arith.addf %828, %827 : vector<8x128xf32>
    %830 = arith.divf %828, %829 : vector<8x128xf32>
    %831 = vector.extract_strided_slice %814 {offsets = [0, 256], sizes = [8, 128], strides = [1, 1]} : vector<8x384xf32> to vector<8x128xf32>
    %832 = vector.extract_strided_slice %813 {offsets = [0, 256], sizes = [8, 128], strides = [1, 1]} : vector<8x384xf32> to vector<8x128xf32>
    %833 = arith.mulf %822, %832 : vector<8x128xf32>
    %834 = arith.addf %831, %833 : vector<8x128xf32>
    %835 = math.tanh %834 : vector<8x128xf32>
    %cst_301 = arith.constant 1.000000e+00 : f32
    %836 = vector.broadcast %cst_301 : f32 to vector<8x128xf32>
    %837 = arith.subf %836, %830 : vector<8x128xf32>
    %838 = arith.mulf %837, %835 : vector<8x128xf32>
    %839 = arith.mulf %830, %807 : vector<8x128xf32>
    %840 = arith.addf %838, %839 : vector<8x128xf32>
    %c64_302 = arith.constant 64 : index
    %c0_303 = arith.constant 0 : index
    %841 = vector.load %arg16[%c64_302, %c0_303] : memref<128x128xf32, #tpu.memory_space<vmem>>, vector<8x128xf32>
    tpu.vector_store %arg16[%c64_302, %c0_303], %840 {strides = array<i32>} : memref<128x128xf32, #tpu.memory_space<vmem>>, vector<8x128xf32>,
    %c0_304 = arith.constant 0 : index
    %c0_305 = arith.constant 0 : index
    %842 = vector.load %arg7[%c0_304, %c0_305] : memref<128x384xf32, #tpu.memory_space<vmem>>, vector<128x384xf32>
    %cst_306 = arith.constant dense<0.000000e+00> : vector<8x384xf32>
    %843 = tpu.matmul %840, %842, %cst_306 {dimension_numbers = #tpu.dot_dimension_numbers<[1], [0], [0], [1], [0, 0, 1, 1], [], []>} : vector<8x128xf32>, vector<128x384xf32>, vector<8x384xf32> -> vector<8x384xf32>
    %c0_307 = arith.constant 0 : index
    %c0_308 = arith.constant 0 : index
    %844 = vector.load %arg9[%c0_307, %c0_308] : memref<1x384xf32, #tpu.memory_space<vmem>>, vector<1x384xf32>
    %845 = vector.broadcast %844 : vector<1x384xf32> to vector<8x384xf32>
    %846 = arith.addf %843, %845 : vector<8x384xf32>
    %c72_309 = arith.constant 72 : index
    %c0_310 = arith.constant 0 : index
    %847 = vector.load %arg15[%c72_309, %c0_310] : memref<128x384xf32, #tpu.memory_space<vmem>>, vector<8x384xf32>
    %848 = vector.extract_strided_slice %847 {offsets = [0, 0], sizes = [8, 128], strides = [1, 1]} : vector<8x384xf32> to vector<8x128xf32>
    %849 = vector.extract_strided_slice %846 {offsets = [0, 0], sizes = [8, 128], strides = [1, 1]} : vector<8x384xf32> to vector<8x128xf32>
    %850 = arith.addf %848, %849 : vector<8x128xf32>
    %851 = arith.negf %850 : vector<8x128xf32>
    %852 = math.exp %851 : vector<8x128xf32>
    %cst_311 = arith.constant 1.000000e+00 : f32
    %853 = vector.broadcast %cst_311 : f32 to vector<8x128xf32>
    %854 = arith.addf %853, %852 : vector<8x128xf32>
    %855 = arith.divf %853, %854 : vector<8x128xf32>
    %856 = vector.extract_strided_slice %847 {offsets = [0, 128], sizes = [8, 128], strides = [1, 1]} : vector<8x384xf32> to vector<8x128xf32>
    %857 = vector.extract_strided_slice %846 {offsets = [0, 128], sizes = [8, 128], strides = [1, 1]} : vector<8x384xf32> to vector<8x128xf32>
    %858 = arith.addf %856, %857 : vector<8x128xf32>
    %859 = arith.negf %858 : vector<8x128xf32>
    %860 = math.exp %859 : vector<8x128xf32>
    %cst_312 = arith.constant 1.000000e+00 : f32
    %861 = vector.broadcast %cst_312 : f32 to vector<8x128xf32>
    %862 = arith.addf %861, %860 : vector<8x128xf32>
    %863 = arith.divf %861, %862 : vector<8x128xf32>
    %864 = vector.extract_strided_slice %847 {offsets = [0, 256], sizes = [8, 128], strides = [1, 1]} : vector<8x384xf32> to vector<8x128xf32>
    %865 = vector.extract_strided_slice %846 {offsets = [0, 256], sizes = [8, 128], strides = [1, 1]} : vector<8x384xf32> to vector<8x128xf32>
    %866 = arith.mulf %855, %865 : vector<8x128xf32>
    %867 = arith.addf %864, %866 : vector<8x128xf32>
    %868 = math.tanh %867 : vector<8x128xf32>
    %cst_313 = arith.constant 1.000000e+00 : f32
    %869 = vector.broadcast %cst_313 : f32 to vector<8x128xf32>
    %870 = arith.subf %869, %863 : vector<8x128xf32>
    %871 = arith.mulf %870, %868 : vector<8x128xf32>
    %872 = arith.mulf %863, %840 : vector<8x128xf32>
    %873 = arith.addf %871, %872 : vector<8x128xf32>
    %c72_314 = arith.constant 72 : index
    %c0_315 = arith.constant 0 : index
    %874 = vector.load %arg16[%c72_314, %c0_315] : memref<128x128xf32, #tpu.memory_space<vmem>>, vector<8x128xf32>
    tpu.vector_store %arg16[%c72_314, %c0_315], %873 {strides = array<i32>} : memref<128x128xf32, #tpu.memory_space<vmem>>, vector<8x128xf32>,
    %c0_316 = arith.constant 0 : index
    %c0_317 = arith.constant 0 : index
    %875 = vector.load %arg7[%c0_316, %c0_317] : memref<128x384xf32, #tpu.memory_space<vmem>>, vector<128x384xf32>
    %cst_318 = arith.constant dense<0.000000e+00> : vector<8x384xf32>
    %876 = tpu.matmul %873, %875, %cst_318 {dimension_numbers = #tpu.dot_dimension_numbers<[1], [0], [0], [1], [0, 0, 1, 1], [], []>} : vector<8x128xf32>, vector<128x384xf32>, vector<8x384xf32> -> vector<8x384xf32>
    %c0_319 = arith.constant 0 : index
    %c0_320 = arith.constant 0 : index
    %877 = vector.load %arg9[%c0_319, %c0_320] : memref<1x384xf32, #tpu.memory_space<vmem>>, vector<1x384xf32>
    %878 = vector.broadcast %877 : vector<1x384xf32> to vector<8x384xf32>
    %879 = arith.addf %876, %878 : vector<8x384xf32>
    %c80_321 = arith.constant 80 : index
    %c0_322 = arith.constant 0 : index
    %880 = vector.load %arg15[%c80_321, %c0_322] : memref<128x384xf32, #tpu.memory_space<vmem>>, vector<8x384xf32>
    %881 = vector.extract_strided_slice %880 {offsets = [0, 0], sizes = [8, 128], strides = [1, 1]} : vector<8x384xf32> to vector<8x128xf32>
    %882 = vector.extract_strided_slice %879 {offsets = [0, 0], sizes = [8, 128], strides = [1, 1]} : vector<8x384xf32> to vector<8x128xf32>
    %883 = arith.addf %881, %882 : vector<8x128xf32>
    %884 = arith.negf %883 : vector<8x128xf32>
    %885 = math.exp %884 : vector<8x128xf32>
    %cst_323 = arith.constant 1.000000e+00 : f32
    %886 = vector.broadcast %cst_323 : f32 to vector<8x128xf32>
    %887 = arith.addf %886, %885 : vector<8x128xf32>
    %888 = arith.divf %886, %887 : vector<8x128xf32>
    %889 = vector.extract_strided_slice %880 {offsets = [0, 128], sizes = [8, 128], strides = [1, 1]} : vector<8x384xf32> to vector<8x128xf32>
    %890 = vector.extract_strided_slice %879 {offsets = [0, 128], sizes = [8, 128], strides = [1, 1]} : vector<8x384xf32> to vector<8x128xf32>
    %891 = arith.addf %889, %890 : vector<8x128xf32>
    %892 = arith.negf %891 : vector<8x128xf32>
    %893 = math.exp %892 : vector<8x128xf32>
    %cst_324 = arith.constant 1.000000e+00 : f32
    %894 = vector.broadcast %cst_324 : f32 to vector<8x128xf32>
    %895 = arith.addf %894, %893 : vector<8x128xf32>
    %896 = arith.divf %894, %895 : vector<8x128xf32>
    %897 = vector.extract_strided_slice %880 {offsets = [0, 256], sizes = [8, 128], strides = [1, 1]} : vector<8x384xf32> to vector<8x128xf32>
    %898 = vector.extract_strided_slice %879 {offsets = [0, 256], sizes = [8, 128], strides = [1, 1]} : vector<8x384xf32> to vector<8x128xf32>
    %899 = arith.mulf %888, %898 : vector<8x128xf32>
    %900 = arith.addf %897, %899 : vector<8x128xf32>
    %901 = math.tanh %900 : vector<8x128xf32>
    %cst_325 = arith.constant 1.000000e+00 : f32
    %902 = vector.broadcast %cst_325 : f32 to vector<8x128xf32>
    %903 = arith.subf %902, %896 : vector<8x128xf32>
    %904 = arith.mulf %903, %901 : vector<8x128xf32>
    %905 = arith.mulf %896, %873 : vector<8x128xf32>
    %906 = arith.addf %904, %905 : vector<8x128xf32>
    %c80_326 = arith.constant 80 : index
    %c0_327 = arith.constant 0 : index
    %907 = vector.load %arg16[%c80_326, %c0_327] : memref<128x128xf32, #tpu.memory_space<vmem>>, vector<8x128xf32>
    tpu.vector_store %arg16[%c80_326, %c0_327], %906 {strides = array<i32>} : memref<128x128xf32, #tpu.memory_space<vmem>>, vector<8x128xf32>,
    %c0_328 = arith.constant 0 : index
    %c0_329 = arith.constant 0 : index
    %908 = vector.load %arg7[%c0_328, %c0_329] : memref<128x384xf32, #tpu.memory_space<vmem>>, vector<128x384xf32>
    %cst_330 = arith.constant dense<0.000000e+00> : vector<8x384xf32>
    %909 = tpu.matmul %906, %908, %cst_330 {dimension_numbers = #tpu.dot_dimension_numbers<[1], [0], [0], [1], [0, 0, 1, 1], [], []>} : vector<8x128xf32>, vector<128x384xf32>, vector<8x384xf32> -> vector<8x384xf32>
    %c0_331 = arith.constant 0 : index
    %c0_332 = arith.constant 0 : index
    %910 = vector.load %arg9[%c0_331, %c0_332] : memref<1x384xf32, #tpu.memory_space<vmem>>, vector<1x384xf32>
    %911 = vector.broadcast %910 : vector<1x384xf32> to vector<8x384xf32>
    %912 = arith.addf %909, %911 : vector<8x384xf32>
    %c88_333 = arith.constant 88 : index
    %c0_334 = arith.constant 0 : index
    %913 = vector.load %arg15[%c88_333, %c0_334] : memref<128x384xf32, #tpu.memory_space<vmem>>, vector<8x384xf32>
    %914 = vector.extract_strided_slice %913 {offsets = [0, 0], sizes = [8, 128], strides = [1, 1]} : vector<8x384xf32> to vector<8x128xf32>
    %915 = vector.extract_strided_slice %912 {offsets = [0, 0], sizes = [8, 128], strides = [1, 1]} : vector<8x384xf32> to vector<8x128xf32>
    %916 = arith.addf %914, %915 : vector<8x128xf32>
    %917 = arith.negf %916 : vector<8x128xf32>
    %918 = math.exp %917 : vector<8x128xf32>
    %cst_335 = arith.constant 1.000000e+00 : f32
    %919 = vector.broadcast %cst_335 : f32 to vector<8x128xf32>
    %920 = arith.addf %919, %918 : vector<8x128xf32>
    %921 = arith.divf %919, %920 : vector<8x128xf32>
    %922 = vector.extract_strided_slice %913 {offsets = [0, 128], sizes = [8, 128], strides = [1, 1]} : vector<8x384xf32> to vector<8x128xf32>
    %923 = vector.extract_strided_slice %912 {offsets = [0, 128], sizes = [8, 128], strides = [1, 1]} : vector<8x384xf32> to vector<8x128xf32>
    %924 = arith.addf %922, %923 : vector<8x128xf32>
    %925 = arith.negf %924 : vector<8x128xf32>
    %926 = math.exp %925 : vector<8x128xf32>
    %cst_336 = arith.constant 1.000000e+00 : f32
    %927 = vector.broadcast %cst_336 : f32 to vector<8x128xf32>
    %928 = arith.addf %927, %926 : vector<8x128xf32>
    %929 = arith.divf %927, %928 : vector<8x128xf32>
    %930 = vector.extract_strided_slice %913 {offsets = [0, 256], sizes = [8, 128], strides = [1, 1]} : vector<8x384xf32> to vector<8x128xf32>
    %931 = vector.extract_strided_slice %912 {offsets = [0, 256], sizes = [8, 128], strides = [1, 1]} : vector<8x384xf32> to vector<8x128xf32>
    %932 = arith.mulf %921, %931 : vector<8x128xf32>
    %933 = arith.addf %930, %932 : vector<8x128xf32>
    %934 = math.tanh %933 : vector<8x128xf32>
    %cst_337 = arith.constant 1.000000e+00 : f32
    %935 = vector.broadcast %cst_337 : f32 to vector<8x128xf32>
    %936 = arith.subf %935, %929 : vector<8x128xf32>
    %937 = arith.mulf %936, %934 : vector<8x128xf32>
    %938 = arith.mulf %929, %906 : vector<8x128xf32>
    %939 = arith.addf %937, %938 : vector<8x128xf32>
    %c88_338 = arith.constant 88 : index
    %c0_339 = arith.constant 0 : index
    %940 = vector.load %arg16[%c88_338, %c0_339] : memref<128x128xf32, #tpu.memory_space<vmem>>, vector<8x128xf32>
    tpu.vector_store %arg16[%c88_338, %c0_339], %939 {strides = array<i32>} : memref<128x128xf32, #tpu.memory_space<vmem>>, vector<8x128xf32>,
    %c0_340 = arith.constant 0 : index
    %c0_341 = arith.constant 0 : index
    %941 = vector.load %arg7[%c0_340, %c0_341] : memref<128x384xf32, #tpu.memory_space<vmem>>, vector<128x384xf32>
    %cst_342 = arith.constant dense<0.000000e+00> : vector<8x384xf32>
    %942 = tpu.matmul %939, %941, %cst_342 {dimension_numbers = #tpu.dot_dimension_numbers<[1], [0], [0], [1], [0, 0, 1, 1], [], []>} : vector<8x128xf32>, vector<128x384xf32>, vector<8x384xf32> -> vector<8x384xf32>
    %c0_343 = arith.constant 0 : index
    %c0_344 = arith.constant 0 : index
    %943 = vector.load %arg9[%c0_343, %c0_344] : memref<1x384xf32, #tpu.memory_space<vmem>>, vector<1x384xf32>
    %944 = vector.broadcast %943 : vector<1x384xf32> to vector<8x384xf32>
    %945 = arith.addf %942, %944 : vector<8x384xf32>
    %c96_345 = arith.constant 96 : index
    %c0_346 = arith.constant 0 : index
    %946 = vector.load %arg15[%c96_345, %c0_346] : memref<128x384xf32, #tpu.memory_space<vmem>>, vector<8x384xf32>
    %947 = vector.extract_strided_slice %946 {offsets = [0, 0], sizes = [8, 128], strides = [1, 1]} : vector<8x384xf32> to vector<8x128xf32>
    %948 = vector.extract_strided_slice %945 {offsets = [0, 0], sizes = [8, 128], strides = [1, 1]} : vector<8x384xf32> to vector<8x128xf32>
    %949 = arith.addf %947, %948 : vector<8x128xf32>
    %950 = arith.negf %949 : vector<8x128xf32>
    %951 = math.exp %950 : vector<8x128xf32>
    %cst_347 = arith.constant 1.000000e+00 : f32
    %952 = vector.broadcast %cst_347 : f32 to vector<8x128xf32>
    %953 = arith.addf %952, %951 : vector<8x128xf32>
    %954 = arith.divf %952, %953 : vector<8x128xf32>
    %955 = vector.extract_strided_slice %946 {offsets = [0, 128], sizes = [8, 128], strides = [1, 1]} : vector<8x384xf32> to vector<8x128xf32>
    %956 = vector.extract_strided_slice %945 {offsets = [0, 128], sizes = [8, 128], strides = [1, 1]} : vector<8x384xf32> to vector<8x128xf32>
    %957 = arith.addf %955, %956 : vector<8x128xf32>
    %958 = arith.negf %957 : vector<8x128xf32>
    %959 = math.exp %958 : vector<8x128xf32>
    %cst_348 = arith.constant 1.000000e+00 : f32
    %960 = vector.broadcast %cst_348 : f32 to vector<8x128xf32>
    %961 = arith.addf %960, %959 : vector<8x128xf32>
    %962 = arith.divf %960, %961 : vector<8x128xf32>
    %963 = vector.extract_strided_slice %946 {offsets = [0, 256], sizes = [8, 128], strides = [1, 1]} : vector<8x384xf32> to vector<8x128xf32>
    %964 = vector.extract_strided_slice %945 {offsets = [0, 256], sizes = [8, 128], strides = [1, 1]} : vector<8x384xf32> to vector<8x128xf32>
    %965 = arith.mulf %954, %964 : vector<8x128xf32>
    %966 = arith.addf %963, %965 : vector<8x128xf32>
    %967 = math.tanh %966 : vector<8x128xf32>
    %cst_349 = arith.constant 1.000000e+00 : f32
    %968 = vector.broadcast %cst_349 : f32 to vector<8x128xf32>
    %969 = arith.subf %968, %962 : vector<8x128xf32>
    %970 = arith.mulf %969, %967 : vector<8x128xf32>
    %971 = arith.mulf %962, %939 : vector<8x128xf32>
    %972 = arith.addf %970, %971 : vector<8x128xf32>
    %c96_350 = arith.constant 96 : index
    %c0_351 = arith.constant 0 : index
    %973 = vector.load %arg16[%c96_350, %c0_351] : memref<128x128xf32, #tpu.memory_space<vmem>>, vector<8x128xf32>
    tpu.vector_store %arg16[%c96_350, %c0_351], %972 {strides = array<i32>} : memref<128x128xf32, #tpu.memory_space<vmem>>, vector<8x128xf32>,
    %c0_352 = arith.constant 0 : index
    %c0_353 = arith.constant 0 : index
    %974 = vector.load %arg7[%c0_352, %c0_353] : memref<128x384xf32, #tpu.memory_space<vmem>>, vector<128x384xf32>
    %cst_354 = arith.constant dense<0.000000e+00> : vector<8x384xf32>
    %975 = tpu.matmul %972, %974, %cst_354 {dimension_numbers = #tpu.dot_dimension_numbers<[1], [0], [0], [1], [0, 0, 1, 1], [], []>} : vector<8x128xf32>, vector<128x384xf32>, vector<8x384xf32> -> vector<8x384xf32>
    %c0_355 = arith.constant 0 : index
    %c0_356 = arith.constant 0 : index
    %976 = vector.load %arg9[%c0_355, %c0_356] : memref<1x384xf32, #tpu.memory_space<vmem>>, vector<1x384xf32>
    %977 = vector.broadcast %976 : vector<1x384xf32> to vector<8x384xf32>
    %978 = arith.addf %975, %977 : vector<8x384xf32>
    %c104_357 = arith.constant 104 : index
    %c0_358 = arith.constant 0 : index
    %979 = vector.load %arg15[%c104_357, %c0_358] : memref<128x384xf32, #tpu.memory_space<vmem>>, vector<8x384xf32>
    %980 = vector.extract_strided_slice %979 {offsets = [0, 0], sizes = [8, 128], strides = [1, 1]} : vector<8x384xf32> to vector<8x128xf32>
    %981 = vector.extract_strided_slice %978 {offsets = [0, 0], sizes = [8, 128], strides = [1, 1]} : vector<8x384xf32> to vector<8x128xf32>
    %982 = arith.addf %980, %981 : vector<8x128xf32>
    %983 = arith.negf %982 : vector<8x128xf32>
    %984 = math.exp %983 : vector<8x128xf32>
    %cst_359 = arith.constant 1.000000e+00 : f32
    %985 = vector.broadcast %cst_359 : f32 to vector<8x128xf32>
    %986 = arith.addf %985, %984 : vector<8x128xf32>
    %987 = arith.divf %985, %986 : vector<8x128xf32>
    %988 = vector.extract_strided_slice %979 {offsets = [0, 128], sizes = [8, 128], strides = [1, 1]} : vector<8x384xf32> to vector<8x128xf32>
    %989 = vector.extract_strided_slice %978 {offsets = [0, 128], sizes = [8, 128], strides = [1, 1]} : vector<8x384xf32> to vector<8x128xf32>
    %990 = arith.addf %988, %989 : vector<8x128xf32>
    %991 = arith.negf %990 : vector<8x128xf32>
    %992 = math.exp %991 : vector<8x128xf32>
    %cst_360 = arith.constant 1.000000e+00 : f32
    %993 = vector.broadcast %cst_360 : f32 to vector<8x128xf32>
    %994 = arith.addf %993, %992 : vector<8x128xf32>
    %995 = arith.divf %993, %994 : vector<8x128xf32>
    %996 = vector.extract_strided_slice %979 {offsets = [0, 256], sizes = [8, 128], strides = [1, 1]} : vector<8x384xf32> to vector<8x128xf32>
    %997 = vector.extract_strided_slice %978 {offsets = [0, 256], sizes = [8, 128], strides = [1, 1]} : vector<8x384xf32> to vector<8x128xf32>
    %998 = arith.mulf %987, %997 : vector<8x128xf32>
    %999 = arith.addf %996, %998 : vector<8x128xf32>
    %1000 = math.tanh %999 : vector<8x128xf32>
    %cst_361 = arith.constant 1.000000e+00 : f32
    %1001 = vector.broadcast %cst_361 : f32 to vector<8x128xf32>
    %1002 = arith.subf %1001, %995 : vector<8x128xf32>
    %1003 = arith.mulf %1002, %1000 : vector<8x128xf32>
    %1004 = arith.mulf %995, %972 : vector<8x128xf32>
    %1005 = arith.addf %1003, %1004 : vector<8x128xf32>
    %c104_362 = arith.constant 104 : index
    %c0_363 = arith.constant 0 : index
    %1006 = vector.load %arg16[%c104_362, %c0_363] : memref<128x128xf32, #tpu.memory_space<vmem>>, vector<8x128xf32>
    tpu.vector_store %arg16[%c104_362, %c0_363], %1005 {strides = array<i32>} : memref<128x128xf32, #tpu.memory_space<vmem>>, vector<8x128xf32>,
    %c0_364 = arith.constant 0 : index
    %c0_365 = arith.constant 0 : index
    %1007 = vector.load %arg7[%c0_364, %c0_365] : memref<128x384xf32, #tpu.memory_space<vmem>>, vector<128x384xf32>
    %cst_366 = arith.constant dense<0.000000e+00> : vector<8x384xf32>
    %1008 = tpu.matmul %1005, %1007, %cst_366 {dimension_numbers = #tpu.dot_dimension_numbers<[1], [0], [0], [1], [0, 0, 1, 1], [], []>} : vector<8x128xf32>, vector<128x384xf32>, vector<8x384xf32> -> vector<8x384xf32>
    %c0_367 = arith.constant 0 : index
    %c0_368 = arith.constant 0 : index
    %1009 = vector.load %arg9[%c0_367, %c0_368] : memref<1x384xf32, #tpu.memory_space<vmem>>, vector<1x384xf32>
    %1010 = vector.broadcast %1009 : vector<1x384xf32> to vector<8x384xf32>
    %1011 = arith.addf %1008, %1010 : vector<8x384xf32>
    %c112_369 = arith.constant 112 : index
    %c0_370 = arith.constant 0 : index
    %1012 = vector.load %arg15[%c112_369, %c0_370] : memref<128x384xf32, #tpu.memory_space<vmem>>, vector<8x384xf32>
    %1013 = vector.extract_strided_slice %1012 {offsets = [0, 0], sizes = [8, 128], strides = [1, 1]} : vector<8x384xf32> to vector<8x128xf32>
    %1014 = vector.extract_strided_slice %1011 {offsets = [0, 0], sizes = [8, 128], strides = [1, 1]} : vector<8x384xf32> to vector<8x128xf32>
    %1015 = arith.addf %1013, %1014 : vector<8x128xf32>
    %1016 = arith.negf %1015 : vector<8x128xf32>
    %1017 = math.exp %1016 : vector<8x128xf32>
    %cst_371 = arith.constant 1.000000e+00 : f32
    %1018 = vector.broadcast %cst_371 : f32 to vector<8x128xf32>
    %1019 = arith.addf %1018, %1017 : vector<8x128xf32>
    %1020 = arith.divf %1018, %1019 : vector<8x128xf32>
    %1021 = vector.extract_strided_slice %1012 {offsets = [0, 128], sizes = [8, 128], strides = [1, 1]} : vector<8x384xf32> to vector<8x128xf32>
    %1022 = vector.extract_strided_slice %1011 {offsets = [0, 128], sizes = [8, 128], strides = [1, 1]} : vector<8x384xf32> to vector<8x128xf32>
    %1023 = arith.addf %1021, %1022 : vector<8x128xf32>
    %1024 = arith.negf %1023 : vector<8x128xf32>
    %1025 = math.exp %1024 : vector<8x128xf32>
    %cst_372 = arith.constant 1.000000e+00 : f32
    %1026 = vector.broadcast %cst_372 : f32 to vector<8x128xf32>
    %1027 = arith.addf %1026, %1025 : vector<8x128xf32>
    %1028 = arith.divf %1026, %1027 : vector<8x128xf32>
    %1029 = vector.extract_strided_slice %1012 {offsets = [0, 256], sizes = [8, 128], strides = [1, 1]} : vector<8x384xf32> to vector<8x128xf32>
    %1030 = vector.extract_strided_slice %1011 {offsets = [0, 256], sizes = [8, 128], strides = [1, 1]} : vector<8x384xf32> to vector<8x128xf32>
    %1031 = arith.mulf %1020, %1030 : vector<8x128xf32>
    %1032 = arith.addf %1029, %1031 : vector<8x128xf32>
    %1033 = math.tanh %1032 : vector<8x128xf32>
    %cst_373 = arith.constant 1.000000e+00 : f32
    %1034 = vector.broadcast %cst_373 : f32 to vector<8x128xf32>
    %1035 = arith.subf %1034, %1028 : vector<8x128xf32>
    %1036 = arith.mulf %1035, %1033 : vector<8x128xf32>
    %1037 = arith.mulf %1028, %1005 : vector<8x128xf32>
    %1038 = arith.addf %1036, %1037 : vector<8x128xf32>
    %c112_374 = arith.constant 112 : index
    %c0_375 = arith.constant 0 : index
    %1039 = vector.load %arg16[%c112_374, %c0_375] : memref<128x128xf32, #tpu.memory_space<vmem>>, vector<8x128xf32>
    tpu.vector_store %arg16[%c112_374, %c0_375], %1038 {strides = array<i32>} : memref<128x128xf32, #tpu.memory_space<vmem>>, vector<8x128xf32>,
    %c0_376 = arith.constant 0 : index
    %c0_377 = arith.constant 0 : index
    %1040 = vector.load %arg7[%c0_376, %c0_377] : memref<128x384xf32, #tpu.memory_space<vmem>>, vector<128x384xf32>
    %cst_378 = arith.constant dense<0.000000e+00> : vector<8x384xf32>
    %1041 = tpu.matmul %1038, %1040, %cst_378 {dimension_numbers = #tpu.dot_dimension_numbers<[1], [0], [0], [1], [0, 0, 1, 1], [], []>} : vector<8x128xf32>, vector<128x384xf32>, vector<8x384xf32> -> vector<8x384xf32>
    %c0_379 = arith.constant 0 : index
    %c0_380 = arith.constant 0 : index
    %1042 = vector.load %arg9[%c0_379, %c0_380] : memref<1x384xf32, #tpu.memory_space<vmem>>, vector<1x384xf32>
    %1043 = vector.broadcast %1042 : vector<1x384xf32> to vector<8x384xf32>
    %1044 = arith.addf %1041, %1043 : vector<8x384xf32>
    %c120_381 = arith.constant 120 : index
    %c0_382 = arith.constant 0 : index
    %1045 = vector.load %arg15[%c120_381, %c0_382] : memref<128x384xf32, #tpu.memory_space<vmem>>, vector<8x384xf32>
    %1046 = vector.extract_strided_slice %1045 {offsets = [0, 0], sizes = [8, 128], strides = [1, 1]} : vector<8x384xf32> to vector<8x128xf32>
    %1047 = vector.extract_strided_slice %1044 {offsets = [0, 0], sizes = [8, 128], strides = [1, 1]} : vector<8x384xf32> to vector<8x128xf32>
    %1048 = arith.addf %1046, %1047 : vector<8x128xf32>
    %1049 = arith.negf %1048 : vector<8x128xf32>
    %1050 = math.exp %1049 : vector<8x128xf32>
    %cst_383 = arith.constant 1.000000e+00 : f32
    %1051 = vector.broadcast %cst_383 : f32 to vector<8x128xf32>
    %1052 = arith.addf %1051, %1050 : vector<8x128xf32>
    %1053 = arith.divf %1051, %1052 : vector<8x128xf32>
    %1054 = vector.extract_strided_slice %1045 {offsets = [0, 128], sizes = [8, 128], strides = [1, 1]} : vector<8x384xf32> to vector<8x128xf32>
    %1055 = vector.extract_strided_slice %1044 {offsets = [0, 128], sizes = [8, 128], strides = [1, 1]} : vector<8x384xf32> to vector<8x128xf32>
    %1056 = arith.addf %1054, %1055 : vector<8x128xf32>
    %1057 = arith.negf %1056 : vector<8x128xf32>
    %1058 = math.exp %1057 : vector<8x128xf32>
    %cst_384 = arith.constant 1.000000e+00 : f32
    %1059 = vector.broadcast %cst_384 : f32 to vector<8x128xf32>
    %1060 = arith.addf %1059, %1058 : vector<8x128xf32>
    %1061 = arith.divf %1059, %1060 : vector<8x128xf32>
    %1062 = vector.extract_strided_slice %1045 {offsets = [0, 256], sizes = [8, 128], strides = [1, 1]} : vector<8x384xf32> to vector<8x128xf32>
    %1063 = vector.extract_strided_slice %1044 {offsets = [0, 256], sizes = [8, 128], strides = [1, 1]} : vector<8x384xf32> to vector<8x128xf32>
    %1064 = arith.mulf %1053, %1063 : vector<8x128xf32>
    %1065 = arith.addf %1062, %1064 : vector<8x128xf32>
    %1066 = math.tanh %1065 : vector<8x128xf32>
    %cst_385 = arith.constant 1.000000e+00 : f32
    %1067 = vector.broadcast %cst_385 : f32 to vector<8x128xf32>
    %1068 = arith.subf %1067, %1061 : vector<8x128xf32>
    %1069 = arith.mulf %1068, %1066 : vector<8x128xf32>
    %1070 = arith.mulf %1061, %1038 : vector<8x128xf32>
    %1071 = arith.addf %1069, %1070 : vector<8x128xf32>
    %c120_386 = arith.constant 120 : index
    %c0_387 = arith.constant 0 : index
    %1072 = vector.load %arg16[%c120_386, %c0_387] : memref<128x128xf32, #tpu.memory_space<vmem>>, vector<8x128xf32>
    tpu.vector_store %arg16[%c120_386, %c0_387], %1071 {strides = array<i32>} : memref<128x128xf32, #tpu.memory_space<vmem>>, vector<8x128xf32>,
    %c0_388 = arith.constant 0 : index
    %c0_389 = arith.constant 0 : index
    %1073 = vector.load %arg16[%c0_388, %c0_389] : memref<128x128xf32, #tpu.memory_space<vmem>>, vector<128x128xf32>
    %c0_390 = arith.constant 0 : index
    %c0_391 = arith.constant 0 : index
    %1074 = vector.load %arg10[%c0_390, %c0_391] : memref<128x128xf32, #tpu.memory_space<vmem>>, vector<128x128xf32>
    %cst_392 = arith.constant dense<0.000000e+00> : vector<128x128xf32>
    %1075 = tpu.matmul %1073, %1074, %cst_392 {dimension_numbers = #tpu.dot_dimension_numbers<[1], [0], [0], [1], [0, 0, 1, 1], [], []>} : vector<128x128xf32>, vector<128x128xf32>, vector<128x128xf32> -> vector<128x128xf32>
    %c0_393 = arith.constant 0 : index
    %c0_394 = arith.constant 0 : index
    %1076 = vector.load %arg11[%c0_393, %c0_394] : memref<1x128xf32, #tpu.memory_space<vmem>>, vector<1x128xf32>
    %1077 = vector.broadcast %1076 : vector<1x128xf32> to vector<128x128xf32>
    %1078 = arith.addf %1075, %1077 : vector<128x128xf32>
    %cst_395 = arith.constant 0.000000e+00 : f32
    %1079 = vector.broadcast %cst_395 : f32 to vector<128x128xf32>
    %1080 = arith.maximumf %1078, %1079 : vector<128x128xf32>
    %c0_396 = arith.constant 0 : index
    %c0_397 = arith.constant 0 : index
    %1081 = vector.load %arg12[%c0_396, %c0_397] : memref<128x128xf32, #tpu.memory_space<vmem>>, vector<128x128xf32>
    %cst_398 = arith.constant dense<0.000000e+00> : vector<128x128xf32>
    %1082 = tpu.matmul %1080, %1081, %cst_398 {dimension_numbers = #tpu.dot_dimension_numbers<[1], [0], [0], [1], [0, 0, 1, 1], [], []>} : vector<128x128xf32>, vector<128x128xf32>, vector<128x128xf32> -> vector<128x128xf32>
    %c0_399 = arith.constant 0 : index
    %c0_400 = arith.constant 0 : index
    %1083 = vector.load %arg13[%c0_399, %c0_400] : memref<1x128xf32, #tpu.memory_space<vmem>>, vector<1x128xf32>
    %1084 = vector.broadcast %1083 : vector<1x128xf32> to vector<128x128xf32>
    %1085 = arith.addf %1082, %1084 : vector<128x128xf32>
    %1086 = vector.shape_cast %1085 : vector<128x128xf32> to vector<16x8x128xf32>
    %c0_401 = arith.constant 0 : index
    %c0_402 = arith.constant 0 : index
    %c0_403 = arith.constant 0 : index
    %1087 = vector.load %arg14[%c0_401, %c0_402, %c0_403] : memref<16x8x128xf32, #tpu.memory_space<vmem>>, vector<16x8x128xf32>
    tpu.vector_store %arg14[%c0_401, %c0_402, %c0_403], %1086 {strides = array<i32>} : memref<16x8x128xf32, #tpu.memory_space<vmem>>, vector<16x8x128xf32>,
    return
  }
  func.func @transform_0(%arg0: i32) -> (i32, i32, i32) {
    %c0_i32 = arith.constant 0 : i32
    %c0_i32_0 = arith.constant 0 : i32
    %c0_i32_1 = arith.constant 0 : i32
    return %c0_i32, %arg0, %c0_i32_0 : i32, i32, i32
  }
  func.func @transform_1(%arg0: i32) -> (i32, i32) {
    %c0_i32 = arith.constant 0 : i32
    %c0_i32_0 = arith.constant 0 : i32
    %c0_i32_1 = arith.constant 0 : i32
    return %c0_i32, %c0_i32_0 : i32, i32
  }
  func.func @transform_2(%arg0: i32) -> (i32, i32) {
    %c0_i32 = arith.constant 0 : i32
    %c0_i32_0 = arith.constant 0 : i32
    %c0_i32_1 = arith.constant 0 : i32
    return %c0_i32, %c0_i32_0 : i32, i32
  }
  func.func @transform_3(%arg0: i32) -> (i32, i32) {
    %c0_i32 = arith.constant 0 : i32
    %c0_i32_0 = arith.constant 0 : i32
    %c0_i32_1 = arith.constant 0 : i32
    return %c0_i32, %c0_i32_0 : i32, i32
  }
  func.func @transform_4(%arg0: i32) -> (i32, i32) {
    %c0_i32 = arith.constant 0 : i32
    %c0_i32_0 = arith.constant 0 : i32
    %c0_i32_1 = arith.constant 0 : i32
    return %c0_i32, %c0_i32_0 : i32, i32
  }
  func.func @transform_5(%arg0: i32) -> (i32, i32) {
    %c0_i32 = arith.constant 0 : i32
    %c0_i32_0 = arith.constant 0 : i32
    %c0_i32_1 = arith.constant 0 : i32
    return %c0_i32, %c0_i32_0 : i32, i32
  }
  func.func @transform_6(%arg0: i32) -> (i32, i32) {
    %c0_i32 = arith.constant 0 : i32
    %c0_i32_0 = arith.constant 0 : i32
    %c0_i32_1 = arith.constant 0 : i32
    return %c0_i32, %c0_i32_0 : i32, i32
  }
  func.func @transform_7(%arg0: i32) -> (i32, i32) {
    %c0_i32 = arith.constant 0 : i32
    %c0_i32_0 = arith.constant 0 : i32
    %c0_i32_1 = arith.constant 0 : i32
    return %c0_i32, %c0_i32_0 : i32, i32
  }
  func.func @transform_8(%arg0: i32) -> (i32, i32) {
    %c0_i32 = arith.constant 0 : i32
    %c0_i32_0 = arith.constant 0 : i32
    %c0_i32_1 = arith.constant 0 : i32
    return %c0_i32, %c0_i32_0 : i32, i32
  }
  func.func @transform_9(%arg0: i32) -> (i32, i32) {
    %c0_i32 = arith.constant 0 : i32
    %c0_i32_0 = arith.constant 0 : i32
    %c0_i32_1 = arith.constant 0 : i32
    return %c0_i32, %c0_i32_0 : i32, i32
  }
  func.func @transform_10(%arg0: i32) -> (i32, i32) {
    %c0_i32 = arith.constant 0 : i32
    %c0_i32_0 = arith.constant 0 : i32
    %c0_i32_1 = arith.constant 0 : i32
    return %c0_i32, %c0_i32_0 : i32, i32
  }
  func.func @transform_11(%arg0: i32) -> (i32, i32) {
    %c0_i32 = arith.constant 0 : i32
    %c0_i32_0 = arith.constant 0 : i32
    %c0_i32_1 = arith.constant 0 : i32
    return %c0_i32, %c0_i32_0 : i32, i32
  }
  func.func @transform_12(%arg0: i32) -> (i32, i32) {
    %c0_i32 = arith.constant 0 : i32
    %c0_i32_0 = arith.constant 0 : i32
    %c0_i32_1 = arith.constant 0 : i32
    return %c0_i32, %c0_i32_0 : i32, i32
  }
  func.func @transform_13(%arg0: i32) -> (i32, i32, i32) {
    %c0_i32 = arith.constant 0 : i32
    %c0_i32_0 = arith.constant 0 : i32
    %c0_i32_1 = arith.constant 0 : i32
    return %c0_i32, %arg0, %c0_i32_0 : i32, i32, i32
  }
}

</mosaic_0001>

<bundles_post_ra>
// kernel: lsmgru_forward_pallas.1
= control target key start
LH: loop header
LB: loop body
LE: loop exit
PB: predicated region body
PF: predicated region fallthrough
CT: control target
= control target key end

     0   :  { %vm131_vm0 = vcmask 1043456   ;;  %v17009_v1 = vmov 0.0   ;;  %vm82_vm1 = vcmask 31744   ;;  %v17011_v49 = vmov 0.0|0.0   ;;  %s16995_s1 = inlined_call_operand.vmem [shape: f32[4,384], index: 1, kind: input, shape index: {}]   ;;  %s16996_s0 = inlined_call_operand.vmem [shape: f32[16,8,4], index: 0, kind: input, shape index: {}]   ;;  %s16997_s2 = inlined_call_operand.vmem [shape: f32[128,384], index: 2, kind: input, shape index: {}]   ;;  %s16998_s3 = inlined_call_operand.vmem [shape: f32[1,384], index: 3, kind: input, shape index: {}]   ;;  %s16999_s4 = inlined_call_operand.vmem [shape: f32[1,384], index: 4, kind: input, shape index: {}]   ;;  %s17000_s5 = inlined_call_operand.vmem [shape: f32[128,384], index: 5, kind: input, shape index: {}]   ;;  %s17001_s6 = inlined_call_operand.vmem [shape: f32[128,384], index: 6, kind: input, shape index: {}]   ;;  %s17002_s8 = inlined_call_operand.vmem [shape: f32[1,384], index: 8, kind: input, shape index: {}]   ;;  %s17003_s7 = inlined_call_operand.vmem [shape: f32[1,384], index: 7, kind: input, shape index: {}]   ;;  %s17004_s9 = inlined_call_operand.vmem [shape: f32[128,128], index: 9, kind: input, shape index: {}]   ;;  %s17005_s11 = inlined_call_operand.vmem [shape: f32[128,128], index: 11, kind: input, shape index: {}]   ;;  %s17006_s10 = inlined_call_operand.vmem [shape: f32[1,128], index: 10, kind: input, shape index: {}]   ;;  %s17007_s12 = inlined_call_operand.vmem [shape: f32[1,128], index: 12, kind: input, shape index: {}]   ;;  %s17008_s13 = inlined_call_operand.vmem [shape: f32[16,8,128], index: 13, kind: output, shape index: {}]  }
   0x1   :  { %v60_v0 = vld [vmem:[%s16995_s1] sm:$0xff]  ;;  %202 = vmatprep.mubr.f32.mxu0 %v17009_v1  ;;  %v493_v3 = vld [vmem:[%s16997_s2 + $0x8] sm:$0xff]  ;;  %v495_v7 = vld [vmem:[%s16997_s2 + $0x18] sm:$0xff]  ;;  %vm13217_vm2 = vmmov 0  }
   0x2   :  { %v44_v2 = vld [vmem:[%s16996_s0] sm:$0xff]  ;;  %v81_v4 = vcombine.high %v60_v0, %v60_v0  ;;  %v499_v10 = vld [vmem:[%s16997_s2 + $0x38] sm:$0xff]  ;;  %v502_v11 = vld [vmem:[%s16997_s2 + $0x50] sm:$0xff] }
   0x3   :  { %v496_v5 = vld [vmem:[%s16997_s2 + $0x20] sm:$0xff]  ;;  %9467 = vmatprep.mubr.msk.f32.mxu1 %vm82_vm1, %v44_v2  ;;  %v498_v12 = vld [vmem:[%s16997_s2 + $0x30] sm:$0xff]  ;;  %v501_v13 = vld [vmem:[%s16997_s2 + $0x48] sm:$0xff]  ;;  %v13326_v14 = vpack.c.bf16 %v502_v11, %v499_v10 }
   0x4   :  { %v492_v6 = vld [vmem:[%s16997_s2] sm:$0xff]  ;;  %v13308_v8 = vpack.c.bf16 %v496_v5, %v493_v3  ;;  %8707 = vmatprep.subr.msk.mxu0 %vm131_vm0, %v81_v4  ;;  %v505_v15 = vld [vmem:[%s16997_s2 + $0x68] sm:$0xff]  ;;  %v13341_v18 = vpack.c.bf16 %v501_v13, %v498_v12  ;;  %v507_v21 = vld [vmem:[%s16997_s2 + $0x78] sm:$0xff] }
   0x5   :  { %v13310_v9 = vpack.c.bf16 %v495_v7, %v492_v6  ;;  %8708 = vmatpush1.msk.msra.mxu0 %vm131_vm0, %v60_v0  ;;  %v508_v16 = vld [vmem:[%s16997_s2 + $0x80] sm:$0xff]  ;;  %v45_v17 = vld [vmem:[%s16996_s0 + $0x8] sm:$0xff]  ;;  %v511_v22 = vld [vmem:[%s16997_s2 + $0x98] sm:$0xff] }
   0x6   :  { %8709 = vmatmul.mubr.msk.f32.vlgmr.msra.gmra.mrb[0].mxu0 %vm82_vm1, %v44_v2  ;;  %10780 = vmatprep.subr.bf16.mxu0 %v13308_v8  ;;  %v13344_v19 = vpack.c.bf16 %v508_v16, %v505_v15  ;;  %v504_v20 = vld [vmem:[%s16997_s2 + $0x60] sm:$0xff]  ;;  %v514_v23 = vld [vmem:[%s16997_s2 + $0xb0] sm:$0xff]  ;;  %v513_v28 = vld [vmem:[%s16997_s2 + $0xa8] sm:$0xff] }
   0x7   :  { %10782 = vmatpush1.bf16.msra.mxu0 %v13310_v9  ;;  %208 = vmatprep.mubr.f32.mxu0 %v17009_v1  ;;  %v46_v24 = vld [vmem:[%s16996_s0 + $0x10] sm:$0xff]  ;;  %v13364_v25 = vpack.c.bf16 %v507_v21, %v504_v20  ;;  %v13367_v26 = vpack.c.bf16 %v514_v23, %v511_v22  ;;  %v517_v29 = vld [vmem:[%s16997_s2 + $0xc8] sm:$0xff]  ;;  %v520_v30 = vld [vmem:[%s16997_s2 + $0xe0] sm:$0xff] }
   0x8   :  { %10784 = vmatprep.subr.bf16.mxu0 %v13326_v14  ;;  %v510_v27 = vld [vmem:[%s16997_s2 + $0x90] sm:$0xff]  ;;  %v47_v31 = vld [vmem:[%s16996_s0 + $0x18] sm:$0xff]  ;;  %v61_v33 = vld [vmem:[%s16995_s1 + $0x8] sm:$0xf]  ;;  %v13393_v34 = vpack.c.bf16 %v520_v30, %v517_v29 }
   0x9   :  { %v13387_v32 = vpack.c.bf16 %v513_v28, %v510_v27  ;;  %v516_v35 = vld [vmem:[%s16997_s2 + $0xc0] sm:$0xff]  ;;  %v519_v36 = vld [vmem:[%s16997_s2 + $0xd8] sm:$0xff]  ;;  %9465 = vmatprep.subr.msk.mxu1 %vm131_vm0, %v61_v33  ;;  %v526_v38 = vld [vmem:[%s16997_s2 + $0x110] sm:$0xff] }
   0xa   :  { %8710 = vmatmul.mubr.msk.f32.gmra.mrb[2].mxu0 %vm82_vm1, %v45_v17  ;;  %v523_v37 = vld [vmem:[%s16997_s2 + $0xf8] sm:$0xff]  ;;  %9466 = vmatpush3.msk.msra.mxu1 %vm131_vm0, %v61_v33  ;;  %v494_v39 = vld [vmem:[%s16997_s2 + $0x10] sm:$0xff]  ;;  %v497_v40 = vld [vmem:[%s16997_s2 + $0x28] sm:$0xff]  ;;  %v13430_v45 = vpack.c.bf16 %v519_v36, %v516_v35 }
   0xb   :  { %214 = vmatprep.mubr.f32.mxu0 %v17009_v1  ;;  %10786 = vmatpush1.bf16.msra.mxu0 %v13341_v18  ;;  %v13417_v41 = vpack.c.bf16 %v497_v40, %v494_v39  ;;  %v500_v42 = vld [vmem:[%s16997_s2 + $0x40] sm:$0xff]  ;;  %v503_v43 = vld [vmem:[%s16997_s2 + $0x58] sm:$0xff]  ;;  %v13433_v46 = vpack.c.bf16 %v526_v38, %v523_v37  ;;  %v522_v47 = vld [vmem:[%s16997_s2 + $0xf0] sm:$0xff]  ;;  %v64_v39 = vlaneseq }
   0xc   :  { %10788 = vmatprep.subr.bf16.mxu0 %v13344_v19  ;;  %9468 = vmatmul.mubr.msk.f32.vlgmr.msra.gmra.mrb[0].mxu1 %vm82_vm1, %v45_v17  ;;  %v48_v44 = vld [vmem:[%s16996_s0 + $0x20] sm:$0xff]  ;;  %v525_v48 = vld [vmem:[%s16997_s2 + $0x108] sm:$0xff]  ;;  %v13450_v52 = vpack.c.bf16 %v503_v43, %v500_v42  ;;  %v506_v53 = vld [vmem:[%s16997_s2 + $0x70] sm:$0xff] }
   0xd   :  { %10811 = vmatprep.subr.bf16.mxu1 %v17011_v49  ;;  %v529_v50 = vld [vmem:[%s16997_s2 + $0x128] sm:$0xff]  ;;  %v532_v51 = vld [vmem:[%s16997_s2 + $0x140] sm:$0xff]  ;;  %9470 = vmatprep.mubr.msk.f32.mxu1 %vm82_vm1, %v46_v24  ;;  %v13465_v56 = vpack.c.bf16 %v525_v48, %v522_v47  ;;  %v531_v59 = vld [vmem:[%s16997_s2 + $0x138] sm:$0xff]  ;;  %v65_v40 = vshrl.u32 %v64_v39, 7 }
   0xe   :  { %8711 = vmatmul.mubr.msk.f32.gmra.mrb[4].mxu0 %vm82_vm1, %v46_v24  ;;  %10813 = vmatpush3.bf16.msra.mxu1 %v13417_v41  ;;  %v509_v54 = vld [vmem:[%s16997_s2 + $0x88] sm:$0xff]  ;;  %v13468_v57 = vpack.c.bf16 %v532_v51, %v529_v50  ;;  %v528_v58 = vld [vmem:[%s16997_s2 + $0x120] sm:$0xff]  ;;  %v535_v60 = vld [vmem:[%s16997_s2 + $0x158] sm:$0xff] }
   0xf   :  { %220 = vmatprep.mubr.f32.mxu0 %v17009_v1  ;;  %10790 = vmatpush1.bf16.msra.mxu0 %v13364_v25  ;;  %v49_v55 = vld [vmem:[%s16996_s0 + $0x28] sm:$0xff]  ;;  %v538_v61 = vld [vmem:[%s16997_s2 + $0x170] sm:$0xff]  ;;  %v13485_v62 = vpack.c.bf16 %v509_v54, %v506_v53  ;;  %v512_v63 = vld [vmem:[%s16997_s2 + $0xa0] sm:$0xff]  ;;  %v13500_v3 = vpack.c.bf16 %v531_v59, %v528_v58  ;;  %v13660_v42 = vsub.s32 2, %v65_v40 }
  0x10   :  { %10792 = vmatprep.subr.bf16.mxu0 %v13367_v26  ;;  %9471 = vmatmul.mubr.msk.f32.gmra.mrb[2].mxu1 %vm82_vm1, %v47_v31  ;;  %v515_v0 = vld [vmem:[%s16997_s2 + $0xb8] sm:$0xff]  ;;  %v50_v2 = vld [vmem:[%s16996_s0 + $0x30] sm:$0xff]  ;;  %v13503_v4 = vpack.c.bf16 %v538_v61, %v535_v60  ;;  %v537_v6 = vld [vmem:[%s16997_s2 + $0x168] sm:$0xff] }
  0x11   :  { %10814 = vmatprep.subr.bf16.mxu1 %v17011_v49  ;;  %9473 = vmatprep.mubr.msk.f32.mxu1 %vm82_vm1, %v48_v44  ;;  %v534_v5 = vld [vmem:[%s16997_s2 + $0x150] sm:$0xff]  ;;  %v51_v7 = vld [vmem:[%s16996_s0 + $0x38] sm:$0xff]  ;;  %v13517_v10 = vpack.c.bf16 %v515_v0, %v512_v63  ;;  %v521_v12 = vld [vmem:[%s16997_s2 + $0xe8] sm:$0xff] }
  0x12   :  { %8712 = vmatmul.mubr.msk.f32.gmra.mrb[6].mxu0 %vm82_vm1, %v47_v31  ;;  %10816 = vmatpush3.bf16.msra.mxu1 %v13450_v52  ;;  %v518_v11 = vld [vmem:[%s16997_s2 + $0xd0] sm:$0xff]  ;;  %v13529_v13 = vpack.c.bf16 %v537_v6, %v534_v5  ;;  %v52_v15 = vld [vmem:[%s16996_s0 + $0x40] sm:$0xff]  ;;  %v53_v16 = vld [vmem:[%s16996_s0 + $0x48] sm:$0xff] }
  0x13   :  { %226 = vmatprep.mubr.f32.mxu0 %v17009_v1  ;;  %10794 = vmatpush1.bf16.msra.mxu0 %v13387_v32  ;;  %v13541_v17 = vpack.c.bf16 %v521_v12, %v518_v11  ;;  %v524_v20 = vld [vmem:[%s16997_s2 + $0x100] sm:$0xff]  ;;  %v527_v21 = vld [vmem:[%s16997_s2 + $0x118] sm:$0xff]  ;;  %v54_v22 = vld [vmem:[%s16996_s0 + $0x50] sm:$0xff] }
  0x14   :  { %10796 = vmatprep.subr.bf16.mxu0 %v13393_v34  ;;  %9474 = vmatmul.mubr.msk.f32.gmra.mrb[4].mxu1 %vm82_vm1, %v49_v55  ;;  %v55_v23 = vld [vmem:[%s16996_s0 + $0x58] sm:$0xff]  ;;  %v13562_v24 = vpack.c.bf16 %v527_v21, %v524_v20  ;;  %v530_v27 = vld [vmem:[%s16997_s2 + $0x130] sm:$0xff]  ;;  %v533_v28 = vld [vmem:[%s16997_s2 + $0x148] sm:$0xff] }
  0x15   :  { %10817 = vmatprep.subr.bf16.mxu1 %v17011_v49  ;;  %9476 = vmatprep.mubr.msk.f32.mxu1 %vm82_vm1, %v50_v2  ;;  %v56_v29 = vld [vmem:[%s16996_s0 + $0x60] sm:$0xff]  ;;  %v57_v30 = vld [vmem:[%s16996_s0 + $0x68] sm:$0xff]  ;;  %v13583_v31 = vpack.c.bf16 %v533_v28, %v530_v27  ;;  %v539_v35 = vld [vmem:[%s16997_s2 + $0x178] sm:$0xff] }
  0x16   :  { %8713 = vmatmul.mubr.msk.f32.gmra.mrb[8].mxu0 %vm82_vm1, %v48_v44  ;;  %10819 = vmatpush3.bf16.msra.mxu1 %v13485_v62  ;;  %v536_v33 = vld [vmem:[%s16997_s2 + $0x160] sm:$0xff]  ;;  %v58_v36 = vld [vmem:[%s16996_s0 + $0x70] sm:$0xff]  ;;  %v59_v37 = vld [vmem:[%s16996_s0 + $0x78] sm:$0xff] }
  0x17   :  { %232 = vmatprep.mubr.f32.mxu0 %v17009_v1  ;;  %10798 = vmatpush1.bf16.msra.mxu0 %v13430_v45  ;;  %v13603_v38 = vpack.c.bf16 %v539_v35, %v536_v33  ;;  %v62_v43 = vld [vmem:[%s16998_s3] sm:$0x7] }
  0x18   :  { %10800 = vmatprep.subr.bf16.mxu0 %v13433_v46  ;;  %9477 = vmatmul.mubr.msk.f32.gmra.mrb[6].mxu1 %vm82_vm1, %v51_v7  ;;  %v75_v44 = vrot.slane %v62_v43, %v13660_v42  ;;  %v540_v39 = vld [vmem:[%s16999_s4] sm:$0x7] }
  0x19   :  { %10820 = vmatprep.subr.bf16.mxu1 %v17011_v49  ;;  %9479 = vmatprep.mubr.msk.f32.mxu1 %vm82_vm1, %v52_v15 }
  0x1a   :  { %8714 = vmatmul.mubr.msk.f32.gmra.mrb[10].mxu0 %vm82_vm1, %v49_v55  ;;  %10822 = vmatpush3.bf16.msra.mxu1 %v13517_v10 }
  0x1b   :  { %238 = vmatprep.mubr.f32.mxu0 %v17009_v1  ;;  %10802 = vmatpush1.bf16.msra.mxu0 %v13465_v56 }
  0x1c   :  { %10804 = vmatprep.subr.bf16.mxu0 %v13468_v57  ;;  %9480 = vmatmul.mubr.msk.f32.gmra.mrb[8].mxu1 %vm82_vm1, %v53_v16 }
  0x1d   :  { %10823 = vmatprep.subr.bf16.mxu1 %v17011_v49  ;;  %9482 = vmatprep.mubr.msk.f32.mxu1 %vm82_vm1, %v54_v22 }
  0x1e   :  { %8715 = vmatmul.mubr.msk.f32.gmra.mrb[12].mxu0 %vm82_vm1, %v50_v2  ;;  %10825 = vmatpush3.bf16.msra.mxu1 %v13541_v17 }
  0x1f   :  { %244 = vmatprep.mubr.f32.mxu0 %v17009_v1  ;;  %10806 = vmatpush1.bf16.msra.mxu0 %v13500_v3 }
  0x20   :  { %10808 = vmatprep.subr.bf16.mxu0 %v13503_v4  ;;  %9483 = vmatmul.mubr.msk.f32.gmra.mrb[10].mxu1 %vm82_vm1, %v55_v23 }
  0x21   :  { %10826 = vmatprep.subr.bf16.mxu1 %v17011_v49  ;;  %9485 = vmatprep.mubr.msk.f32.mxu1 %vm82_vm1, %v56_v29 }
  0x22   :  { %8716 = vmatmul.mubr.msk.f32.gmra.mrb[14].mxu0 %vm82_vm1, %v51_v7  ;;  %10828 = vmatpush3.bf16.msra.mxu1 %v13562_v24 }
  0x23   :  { %250 = vmatprep.mubr.f32.mxu0 %v17009_v1  ;;  %10810 = vmatpush1.bf16.msra.mxu0 %v13529_v13 }
  0x24   :  { %10836 = vmatprep.subr.bf16.mxu0 %v13308_v8  ;;  %9486 = vmatmul.mubr.msk.f32.gmra.mrb[12].mxu1 %vm82_vm1, %v57_v30 }
  0x25   :  { %10829 = vmatprep.subr.bf16.mxu1 %v17011_v49  ;;  %9488 = vmatprep.mubr.msk.f32.mxu1 %vm82_vm1, %v58_v36 }
  0x26   :  { %8717 = vmatmul.mubr.msk.f32.gmra.mrb[16].mxu0 %vm82_vm1, %v52_v15  ;;  %10831 = vmatpush3.bf16.msra.mxu1 %v13583_v31 }
  0x27   :  { %256 = vmatprep.mubr.f32.mxu0 %v17009_v1  ;;  %10832 = vmatprep.subr.bf16.mxu1 %v17011_v49 }
  0x28   :  { %9489 = vmatmul.mubr.msk.f32.gmra.mrb[14].mxu1 %vm82_vm1, %v59_v37 }
  0x29   :  { %9523 = vmatprep.mubr.msk.f32.mxu1 %vm13217_vm2, %v17009_v1 }
  0x2a   :  { %8718 = vmatmul.mubr.msk.f32.gmra.mrb[18].mxu0 %vm82_vm1, %v53_v16  ;;  %10834 = vmatpush3.bf16.msra.mxu1 %v13603_v38 }
  0x2b   :  { %262 = vmatprep.mubr.f32.mxu0 %v17009_v1  ;;  %10867 = vmatprep.subr.bf16.mxu1 %v17011_v49 }
  0x2d   :  { %9524 = vmatmul.mubr.f32.vlgmr.msra.gmra.mrb[16].mxu1 %v17009_v1 }
  0x2e   :  { %8719 = vmatmul.mubr.msk.f32.gmra.mrb[20].mxu0 %vm82_vm1, %v54_v22  ;;  %10869 = vmatpush3.bf16.msra.mxu1 %v13417_v41 }
  0x2f   :  { %268 = vmatprep.mubr.f32.mxu0 %v17009_v1  ;;  %9558 = vmatprep.mubr.msk.f32.mxu1 %vm13217_vm2, %v17009_v1 }
  0x30   :  { %10870 = vmatprep.subr.bf16.mxu1 %v17011_v49 }
  0x32   :  { %8720 = vmatmul.mubr.msk.f32.gmra.mrb[22].mxu0 %vm82_vm1, %v55_v23  ;;  %10872 = vmatpush3.bf16.msra.mxu1 %v13450_v52 }
  0x33   :  { %274 = vmatprep.mubr.f32.mxu0 %v17009_v1  ;;  %10873 = vmatprep.subr.bf16.mxu1 %v17011_v49 }
  0x36   :  { %8721 = vmatmul.mubr.msk.f32.gmra.mrb[24].mxu0 %vm82_vm1, %v56_v29  ;;  %10875 = vmatpush3.bf16.msra.mxu1 %v13485_v62 }
  0x37   :  { %280 = vmatprep.mubr.f32.mxu0 %v17009_v1  ;;  %10876 = vmatprep.subr.bf16.mxu1 %v17011_v49 }
  0x3a   :  { %8722 = vmatmul.mubr.msk.f32.gmra.mrb[26].mxu0 %vm82_vm1, %v57_v30  ;;  %10878 = vmatpush3.bf16.msra.mxu1 %v13517_v10 }
  0x3b   :  { %286 = vmatprep.mubr.f32.mxu0 %v17009_v1  ;;  %10879 = vmatprep.subr.bf16.mxu1 %v17011_v49 }
  0x3e   :  { %8723 = vmatmul.mubr.msk.f32.gmra.mrb[28].mxu0 %vm82_vm1, %v58_v36  ;;  %10881 = vmatpush3.bf16.msra.mxu1 %v13541_v17 }
  0x3f   :  { %292 = vmatprep.mubr.f32.mxu0 %v17009_v1  ;;  %10882 = vmatprep.subr.bf16.mxu1 %v17011_v49 }
  0x42   :  { %8724 = vmatmul.mubr.msk.f32.gmra.mrb[30].mxu0 %vm82_vm1, %v59_v37  ;;  %10884 = vmatpush3.bf16.msra.mxu1 %v13562_v24  ;;  %v13696_v37 = vsub.s32 0, %v65_v40 }
  0x43   :  { %621 = vmatprep.mubr.f32.mxu0 %v17009_v1  ;;  %10885 = vmatprep.subr.bf16.mxu1 %v17011_v49 }
  0x46   :  { %622 = vmatmul.mubr.f32.vlgmr.msra.gmra.mrb[0].mxu0 %v17009_v1  ;;  %10887 = vmatpush3.bf16.msra.mxu1 %v13583_v31 }
  0x47   :  { %10838 = vmatpush1.bf16.msra.mxu0 %v13310_v9  ;;  %852 = vmatprep.mubr.f32.mxu0 %v17009_v1 }
  0x48   :  { %10840 = vmatprep.subr.bf16.mxu0 %v13326_v14  ;;  %10888 = vmatprep.subr.bf16.mxu1 %v17011_v49 }
  0x4a   :  { %10890 = vmatpush3.bf16.msra.mxu1 %v13603_v38 }
  0x4b   :  { %10842 = vmatpush1.bf16.msra.mxu0 %v13341_v18  ;;  %10923 = vmatprep.subr.bf16.mxu1 %v17011_v49 }
  0x4c   :  { %10844 = vmatprep.subr.bf16.mxu0 %v13344_v19 }
  0x4f   :  { %10846 = vmatpush1.bf16.msra.mxu0 %v13364_v25 }
  0x50   :  { %10848 = vmatprep.subr.bf16.mxu0 %v13367_v26 }
  0x53   :  { %10850 = vmatpush1.bf16.msra.mxu0 %v13387_v32 }
  0x54   :  { %10852 = vmatprep.subr.bf16.mxu0 %v13393_v34 }
  0x57   :  { %10854 = vmatpush1.bf16.msra.mxu0 %v13430_v45 }
  0x58   :  { %10856 = vmatprep.subr.bf16.mxu0 %v13433_v46 }
  0x5b   :  { %10858 = vmatpush1.bf16.msra.mxu0 %v13465_v56 }
  0x5c   :  { %10860 = vmatprep.subr.bf16.mxu0 %v13468_v57 }
  0x5f   :  { %10862 = vmatpush1.bf16.msra.mxu0 %v13500_v3 }
  0x60   :  { %10864 = vmatprep.subr.bf16.mxu0 %v13503_v4 }
  0x63   :  { %10866 = vmatpush1.bf16.msra.mxu0 %v13529_v13 }
  0x64   :  { %10892 = vmatprep.subr.bf16.mxu0 %v13308_v8 }
  0xdf   :  { %v9469_v47 = vpop.f32.mrb[0].mxu1 }
  0xe0   :  { %v13666_v48 = vadd.f32 %v9469_v47, %v75_v44  ;;  %v365_v50 = vpop.f32.mrb[1].mxu1  ;;  %v13701_v47 = vsub.s32 1, %v65_v40 }
  0xe3   :  { %v9472_v51 = vpop.f32.mrb[2].mxu1 }
  0xe4   :  { %v13668_v53 = vadd.f32 %v9472_v51, %v75_v44  ;;  %v375_v54 = vpop.f32.mrb[3].mxu1  ;;  %v13704_v51 = vrot.slane %v62_v43, %v13696_v37 }
  0xe5   :  { %v13670_v55 = vadd.f32 %v375_v54, %v75_v44  ;;  %v545_v54 = vrot.slane %v540_v39, %v13696_v37 }
  0xe7   :  { %v9475_v8 = vpop.f32.mrb[4].mxu1 }
  0xe8   :  { %v13672_v58 = vadd.f32 %v9475_v8, %v75_v44  ;;  %v385_v59 = vpop.f32.mrb[5].mxu1  ;;  %v13708_v8 = vrot.slane %v62_v43, %v13701_v47  ;;  %v553_v43 = vrot.slane %v540_v39, %v13660_v42 }
  0xe9   :  { %v13674_v60 = vadd.f32 %v385_v59, %v75_v44  ;;  %v549_v59 = vrot.slane %v540_v39, %v13701_v47 }
  0xeb   :  { %v9478_v61 = vpop.f32.mrb[6].mxu1 }
  0xec   :  { %v13676_v63 = vadd.f32 %v9478_v61, %v75_v44  ;;  %v395_v0 = vpop.f32.mrb[7].mxu1  ;;  %v12699_v61 = vadd.f32 %v545_v54, %v13704_v51  ;;  %v366_v54 = vadd.f32 %v365_v50, %v75_v44 }
  0xed   :  { %v13678_v2 = vadd.f32 %v395_v0, %v75_v44 }
  0xef   :  { %v9481_v5 = vpop.f32.mrb[8].mxu1 }
  0xf0   :  { %v13680_v6 = vadd.f32 %v9481_v5, %v75_v44  ;;  %v405_v7 = vpop.f32.mrb[9].mxu1  ;;  %v12701_v5 = vadd.f32 %v549_v59, %v13708_v8 }
  0xf1   :  { %v13682_v11 = vadd.f32 %v405_v7, %v75_v44 }
  0xf3   :  { %v9484_v12 = vpop.f32.mrb[10].mxu1 }
  0xf4   :  { %v13684_v15 = vadd.f32 %v9484_v12, %v75_v44  ;;  %v415_v16 = vpop.f32.mrb[11].mxu1 }
  0xf5   :  { %v13686_v20 = vadd.f32 %v415_v16, %v75_v44 }
  0xf7   :  { %v9487_v21 = vpop.f32.mrb[12].mxu1 }
  0xf8   :  { %v13688_v22 = vadd.f32 %v9487_v21, %v75_v44  ;;  %v425_v23 = vpop.f32.mrb[13].mxu1 }
  0xf9   :  { %v13690_v27 = vadd.f32 %v425_v23, %v75_v44 }
  0xfb   :  { %v9490_v28 = vpop.f32.mrb[14].mxu1 }
  0xfc   :  { %v13692_v29 = vadd.f32 %v9490_v28, %v75_v44  ;;  %v435_v30 = vpop.f32.mrb[15].mxu1 }
  0xfd   :  { %v13694_v33 = vadd.f32 %v435_v30, %v75_v44 }
  0xfe   :  { %17017 = vst [vmem:[#allocation4_spill] sm:$0xff] %v13692_v29 }
 0x100   :  { %v694_v35 = vpop.f32.mrb[16].mxu1 }
 0x101   :  { %v9525_v36 = vpop.f32.mrb[17].mxu1  ;;  %v695_v1 = vadd.f32 %v694_v35, %v553_v43 }
 0x119   :  { %v623_v0 = vpop.f32.mrb[0].mxu0 }
 0x11a   :  { %v12700_v7 = vadd.f32 %v12699_v61, %v623_v0  ;;  %v625_v12 = vpop.f32.mrb[1].mxu0 }
 0x11b   :  { %v12702_v40 = vadd.f32 %v12701_v5, %v625_v12 }
 0x11c   :  { %v8742_v16 = vmul.f32 -1.442695, %v12700_v7 }
 0x11d   :  { %v8743_v21 = vmul.f32 -1.442695, %v12702_v40 }
 0x11e   :  { %12895 = vpow2.f32 %v8742_v16 }
 0x11f   :  { %12897 = vpow2.f32 %v8743_v21 }
 0x128   :  { %v12896_v23 = vpop.eup %12895 }
 0x129   :  { %v705_v28 = vadd.f32 1.0, %v12896_v23  ;;  %v12898_v30 = vpop.eup %12897 }
 0x12a   :  { %v712_v36 = vadd.f32 1.0, %v12898_v30 }
 0x12b   :  { %12899 = vrcp.f32 %v705_v28 }
 0x12c   :  { %12901 = vrcp.f32 %v712_v36 }
 0x135   :  { %v12900_v49 = vpop.eup %12899 }
 0x136   :  { %v715_v29 = vmul.f32 %v12900_v49, %v695_v1  ;;  %v12902_v61 = vpop.eup %12901  ;;  %v17019_v1 = vmov 0.0|0.0   ;;  %v17020_v49 = vmov 0.0  }
 0x137   :  { %v718_v0 = vsub.f32 1.0, %v12902_v61  ;;  %v720_v12 = vmul.f32 0.0, %v12902_v61 }
 0x138   :  { %v716_v59 = vadd.f32 %v715_v29, %v366_v54 }
 0x13a   :  { %12903 = vtanh.f32 %v716_v59 }
 0x144   :  { %v12904_v5 = vpop.eup %12903 }
 0x145   :  { %v719_v7 = vmul.f32 %v12904_v5, %v718_v0 }
 0x147   :  { %v13714_v16 = vadd.f32 %v720_v12, %v719_v7 }
 0x149   :  { %17018 = vst [vmem:[#allocation5_spill] sm:$0xff] %v13714_v16  ;;  %853 = vmatmul.mubr.f32.vlgmr.msra.gmra.mrb[2].mxu0 %v13714_v16  ;;  %9559 = vmatmul.mubr.f32.vlgmr.msra.gmra.mrb[18].mxu1 %v13714_v16 }
 0x14a   :  { %10894 = vmatpush1.bf16.msra.mxu0 %v13310_v9  ;;  %10925 = vmatpush3.bf16.msra.mxu1 %v13417_v41  ;;  %v771_v9 = vld [vmem:[%s16999_s4] sm:$0x7] }
 0x14b   :  { %10896 = vmatprep.subr.bf16.mxu0 %v13326_v14  ;;  %10926 = vmatprep.subr.bf16.mxu1 %v17019_v1  ;;  %v776_v14 = vrot.slane %v771_v9, %v13696_v37  ;;  %v784_v54 = vrot.slane %v771_v9, %v13660_v42 }
 0x14c   :  { %1083 = vmatprep.mubr.f32.mxu0 %v17020_v49  ;;  %9593 = vmatprep.mubr.msk.f32.mxu1 %vm13217_vm2, %v17020_v49 }
 0x14e   :  { %10898 = vmatpush1.bf16.msra.mxu0 %v13341_v18  ;;  %10928 = vmatpush3.bf16.msra.mxu1 %v13450_v52  ;;  %v780_v18 = vrot.slane %v771_v9, %v13701_v47  ;;  %v1191_v9 = vld [vmem:[%s16997_s2 + $0x30] sm:$0xff] }
 0x14f   :  { %10900 = vmatprep.subr.bf16.mxu0 %v13344_v19  ;;  %10929 = vmatprep.subr.bf16.mxu1 %v17019_v1 }
 0x150   :  { %v12705_v29 = vadd.f32 %v780_v18, %v13708_v8 }
 0x152   :  { %10902 = vmatpush1.bf16.msra.mxu0 %v13364_v25  ;;  %10931 = vmatpush3.bf16.msra.mxu1 %v13485_v62  ;;  %v12703_v25 = vadd.f32 %v776_v14, %v13704_v51 }
 0x153   :  { %10904 = vmatprep.subr.bf16.mxu0 %v13367_v26  ;;  %10932 = vmatprep.subr.bf16.mxu1 %v17019_v1 }
 0x156   :  { %10906 = vmatpush1.bf16.msra.mxu0 %v13387_v32  ;;  %10934 = vmatpush3.bf16.msra.mxu1 %v13517_v10 }
 0x157   :  { %10908 = vmatprep.subr.bf16.mxu0 %v13393_v34  ;;  %10935 = vmatprep.subr.bf16.mxu1 %v17019_v1 }
 0x15a   :  { %10910 = vmatpush1.bf16.msra.mxu0 %v13430_v45  ;;  %10937 = vmatpush3.bf16.msra.mxu1 %v13541_v17 }
 0x15b   :  { %10912 = vmatprep.subr.bf16.mxu0 %v13433_v46  ;;  %10938 = vmatprep.subr.bf16.mxu1 %v17019_v1 }
 0x15e   :  { %10914 = vmatpush1.bf16.msra.mxu0 %v13465_v56  ;;  %10940 = vmatpush3.bf16.msra.mxu1 %v13562_v24 }
 0x15f   :  { %10916 = vmatprep.subr.bf16.mxu0 %v13468_v57  ;;  %10941 = vmatprep.subr.bf16.mxu1 %v17019_v1 }
 0x162   :  { %10918 = vmatpush1.bf16.msra.mxu0 %v13500_v3  ;;  %10943 = vmatpush3.bf16.msra.mxu1 %v13583_v31 }
 0x163   :  { %10920 = vmatprep.subr.bf16.mxu0 %v13503_v4  ;;  %10944 = vmatprep.subr.bf16.mxu1 %v17019_v1 }
 0x166   :  { %10922 = vmatpush1.bf16.msra.mxu0 %v13529_v13  ;;  %10946 = vmatpush3.bf16.msra.mxu1 %v13603_v38 }
 0x167   :  { %10979 = vmatprep.subr.bf16.mxu1 %v17019_v1 }
 0x21c   :  { %v854_v44 = vpop.f32.mrb[2].mxu0  ;;  %v925_v50 = vpop.f32.mrb[18].mxu1 }
 0x21d   :  { %v12704_v35 = vadd.f32 %v12703_v25, %v854_v44  ;;  %v856_v39 = vpop.f32.mrb[3].mxu0  ;;  %v9560_v40 = vpop.f32.mrb[19].mxu1  ;;  %v926_v61 = vadd.f32 %v925_v50, %v784_v54  ;;  %v1194_v50 = vld [vmem:[%s16997_s2 + $0x48] sm:$0xff] }
 0x21e   :  { %v12706_v23 = vadd.f32 %v12705_v29, %v856_v39  ;;  %v1197_v39 = vld [vmem:[%s16997_s2 + $0x60] sm:$0xff]  ;;  %v1200_v40 = vld [vmem:[%s16997_s2 + $0x78] sm:$0xff] }
 0x21f   :  { %v8744_v21 = vmul.f32 -1.442695, %v12704_v35  ;;  %v13817_v35 = vpack.c.bf16 %v1194_v50, %v1191_v9  ;;  %v1429_v9 = vld [vmem:[%s16997_s2 + $0x68] sm:$0xff]  ;;  %v1432_v50 = vld [vmem:[%s16997_s2 + $0x80] sm:$0xff] }
 0x220   :  { %v8745_v28 = vmul.f32 -1.442695, %v12706_v23 }
 0x221   :  { %12905 = vpow2.f32 %v8744_v21  ;;  %v13828_v21 = vpack.c.bf16 %v1200_v40, %v1197_v39  ;;  %v13887_v39 = vpack.c.bf16 %v1432_v50, %v1429_v9  ;;  %v1430_v40 = vld [vmem:[%s16997_s2 + $0x70] sm:$0xff]  ;;  %v1452_v9 = vld [vmem:[%s16997_s2 + $0x120] sm:$0xff] }
 0x222   :  { %12907 = vpow2.f32 %v8745_v28 }
 0x22b   :  { %v12906_v43 = vpop.eup %12905 }
 0x22c   :  { %v936_v30 = vadd.f32 1.0, %v12906_v43  ;;  %v12908_v36 = vpop.eup %12907 }
 0x22d   :  { %v943_v59 = vadd.f32 1.0, %v12908_v36 }
 0x22e   :  { %12909 = vrcp.f32 %v936_v30 }
 0x22f   :  { %12911 = vrcp.f32 %v943_v59 }
 0x238   :  { %v12910_v0 = vpop.eup %12909 }
 0x239   :  { %v946_v5 = vmul.f32 %v12910_v0, %v926_v61  ;;  %v12912_v12 = vpop.eup %12911 }
 0x23a   :  { %v949_v14 = vsub.f32 1.0, %v12912_v12  ;;  %v951_v44 = vmul.f32 %v12912_v12, %v13714_v16 }
 0x23b   :  { %v947_v7 = vadd.f32 %v946_v5, %v13666_v48 }
 0x23d   :  { %12913 = vtanh.f32 %v947_v7 }
 0x247   :  { %v12914_v18 = vpop.eup %12913 }
 0x248   :  { %v950_v25 = vmul.f32 %v12914_v18, %v949_v14 }
 0x24a   :  { %v13762_v29 = vadd.f32 %v951_v44, %v950_v25 }
 0x24c   :  { %17021 = vst [vmem:[#allocation6_spill] sm:$0xff] %v13762_v29  ;;  %1084 = vmatmul.mubr.f32.vlgmr.msra.gmra.mrb[4].mxu0 %v13762_v29  ;;  %9594 = vmatmul.mubr.f32.vlgmr.msra.gmra.mrb[20].mxu1 %v13762_v29 }
 0x24d   :  { %10981 = vmatpush3.bf16.msra.mxu1 %v13417_v41  ;;  %1314 = vmatprep.mubr.f32.mxu0 %v17020_v49  ;;  %v1186_v41 = vld [vmem:[%s16997_s2 + $0x8] sm:$0xff] }
 0x24e   :  { %10982 = vmatprep.subr.bf16.mxu1 %v17019_v1  ;;  %9628 = vmatprep.mubr.msk.f32.mxu1 %vm13217_vm2, %v17020_v49 }
 0x251   :  { %10984 = vmatpush3.bf16.msra.mxu1 %v13450_v52  ;;  %v1189_v52 = vld [vmem:[%s16997_s2 + $0x20] sm:$0xff] }
 0x252   :  { %10985 = vmatprep.subr.bf16.mxu1 %v17019_v1 }
 0x255   :  { %10987 = vmatpush3.bf16.msra.mxu1 %v13485_v62  ;;  %v13791_v62 = vpack.c.bf16 %v1189_v52, %v1186_v41  ;;  %v1421_v52 = vld [vmem:[%s16997_s2 + $0x28] sm:$0xff] }
 0x256   :  { %10988 = vmatprep.subr.bf16.mxu1 %v17019_v1 }
 0x257   :  { %10948 = vmatprep.subr.bf16.mxu0 %v13791_v62 }
 0x259   :  { %10990 = vmatpush3.bf16.msra.mxu1 %v13517_v10  ;;  %v1185_v10 = vld [vmem:[%s16997_s2] sm:$0xff] }
 0x25a   :  { %10991 = vmatprep.subr.bf16.mxu1 %v17019_v1 }
 0x25d   :  { %10993 = vmatpush3.bf16.msra.mxu1 %v13541_v17  ;;  %v1188_v17 = vld [vmem:[%s16997_s2 + $0x18] sm:$0xff] }
 0x25e   :  { %10994 = vmatprep.subr.bf16.mxu1 %v17019_v1 }
 0x261   :  { %10996 = vmatpush3.bf16.msra.mxu1 %v13562_v24  ;;  %v13799_v24 = vpack.c.bf16 %v1188_v17, %v1185_v10  ;;  %v1424_v17 = vld [vmem:[%s16997_s2 + $0x40] sm:$0xff] }
 0x262   :  { %10997 = vmatprep.subr.bf16.mxu1 %v17019_v1 }
 0x263   :  { %10950 = vmatpush1.bf16.msra.mxu0 %v13799_v24 }
 0x265   :  { %10999 = vmatpush3.bf16.msra.mxu1 %v13583_v31  ;;  %v1192_v31 = vld [vmem:[%s16997_s2 + $0x38] sm:$0xff] }
 0x266   :  { %11000 = vmatprep.subr.bf16.mxu1 %v17019_v1 }
 0x269   :  { %11002 = vmatpush3.bf16.msra.mxu1 %v13603_v38  ;;  %v1195_v38 = vld [vmem:[%s16997_s2 + $0x50] sm:$0xff] }
 0x26a   :  { %11035 = vmatprep.subr.bf16.mxu1 %v17019_v1  ;;  %v13809_v48 = vpack.c.bf16 %v1195_v38, %v1192_v31  ;;  %v1427_v31 = vld [vmem:[%s16997_s2 + $0x58] sm:$0xff] }
 0x26b   :  { %v13878_v38 = vpack.c.bf16 %v1427_v31, %v1424_v17  ;;  %v1453_v17 = vld [vmem:[%s16997_s2 + $0x128] sm:$0xff]  ;;  %v1456_v31 = vld [vmem:[%s16997_s2 + $0x140] sm:$0xff] }
 0x26c   :  { %10952 = vmatprep.subr.bf16.mxu0 %v13809_v48  ;;  %v13992_v50 = vpack.c.bf16 %v1456_v31, %v1453_v17 }
 0x26d   :  { %10954 = vmatpush1.bf16.msra.mxu0 %v13817_v35 }
 0x26e   :  { %10956 = vmatprep.subr.bf16.mxu0 %v13344_v19  ;;  %v1002_v19 = vld [vmem:[%s16999_s4] sm:$0x7] }
 0x26f   :  { %v1015_v54 = vrot.slane %v1002_v19, %v13660_v42 }
 0x271   :  { %10958 = vmatpush1.bf16.msra.mxu0 %v13828_v21 }
 0x272   :  { %10960 = vmatprep.subr.bf16.mxu0 %v13367_v26  ;;  %v1007_v26 = vrot.slane %v1002_v19, %v13696_v37 }
 0x275   :  { %10962 = vmatpush1.bf16.msra.mxu0 %v13387_v32  ;;  %v1011_v32 = vrot.slane %v1002_v19, %v13701_v47  ;;  %v1433_v19 = vld [vmem:[%s16997_s2 + $0x88] sm:$0xff] }
 0x276   :  { %10964 = vmatprep.subr.bf16.mxu0 %v13393_v34  ;;  %v12707_v34 = vadd.f32 %v1007_v26, %v13704_v51  ;;  %v13896_v26 = vpack.c.bf16 %v1433_v19, %v1430_v40  ;;  %v1455_v40 = vld [vmem:[%s16997_s2 + $0x138] sm:$0xff]  ;;  %v1454_v19 = vld [vmem:[%s16997_s2 + $0x130] sm:$0xff] }
 0x279   :  { %10966 = vmatpush1.bf16.msra.mxu0 %v13430_v45 }
 0x27a   :  { %10968 = vmatprep.subr.bf16.mxu0 %v13433_v46 }
 0x27d   :  { %10970 = vmatpush1.bf16.msra.mxu0 %v13465_v56  ;;  %v12709_v56 = vadd.f32 %v1011_v32, %v13708_v8  ;;  %v1435_v32 = vld [vmem:[%s16997_s2 + $0x98] sm:$0xff] }
 0x27e   :  { %10972 = vmatprep.subr.bf16.mxu0 %v13468_v57 }
 0x281   :  { %10974 = vmatpush1.bf16.msra.mxu0 %v13500_v3 }
 0x282   :  { %10976 = vmatprep.subr.bf16.mxu0 %v13503_v4 }
 0x285   :  { %10978 = vmatpush1.bf16.msra.mxu0 %v13529_v13 }
 0x286   :  { %11004 = vmatprep.subr.bf16.mxu0 %v13791_v62 }
 0x31f   :  { %v1085_v45 = vpop.f32.mrb[4].mxu0  ;;  %v1156_v46 = vpop.f32.mrb[20].mxu1 }
 0x320   :  { %v12708_v57 = vadd.f32 %v12707_v34, %v1085_v45  ;;  %v1087_v3 = vpop.f32.mrb[5].mxu0  ;;  %v9595_v4 = vpop.f32.mrb[21].mxu1  ;;  %v1157_v61 = vadd.f32 %v1156_v46, %v1015_v54  ;;  %v1438_v34 = vld [vmem:[%s16997_s2 + $0xb0] sm:$0xff] }
 0x321   :  { %v12710_v23 = vadd.f32 %v12709_v56, %v1087_v3  ;;  %v13907_v45 = vpack.c.bf16 %v1438_v34, %v1435_v32  ;;  %v1434_v46 = vld [vmem:[%s16997_s2 + $0x90] sm:$0xff]  ;;  %v1437_v56 = vld [vmem:[%s16997_s2 + $0xa8] sm:$0xff]  ;;  %v1439_v4 = vld [vmem:[%s16997_s2 + $0xb8] sm:$0xff]  ;;  %v14004_v34 = vpack.c.bf16 %v1455_v40, %v1452_v9 }
 0x322   :  { %v8746_v13 = vmul.f32 -1.442695, %v12708_v57  ;;  %v1436_v57 = vld [vmem:[%s16997_s2 + $0xa0] sm:$0xff]  ;;  %v13919_v3 = vpack.c.bf16 %v1437_v56, %v1434_v46  ;;  %v1442_v54 = vld [vmem:[%s16997_s2 + $0xd0] sm:$0xff]  ;;  %v1457_v32 = vld [vmem:[%s16997_s2 + $0x148] sm:$0xff] }
 0x323   :  { %v8747_v28 = vmul.f32 -1.442695, %v12710_v23  ;;  %v1441_v23 = vld [vmem:[%s16997_s2 + $0xc8] sm:$0xff]  ;;  %v1459_v46 = vld [vmem:[%s16997_s2 + $0x158] sm:$0xff]  ;;  %v1462_v56 = vld [vmem:[%s16997_s2 + $0x170] sm:$0xff] }
 0x324   :  { %12915 = vpow2.f32 %v8746_v13  ;;  %v13925_v13 = vpack.c.bf16 %v1439_v4, %v1436_v57  ;;  %v14014_v57 = vpack.c.bf16 %v1457_v32, %v1454_v19  ;;  %v14016_v4 = vpack.c.bf16 %v1462_v56, %v1459_v46 }
 0x325   :  { %12917 = vpow2.f32 %v8747_v28  ;;  %v1444_v28 = vld [vmem:[%s16997_s2 + $0xe0] sm:$0xff] }
 0x32e   :  { %v12916_v43 = vpop.eup %12915 }
 0x32f   :  { %v1167_v30 = vadd.f32 1.0, %v12916_v43  ;;  %v12918_v36 = vpop.eup %12917  ;;  %v13935_v43 = vpack.c.bf16 %v1444_v28, %v1441_v23  ;;  %v1458_v23 = vld [vmem:[%s16997_s2 + $0x150] sm:$0xff]  ;;  %v1461_v28 = vld [vmem:[%s16997_s2 + $0x168] sm:$0xff] }
 0x330   :  { %v1174_v59 = vadd.f32 1.0, %v12918_v36  ;;  %v1443_v36 = vld [vmem:[%s16997_s2 + $0xd8] sm:$0xff] }
 0x331   :  { %12919 = vrcp.f32 %v1167_v30  ;;  %v1440_v30 = vld [vmem:[%s16997_s2 + $0xc0] sm:$0xff] }
 0x332   :  { %12921 = vrcp.f32 %v1174_v59  ;;  %v13947_v59 = vpack.c.bf16 %v1443_v36, %v1440_v30  ;;  %v1460_v30 = vld [vmem:[%s16997_s2 + $0x160] sm:$0xff]  ;;  %v1463_v36 = vld [vmem:[%s16997_s2 + $0x178] sm:$0xff] }
 0x33b   :  { %v12920_v0 = vpop.eup %12919 }
 0x33c   :  { %v1177_v5 = vmul.f32 %v12920_v0, %v1157_v61  ;;  %v12922_v12 = vpop.eup %12921  ;;  %v1445_v61 = vld [vmem:[%s16997_s2 + $0xe8] sm:$0xff] }
 0x33d   :  { %v1180_v14 = vsub.f32 1.0, %v12922_v12  ;;  %v1182_v44 = vmul.f32 %v12922_v12, %v13762_v29  ;;  %v13953_v0 = vpack.c.bf16 %v1445_v61, %v1442_v54  ;;  %v1446_v12 = vld [vmem:[%s16997_s2 + $0xf0] sm:$0xff]  ;;  %v14032_v54 = vpack.c.bf16 %v1461_v28, %v1458_v23 }
 0x33e   :  { %v1178_v7 = vadd.f32 %v1177_v5, %v13670_v55  ;;  %v1418_v55 = vld [vmem:[%s16997_s2 + $0x10] sm:$0xff]  ;;  %v1447_v5 = vld [vmem:[%s16997_s2 + $0xf8] sm:$0xff]  ;;  %v14036_v61 = vpack.c.bf16 %v1463_v36, %v1460_v30 }
 0x33f   :  { %v13868_v10 = vpack.c.bf16 %v1421_v52, %v1418_v55 }
 0x340   :  { %12923 = vtanh.f32 %v1178_v7  ;;  %v1450_v7 = vld [vmem:[%s16997_s2 + $0x110] sm:$0xff] }
 0x34a   :  { %v12924_v18 = vpop.eup %12923 }
 0x34b   :  { %v1181_v25 = vmul.f32 %v12924_v18, %v1180_v14  ;;  %v13966_v14 = vpack.c.bf16 %v1450_v7, %v1447_v5  ;;  %v1449_v18 = vld [vmem:[%s16997_s2 + $0x108] sm:$0xff]  ;;  %v1233_v5 = vld [vmem:[%s16999_s4] sm:$0x7] }
 0x34c   :  { %v13978_v55 = vpack.c.bf16 %v1449_v18, %v1446_v12  ;;  %v1238_v7 = vrot.slane %v1233_v5, %v13696_v37  ;;  %v1242_v12 = vrot.slane %v1233_v5, %v13701_v47  ;;  %v1246_v30 = vrot.slane %v1233_v5, %v13660_v42 }
 0x34d   :  { %v13852_v41 = vadd.f32 %v1182_v44, %v1181_v25  ;;  %v1448_v25 = vld [vmem:[%s16997_s2 + $0x100] sm:$0xff]  ;;  %v1451_v44 = vld [vmem:[%s16997_s2 + $0x118] sm:$0xff] }
 0x34e   :  { %v13980_v52 = vpack.c.bf16 %v1451_v44, %v1448_v25  ;;  %v12711_v18 = vadd.f32 %v1238_v7, %v13704_v51  ;;  %v12713_v17 = vadd.f32 %v1242_v12, %v13708_v8 }
 0x34f   :  { %1315 = vmatmul.mubr.f32.vlgmr.msra.gmra.mrb[6].mxu0 %v13852_v41  ;;  %9629 = vmatmul.mubr.f32.vlgmr.msra.gmra.mrb[22].mxu1 %v13852_v41 }
 0x350   :  { %11006 = vmatpush1.bf16.msra.mxu0 %v13799_v24  ;;  %1545 = vmatprep.mubr.f32.mxu0 %v17020_v49 }
 0x351   :  { %11008 = vmatprep.subr.bf16.mxu0 %v13809_v48  ;;  %9663 = vmatprep.mubr.msk.f32.mxu1 %vm13217_vm2, %v17020_v49 }
 0x352   :  { %11037 = vmatpush3.bf16.msra.mxu1 %v13868_v10 }
 0x353   :  { %11038 = vmatprep.subr.bf16.mxu1 %v17019_v1 }
 0x354   :  { %11010 = vmatpush1.bf16.msra.mxu0 %v13817_v35 }
 0x355   :  { %11012 = vmatprep.subr.bf16.mxu0 %v13887_v39 }
 0x356   :  { %11040 = vmatpush3.bf16.msra.mxu1 %v13878_v38 }
 0x357   :  { %11041 = vmatprep.subr.bf16.mxu1 %v17019_v1 }
 0x358   :  { %11014 = vmatpush1.bf16.msra.mxu0 %v13828_v21 }
 0x359   :  { %11016 = vmatprep.subr.bf16.mxu0 %v13907_v45 }
 0x35a   :  { %11043 = vmatpush3.bf16.msra.mxu1 %v13896_v26 }
 0x35b   :  { %11044 = vmatprep.subr.bf16.mxu1 %v17019_v1 }
 0x35c   :  { %11018 = vmatpush1.bf16.msra.mxu0 %v13919_v3 }
 0x35d   :  { %11020 = vmatprep.subr.bf16.mxu0 %v13935_v43 }
 0x35e   :  { %11046 = vmatpush3.bf16.msra.mxu1 %v13925_v13 }
 0x35f   :  { %11047 = vmatprep.subr.bf16.mxu1 %v17019_v1 }
 0x360   :  { %11022 = vmatpush1.bf16.msra.mxu0 %v13947_v59 }
 0x361   :  { %11024 = vmatprep.subr.bf16.mxu0 %v13966_v14 }
 0x362   :  { %11049 = vmatpush3.bf16.msra.mxu1 %v13953_v0 }
 0x363   :  { %11050 = vmatprep.subr.bf16.mxu1 %v17019_v1 }
 0x364   :  { %11026 = vmatpush1.bf16.msra.mxu0 %v13978_v55 }
 0x365   :  { %11028 = vmatprep.subr.bf16.mxu0 %v13992_v50 }
 0x366   :  { %11052 = vmatpush3.bf16.msra.mxu1 %v13980_v52 }
 0x367   :  { %11053 = vmatprep.subr.bf16.mxu1 %v17019_v1 }
 0x368   :  { %11030 = vmatpush1.bf16.msra.mxu0 %v14004_v34 }
 0x369   :  { %11032 = vmatprep.subr.bf16.mxu0 %v14016_v4 }
 0x36a   :  { %11055 = vmatpush3.bf16.msra.mxu1 %v14014_v57 }
 0x36b   :  { %11056 = vmatprep.subr.bf16.mxu1 %v17019_v1 }
 0x36c   :  { %11034 = vmatpush1.bf16.msra.mxu0 %v14032_v54 }
 0x36d   :  { %11060 = vmatprep.subr.bf16.mxu0 %v13791_v62 }
 0x36e   :  { %11058 = vmatpush3.bf16.msra.mxu1 %v14036_v61 }
 0x36f   :  { %11091 = vmatprep.subr.bf16.mxu1 %v17019_v1 }
 0x422   :  { %v1316_v25 = vpop.f32.mrb[6].mxu0  ;;  %v1387_v44 = vpop.f32.mrb[22].mxu1 }
 0x423   :  { %v12712_v31 = vadd.f32 %v12711_v18, %v1316_v25  ;;  %v1318_v9 = vpop.f32.mrb[7].mxu0  ;;  %v9630_v40 = vpop.f32.mrb[23].mxu1  ;;  %v1388_v7 = vadd.f32 %v1387_v44, %v1246_v30 }
 0x424   :  { %v12714_v32 = vadd.f32 %v12713_v17, %v1318_v9 }
 0x425   :  { %v8748_v19 = vmul.f32 -1.442695, %v12712_v31 }
 0x426   :  { %v8749_v46 = vmul.f32 -1.442695, %v12714_v32 }
 0x427   :  { %12925 = vpow2.f32 %v8748_v19 }
 0x428   :  { %12927 = vpow2.f32 %v8749_v46 }
 0x431   :  { %v12926_v56 = vpop.eup %12925 }
 0x432   :  { %v1398_v23 = vadd.f32 1.0, %v12926_v56  ;;  %v12928_v28 = vpop.eup %12927 }
 0x433   :  { %v1405_v36 = vadd.f32 1.0, %v12928_v28 }
 0x434   :  { %12929 = vrcp.f32 %v1398_v23 }
 0x435   :  { %12931 = vrcp.f32 %v1405_v36 }
 0x43e   :  { %v12930_v29 = vpop.eup %12929 }
 0x43f   :  { %v1408_v16 = vmul.f32 %v12930_v29, %v1388_v7  ;;  %v12932_v18 = vpop.eup %12931 }
 0x440   :  { %v1411_v25 = vsub.f32 1.0, %v12932_v18  ;;  %v1413_v9 = vmul.f32 %v12932_v18, %v13852_v41 }
 0x441   :  { %v1409_v12 = vadd.f32 %v1408_v16, %v13668_v53  ;;  %v1464_v53 = vld [vmem:[%s16999_s4] sm:$0x7] }
 0x442   :  { %v1469_v16 = vrot.slane %v1464_v53, %v13696_v37  ;;  %v1473_v29 = vrot.slane %v1464_v53, %v13701_v47  ;;  %v1477_v18 = vrot.slane %v1464_v53, %v13660_v42 }
 0x443   :  { %12933 = vtanh.f32 %v1409_v12 }
 0x444   :  { %v12715_v5 = vadd.f32 %v1469_v16, %v13704_v51  ;;  %v12717_v32 = vadd.f32 %v1473_v29, %v13708_v8 }
 0x44d   :  { %v12934_v17 = vpop.eup %12933 }
 0x44e   :  { %v1412_v31 = vmul.f32 %v12934_v17, %v1411_v25 }
 0x450   :  { %v14053_v40 = vadd.f32 %v1413_v9, %v1412_v31 }
 0x452   :  { %1546 = vmatmul.mubr.f32.vlgmr.msra.gmra.mrb[8].mxu0 %v14053_v40  ;;  %9664 = vmatmul.mubr.f32.vlgmr.msra.gmra.mrb[24].mxu1 %v14053_v40 }
 0x453   :  { %11062 = vmatpush1.bf16.msra.mxu0 %v13799_v24  ;;  %11093 = vmatpush3.bf16.msra.mxu1 %v13868_v10 }
 0x454   :  { %11064 = vmatprep.subr.bf16.mxu0 %v13809_v48  ;;  %11094 = vmatprep.subr.bf16.mxu1 %v17019_v1 }
 0x455   :  { %1776 = vmatprep.mubr.f32.mxu0 %v17020_v49  ;;  %9698 = vmatprep.mubr.msk.f32.mxu1 %vm13217_vm2, %v17020_v49 }
 0x457   :  { %11066 = vmatpush1.bf16.msra.mxu0 %v13817_v35  ;;  %11096 = vmatpush3.bf16.msra.mxu1 %v13878_v38 }
 0x458   :  { %11068 = vmatprep.subr.bf16.mxu0 %v13887_v39  ;;  %11097 = vmatprep.subr.bf16.mxu1 %v17019_v1 }
 0x45b   :  { %11070 = vmatpush1.bf16.msra.mxu0 %v13828_v21  ;;  %11099 = vmatpush3.bf16.msra.mxu1 %v13896_v26 }
 0x45c   :  { %11072 = vmatprep.subr.bf16.mxu0 %v13907_v45  ;;  %11100 = vmatprep.subr.bf16.mxu1 %v17019_v1 }
 0x45f   :  { %11074 = vmatpush1.bf16.msra.mxu0 %v13919_v3  ;;  %11102 = vmatpush3.bf16.msra.mxu1 %v13925_v13 }
 0x460   :  { %11076 = vmatprep.subr.bf16.mxu0 %v13935_v43  ;;  %11103 = vmatprep.subr.bf16.mxu1 %v17019_v1 }
 0x463   :  { %11078 = vmatpush1.bf16.msra.mxu0 %v13947_v59  ;;  %11105 = vmatpush3.bf16.msra.mxu1 %v13953_v0 }
 0x464   :  { %11080 = vmatprep.subr.bf16.mxu0 %v13966_v14  ;;  %11106 = vmatprep.subr.bf16.mxu1 %v17019_v1 }
 0x467   :  { %11082 = vmatpush1.bf16.msra.mxu0 %v13978_v55  ;;  %11108 = vmatpush3.bf16.msra.mxu1 %v13980_v52 }
 0x468   :  { %11084 = vmatprep.subr.bf16.mxu0 %v13992_v50  ;;  %11109 = vmatprep.subr.bf16.mxu1 %v17019_v1 }
 0x46b   :  { %11086 = vmatpush1.bf16.msra.mxu0 %v14004_v34  ;;  %11111 = vmatpush3.bf16.msra.mxu1 %v14014_v57 }
 0x46c   :  { %11088 = vmatprep.subr.bf16.mxu0 %v14016_v4  ;;  %11112 = vmatprep.subr.bf16.mxu1 %v17019_v1 }
 0x46f   :  { %11090 = vmatpush1.bf16.msra.mxu0 %v14032_v54  ;;  %11114 = vmatpush3.bf16.msra.mxu1 %v14036_v61 }
 0x470   :  { %11116 = vmatprep.subr.bf16.mxu0 %v13791_v62  ;;  %11147 = vmatprep.subr.bf16.mxu1 %v17019_v1 }
 0x525   :  { %v1547_v44 = vpop.f32.mrb[8].mxu0  ;;  %v1618_v19 = vpop.f32.mrb[24].mxu1 }
 0x526   :  { %v12716_v46 = vadd.f32 %v12715_v5, %v1547_v44  ;;  %v1549_v56 = vpop.f32.mrb[9].mxu0  ;;  %v9665_v23 = vpop.f32.mrb[25].mxu1  ;;  %v1619_v17 = vadd.f32 %v1618_v19, %v1477_v18 }
 0x527   :  { %v12718_v28 = vadd.f32 %v12717_v32, %v1549_v56 }
 0x528   :  { %v8750_v62 = vmul.f32 -1.442695, %v12716_v46 }
 0x529   :  { %v8751_v30 = vmul.f32 -1.442695, %v12718_v28 }
 0x52a   :  { %12935 = vpow2.f32 %v8750_v62 }
 0x52b   :  { %12937 = vpow2.f32 %v8751_v30 }
 0x534   :  { %v12936_v36 = vpop.eup %12935 }
 0x535   :  { %v1629_v7 = vadd.f32 1.0, %v12936_v36  ;;  %v12938_v12 = vpop.eup %12937 }
 0x536   :  { %v1636_v25 = vadd.f32 1.0, %v12938_v12 }
 0x537   :  { %12939 = vrcp.f32 %v1629_v7 }
 0x538   :  { %12941 = vrcp.f32 %v1636_v25 }
 0x541   :  { %v12940_v31 = vpop.eup %12939 }
 0x542   :  { %v1639_v9 = vmul.f32 %v12940_v31, %v1619_v17  ;;  %v12942_v29 = vpop.eup %12941 }
 0x543   :  { %v1642_v5 = vsub.f32 1.0, %v12942_v29  ;;  %v1644_v46 = vmul.f32 %v12942_v29, %v14053_v40 }
 0x544   :  { %v1640_v16 = vadd.f32 %v1639_v9, %v13674_v60  ;;  %v1695_v60 = vld [vmem:[%s16999_s4] sm:$0x7] }
 0x545   :  { %v1708_v17 = vrot.slane %v1695_v60, %v13660_v42 }
 0x546   :  { %12943 = vtanh.f32 %v1640_v16 }
 0x550   :  { %v12944_v44 = vpop.eup %12943 }
 0x551   :  { %v1643_v32 = vmul.f32 %v12944_v44, %v1642_v5 }
 0x553   :  { %v14102_v56 = vadd.f32 %v1644_v46, %v1643_v32 }
 0x555   :  { %1777 = vmatmul.mubr.f32.vlgmr.msra.gmra.mrb[10].mxu0 %v14102_v56  ;;  %9699 = vmatmul.mubr.f32.vlgmr.msra.gmra.mrb[26].mxu1 %v14102_v56 }
 0x556   :  { %11118 = vmatpush1.bf16.msra.mxu0 %v13799_v24  ;;  %11149 = vmatpush3.bf16.msra.mxu1 %v13868_v10  ;;  %v1700_v24 = vrot.slane %v1695_v60, %v13696_v37 }
 0x557   :  { %11120 = vmatprep.subr.bf16.mxu0 %v13809_v48  ;;  %11150 = vmatprep.subr.bf16.mxu1 %v17019_v1  ;;  %v1704_v48 = vrot.slane %v1695_v60, %v13701_v47  ;;  %v2115_v60 = vld [vmem:[%s16997_s2 + $0x30] sm:$0xff] }
 0x558   :  { %2007 = vmatprep.mubr.f32.mxu0 %v17020_v49  ;;  %9733 = vmatprep.mubr.msk.f32.mxu1 %vm13217_vm2, %v17020_v49 }
 0x559   :  { %v12721_v19 = vadd.f32 %v1704_v48, %v13708_v8 }
 0x55a   :  { %11122 = vmatpush1.bf16.msra.mxu0 %v13817_v35  ;;  %11152 = vmatpush3.bf16.msra.mxu1 %v13878_v38  ;;  %v12719_v35 = vadd.f32 %v1700_v24, %v13704_v51 }
 0x55b   :  { %11124 = vmatprep.subr.bf16.mxu0 %v13887_v39  ;;  %11153 = vmatprep.subr.bf16.mxu1 %v17019_v1 }
 0x55e   :  { %11126 = vmatpush1.bf16.msra.mxu0 %v13828_v21  ;;  %11155 = vmatpush3.bf16.msra.mxu1 %v13896_v26 }
 0x55f   :  { %11128 = vmatprep.subr.bf16.mxu0 %v13907_v45  ;;  %11156 = vmatprep.subr.bf16.mxu1 %v17019_v1 }
 0x562   :  { %11130 = vmatpush1.bf16.msra.mxu0 %v13919_v3  ;;  %11158 = vmatpush3.bf16.msra.mxu1 %v13925_v13 }
 0x563   :  { %11132 = vmatprep.subr.bf16.mxu0 %v13935_v43  ;;  %11159 = vmatprep.subr.bf16.mxu1 %v17019_v1 }
 0x566   :  { %11134 = vmatpush1.bf16.msra.mxu0 %v13947_v59  ;;  %11161 = vmatpush3.bf16.msra.mxu1 %v13953_v0 }
 0x567   :  { %11136 = vmatprep.subr.bf16.mxu0 %v13966_v14  ;;  %11162 = vmatprep.subr.bf16.mxu1 %v17019_v1 }
 0x56a   :  { %11138 = vmatpush1.bf16.msra.mxu0 %v13978_v55  ;;  %11164 = vmatpush3.bf16.msra.mxu1 %v13980_v52 }
 0x56b   :  { %11140 = vmatprep.subr.bf16.mxu0 %v13992_v50  ;;  %11165 = vmatprep.subr.bf16.mxu1 %v17019_v1 }
 0x56e   :  { %11142 = vmatpush1.bf16.msra.mxu0 %v14004_v34  ;;  %11167 = vmatpush3.bf16.msra.mxu1 %v14014_v57 }
 0x56f   :  { %11144 = vmatprep.subr.bf16.mxu0 %v14016_v4  ;;  %11168 = vmatprep.subr.bf16.mxu1 %v17019_v1 }
 0x572   :  { %11146 = vmatpush1.bf16.msra.mxu0 %v14032_v54  ;;  %11170 = vmatpush3.bf16.msra.mxu1 %v14036_v61 }
 0x573   :  { %11203 = vmatprep.subr.bf16.mxu1 %v17019_v1 }
 0x628   :  { %v1778_v21 = vpop.f32.mrb[10].mxu0  ;;  %v1849_v53 = vpop.f32.mrb[26].mxu1 }
 0x629   :  { %v12720_v23 = vadd.f32 %v12719_v35, %v1778_v21  ;;  %v1780_v62 = vpop.f32.mrb[11].mxu0  ;;  %v9700_v28 = vpop.f32.mrb[27].mxu1  ;;  %v1850_v9 = vadd.f32 %v1849_v53, %v1708_v17  ;;  %v2118_v21 = vld [vmem:[%s16997_s2 + $0x48] sm:$0xff] }
 0x62a   :  { %v12722_v36 = vadd.f32 %v12721_v19, %v1780_v62  ;;  %v14205_v53 = vpack.c.bf16 %v2118_v21, %v2115_v60  ;;  %v2121_v19 = vld [vmem:[%s16997_s2 + $0x60] sm:$0xff]  ;;  %v2354_v21 = vld [vmem:[%s16997_s2 + $0x70] sm:$0xff] }
 0x62b   :  { %v8752_v30 = vmul.f32 -1.442695, %v12720_v23  ;;  %v2124_v23 = vld [vmem:[%s16997_s2 + $0x78] sm:$0xff] }
 0x62c   :  { %v8753_v7 = vmul.f32 -1.442695, %v12722_v36  ;;  %v14216_v62 = vpack.c.bf16 %v2124_v23, %v2121_v19  ;;  %v2357_v19 = vld [vmem:[%s16997_s2 + $0x88] sm:$0xff] }
 0x62d   :  { %12945 = vpow2.f32 %v8752_v30  ;;  %v14284_v23 = vpack.c.bf16 %v2357_v19, %v2354_v21  ;;  %v2381_v21 = vld [vmem:[%s16997_s2 + $0x148] sm:$0xff] }
 0x62e   :  { %12947 = vpow2.f32 %v8753_v7 }
 0x637   :  { %v12946_v12 = vpop.eup %12945 }
 0x638   :  { %v1860_v18 = vadd.f32 1.0, %v12946_v12  ;;  %v12948_v25 = vpop.eup %12947 }
 0x639   :  { %v1867_v31 = vadd.f32 1.0, %v12948_v25 }
 0x63a   :  { %12949 = vrcp.f32 %v1860_v18 }
 0x63b   :  { %12951 = vrcp.f32 %v1867_v31 }
 0x644   :  { %v12950_v16 = vpop.eup %12949 }
 0x645   :  { %v1870_v29 = vmul.f32 %v12950_v16, %v1850_v9  ;;  %v12952_v44 = vpop.eup %12951 }
 0x646   :  { %v1873_v32 = vsub.f32 1.0, %v12952_v44  ;;  %v1875_v48 = vmul.f32 %v12952_v44, %v14102_v56 }
 0x647   :  { %v1871_v5 = vadd.f32 %v1870_v29, %v13672_v58  ;;  %v2110_v58 = vld [vmem:[%s16997_s2 + $0x8] sm:$0xff] }
 0x649   :  { %12953 = vtanh.f32 %v1871_v5 }
 0x653   :  { %v12954_v46 = vpop.eup %12953 }
 0x654   :  { %v1874_v24 = vmul.f32 %v12954_v46, %v1873_v32 }
 0x656   :  { %v14150_v35 = vadd.f32 %v1875_v48, %v1874_v24  ;;  %v2345_v48 = vld [vmem:[%s16997_s2 + $0x28] sm:$0xff] }
 0x658   :  { %2008 = vmatmul.mubr.f32.vlgmr.msra.gmra.mrb[12].mxu0 %v14150_v35  ;;  %9734 = vmatmul.mubr.f32.vlgmr.msra.gmra.mrb[28].mxu1 %v14150_v35 }
 0x659   :  { %11205 = vmatpush3.bf16.msra.mxu1 %v13868_v10  ;;  %2238 = vmatprep.mubr.f32.mxu0 %v17020_v49  ;;  %v2113_v10 = vld [vmem:[%s16997_s2 + $0x20] sm:$0xff] }
 0x65a   :  { %11206 = vmatprep.subr.bf16.mxu1 %v17019_v1  ;;  %9768 = vmatprep.mubr.msk.f32.mxu1 %vm13217_vm2, %v17020_v49 }
 0x65d   :  { %11208 = vmatpush3.bf16.msra.mxu1 %v13878_v38  ;;  %v14179_v38 = vpack.c.bf16 %v2113_v10, %v2110_v58  ;;  %v2348_v10 = vld [vmem:[%s16997_s2 + $0x40] sm:$0xff] }
 0x65e   :  { %11209 = vmatprep.subr.bf16.mxu1 %v17019_v1 }
 0x65f   :  { %11172 = vmatprep.subr.bf16.mxu0 %v14179_v38 }
 0x661   :  { %11211 = vmatpush3.bf16.msra.mxu1 %v13896_v26  ;;  %v2109_v26 = vld [vmem:[%s16997_s2] sm:$0xff] }
 0x662   :  { %11212 = vmatprep.subr.bf16.mxu1 %v17019_v1 }
 0x665   :  { %11214 = vmatpush3.bf16.msra.mxu1 %v13925_v13  ;;  %v2112_v13 = vld [vmem:[%s16997_s2 + $0x18] sm:$0xff] }
 0x666   :  { %11215 = vmatprep.subr.bf16.mxu1 %v17019_v1 }
 0x669   :  { %11217 = vmatpush3.bf16.msra.mxu1 %v13953_v0  ;;  %v14187_v0 = vpack.c.bf16 %v2112_v13, %v2109_v26  ;;  %v2351_v26 = vld [vmem:[%s16997_s2 + $0x58] sm:$0xff] }
 0x66a   :  { %11218 = vmatprep.subr.bf16.mxu1 %v17019_v1  ;;  %v14266_v13 = vpack.c.bf16 %v2351_v26, %v2348_v10  ;;  %v2376_v10 = vld [vmem:[%s16997_s2 + $0x120] sm:$0xff] }
 0x66b   :  { %11174 = vmatpush1.bf16.msra.mxu0 %v14187_v0 }
 0x66d   :  { %11220 = vmatpush3.bf16.msra.mxu1 %v13980_v52  ;;  %v2116_v52 = vld [vmem:[%s16997_s2 + $0x38] sm:$0xff] }
 0x66e   :  { %11221 = vmatprep.subr.bf16.mxu1 %v17019_v1 }
 0x671   :  { %11223 = vmatpush3.bf16.msra.mxu1 %v14014_v57  ;;  %v2119_v57 = vld [vmem:[%s16997_s2 + $0x50] sm:$0xff] }
 0x672   :  { %11224 = vmatprep.subr.bf16.mxu1 %v17019_v1 }
 0x675   :  { %11226 = vmatpush3.bf16.msra.mxu1 %v14036_v61  ;;  %v14197_v61 = vpack.c.bf16 %v2119_v57, %v2116_v52  ;;  %v2353_v52 = vld [vmem:[%s16997_s2 + $0x68] sm:$0xff]  ;;  %v2356_v57 = vld [vmem:[%s16997_s2 + $0x80] sm:$0xff] }
 0x676   :  { %11259 = vmatprep.subr.bf16.mxu1 %v17019_v1  ;;  %v14275_v60 = vpack.c.bf16 %v2356_v57, %v2353_v52  ;;  %v2379_v52 = vld [vmem:[%s16997_s2 + $0x138] sm:$0xff]  ;;  %v2378_v57 = vld [vmem:[%s16997_s2 + $0x130] sm:$0xff] }
 0x677   :  { %11176 = vmatprep.subr.bf16.mxu0 %v14197_v61  ;;  %v14392_v19 = vpack.c.bf16 %v2379_v52, %v2376_v10 }
 0x678   :  { %11178 = vmatpush1.bf16.msra.mxu0 %v14205_v53 }
 0x679   :  { %11180 = vmatprep.subr.bf16.mxu0 %v13887_v39  ;;  %v1926_v39 = vld [vmem:[%s16999_s4] sm:$0x7] }
 0x67a   :  { %v1939_v18 = vrot.slane %v1926_v39, %v13660_v42 }
 0x67c   :  { %11182 = vmatpush1.bf16.msra.mxu0 %v14216_v62 }
 0x67d   :  { %11184 = vmatprep.subr.bf16.mxu0 %v13907_v45  ;;  %v1931_v45 = vrot.slane %v1926_v39, %v13696_v37 }
 0x680   :  { %11186 = vmatpush1.bf16.msra.mxu0 %v13919_v3  ;;  %v1935_v3 = vrot.slane %v1926_v39, %v13701_v47  ;;  %v2359_v39 = vld [vmem:[%s16997_s2 + $0x98] sm:$0xff] }
 0x681   :  { %11188 = vmatprep.subr.bf16.mxu0 %v13935_v43  ;;  %v12723_v43 = vadd.f32 %v1931_v45, %v13704_v51  ;;  %v2362_v45 = vld [vmem:[%s16997_s2 + $0xb0] sm:$0xff] }
 0x684   :  { %11190 = vmatpush1.bf16.msra.mxu0 %v13947_v59 }
 0x685   :  { %11192 = vmatprep.subr.bf16.mxu0 %v13966_v14 }
 0x688   :  { %11194 = vmatpush1.bf16.msra.mxu0 %v13978_v55  ;;  %v12725_v55 = vadd.f32 %v1935_v3, %v13708_v8  ;;  %v14295_v3 = vpack.c.bf16 %v2362_v45, %v2359_v39  ;;  %v2383_v39 = vld [vmem:[%s16997_s2 + $0x158] sm:$0xff]  ;;  %v2386_v45 = vld [vmem:[%s16997_s2 + $0x170] sm:$0xff] }
 0x689   :  { %11196 = vmatprep.subr.bf16.mxu0 %v13992_v50 }
 0x68c   :  { %11198 = vmatpush1.bf16.msra.mxu0 %v14004_v34 }
 0x68d   :  { %11200 = vmatprep.subr.bf16.mxu0 %v14016_v4 }
 0x690   :  { %11202 = vmatpush1.bf16.msra.mxu0 %v14032_v54 }
 0x691   :  { %11228 = vmatprep.subr.bf16.mxu0 %v14179_v38 }
 0x72b   :  { %v2009_v59 = vpop.f32.mrb[12].mxu0  ;;  %v2080_v14 = vpop.f32.mrb[28].mxu1 }
 0x72c   :  { %v12724_v50 = vadd.f32 %v12723_v43, %v2009_v59  ;;  %v2011_v34 = vpop.f32.mrb[13].mxu0  ;;  %v9735_v4 = vpop.f32.mrb[29].mxu1  ;;  %v2081_v17 = vadd.f32 %v2080_v14, %v1939_v18  ;;  %v2358_v43 = vld [vmem:[%s16997_s2 + $0x90] sm:$0xff]  ;;  %v2361_v59 = vld [vmem:[%s16997_s2 + $0xa8] sm:$0xff]  ;;  %v2360_v14 = vld [vmem:[%s16997_s2 + $0xa0] sm:$0xff] }
 0x72d   :  { %v12726_v28 = vadd.f32 %v12725_v55, %v2011_v34  ;;  %v14307_v55 = vpack.c.bf16 %v2361_v59, %v2358_v43  ;;  %v2365_v4 = vld [vmem:[%s16997_s2 + $0xc8] sm:$0xff]  ;;  %v14402_v43 = vpack.c.bf16 %v2381_v21, %v2378_v57  ;;  %v14404_v59 = vpack.c.bf16 %v2386_v45, %v2383_v39 }
 0x72e   :  { %v8754_v54 = vmul.f32 -1.442695, %v12724_v50  ;;  %v2363_v50 = vld [vmem:[%s16997_s2 + $0xb8] sm:$0xff]  ;;  %v2369_v18 = vld [vmem:[%s16997_s2 + $0xe8] sm:$0xff] }
 0x72f   :  { %v8755_v30 = vmul.f32 -1.442695, %v12726_v28  ;;  %v14313_v34 = vpack.c.bf16 %v2363_v50, %v2360_v14  ;;  %v2382_v14 = vld [vmem:[%s16997_s2 + $0x150] sm:$0xff]  ;;  %v2385_v50 = vld [vmem:[%s16997_s2 + $0x168] sm:$0xff] }
 0x730   :  { %12955 = vpow2.f32 %v8754_v54  ;;  %v2368_v54 = vld [vmem:[%s16997_s2 + $0xe0] sm:$0xff] }
 0x731   :  { %12957 = vpow2.f32 %v8755_v30  ;;  %v14323_v28 = vpack.c.bf16 %v2368_v54, %v2365_v4  ;;  %v2364_v30 = vld [vmem:[%s16997_s2 + $0xc0] sm:$0xff]  ;;  %v2387_v54 = vld [vmem:[%s16997_s2 + $0x178] sm:$0xff] }
 0x732   :  { %v2384_v4 = vld [vmem:[%s16997_s2 + $0x160] sm:$0xff] }
 0x73a   :  { %v12956_v36 = vpop.eup %12955 }
 0x73b   :  { %v2091_v7 = vadd.f32 1.0, %v12956_v36  ;;  %v12958_v12 = vpop.eup %12957  ;;  %v2367_v36 = vld [vmem:[%s16997_s2 + $0xd8] sm:$0xff] }
 0x73c   :  { %v2098_v25 = vadd.f32 1.0, %v12958_v12  ;;  %v14335_v12 = vpack.c.bf16 %v2367_v36, %v2364_v30  ;;  %v14420_v30 = vpack.c.bf16 %v2385_v50, %v2382_v14  ;;  %v14424_v36 = vpack.c.bf16 %v2387_v54, %v2384_v4 }
 0x73d   :  { %12959 = vrcp.f32 %v2091_v7  ;;  %v2366_v7 = vld [vmem:[%s16997_s2 + $0xd0] sm:$0xff] }
 0x73e   :  { %12961 = vrcp.f32 %v2098_v25  ;;  %v14341_v25 = vpack.c.bf16 %v2369_v18, %v2366_v7  ;;  %v2157_v7 = vld [vmem:[%s16999_s4] sm:$0x7] }
 0x73f   :  { %v2162_v18 = vrot.slane %v2157_v7, %v13696_v37  ;;  %v2170_v14 = vrot.slane %v2157_v7, %v13660_v42 }
 0x747   :  { %v12960_v31 = vpop.eup %12959 }
 0x748   :  { %v2101_v9 = vmul.f32 %v12960_v31, %v2081_v17  ;;  %v12962_v29 = vpop.eup %12961  ;;  %v2371_v17 = vld [vmem:[%s16997_s2 + $0xf8] sm:$0xff]  ;;  %v2374_v31 = vld [vmem:[%s16997_s2 + $0x110] sm:$0xff] }
 0x749   :  { %v2104_v5 = vsub.f32 1.0, %v12962_v29  ;;  %v2106_v46 = vmul.f32 %v12962_v29, %v14150_v35  ;;  %v2373_v29 = vld [vmem:[%s16997_s2 + $0x108] sm:$0xff] }
 0x74a   :  { %v2102_v16 = vadd.f32 %v2101_v9, %v13678_v2  ;;  %v2342_v2 = vld [vmem:[%s16997_s2 + $0x10] sm:$0xff] }
 0x74b   :  { %v14256_v58 = vpack.c.bf16 %v2345_v48, %v2342_v2  ;;  %v2370_v9 = vld [vmem:[%s16997_s2 + $0xf0] sm:$0xff]  ;;  %v2377_v2 = vld [vmem:[%s16997_s2 + $0x128] sm:$0xff]  ;;  %v2380_v48 = vld [vmem:[%s16997_s2 + $0x140] sm:$0xff] }
 0x74c   :  { %12963 = vtanh.f32 %v2102_v16  ;;  %v14354_v16 = vpack.c.bf16 %v2374_v31, %v2371_v17  ;;  %v14380_v26 = vpack.c.bf16 %v2380_v48, %v2377_v2  ;;  %v2166_v17 = vrot.slane %v2157_v7, %v13701_v47 }
 0x74d   :  { %v12727_v31 = vadd.f32 %v2162_v18, %v13704_v51 }
 0x756   :  { %v12964_v44 = vpop.eup %12963 }
 0x757   :  { %v2105_v32 = vmul.f32 %v12964_v44, %v2104_v5  ;;  %v2372_v5 = vld [vmem:[%s16997_s2 + $0x100] sm:$0xff]  ;;  %v2375_v44 = vld [vmem:[%s16997_s2 + $0x118] sm:$0xff] }
 0x759   :  { %v14240_v24 = vadd.f32 %v2106_v46, %v2105_v32  ;;  %v14366_v32 = vpack.c.bf16 %v2373_v29, %v2370_v9  ;;  %v14368_v46 = vpack.c.bf16 %v2375_v44, %v2372_v5  ;;  %v12729_v5 = vadd.f32 %v2166_v17, %v13708_v8 }
 0x75b   :  { %2239 = vmatmul.mubr.f32.vlgmr.msra.gmra.mrb[14].mxu0 %v14240_v24  ;;  %9769 = vmatmul.mubr.f32.vlgmr.msra.gmra.mrb[30].mxu1 %v14240_v24 }
 0x75c   :  { %11230 = vmatpush1.bf16.msra.mxu0 %v14187_v0  ;;  %2469 = vmatprep.mubr.f32.mxu0 %v17020_v49 }
 0x75d   :  { %11232 = vmatprep.subr.bf16.mxu0 %v14197_v61  ;;  %9803 = vmatprep.mubr.msk.f32.mxu1 %vm13217_vm2, %v17020_v49 }
 0x75e   :  { %11261 = vmatpush3.bf16.msra.mxu1 %v14256_v58 }
 0x75f   :  { %11262 = vmatprep.subr.bf16.mxu1 %v17019_v1 }
 0x760   :  { %11234 = vmatpush1.bf16.msra.mxu0 %v14205_v53 }
 0x761   :  { %11236 = vmatprep.subr.bf16.mxu0 %v14275_v60 }
 0x762   :  { %11264 = vmatpush3.bf16.msra.mxu1 %v14266_v13 }
 0x763   :  { %11265 = vmatprep.subr.bf16.mxu1 %v17019_v1 }
 0x764   :  { %11238 = vmatpush1.bf16.msra.mxu0 %v14216_v62 }
 0x765   :  { %11240 = vmatprep.subr.bf16.mxu0 %v14295_v3 }
 0x766   :  { %11267 = vmatpush3.bf16.msra.mxu1 %v14284_v23 }
 0x767   :  { %11268 = vmatprep.subr.bf16.mxu1 %v17019_v1 }
 0x768   :  { %11242 = vmatpush1.bf16.msra.mxu0 %v14307_v55 }
 0x769   :  { %11244 = vmatprep.subr.bf16.mxu0 %v14323_v28 }
 0x76a   :  { %11270 = vmatpush3.bf16.msra.mxu1 %v14313_v34 }
 0x76b   :  { %11271 = vmatprep.subr.bf16.mxu1 %v17019_v1 }
 0x76c   :  { %11246 = vmatpush1.bf16.msra.mxu0 %v14335_v12 }
 0x76d   :  { %11248 = vmatprep.subr.bf16.mxu0 %v14354_v16 }
 0x76e   :  { %11273 = vmatpush3.bf16.msra.mxu1 %v14341_v25 }
 0x76f   :  { %11274 = vmatprep.subr.bf16.mxu1 %v17019_v1 }
 0x770   :  { %11250 = vmatpush1.bf16.msra.mxu0 %v14366_v32 }
 0x771   :  { %11252 = vmatprep.subr.bf16.mxu0 %v14380_v26 }
 0x772   :  { %11276 = vmatpush3.bf16.msra.mxu1 %v14368_v46 }
 0x773   :  { %11277 = vmatprep.subr.bf16.mxu1 %v17019_v1 }
 0x774   :  { %11254 = vmatpush1.bf16.msra.mxu0 %v14392_v19 }
 0x775   :  { %11256 = vmatprep.subr.bf16.mxu0 %v14404_v59 }
 0x776   :  { %11279 = vmatpush3.bf16.msra.mxu1 %v14402_v43 }
 0x777   :  { %11280 = vmatprep.subr.bf16.mxu1 %v17019_v1 }
 0x778   :  { %11258 = vmatpush1.bf16.msra.mxu0 %v14420_v30 }
 0x779   :  { %11284 = vmatprep.subr.bf16.mxu0 %v14179_v38 }
 0x77a   :  { %11282 = vmatpush3.bf16.msra.mxu1 %v14424_v36 }
 0x77b   :  { %11315 = vmatprep.subr.bf16.mxu1 %v17019_v1 }
 0x82e   :  { %v2240_v9 = vpop.f32.mrb[14].mxu0  ;;  %v2311_v29 = vpop.f32.mrb[30].mxu1 }
 0x82f   :  { %v12728_v44 = vadd.f32 %v12727_v31, %v2240_v9  ;;  %v2242_v2 = vpop.f32.mrb[15].mxu0  ;;  %v9770_v48 = vpop.f32.mrb[31].mxu1  ;;  %v2312_v4 = vadd.f32 %v2311_v29, %v2170_v14 }
 0x830   :  { %v12730_v52 = vadd.f32 %v12729_v5, %v2242_v2 }
 0x831   :  { %v8756_v10 = vmul.f32 -1.442695, %v12728_v44 }
 0x832   :  { %v8757_v57 = vmul.f32 -1.442695, %v12730_v52 }
 0x833   :  { %12965 = vpow2.f32 %v8756_v10 }
 0x834   :  { %12967 = vpow2.f32 %v8757_v57 }
 0x83d   :  { %v12966_v21 = vpop.eup %12965 }
 0x83e   :  { %v2322_v39 = vadd.f32 1.0, %v12966_v21  ;;  %v12968_v45 = vpop.eup %12967 }
 0x83f   :  { %v2329_v50 = vadd.f32 1.0, %v12968_v45 }
 0x840   :  { %12969 = vrcp.f32 %v2322_v39 }
 0x841   :  { %12971 = vrcp.f32 %v2329_v50 }
 0x84a   :  { %v12970_v54 = vpop.eup %12969 }
 0x84b   :  { %v2332_v18 = vmul.f32 %v12970_v54, %v2312_v4  ;;  %v12972_v31 = vpop.eup %12971 }
 0x84c   :  { %v2335_v9 = vsub.f32 1.0, %v12972_v31  ;;  %v2337_v2 = vmul.f32 %v12972_v31, %v14240_v24 }
 0x84d   :  { %v2333_v17 = vadd.f32 %v2332_v18, %v13676_v63  ;;  %v2388_v63 = vld [vmem:[%s16999_s4] sm:$0x7] }
 0x84e   :  { %v2393_v7 = vrot.slane %v2388_v63, %v13696_v37  ;;  %v2397_v29 = vrot.slane %v2388_v63, %v13701_v47  ;;  %v2401_v31 = vrot.slane %v2388_v63, %v13660_v42 }
 0x84f   :  { %12973 = vtanh.f32 %v2333_v17 }
 0x850   :  { %v12731_v10 = vadd.f32 %v2393_v7, %v13704_v51  ;;  %v12733_v21 = vadd.f32 %v2397_v29, %v13708_v8 }
 0x859   :  { %v12974_v5 = vpop.eup %12973 }
 0x85a   :  { %v2336_v44 = vmul.f32 %v12974_v5, %v2335_v9 }
 0x85c   :  { %v14441_v48 = vadd.f32 %v2337_v2, %v2336_v44 }
 0x85e   :  { %2470 = vmatmul.mubr.f32.vlgmr.msra.gmra.mrb[16].mxu0 %v14441_v48  ;;  %9804 = vmatmul.mubr.f32.vlgmr.msra.gmra.mrb[32].mxu1 %v14441_v48 }
 0x85f   :  { %11286 = vmatpush1.bf16.msra.mxu0 %v14187_v0  ;;  %11317 = vmatpush3.bf16.msra.mxu1 %v14256_v58 }
 0x860   :  { %11288 = vmatprep.subr.bf16.mxu0 %v14197_v61  ;;  %11318 = vmatprep.subr.bf16.mxu1 %v17019_v1 }
 0x861   :  { %2700 = vmatprep.mubr.f32.mxu0 %v17020_v49  ;;  %9838 = vmatprep.mubr.msk.f32.mxu1 %vm13217_vm2, %v17020_v49 }
 0x863   :  { %11290 = vmatpush1.bf16.msra.mxu0 %v14205_v53  ;;  %11320 = vmatpush3.bf16.msra.mxu1 %v14266_v13 }
 0x864   :  { %11292 = vmatprep.subr.bf16.mxu0 %v14275_v60  ;;  %11321 = vmatprep.subr.bf16.mxu1 %v17019_v1 }
 0x867   :  { %11294 = vmatpush1.bf16.msra.mxu0 %v14216_v62  ;;  %11323 = vmatpush3.bf16.msra.mxu1 %v14284_v23 }
 0x868   :  { %11296 = vmatprep.subr.bf16.mxu0 %v14295_v3  ;;  %11324 = vmatprep.subr.bf16.mxu1 %v17019_v1 }
 0x86b   :  { %11298 = vmatpush1.bf16.msra.mxu0 %v14307_v55  ;;  %11326 = vmatpush3.bf16.msra.mxu1 %v14313_v34 }
 0x86c   :  { %11300 = vmatprep.subr.bf16.mxu0 %v14323_v28  ;;  %11327 = vmatprep.subr.bf16.mxu1 %v17019_v1 }
 0x86f   :  { %11302 = vmatpush1.bf16.msra.mxu0 %v14335_v12  ;;  %11329 = vmatpush3.bf16.msra.mxu1 %v14341_v25 }
 0x870   :  { %11304 = vmatprep.subr.bf16.mxu0 %v14354_v16  ;;  %11330 = vmatprep.subr.bf16.mxu1 %v17019_v1 }
 0x873   :  { %11306 = vmatpush1.bf16.msra.mxu0 %v14366_v32  ;;  %11332 = vmatpush3.bf16.msra.mxu1 %v14368_v46 }
 0x874   :  { %11308 = vmatprep.subr.bf16.mxu0 %v14380_v26  ;;  %11333 = vmatprep.subr.bf16.mxu1 %v17019_v1 }
 0x877   :  { %11310 = vmatpush1.bf16.msra.mxu0 %v14392_v19  ;;  %11335 = vmatpush3.bf16.msra.mxu1 %v14402_v43 }
 0x878   :  { %11312 = vmatprep.subr.bf16.mxu0 %v14404_v59  ;;  %11336 = vmatprep.subr.bf16.mxu1 %v17019_v1 }
 0x87b   :  { %11314 = vmatpush1.bf16.msra.mxu0 %v14420_v30  ;;  %11338 = vmatpush3.bf16.msra.mxu1 %v14424_v36 }
 0x87c   :  { %11340 = vmatprep.subr.bf16.mxu0 %v14179_v38  ;;  %11371 = vmatprep.subr.bf16.mxu1 %v17019_v1 }
 0x931   :  { %v2471_v52 = vpop.f32.mrb[16].mxu0  ;;  %v2542_v57 = vpop.f32.mrb[32].mxu1 }
 0x932   :  { %v12732_v39 = vadd.f32 %v12731_v10, %v2471_v52  ;;  %v2473_v45 = vpop.f32.mrb[17].mxu0  ;;  %v9805_v14 = vpop.f32.mrb[33].mxu1  ;;  %v2543_v5 = vadd.f32 %v2542_v57, %v2401_v31 }
 0x933   :  { %v12734_v50 = vadd.f32 %v12733_v21, %v2473_v45 }
 0x934   :  { %v8758_v38 = vmul.f32 -1.442695, %v12732_v39 }
 0x935   :  { %v8759_v4 = vmul.f32 -1.442695, %v12734_v50 }
 0x936   :  { %12975 = vpow2.f32 %v8758_v38 }
 0x937   :  { %12977 = vpow2.f32 %v8759_v4 }
 0x940   :  { %v12976_v54 = vpop.eup %12975 }
 0x941   :  { %v2553_v18 = vadd.f32 1.0, %v12976_v54  ;;  %v12978_v17 = vpop.eup %12977 }
 0x942   :  { %v2560_v9 = vadd.f32 1.0, %v12978_v17 }
 0x943   :  { %12979 = vrcp.f32 %v2553_v18 }
 0x944   :  { %12981 = vrcp.f32 %v2560_v9 }
 0x94d   :  { %v12980_v44 = vpop.eup %12979 }
 0x94e   :  { %v2563_v2 = vmul.f32 %v12980_v44, %v2543_v5  ;;  %v12982_v29 = vpop.eup %12981 }
 0x94f   :  { %v2566_v10 = vsub.f32 1.0, %v12982_v29  ;;  %v2568_v39 = vmul.f32 %v12982_v29, %v14441_v48 }
 0x950   :  { %v2564_v7 = vadd.f32 %v2563_v2, %v13682_v11  ;;  %v2619_v11 = vld [vmem:[%s16999_s4] sm:$0x7] }
 0x951   :  { %v2632_v5 = vrot.slane %v2619_v11, %v13660_v42 }
 0x952   :  { %12983 = vtanh.f32 %v2564_v7 }
 0x95c   :  { %v12984_v52 = vpop.eup %12983 }
 0x95d   :  { %v2567_v21 = vmul.f32 %v12984_v52, %v2566_v10 }
 0x95f   :  { %v14490_v45 = vadd.f32 %v2568_v39, %v2567_v21 }
 0x961   :  { %2701 = vmatmul.mubr.f32.vlgmr.msra.gmra.mrb[18].mxu0 %v14490_v45  ;;  %9839 = vmatmul.mubr.f32.vlgmr.msra.gmra.mrb[34].mxu1 %v14490_v45 }
 0x962   :  { %11342 = vmatpush1.bf16.msra.mxu0 %v14187_v0  ;;  %11373 = vmatpush3.bf16.msra.mxu1 %v14256_v58  ;;  %v2624_v0 = vrot.slane %v2619_v11, %v13696_v37 }
 0x963   :  { %11344 = vmatprep.subr.bf16.mxu0 %v14197_v61  ;;  %11374 = vmatprep.subr.bf16.mxu1 %v17019_v1  ;;  %v2628_v61 = vrot.slane %v2619_v11, %v13701_v47  ;;  %v3039_v11 = vld [vmem:[%s16997_s2 + $0x30] sm:$0xff] }
 0x964   :  { %2931 = vmatprep.mubr.f32.mxu0 %v17020_v49  ;;  %9873 = vmatprep.mubr.msk.f32.mxu1 %vm13217_vm2, %v17020_v49 }
 0x965   :  { %v12737_v57 = vadd.f32 %v2628_v61, %v13708_v8 }
 0x966   :  { %11346 = vmatpush1.bf16.msra.mxu0 %v14205_v53  ;;  %11376 = vmatpush3.bf16.msra.mxu1 %v14266_v13  ;;  %v12735_v53 = vadd.f32 %v2624_v0, %v13704_v51 }
 0x967   :  { %11348 = vmatprep.subr.bf16.mxu0 %v14275_v60  ;;  %11377 = vmatprep.subr.bf16.mxu1 %v17019_v1 }
 0x96a   :  { %11350 = vmatpush1.bf16.msra.mxu0 %v14216_v62  ;;  %11379 = vmatpush3.bf16.msra.mxu1 %v14284_v23 }
 0x96b   :  { %11352 = vmatprep.subr.bf16.mxu0 %v14295_v3  ;;  %11380 = vmatprep.subr.bf16.mxu1 %v17019_v1 }
 0x96e   :  { %11354 = vmatpush1.bf16.msra.mxu0 %v14307_v55  ;;  %11382 = vmatpush3.bf16.msra.mxu1 %v14313_v34 }
 0x96f   :  { %11356 = vmatprep.subr.bf16.mxu0 %v14323_v28  ;;  %11383 = vmatprep.subr.bf16.mxu1 %v17019_v1 }
 0x972   :  { %11358 = vmatpush1.bf16.msra.mxu0 %v14335_v12  ;;  %11385 = vmatpush3.bf16.msra.mxu1 %v14341_v25 }
 0x973   :  { %11360 = vmatprep.subr.bf16.mxu0 %v14354_v16  ;;  %11386 = vmatprep.subr.bf16.mxu1 %v17019_v1 }
 0x976   :  { %11362 = vmatpush1.bf16.msra.mxu0 %v14366_v32  ;;  %11388 = vmatpush3.bf16.msra.mxu1 %v14368_v46 }
 0x977   :  { %11364 = vmatprep.subr.bf16.mxu0 %v14380_v26  ;;  %11389 = vmatprep.subr.bf16.mxu1 %v17019_v1 }
 0x97a   :  { %11366 = vmatpush1.bf16.msra.mxu0 %v14392_v19  ;;  %11391 = vmatpush3.bf16.msra.mxu1 %v14402_v43 }
 0x97b   :  { %11368 = vmatprep.subr.bf16.mxu0 %v14404_v59  ;;  %11392 = vmatprep.subr.bf16.mxu1 %v17019_v1 }
 0x97e   :  { %11370 = vmatpush1.bf16.msra.mxu0 %v14420_v30  ;;  %11394 = vmatpush3.bf16.msra.mxu1 %v14424_v36 }
 0x97f   :  { %11427 = vmatprep.subr.bf16.mxu1 %v17019_v1 }
 0xa34   :  { %v2702_v62 = vpop.f32.mrb[18].mxu0  ;;  %v2773_v63 = vpop.f32.mrb[34].mxu1 }
 0xa35   :  { %v12736_v14 = vadd.f32 %v12735_v53, %v2702_v62  ;;  %v2704_v38 = vpop.f32.mrb[19].mxu0  ;;  %v9840_v50 = vpop.f32.mrb[35].mxu1  ;;  %v2774_v2 = vadd.f32 %v2773_v63, %v2632_v5  ;;  %v3042_v62 = vld [vmem:[%s16997_s2 + $0x48] sm:$0xff] }
 0xa36   :  { %v12738_v54 = vadd.f32 %v12737_v57, %v2704_v38  ;;  %v14593_v63 = vpack.c.bf16 %v3042_v62, %v3039_v11  ;;  %v3045_v57 = vld [vmem:[%s16997_s2 + $0x60] sm:$0xff]  ;;  %v3278_v62 = vld [vmem:[%s16997_s2 + $0x70] sm:$0xff] }
 0xa37   :  { %v8760_v4 = vmul.f32 -1.442695, %v12736_v14  ;;  %v3048_v14 = vld [vmem:[%s16997_s2 + $0x78] sm:$0xff] }
 0xa38   :  { %v8761_v18 = vmul.f32 -1.442695, %v12738_v54  ;;  %v14604_v38 = vpack.c.bf16 %v3048_v14, %v3045_v57  ;;  %v3281_v57 = vld [vmem:[%s16997_s2 + $0x88] sm:$0xff] }
 0xa39   :  { %12985 = vpow2.f32 %v8760_v4  ;;  %v14672_v14 = vpack.c.bf16 %v3281_v57, %v3278_v62  ;;  %v3305_v62 = vld [vmem:[%s16997_s2 + $0x148] sm:$0xff] }
 0xa3a   :  { %12987 = vpow2.f32 %v8761_v18 }
 0xa43   :  { %v12986_v17 = vpop.eup %12985 }
 0xa44   :  { %v2784_v31 = vadd.f32 1.0, %v12986_v17  ;;  %v12988_v9 = vpop.eup %12987 }
 0xa45   :  { %v2791_v44 = vadd.f32 1.0, %v12988_v9 }
 0xa46   :  { %12989 = vrcp.f32 %v2784_v31 }
 0xa47   :  { %12991 = vrcp.f32 %v2791_v44 }
 0xa50   :  { %v12990_v7 = vpop.eup %12989 }
 0xa51   :  { %v2794_v29 = vmul.f32 %v12990_v7, %v2774_v2  ;;  %v12992_v52 = vpop.eup %12991 }
 0xa52   :  { %v2797_v21 = vsub.f32 1.0, %v12992_v52  ;;  %v2799_v61 = vmul.f32 %v12992_v52, %v14490_v45 }
 0xa53   :  { %v2795_v10 = vadd.f32 %v2794_v29, %v13680_v6  ;;  %v3034_v6 = vld [vmem:[%s16997_s2 + $0x8] sm:$0xff] }
 0xa55   :  { %12993 = vtanh.f32 %v2795_v10 }
 0xa5f   :  { %v12994_v39 = vpop.eup %12993 }
 0xa60   :  { %v2798_v0 = vmul.f32 %v12994_v39, %v2797_v21 }
 0xa62   :  { %v14538_v53 = vadd.f32 %v2799_v61, %v2798_v0  ;;  %v3269_v61 = vld [vmem:[%s16997_s2 + $0x28] sm:$0xff] }
 0xa64   :  { %2932 = vmatmul.mubr.f32.vlgmr.msra.gmra.mrb[20].mxu0 %v14538_v53  ;;  %9874 = vmatmul.mubr.f32.vlgmr.msra.gmra.mrb[36].mxu1 %v14538_v53 }
 0xa65   :  { %11429 = vmatpush3.bf16.msra.mxu1 %v14256_v58  ;;  %3162 = vmatprep.mubr.f32.mxu0 %v17020_v49  ;;  %v3037_v58 = vld [vmem:[%s16997_s2 + $0x20] sm:$0xff] }
 0xa66   :  { %11430 = vmatprep.subr.bf16.mxu1 %v17019_v1  ;;  %9908 = vmatprep.mubr.msk.f32.mxu1 %vm13217_vm2, %v17020_v49 }
 0xa69   :  { %11432 = vmatpush3.bf16.msra.mxu1 %v14266_v13  ;;  %v14567_v13 = vpack.c.bf16 %v3037_v58, %v3034_v6  ;;  %v3272_v58 = vld [vmem:[%s16997_s2 + $0x40] sm:$0xff] }
 0xa6a   :  { %11433 = vmatprep.subr.bf16.mxu1 %v17019_v1 }
 0xa6b   :  { %11396 = vmatprep.subr.bf16.mxu0 %v14567_v13 }
 0xa6d   :  { %11435 = vmatpush3.bf16.msra.mxu1 %v14284_v23  ;;  %v3033_v23 = vld [vmem:[%s16997_s2] sm:$0xff] }
 0xa6e   :  { %11436 = vmatprep.subr.bf16.mxu1 %v17019_v1 }
 0xa71   :  { %11438 = vmatpush3.bf16.msra.mxu1 %v14313_v34  ;;  %v3036_v34 = vld [vmem:[%s16997_s2 + $0x18] sm:$0xff] }
 0xa72   :  { %11439 = vmatprep.subr.bf16.mxu1 %v17019_v1 }
 0xa75   :  { %11441 = vmatpush3.bf16.msra.mxu1 %v14341_v25  ;;  %v14575_v25 = vpack.c.bf16 %v3036_v34, %v3033_v23  ;;  %v3275_v23 = vld [vmem:[%s16997_s2 + $0x58] sm:$0xff] }
 0xa76   :  { %11442 = vmatprep.subr.bf16.mxu1 %v17019_v1  ;;  %v14654_v34 = vpack.c.bf16 %v3275_v23, %v3272_v58  ;;  %v3300_v58 = vld [vmem:[%s16997_s2 + $0x120] sm:$0xff] }
 0xa77   :  { %11398 = vmatpush1.bf16.msra.mxu0 %v14575_v25 }
 0xa79   :  { %11444 = vmatpush3.bf16.msra.mxu1 %v14368_v46  ;;  %v3040_v46 = vld [vmem:[%s16997_s2 + $0x38] sm:$0xff] }
 0xa7a   :  { %11445 = vmatprep.subr.bf16.mxu1 %v17019_v1 }
 0xa7d   :  { %11447 = vmatpush3.bf16.msra.mxu1 %v14402_v43  ;;  %v3043_v43 = vld [vmem:[%s16997_s2 + $0x50] sm:$0xff] }
 0xa7e   :  { %11448 = vmatprep.subr.bf16.mxu1 %v17019_v1 }
 0xa81   :  { %11450 = vmatpush3.bf16.msra.mxu1 %v14424_v36  ;;  %v14585_v36 = vpack.c.bf16 %v3043_v43, %v3040_v46  ;;  %v3277_v46 = vld [vmem:[%s16997_s2 + $0x68] sm:$0xff]  ;;  %v3280_v43 = vld [vmem:[%s16997_s2 + $0x80] sm:$0xff] }
 0xa82   :  { %11483 = vmatprep.subr.bf16.mxu1 %v17019_v1  ;;  %v14663_v11 = vpack.c.bf16 %v3280_v43, %v3277_v46  ;;  %v3303_v46 = vld [vmem:[%s16997_s2 + $0x138] sm:$0xff]  ;;  %v3302_v43 = vld [vmem:[%s16997_s2 + $0x130] sm:$0xff] }
 0xa83   :  { %11400 = vmatprep.subr.bf16.mxu0 %v14585_v36  ;;  %v14780_v57 = vpack.c.bf16 %v3303_v46, %v3300_v58 }
 0xa84   :  { %11402 = vmatpush1.bf16.msra.mxu0 %v14593_v63 }
 0xa85   :  { %11404 = vmatprep.subr.bf16.mxu0 %v14275_v60  ;;  %v2850_v60 = vld [vmem:[%s16999_s4] sm:$0x7] }
 0xa86   :  { %v2863_v31 = vrot.slane %v2850_v60, %v13660_v42 }
 0xa88   :  { %11406 = vmatpush1.bf16.msra.mxu0 %v14604_v38 }
 0xa89   :  { %11408 = vmatprep.subr.bf16.mxu0 %v14295_v3  ;;  %v2855_v3 = vrot.slane %v2850_v60, %v13696_v37 }
 0xa8c   :  { %11410 = vmatpush1.bf16.msra.mxu0 %v14307_v55  ;;  %v2859_v55 = vrot.slane %v2850_v60, %v13701_v47  ;;  %v3283_v60 = vld [vmem:[%s16997_s2 + $0x98] sm:$0xff] }
 0xa8d   :  { %11412 = vmatprep.subr.bf16.mxu0 %v14323_v28  ;;  %v12739_v28 = vadd.f32 %v2855_v3, %v13704_v51  ;;  %v3286_v3 = vld [vmem:[%s16997_s2 + $0xb0] sm:$0xff] }
 0xa90   :  { %11414 = vmatpush1.bf16.msra.mxu0 %v14335_v12 }
 0xa91   :  { %11416 = vmatprep.subr.bf16.mxu0 %v14354_v16 }
 0xa94   :  { %11418 = vmatpush1.bf16.msra.mxu0 %v14366_v32  ;;  %v12741_v32 = vadd.f32 %v2859_v55, %v13708_v8  ;;  %v14683_v55 = vpack.c.bf16 %v3286_v3, %v3283_v60  ;;  %v3307_v60 = vld [vmem:[%s16997_s2 + $0x158] sm:$0xff]  ;;  %v3310_v3 = vld [vmem:[%s16997_s2 + $0x170] sm:$0xff] }
 0xa95   :  { %11420 = vmatprep.subr.bf16.mxu0 %v14380_v26 }
 0xa98   :  { %11422 = vmatpush1.bf16.msra.mxu0 %v14392_v19 }
 0xa99   :  { %11424 = vmatprep.subr.bf16.mxu0 %v14404_v59 }
 0xa9c   :  { %11426 = vmatpush1.bf16.msra.mxu0 %v14420_v30 }
 0xa9d   :  { %11452 = vmatprep.subr.bf16.mxu0 %v14567_v13 }
 0xb37   :  { %v2933_v12 = vpop.f32.mrb[20].mxu0  ;;  %v3004_v16 = vpop.f32.mrb[36].mxu1 }
 0xb38   :  { %v12740_v26 = vadd.f32 %v12739_v28, %v2933_v12  ;;  %v2935_v19 = vpop.f32.mrb[21].mxu0  ;;  %v9875_v59 = vpop.f32.mrb[37].mxu1  ;;  %v3005_v5 = vadd.f32 %v3004_v16, %v2863_v31  ;;  %v3282_v28 = vld [vmem:[%s16997_s2 + $0x90] sm:$0xff]  ;;  %v3285_v12 = vld [vmem:[%s16997_s2 + $0xa8] sm:$0xff]  ;;  %v3284_v16 = vld [vmem:[%s16997_s2 + $0xa0] sm:$0xff] }
 0xb39   :  { %v12742_v50 = vadd.f32 %v12741_v32, %v2935_v19  ;;  %v14695_v32 = vpack.c.bf16 %v3285_v12, %v3282_v28  ;;  %v3289_v59 = vld [vmem:[%s16997_s2 + $0xc8] sm:$0xff]  ;;  %v14790_v28 = vpack.c.bf16 %v3305_v62, %v3302_v43  ;;  %v14792_v12 = vpack.c.bf16 %v3310_v3, %v3307_v60 }
 0xb3a   :  { %v8762_v30 = vmul.f32 -1.442695, %v12740_v26  ;;  %v3287_v26 = vld [vmem:[%s16997_s2 + $0xb8] sm:$0xff]  ;;  %v3293_v31 = vld [vmem:[%s16997_s2 + $0xe8] sm:$0xff] }
 0xb3b   :  { %v8763_v4 = vmul.f32 -1.442695, %v12742_v50  ;;  %v14701_v19 = vpack.c.bf16 %v3287_v26, %v3284_v16  ;;  %v3306_v16 = vld [vmem:[%s16997_s2 + $0x150] sm:$0xff]  ;;  %v3309_v26 = vld [vmem:[%s16997_s2 + $0x168] sm:$0xff] }
 0xb3c   :  { %12995 = vpow2.f32 %v8762_v30  ;;  %v3292_v30 = vld [vmem:[%s16997_s2 + $0xe0] sm:$0xff] }
 0xb3d   :  { %12997 = vpow2.f32 %v8763_v4  ;;  %v14711_v50 = vpack.c.bf16 %v3292_v30, %v3289_v59  ;;  %v3288_v4 = vld [vmem:[%s16997_s2 + $0xc0] sm:$0xff]  ;;  %v3311_v30 = vld [vmem:[%s16997_s2 + $0x178] sm:$0xff] }
 0xb3e   :  { %v3308_v59 = vld [vmem:[%s16997_s2 + $0x160] sm:$0xff] }
 0xb46   :  { %v12996_v54 = vpop.eup %12995 }
 0xb47   :  { %v3015_v18 = vadd.f32 1.0, %v12996_v54  ;;  %v12998_v17 = vpop.eup %12997  ;;  %v3291_v54 = vld [vmem:[%s16997_s2 + $0xd8] sm:$0xff] }
 0xb48   :  { %v3022_v9 = vadd.f32 1.0, %v12998_v17  ;;  %v14723_v17 = vpack.c.bf16 %v3291_v54, %v3288_v4  ;;  %v14808_v4 = vpack.c.bf16 %v3309_v26, %v3306_v16  ;;  %v14812_v54 = vpack.c.bf16 %v3311_v30, %v3308_v59 }
 0xb49   :  { %12999 = vrcp.f32 %v3015_v18  ;;  %v3290_v18 = vld [vmem:[%s16997_s2 + $0xd0] sm:$0xff] }
 0xb4a   :  { %13001 = vrcp.f32 %v3022_v9  ;;  %v14729_v9 = vpack.c.bf16 %v3293_v31, %v3290_v18  ;;  %v3081_v18 = vld [vmem:[%s16999_s4] sm:$0x7] }
 0xb4b   :  { %v3086_v31 = vrot.slane %v3081_v18, %v13696_v37  ;;  %v3094_v16 = vrot.slane %v3081_v18, %v13660_v42 }
 0xb53   :  { %v13000_v44 = vpop.eup %12999 }
 0xb54   :  { %v3025_v2 = vmul.f32 %v13000_v44, %v3005_v5  ;;  %v13002_v29 = vpop.eup %13001  ;;  %v3295_v5 = vld [vmem:[%s16997_s2 + $0xf8] sm:$0xff]  ;;  %v3298_v44 = vld [vmem:[%s16997_s2 + $0x110] sm:$0xff] }
 0xb55   :  { %v3028_v10 = vsub.f32 1.0, %v13002_v29  ;;  %v3030_v39 = vmul.f32 %v13002_v29, %v14538_v53  ;;  %v3297_v29 = vld [vmem:[%s16997_s2 + $0x108] sm:$0xff] }
 0xb56   :  { %v3026_v7 = vadd.f32 %v3025_v2, %v13686_v20  ;;  %v3266_v20 = vld [vmem:[%s16997_s2 + $0x10] sm:$0xff] }
 0xb57   :  { %v14644_v6 = vpack.c.bf16 %v3269_v61, %v3266_v20  ;;  %v3294_v2 = vld [vmem:[%s16997_s2 + $0xf0] sm:$0xff]  ;;  %v3301_v20 = vld [vmem:[%s16997_s2 + $0x128] sm:$0xff]  ;;  %v3304_v61 = vld [vmem:[%s16997_s2 + $0x140] sm:$0xff] }
 0xb58   :  { %13003 = vtanh.f32 %v3026_v7  ;;  %v14742_v7 = vpack.c.bf16 %v3298_v44, %v3295_v5  ;;  %v14768_v23 = vpack.c.bf16 %v3304_v61, %v3301_v20  ;;  %v3090_v5 = vrot.slane %v3081_v18, %v13701_v47 }
 0xb59   :  { %v12743_v44 = vadd.f32 %v3086_v31, %v13704_v51 }
 0xb62   :  { %v13004_v52 = vpop.eup %13003 }
 0xb63   :  { %v3029_v21 = vmul.f32 %v13004_v52, %v3028_v10  ;;  %v3296_v10 = vld [vmem:[%s16997_s2 + $0x100] sm:$0xff]  ;;  %v3299_v52 = vld [vmem:[%s16997_s2 + $0x118] sm:$0xff] }
 0xb65   :  { %v14628_v0 = vadd.f32 %v3030_v39, %v3029_v21  ;;  %v14754_v21 = vpack.c.bf16 %v3297_v29, %v3294_v2  ;;  %v14756_v39 = vpack.c.bf16 %v3299_v52, %v3296_v10  ;;  %v12745_v10 = vadd.f32 %v3090_v5, %v13708_v8 }
 0xb67   :  { %3163 = vmatmul.mubr.f32.vlgmr.msra.gmra.mrb[22].mxu0 %v14628_v0  ;;  %9909 = vmatmul.mubr.f32.vlgmr.msra.gmra.mrb[38].mxu1 %v14628_v0 }
 0xb68   :  { %11454 = vmatpush1.bf16.msra.mxu0 %v14575_v25  ;;  %3393 = vmatprep.mubr.f32.mxu0 %v17020_v49 }
 0xb69   :  { %11456 = vmatprep.subr.bf16.mxu0 %v14585_v36  ;;  %9943 = vmatprep.mubr.msk.f32.mxu1 %vm13217_vm2, %v17020_v49 }
 0xb6a   :  { %11485 = vmatpush3.bf16.msra.mxu1 %v14644_v6 }
 0xb6b   :  { %11486 = vmatprep.subr.bf16.mxu1 %v17019_v1 }
 0xb6c   :  { %11458 = vmatpush1.bf16.msra.mxu0 %v14593_v63 }
 0xb6d   :  { %11460 = vmatprep.subr.bf16.mxu0 %v14663_v11 }
 0xb6e   :  { %11488 = vmatpush3.bf16.msra.mxu1 %v14654_v34 }
 0xb6f   :  { %11489 = vmatprep.subr.bf16.mxu1 %v17019_v1 }
 0xb70   :  { %11462 = vmatpush1.bf16.msra.mxu0 %v14604_v38 }
 0xb71   :  { %11464 = vmatprep.subr.bf16.mxu0 %v14683_v55 }
 0xb72   :  { %11491 = vmatpush3.bf16.msra.mxu1 %v14672_v14 }
 0xb73   :  { %11492 = vmatprep.subr.bf16.mxu1 %v17019_v1 }
 0xb74   :  { %11466 = vmatpush1.bf16.msra.mxu0 %v14695_v32 }
 0xb75   :  { %11468 = vmatprep.subr.bf16.mxu0 %v14711_v50 }
 0xb76   :  { %11494 = vmatpush3.bf16.msra.mxu1 %v14701_v19 }
 0xb77   :  { %11495 = vmatprep.subr.bf16.mxu1 %v17019_v1 }
 0xb78   :  { %11470 = vmatpush1.bf16.msra.mxu0 %v14723_v17 }
 0xb79   :  { %11472 = vmatprep.subr.bf16.mxu0 %v14742_v7 }
 0xb7a   :  { %11497 = vmatpush3.bf16.msra.mxu1 %v14729_v9 }
 0xb7b   :  { %11498 = vmatprep.subr.bf16.mxu1 %v17019_v1 }
 0xb7c   :  { %11474 = vmatpush1.bf16.msra.mxu0 %v14754_v21 }
 0xb7d   :  { %11476 = vmatprep.subr.bf16.mxu0 %v14768_v23 }
 0xb7e   :  { %11500 = vmatpush3.bf16.msra.mxu1 %v14756_v39 }
 0xb7f   :  { %11501 = vmatprep.subr.bf16.mxu1 %v17019_v1 }
 0xb80   :  { %11478 = vmatpush1.bf16.msra.mxu0 %v14780_v57 }
 0xb81   :  { %11480 = vmatprep.subr.bf16.mxu0 %v14792_v12 }
 0xb82   :  { %11503 = vmatpush3.bf16.msra.mxu1 %v14790_v28 }
 0xb83   :  { %11504 = vmatprep.subr.bf16.mxu1 %v17019_v1 }
 0xb84   :  { %11482 = vmatpush1.bf16.msra.mxu0 %v14808_v4 }
 0xb85   :  { %11508 = vmatprep.subr.bf16.mxu0 %v14567_v13 }
 0xb86   :  { %11506 = vmatpush3.bf16.msra.mxu1 %v14812_v54 }
 0xb87   :  { %11539 = vmatprep.subr.bf16.mxu1 %v17019_v1 }
 0xc3a   :  { %v3164_v2 = vpop.f32.mrb[22].mxu0  ;;  %v3235_v29 = vpop.f32.mrb[38].mxu1 }
 0xc3b   :  { %v12744_v52 = vadd.f32 %v12743_v44, %v3164_v2  ;;  %v3166_v20 = vpop.f32.mrb[23].mxu0  ;;  %v9910_v61 = vpop.f32.mrb[39].mxu1  ;;  %v3236_v59 = vadd.f32 %v3235_v29, %v3094_v16 }
 0xc3c   :  { %v12746_v46 = vadd.f32 %v12745_v10, %v3166_v20 }
 0xc3d   :  { %v8764_v58 = vmul.f32 -1.442695, %v12744_v52 }
 0xc3e   :  { %v8765_v43 = vmul.f32 -1.442695, %v12746_v46 }
 0xc3f   :  { %13005 = vpow2.f32 %v8764_v58 }
 0xc40   :  { %13007 = vpow2.f32 %v8765_v43 }
 0xc49   :  { %v13006_v62 = vpop.eup %13005 }
 0xc4a   :  { %v3246_v60 = vadd.f32 1.0, %v13006_v62  ;;  %v13008_v3 = vpop.eup %13007 }
 0xc4b   :  { %v3253_v26 = vadd.f32 1.0, %v13008_v3 }
 0xc4c   :  { %13009 = vrcp.f32 %v3246_v60 }
 0xc4d   :  { %13011 = vrcp.f32 %v3253_v26 }
 0xc56   :  { %v13010_v30 = vpop.eup %13009 }
 0xc57   :  { %v3256_v31 = vmul.f32 %v13010_v30, %v3236_v59  ;;  %v13012_v44 = vpop.eup %13011 }
 0xc58   :  { %v3259_v2 = vsub.f32 1.0, %v13012_v44  ;;  %v3261_v20 = vmul.f32 %v13012_v44, %v14628_v0 }
 0xc59   :  { %v3257_v5 = vadd.f32 %v3256_v31, %v13684_v15  ;;  %v3312_v15 = vld [vmem:[%s16999_s4] sm:$0x7] }
 0xc5a   :  { %v3317_v18 = vrot.slane %v3312_v15, %v13696_v37  ;;  %v3321_v29 = vrot.slane %v3312_v15, %v13701_v47  ;;  %v3325_v44 = vrot.slane %v3312_v15, %v13660_v42 }
 0xc5b   :  { %13013 = vtanh.f32 %v3257_v5 }
 0xc5c   :  { %v12747_v58 = vadd.f32 %v3317_v18, %v13704_v51  ;;  %v12749_v62 = vadd.f32 %v3321_v29, %v13708_v8 }
 0xc65   :  { %v13014_v10 = vpop.eup %13013 }
 0xc66   :  { %v3260_v52 = vmul.f32 %v13014_v10, %v3259_v2 }
 0xc68   :  { %v14829_v61 = vadd.f32 %v3261_v20, %v3260_v52 }
 0xc6a   :  { %3394 = vmatmul.mubr.f32.vlgmr.msra.gmra.mrb[24].mxu0 %v14829_v61  ;;  %9944 = vmatmul.mubr.f32.vlgmr.msra.gmra.mrb[40].mxu1 %v14829_v61 }
 0xc6b   :  { %11510 = vmatpush1.bf16.msra.mxu0 %v14575_v25  ;;  %11541 = vmatpush3.bf16.msra.mxu1 %v14644_v6 }
 0xc6c   :  { %11512 = vmatprep.subr.bf16.mxu0 %v14585_v36  ;;  %11542 = vmatprep.subr.bf16.mxu1 %v17019_v1 }
 0xc6d   :  { %3624 = vmatprep.mubr.f32.mxu0 %v17020_v49  ;;  %9978 = vmatprep.mubr.msk.f32.mxu1 %vm13217_vm2, %v17020_v49 }
 0xc6f   :  { %11514 = vmatpush1.bf16.msra.mxu0 %v14593_v63  ;;  %11544 = vmatpush3.bf16.msra.mxu1 %v14654_v34 }
 0xc70   :  { %11516 = vmatprep.subr.bf16.mxu0 %v14663_v11  ;;  %11545 = vmatprep.subr.bf16.mxu1 %v17019_v1 }
 0xc73   :  { %11518 = vmatpush1.bf16.msra.mxu0 %v14604_v38  ;;  %11547 = vmatpush3.bf16.msra.mxu1 %v14672_v14 }
 0xc74   :  { %11520 = vmatprep.subr.bf16.mxu0 %v14683_v55  ;;  %11548 = vmatprep.subr.bf16.mxu1 %v17019_v1 }
 0xc77   :  { %11522 = vmatpush1.bf16.msra.mxu0 %v14695_v32  ;;  %11550 = vmatpush3.bf16.msra.mxu1 %v14701_v19 }
 0xc78   :  { %11524 = vmatprep.subr.bf16.mxu0 %v14711_v50  ;;  %11551 = vmatprep.subr.bf16.mxu1 %v17019_v1 }
 0xc7b   :  { %11526 = vmatpush1.bf16.msra.mxu0 %v14723_v17  ;;  %11553 = vmatpush3.bf16.msra.mxu1 %v14729_v9 }
 0xc7c   :  { %11528 = vmatprep.subr.bf16.mxu0 %v14742_v7  ;;  %11554 = vmatprep.subr.bf16.mxu1 %v17019_v1 }
 0xc7f   :  { %11530 = vmatpush1.bf16.msra.mxu0 %v14754_v21  ;;  %11556 = vmatpush3.bf16.msra.mxu1 %v14756_v39 }
 0xc80   :  { %11532 = vmatprep.subr.bf16.mxu0 %v14768_v23  ;;  %11557 = vmatprep.subr.bf16.mxu1 %v17019_v1 }
 0xc83   :  { %11534 = vmatpush1.bf16.msra.mxu0 %v14780_v57  ;;  %11559 = vmatpush3.bf16.msra.mxu1 %v14790_v28 }
 0xc84   :  { %11536 = vmatprep.subr.bf16.mxu0 %v14792_v12  ;;  %11560 = vmatprep.subr.bf16.mxu1 %v17019_v1 }
 0xc87   :  { %11538 = vmatpush1.bf16.msra.mxu0 %v14808_v4  ;;  %11562 = vmatpush3.bf16.msra.mxu1 %v14812_v54 }
 0xc88   :  { %11564 = vmatprep.subr.bf16.mxu0 %v14567_v13  ;;  %11595 = vmatprep.subr.bf16.mxu1 %v17019_v1 }
 0xd3d   :  { %v3395_v46 = vpop.f32.mrb[24].mxu0  ;;  %v3466_v43 = vpop.f32.mrb[40].mxu1 }
 0xd3e   :  { %v12748_v60 = vadd.f32 %v12747_v58, %v3395_v46  ;;  %v3397_v3 = vpop.f32.mrb[25].mxu0  ;;  %v9945_v16 = vpop.f32.mrb[41].mxu1  ;;  %v3467_v10 = vadd.f32 %v3466_v43, %v3325_v44 }
 0xd3f   :  { %v12750_v26 = vadd.f32 %v12749_v62, %v3397_v3 }
 0xd40   :  { %v8766_v13 = vmul.f32 -1.442695, %v12748_v60 }
 0xd41   :  { %v8767_v59 = vmul.f32 -1.442695, %v12750_v26 }
 0xd42   :  { %13015 = vpow2.f32 %v8766_v13 }
 0xd43   :  { %13017 = vpow2.f32 %v8767_v59 }
 0xd4c   :  { %v13016_v30 = vpop.eup %13015 }
 0xd4d   :  { %v3477_v31 = vadd.f32 1.0, %v13016_v30  ;;  %v13018_v5 = vpop.eup %13017 }
 0xd4e   :  { %v3484_v2 = vadd.f32 1.0, %v13018_v5 }
 0xd4f   :  { %13019 = vrcp.f32 %v3477_v31 }
 0xd50   :  { %13021 = vrcp.f32 %v3484_v2 }
 0xd59   :  { %v13020_v52 = vpop.eup %13019 }
 0xd5a   :  { %v3487_v20 = vmul.f32 %v13020_v52, %v3467_v10  ;;  %v13022_v29 = vpop.eup %13021 }
 0xd5b   :  { %v3490_v58 = vsub.f32 1.0, %v13022_v29  ;;  %v3492_v60 = vmul.f32 %v13022_v29, %v14829_v61 }
 0xd5c   :  { %v3488_v18 = vadd.f32 %v3487_v20, %v13690_v27  ;;  %v3543_v27 = vld [vmem:[%s16999_s4] sm:$0x7] }
 0xd5d   :  { %v3556_v10 = vrot.slane %v3543_v27, %v13660_v42 }
 0xd5e   :  { %13023 = vtanh.f32 %v3488_v18 }
 0xd68   :  { %v13024_v46 = vpop.eup %13023 }
 0xd69   :  { %v3491_v62 = vmul.f32 %v13024_v46, %v3490_v58 }
 0xd6b   :  { %v14878_v3 = vadd.f32 %v3492_v60, %v3491_v62 }
 0xd6d   :  { %3625 = vmatmul.mubr.f32.vlgmr.msra.gmra.mrb[26].mxu0 %v14878_v3  ;;  %9979 = vmatmul.mubr.f32.vlgmr.msra.gmra.mrb[42].mxu1 %v14878_v3 }
 0xd6e   :  { %11566 = vmatpush1.bf16.msra.mxu0 %v14575_v25  ;;  %11597 = vmatpush3.bf16.msra.mxu1 %v14644_v6  ;;  %v3548_v25 = vrot.slane %v3543_v27, %v13696_v37 }
 0xd6f   :  { %11568 = vmatprep.subr.bf16.mxu0 %v14585_v36  ;;  %11598 = vmatprep.subr.bf16.mxu1 %v17019_v1  ;;  %v3552_v36 = vrot.slane %v3543_v27, %v13701_v47  ;;  %v3963_v27 = vld [vmem:[%s16997_s2 + $0x30] sm:$0xff] }
 0xd70   :  { %3855 = vmatprep.mubr.f32.mxu0 %v17020_v49  ;;  %10013 = vmatprep.mubr.msk.f32.mxu1 %vm13217_vm2, %v17020_v49 }
 0xd71   :  { %v12753_v43 = vadd.f32 %v3552_v36, %v13708_v8 }
 0xd72   :  { %11570 = vmatpush1.bf16.msra.mxu0 %v14593_v63  ;;  %11600 = vmatpush3.bf16.msra.mxu1 %v14654_v34  ;;  %v12751_v63 = vadd.f32 %v3548_v25, %v13704_v51 }
 0xd73   :  { %11572 = vmatprep.subr.bf16.mxu0 %v14663_v11  ;;  %11601 = vmatprep.subr.bf16.mxu1 %v17019_v1 }
 0xd76   :  { %11574 = vmatpush1.bf16.msra.mxu0 %v14604_v38  ;;  %11603 = vmatpush3.bf16.msra.mxu1 %v14672_v14 }
 0xd77   :  { %11576 = vmatprep.subr.bf16.mxu0 %v14683_v55  ;;  %11604 = vmatprep.subr.bf16.mxu1 %v17019_v1 }
 0xd7a   :  { %11578 = vmatpush1.bf16.msra.mxu0 %v14695_v32  ;;  %11606 = vmatpush3.bf16.msra.mxu1 %v14701_v19 }
 0xd7b   :  { %11580 = vmatprep.subr.bf16.mxu0 %v14711_v50  ;;  %11607 = vmatprep.subr.bf16.mxu1 %v17019_v1 }
 0xd7e   :  { %11582 = vmatpush1.bf16.msra.mxu0 %v14723_v17  ;;  %11609 = vmatpush3.bf16.msra.mxu1 %v14729_v9 }
 0xd7f   :  { %11584 = vmatprep.subr.bf16.mxu0 %v14742_v7  ;;  %11610 = vmatprep.subr.bf16.mxu1 %v17019_v1 }
 0xd82   :  { %11586 = vmatpush1.bf16.msra.mxu0 %v14754_v21  ;;  %11612 = vmatpush3.bf16.msra.mxu1 %v14756_v39 }
 0xd83   :  { %11588 = vmatprep.subr.bf16.mxu0 %v14768_v23  ;;  %11613 = vmatprep.subr.bf16.mxu1 %v17019_v1 }
 0xd86   :  { %11590 = vmatpush1.bf16.msra.mxu0 %v14780_v57  ;;  %11615 = vmatpush3.bf16.msra.mxu1 %v14790_v28 }
 0xd87   :  { %11592 = vmatprep.subr.bf16.mxu0 %v14792_v12  ;;  %11616 = vmatprep.subr.bf16.mxu1 %v17019_v1 }
 0xd8a   :  { %11594 = vmatpush1.bf16.msra.mxu0 %v14808_v4  ;;  %11618 = vmatpush3.bf16.msra.mxu1 %v14812_v54 }
 0xd8b   :  { %11651 = vmatprep.subr.bf16.mxu1 %v17019_v1 }
 0xe40   :  { %v3626_v38 = vpop.f32.mrb[26].mxu0  ;;  %v3697_v15 = vpop.f32.mrb[42].mxu1 }
 0xe41   :  { %v12752_v16 = vadd.f32 %v12751_v63, %v3626_v38  ;;  %v3628_v13 = vpop.f32.mrb[27].mxu0  ;;  %v9980_v26 = vpop.f32.mrb[43].mxu1  ;;  %v3698_v20 = vadd.f32 %v3697_v15, %v3556_v10  ;;  %v3966_v38 = vld [vmem:[%s16997_s2 + $0x48] sm:$0xff] }
 0xe42   :  { %v12754_v30 = vadd.f32 %v12753_v43, %v3628_v13  ;;  %v11625_v15 = vpack.c.bf16 %v3966_v38, %v3963_v27  ;;  %v3969_v43 = vld [vmem:[%s16997_s2 + $0x60] sm:$0xff] }
 0xe43   :  { %v8768_v59 = vmul.f32 -1.442695, %v12752_v16  ;;  %v3972_v16 = vld [vmem:[%s16997_s2 + $0x78] sm:$0xff]  ;;  %v4208_v26 = vld [vmem:[%s17000_s5 + $0x20] sm:$0xff] }
 0xe44   :  { %v8769_v31 = vmul.f32 -1.442695, %v12754_v30  ;;  %v11629_v13 = vpack.c.bf16 %v3972_v16, %v3969_v43  ;;  %v4210_v43 = vld [vmem:[%s17000_s5 + $0x30] sm:$0xff]  ;;  %v4213_v16 = vld [vmem:[%s17000_s5 + $0x48] sm:$0xff] }
 0xe45   :  { %13025 = vpow2.f32 %v8768_v59 }
 0xe46   :  { %13027 = vpow2.f32 %v8769_v31 }
 0xe4f   :  { %v13026_v5 = vpop.eup %13025 }
 0xe50   :  { %v3708_v44 = vadd.f32 1.0, %v13026_v5  ;;  %v13028_v2 = vpop.eup %13027 }
 0xe51   :  { %v3715_v52 = vadd.f32 1.0, %v13028_v2 }
 0xe52   :  { %13029 = vrcp.f32 %v3708_v44 }
 0xe53   :  { %13031 = vrcp.f32 %v3715_v52 }
 0xe5c   :  { %v13030_v18 = vpop.eup %13029 }
 0xe5d   :  { %v3718_v29 = vmul.f32 %v13030_v18, %v3698_v20  ;;  %v13032_v46 = vpop.eup %13031 }
 0xe5e   :  { %v3721_v62 = vsub.f32 1.0, %v13032_v46  ;;  %v3723_v36 = vmul.f32 %v13032_v46, %v14878_v3 }
 0xe5f   :  { %v3719_v58 = vadd.f32 %v3718_v29, %v13688_v22  ;;  %v3958_v22 = vld [vmem:[%s16997_s2 + $0x8] sm:$0xff] }
 0xe61   :  { %13033 = vtanh.f32 %v3719_v58 }
 0xe6b   :  { %v13034_v60 = vpop.eup %13033 }
 0xe6c   :  { %v3722_v25 = vmul.f32 %v13034_v60, %v3721_v62 }
 0xe6e   :  { %v14926_v63 = vadd.f32 %v3723_v36, %v3722_v25 }
 0xe70   :  { %3856 = vmatmul.mubr.f32.vlgmr.msra.gmra.mrb[28].mxu0 %v14926_v63  ;;  %10014 = vmatmul.mubr.f32.vlgmr.msra.gmra.mrb[44].mxu1 %v14926_v63 }
 0xe71   :  { %11653 = vmatpush3.bf16.msra.mxu1 %v14644_v6  ;;  %4086 = vmatprep.mubr.f32.mxu0 %v17020_v49  ;;  %v3961_v6 = vld [vmem:[%s16997_s2 + $0x20] sm:$0xff] }
 0xe72   :  { %11654 = vmatprep.subr.bf16.mxu1 %v17019_v1  ;;  %10048 = vmatprep.mubr.msk.f32.mxu1 %vm13217_vm2, %v17020_v49 }
 0xe75   :  { %11656 = vmatpush3.bf16.msra.mxu1 %v14654_v34  ;;  %v11619_v34 = vpack.c.bf16 %v3961_v6, %v3958_v22  ;;  %v4204_v6 = vld [vmem:[%s17000_s5] sm:$0xff] }
 0xe76   :  { %11657 = vmatprep.subr.bf16.mxu1 %v17019_v1 }
 0xe77   :  { %11620 = vmatprep.subr.bf16.mxu0 %v11619_v34  ;;  %v4207_v34 = vld [vmem:[%s17000_s5 + $0x18] sm:$0xff] }
 0xe78   :  { %v11677_v27 = vpack.c.bf16 %v4207_v34, %v4204_v6  ;;  %v4236_v6 = vld [vmem:[%s17000_s5 + $0x100] sm:$0xff]  ;;  %v4239_v34 = vld [vmem:[%s17000_s5 + $0x118] sm:$0xff] }
 0xe79   :  { %11659 = vmatpush3.bf16.msra.mxu1 %v14672_v14  ;;  %v3957_v14 = vld [vmem:[%s16997_s2] sm:$0xff] }
 0xe7a   :  { %11660 = vmatprep.subr.bf16.mxu1 %v17019_v1 }
 0xe7d   :  { %11662 = vmatpush3.bf16.msra.mxu1 %v14701_v19  ;;  %v3960_v19 = vld [vmem:[%s16997_s2 + $0x18] sm:$0xff] }
 0xe7e   :  { %11663 = vmatprep.subr.bf16.mxu1 %v17019_v1 }
 0xe81   :  { %11665 = vmatpush3.bf16.msra.mxu1 %v14729_v9  ;;  %v11621_v9 = vpack.c.bf16 %v3960_v19, %v3957_v14  ;;  %v4211_v19 = vld [vmem:[%s17000_s5 + $0x38] sm:$0xff] }
 0xe82   :  { %11666 = vmatprep.subr.bf16.mxu1 %v17019_v1 }
 0xe83   :  { %11622 = vmatpush1.bf16.msra.mxu0 %v11621_v9 }
 0xe85   :  { %11668 = vmatpush3.bf16.msra.mxu1 %v14756_v39  ;;  %v3964_v39 = vld [vmem:[%s16997_s2 + $0x38] sm:$0xff] }
 0xe86   :  { %11669 = vmatprep.subr.bf16.mxu1 %v17019_v1 }
 0xe89   :  { %11671 = vmatpush3.bf16.msra.mxu1 %v14790_v28  ;;  %v3967_v28 = vld [vmem:[%s16997_s2 + $0x50] sm:$0xff] }
 0xe8a   :  { %11672 = vmatprep.subr.bf16.mxu1 %v17019_v1 }
 0xe8d   :  { %11674 = vmatpush3.bf16.msra.mxu1 %v14812_v54  ;;  %v11623_v54 = vpack.c.bf16 %v3967_v28, %v3964_v39  ;;  %v4212_v28 = vld [vmem:[%s17000_s5 + $0x40] sm:$0xff] }
 0xe8f   :  { %11624 = vmatprep.subr.bf16.mxu0 %v11623_v54  ;;  %v4215_v54 = vld [vmem:[%s17000_s5 + $0x58] sm:$0xff] }
 0xe90   :  { %11626 = vmatpush1.bf16.msra.mxu0 %v11625_v15 }
 0xe91   :  { %11628 = vmatprep.subr.bf16.mxu0 %v14663_v11  ;;  %v4205_v11 = vld [vmem:[%s17000_s5 + $0x8] sm:$0xff] }
 0xe92   :  { %v11675_v59 = vpack.c.bf16 %v4208_v26, %v4205_v11  ;;  %v11711_v11 = vpack.c.bf16 %v4215_v54, %v4212_v28  ;;  %v4220_v26 = vld [vmem:[%s17000_s5 + $0x80] sm:$0xff]  ;;  %v4241_v28 = vld [vmem:[%s17000_s5 + $0x128] sm:$0xff] }
 0xe93   :  { %v4244_v54 = vld [vmem:[%s17000_s5 + $0x140] sm:$0xff] }
 0xe94   :  { %11630 = vmatpush1.bf16.msra.mxu0 %v11629_v13  ;;  %11676 = vmatprep.subr.bf16.mxu1 %v11675_v59  ;;  %v4217_v13 = vld [vmem:[%s17000_s5 + $0x68] sm:$0xff]  ;;  %v4218_v59 = vld [vmem:[%s17000_s5 + $0x70] sm:$0xff] }
 0xe95   :  { %11632 = vmatprep.subr.bf16.mxu0 %v14683_v55  ;;  %v4206_v55 = vld [vmem:[%s17000_s5 + $0x10] sm:$0xff] }
 0xe98   :  { %11634 = vmatpush1.bf16.msra.mxu0 %v14695_v32  ;;  %v4209_v32 = vld [vmem:[%s17000_s5 + $0x28] sm:$0xff] }
 0xe99   :  { %11636 = vmatprep.subr.bf16.mxu0 %v14711_v50  ;;  %v11707_v50 = vpack.c.bf16 %v4209_v32, %v4206_v55  ;;  %v4221_v55 = vld [vmem:[%s17000_s5 + $0x88] sm:$0xff]  ;;  %v11681_v32 = vpack.c.bf16 %v4213_v16, %v4210_v43  ;;  %v11699_v16 = vpack.c.bf16 %v4244_v54, %v4241_v28  ;;  %v4663_v54 = vld [vmem:[%s17001_s6 + $0x140] sm:$0xff] }
 0xe9a   :  { %v4660_v28 = vld [vmem:[%s17001_s6 + $0x128] sm:$0xff] }
 0xe9c   :  { %11638 = vmatpush1.bf16.msra.mxu0 %v14723_v17  ;;  %v3774_v17 = vld [vmem:[%s16999_s4] sm:$0x7] }
 0xe9d   :  { %11640 = vmatprep.subr.bf16.mxu0 %v14742_v7  ;;  %v3779_v7 = vrot.slane %v3774_v17, %v13696_v37  ;;  %v3787_v29 = vrot.slane %v3774_v17, %v13660_v42 }
 0xea0   :  { %11642 = vmatpush1.bf16.msra.mxu0 %v14754_v21  ;;  %v3783_v21 = vrot.slane %v3774_v17, %v13701_v47  ;;  %v17022_v17 = vld [vmem:[#allocation5_spill] sm:$0xff] }
 0xea1   :  { %11644 = vmatprep.subr.bf16.mxu0 %v14768_v23  ;;  %v12755_v23 = vadd.f32 %v3779_v7, %v13704_v51  ;;  %v11683_v7 = vpack.c.bf16 %v4220_v26, %v4217_v13  ;;  %v4243_v26 = vld [vmem:[%s17000_s5 + $0x138] sm:$0xff] }
 0xea4   :  { %11646 = vmatpush1.bf16.msra.mxu0 %v14780_v57  ;;  %v12757_v57 = vadd.f32 %v3783_v21, %v13708_v8  ;;  %v11715_v21 = vpack.c.bf16 %v4221_v55, %v4218_v59  ;;  %v4247_v59 = vld [vmem:[%s17000_s5 + $0x158] sm:$0xff]  ;;  %v4250_v55 = vld [vmem:[%s17000_s5 + $0x170] sm:$0xff] }
 0xea5   :  { %11648 = vmatprep.subr.bf16.mxu0 %v14792_v12 }
 0xea8   :  { %11650 = vmatpush1.bf16.msra.mxu0 %v14808_v4 }
 0xea9   :  { %11708 = vmatprep.subr.bf16.mxu0 %v11707_v50 }
 0xf43   :  { %v3857_v30 = vpop.f32.mrb[28].mxu0  ;;  %v3928_v31 = vpop.f32.mrb[44].mxu1 }
 0xf44   :  { %v12756_v5 = vadd.f32 %v12755_v23, %v3857_v30  ;;  %v3859_v12 = vpop.f32.mrb[29].mxu0  ;;  %v10015_v44 = vpop.f32.mrb[45].mxu1  ;;  %v3929_v46 = vadd.f32 %v3928_v31, %v3787_v29  ;;  %v4216_v23 = vld [vmem:[%s17000_s5 + $0x60] sm:$0xff]  ;;  %v4219_v30 = vld [vmem:[%s17000_s5 + $0x78] sm:$0xff]  ;;  %v4233_v29 = vld [vmem:[%s17000_s5 + $0xe8] sm:$0xff] }
 0xf45   :  { %v12758_v4 = vadd.f32 %v12757_v57, %v3859_v12  ;;  %v4223_v31 = vld [vmem:[%s17000_s5 + $0x98] sm:$0xff]  ;;  %v4224_v57 = vld [vmem:[%s17000_s5 + $0xa0] sm:$0xff]  ;;  %v11685_v12 = vpack.c.bf16 %v4219_v30, %v4216_v23  ;;  %v11703_v23 = vpack.c.bf16 %v4250_v55, %v4247_v59  ;;  %v4669_v55 = vld [vmem:[%s17001_s6 + $0x170] sm:$0xff] }
 0xf46   :  { %v8770_v2 = vmul.f32 -1.442695, %v12756_v5  ;;  %v4227_v5 = vld [vmem:[%s17000_s5 + $0xb8] sm:$0xff] }
 0xf47   :  { %v8771_v10 = vmul.f32 -1.442695, %v12758_v4  ;;  %v4222_v4 = vld [vmem:[%s17000_s5 + $0x90] sm:$0xff]  ;;  %v4666_v59 = vld [vmem:[%s17001_s6 + $0x158] sm:$0xff] }
 0xf48   :  { %13035 = vpow2.f32 %v8770_v2  ;;  %v11719_v2 = vpack.c.bf16 %v4227_v5, %v4224_v57  ;;  %v4624_v57 = vld [vmem:[%s17001_s6 + $0x8] sm:$0xff]  ;;  %v4627_v5 = vld [vmem:[%s17001_s6 + $0x20] sm:$0xff] }
 0xf49   :  { %13037 = vpow2.f32 %v8771_v10  ;;  %v4225_v10 = vld [vmem:[%s17000_s5 + $0xa8] sm:$0xff] }
 0xf52   :  { %v13036_v52 = vpop.eup %13035 }
 0xf53   :  { %v3939_v20 = vadd.f32 1.0, %v13036_v52  ;;  %v13038_v18 = vpop.eup %13037  ;;  %v4229_v52 = vld [vmem:[%s17000_s5 + $0xc8] sm:$0xff] }
 0xf54   :  { %v3946_v58 = vadd.f32 1.0, %v13038_v18  ;;  %v4230_v18 = vld [vmem:[%s17000_s5 + $0xd0] sm:$0xff] }
 0xf55   :  { %13039 = vrcp.f32 %v3939_v20  ;;  %v4232_v20 = vld [vmem:[%s17000_s5 + $0xe0] sm:$0xff] }
 0xf56   :  { %13041 = vrcp.f32 %v3946_v58  ;;  %v11689_v58 = vpack.c.bf16 %v4225_v10, %v4222_v4  ;;  %v4626_v4 = vld [vmem:[%s17001_s6 + $0x18] sm:$0xff] }
 0xf57   :  { %v4630_v10 = vld [vmem:[%s17001_s6 + $0x38] sm:$0xff] }
 0xf5f   :  { %v13040_v62 = vpop.eup %13039 }
 0xf60   :  { %v3949_v60 = vmul.f32 %v13040_v62, %v3929_v46  ;;  %v13042_v36 = vpop.eup %13041  ;;  %v11691_v46 = vpack.c.bf16 %v4232_v20, %v4229_v52  ;;  %v11723_v62 = vpack.c.bf16 %v4233_v29, %v4230_v18  ;;  %v4633_v52 = vld [vmem:[%s17001_s6 + $0x50] sm:$0xff] }
 0xf61   :  { %v3952_v22 = vsub.f32 1.0, %v13042_v36  ;;  %v3954_v39 = vmul.f32 %v13042_v36, %v14926_v63  ;;  %v4235_v36 = vld [vmem:[%s17000_s5 + $0xf8] sm:$0xff]  ;;  %v15173_v18 = vpack.c.bf16 %v4633_v52, %v4630_v10  ;;  %v4629_v29 = vld [vmem:[%s17001_s6 + $0x30] sm:$0xff] }
 0xf62   :  { %v3950_v25 = vadd.f32 %v3949_v60, %v13694_v33  ;;  %v4214_v33 = vld [vmem:[%s17000_s5 + $0x50] sm:$0xff]  ;;  %v4228_v60 = vld [vmem:[%s17000_s5 + $0xc0] sm:$0xff] }
 0xf63   :  { %v11679_v15 = vpack.c.bf16 %v4214_v33, %v4211_v19  ;;  %v11727_v33 = vpack.c.bf16 %v4239_v34, %v4236_v6  ;;  %v4654_v6 = vld [vmem:[%s17001_s6 + $0xf8] sm:$0xff]  ;;  %v4657_v34 = vld [vmem:[%s17001_s6 + $0x110] sm:$0xff] }
 0xf64   :  { %13043 = vtanh.f32 %v3950_v25  ;;  %v4231_v25 = vld [vmem:[%s17000_s5 + $0xd8] sm:$0xff]  ;;  %v4649_v52 = vld [vmem:[%s17001_s6 + $0xd0] sm:$0xff] }
 0xf6e   :  { %v13044_v14 = vpop.eup %13043 }
 0xf6f   :  { %v3953_v9 = vmul.f32 %v13044_v14, %v3952_v22  ;;  %v4238_v22 = vld [vmem:[%s17000_s5 + $0x110] sm:$0xff]  ;;  %v11693_v14 = vpack.c.bf16 %v4231_v25, %v4228_v60  ;;  %v4651_v60 = vld [vmem:[%s17001_s6 + $0xe0] sm:$0xff] }
 0xf70   :  { %v11695_v19 = vpack.c.bf16 %v4238_v22, %v4235_v36  ;;  %v4647_v25 = vld [vmem:[%s17001_s6 + $0xc0] sm:$0xff]  ;;  %v4650_v22 = vld [vmem:[%s17001_s6 + $0xd8] sm:$0xff] }
 0xf71   :  { %v15029_v38 = vadd.f32 %v3954_v39, %v3953_v9  ;;  %v4234_v9 = vld [vmem:[%s17000_s5 + $0xf0] sm:$0xff]  ;;  %v4237_v39 = vld [vmem:[%s17000_s5 + $0x108] sm:$0xff] }
 0xf72   :  { %v11697_v43 = vpack.c.bf16 %v4237_v39, %v4234_v9  ;;  %v4656_v9 = vld [vmem:[%s17001_s6 + $0x108] sm:$0xff] }
 0xf73   :  { %4087 = vmatmul.mubr.f32.vlgmr.msra.gmra.mrb[30].mxu0 %v15029_v38  ;;  %10049 = vmatmul.mubr.f32.vlgmr.msra.gmra.mrb[46].mxu1 %v15029_v38 }
 0xf74   :  { %11678 = vmatpush1.bf16.msra.mxu1 %v11677_v27  ;;  %11710 = vmatpush3.bf16.msra.mxu0 %v11707_v50  ;;  %v4226_v50 = vld [vmem:[%s17000_s5 + $0xb0] sm:$0xff] }
 0xf75   :  { %10083 = vmatprep.mubr.f32.mxu0 %v17022_v17  ;;  %11680 = vmatprep.subr.bf16.mxu1 %v11679_v15  ;;  %v11687_v44 = vpack.c.bf16 %v4226_v50, %v4223_v31  ;;  %v4242_v27 = vld [vmem:[%s17000_s5 + $0x130] sm:$0xff]  ;;  %v4245_v15 = vld [vmem:[%s17000_s5 + $0x148] sm:$0xff] }
 0xf76   :  { %11712 = vmatprep.subr.bf16.mxu0 %v11711_v11  ;;  %4333 = vmatprep.mubr.f32.mxu1 %v17020_v49  ;;  %v11731_v13 = vpack.c.bf16 %v4245_v15, %v4242_v27  ;;  %v4246_v31 = vld [vmem:[%s17000_s5 + $0x150] sm:$0xff]  ;;  %v4249_v50 = vld [vmem:[%s17000_s5 + $0x168] sm:$0xff]  ;;  %v15307_v27 = vpack.c.bf16 %v4663_v54, %v4660_v28  ;;  %v4659_v15 = vld [vmem:[%s17001_s6 + $0x120] sm:$0xff] }
 0xf78   :  { %11682 = vmatpush1.bf16.msra.mxu1 %v11681_v32  ;;  %11714 = vmatpush3.bf16.msra.mxu0 %v11711_v11  ;;  %v4240_v11 = vld [vmem:[%s17000_s5 + $0x120] sm:$0xff] }
 0xf79   :  { %11684 = vmatprep.subr.bf16.mxu1 %v11683_v7  ;;  %11716 = vmatprep.subr.bf16.mxu0 %v11715_v21  ;;  %v4248_v32 = vld [vmem:[%s17000_s5 + $0x160] sm:$0xff]  ;;  %v4251_v7 = vld [vmem:[%s17000_s5 + $0x178] sm:$0xff] }
 0xf7a   :  { %v11735_v30 = vpack.c.bf16 %v4251_v7, %v4248_v32  ;;  %v4665_v32 = vld [vmem:[%s17001_s6 + $0x150] sm:$0xff]  ;;  %v15337_v7 = vpack.c.bf16 %v4669_v55, %v4666_v59 }
 0xf7c   :  { %11686 = vmatpush1.bf16.msra.mxu1 %v11685_v12  ;;  %11718 = vmatpush3.bf16.msra.mxu0 %v11715_v21  ;;  %v11701_v21 = vpack.c.bf16 %v4243_v26, %v4240_v11  ;;  %v11705_v12 = vpack.c.bf16 %v4249_v50, %v4246_v31  ;;  %v4628_v11 = vld [vmem:[%s17001_s6 + $0x28] sm:$0xff]  ;;  %v4634_v31 = vld [vmem:[%s17001_s6 + $0x58] sm:$0xff] }
 0xf7d   :  { %11688 = vmatprep.subr.bf16.mxu1 %v11687_v44  ;;  %11720 = vmatprep.subr.bf16.mxu0 %v11719_v2  ;;  %v15155_v44 = vpack.c.bf16 %v4627_v5, %v4624_v57  ;;  %v4637_v57 = vld [vmem:[%s17001_s6 + $0x70] sm:$0xff]  ;;  %v4640_v5 = vld [vmem:[%s17001_s6 + $0x88] sm:$0xff] }
 0xf80   :  { %11690 = vmatpush1.bf16.msra.mxu1 %v11689_v58  ;;  %11722 = vmatpush3.bf16.msra.mxu0 %v11719_v2  ;;  %v4623_v2 = vld [vmem:[%s17001_s6] sm:$0xff]  ;;  %v4632_v58 = vld [vmem:[%s17001_s6 + $0x48] sm:$0xff] }
 0xf81   :  { %11692 = vmatprep.subr.bf16.mxu1 %v11691_v46  ;;  %11724 = vmatprep.subr.bf16.mxu0 %v11723_v62  ;;  %v15170_v20 = vpack.c.bf16 %v4626_v4, %v4623_v2  ;;  %v17023_v46 = vld [vmem:[#allocation6_spill] sm:$0xff]  ;;  %v4643_v2 = vld [vmem:[%s17001_s6 + $0xa0] sm:$0xff]  ;;  %v4646_v4 = vld [vmem:[%s17001_s6 + $0xb8] sm:$0xff] }
 0xf82   :  { %v15375_v10 = vpack.c.bf16 %v4646_v4, %v4643_v2 }
 0xf84   :  { %11694 = vmatpush1.bf16.msra.mxu1 %v11693_v14  ;;  %11726 = vmatpush3.bf16.msra.mxu0 %v11723_v62  ;;  %v15186_v62 = vpack.c.bf16 %v4632_v58, %v4629_v29  ;;  %v15286_v14 = vpack.c.bf16 %v4650_v22, %v4647_v25  ;;  %v4652_v29 = vld [vmem:[%s17001_s6 + $0xe8] sm:$0xff] }
 0xf85   :  { %11696 = vmatprep.subr.bf16.mxu1 %v11695_v19  ;;  %11728 = vmatprep.subr.bf16.mxu0 %v11727_v33  ;;  %v15288_v19 = vpack.c.bf16 %v4657_v34, %v4654_v6  ;;  %v15384_v58 = vpack.c.bf16 %v4652_v29, %v4649_v52 }
 0xf88   :  { %11698 = vmatpush1.bf16.msra.mxu1 %v11697_v43  ;;  %11730 = vmatpush3.bf16.msra.mxu0 %v11727_v33  ;;  %v4653_v33 = vld [vmem:[%s17001_s6 + $0xf0] sm:$0xff]  ;;  %v4662_v43 = vld [vmem:[%s17001_s6 + $0x138] sm:$0xff] }
 0xf89   :  { %11700 = vmatprep.subr.bf16.mxu1 %v11699_v16  ;;  %11732 = vmatprep.subr.bf16.mxu0 %v11731_v13  ;;  %v15298_v39 = vpack.c.bf16 %v4656_v9, %v4653_v33  ;;  %v15316_v16 = vpack.c.bf16 %v4662_v43, %v4659_v15 }
 0xf8c   :  { %11702 = vmatpush1.bf16.msra.mxu1 %v11701_v21  ;;  %11734 = vmatpush3.bf16.msra.mxu0 %v11731_v13  ;;  %v4625_v13 = vld [vmem:[%s17001_s6 + $0x10] sm:$0xff]  ;;  %v4668_v21 = vld [vmem:[%s17001_s6 + $0x168] sm:$0xff] }
 0xf8d   :  { %11704 = vmatprep.subr.bf16.mxu1 %v11703_v23  ;;  %11736 = vmatprep.subr.bf16.mxu0 %v11735_v30  ;;  %v15325_v26 = vpack.c.bf16 %v4628_v11, %v4625_v13  ;;  %v15343_v23 = vpack.c.bf16 %v4668_v21, %v4665_v32 }
 0xf90   :  { %11706 = vmatpush1.bf16.msra.mxu1 %v11705_v12  ;;  %11738 = vmatpush3.bf16.msra.mxu0 %v11735_v30  ;;  %v4631_v30 = vld [vmem:[%s17001_s6 + $0x40] sm:$0xff]  ;;  %v15365_v12 = vpack.c.bf16 %v4640_v5, %v4637_v57 }
 0xf91   :  { %11740 = vmatprep.subr.bf16.mxu1 %v15155_v44  ;;  %11771 = vmatprep.subr.bf16.mxu0 %v17019_v1  ;;  %v15353_v50 = vpack.c.bf16 %v4634_v31, %v4631_v30 }
 0xf93   :  { %4334 = vmatmul.mubr.f32.vlgmr.msra.gmra.mrb[48].mxu1 %v17022_v17  ;;  %10084 = vmatmul.mubr.f32.vlgmr.msra.gmra.mrb[32].mxu0 %v17023_v46  ;;  %v4648_v17 = vld [vmem:[%s17001_s6 + $0xc8] sm:$0xff] }
 0xf94   :  { %10086 = vmatprep.mubr.f32.mxu0 %v13852_v41  ;;  %4339 = vmatprep.mubr.f32.mxu1 %v17020_v49  ;;  %v15275_v36 = vpack.c.bf16 %v4651_v60, %v4648_v17  ;;  %v4005_v17 = vld [vmem:[%s16999_s4] sm:$0x7] }
 0xf95   :  { %11742 = vmatpush1.bf16.msra.mxu1 %v15170_v20  ;;  %11773 = vmatpush3.bf16.msra.mxu0 %v15325_v26  ;;  %v4010_v60 = vrot.slane %v4005_v17, %v13696_v37  ;;  %v4014_v25 = vrot.slane %v4005_v17, %v13701_v47  ;;  %v4018_v32 = vrot.slane %v4005_v17, %v13660_v42 }
 0xf96   :  { %11744 = vmatprep.subr.bf16.mxu1 %v15173_v18  ;;  %11774 = vmatprep.subr.bf16.mxu0 %v17019_v1 }
 0xf97   :  { %4340 = vmatmul.mubr.f32.gmra.mrb[50].mxu1 %v17023_v46  ;;  %10087 = vmatmul.mubr.f32.gmra.mrb[34].mxu0 %v14053_v40  ;;  %v4655_v46 = vld [vmem:[%s17001_s6 + $0x100] sm:$0xff]  ;;  %v12759_v22 = vadd.f32 %v4010_v60, %v13704_v51  ;;  %v12761_v33 = vadd.f32 %v4014_v25, %v13708_v8 }
 0xf98   :  { %10089 = vmatprep.mubr.f32.mxu0 %v14102_v56  ;;  %4345 = vmatprep.mubr.f32.mxu1 %v17020_v49  ;;  %v17024_v8 = vld [vmem:[#allocation4_spill] sm:$0xff] }
 0xf99   :  { %11746 = vmatpush1.bf16.msra.mxu1 %v15186_v62  ;;  %11776 = vmatpush3.bf16.msra.mxu0 %v15353_v50 }
 0xf9a   :  { %11777 = vmatprep.subr.bf16.mxu0 %v17019_v1 }
 0xf9b   :  { %4346 = vmatmul.mubr.f32.gmra.mrb[52].mxu1 %v13852_v41  ;;  %10090 = vmatmul.mubr.f32.gmra.mrb[36].mxu0 %v14150_v35  ;;  %v4636_v41 = vld [vmem:[%s17001_s6 + $0x68] sm:$0xff] }
 0xf9c   :  { %10092 = vmatprep.mubr.f32.mxu0 %v14240_v24  ;;  %4351 = vmatprep.mubr.f32.mxu1 %v17020_v49 }
 0xf9d   :  { %11779 = vmatpush3.bf16.msra.mxu0 %v15365_v12 }
 0xf9e   :  { %11780 = vmatprep.subr.bf16.mxu0 %v17019_v1 }
 0xf9f   :  { %4352 = vmatmul.mubr.f32.gmra.mrb[54].mxu1 %v14053_v40  ;;  %10093 = vmatmul.mubr.f32.gmra.mrb[38].mxu0 %v14441_v48  ;;  %v4639_v40 = vld [vmem:[%s17001_s6 + $0x80] sm:$0xff] }
 0xfa0   :  { %10095 = vmatprep.mubr.f32.mxu0 %v14490_v45  ;;  %4357 = vmatprep.mubr.f32.mxu1 %v17020_v49 }
 0xfa1   :  { %11782 = vmatpush3.bf16.msra.mxu0 %v15375_v10 }
 0xfa2   :  { %11783 = vmatprep.subr.bf16.mxu0 %v17019_v1 }
 0xfa3   :  { %4358 = vmatmul.mubr.f32.gmra.mrb[56].mxu1 %v14102_v56  ;;  %10096 = vmatmul.mubr.f32.gmra.mrb[40].mxu0 %v14538_v53  ;;  %v15236_v56 = vpack.c.bf16 %v4639_v40, %v4636_v41  ;;  %v4658_v41 = vld [vmem:[%s17001_s6 + $0x118] sm:$0xff] }
 0xfa4   :  { %10098 = vmatprep.mubr.f32.mxu0 %v14628_v0  ;;  %4363 = vmatprep.mubr.f32.mxu1 %v17020_v49  ;;  %v15394_v40 = vpack.c.bf16 %v4658_v41, %v4655_v46 }
 0xfa5   :  { %11748 = vmatprep.subr.bf16.mxu1 %v15236_v56  ;;  %11785 = vmatpush3.bf16.msra.mxu0 %v15384_v58 }
 0xfa6   :  { %11786 = vmatprep.subr.bf16.mxu0 %v17019_v1 }
 0xfa7   :  { %4364 = vmatmul.mubr.f32.gmra.mrb[58].mxu1 %v14150_v35  ;;  %10099 = vmatmul.mubr.f32.gmra.mrb[42].mxu0 %v14829_v61  ;;  %v4635_v35 = vld [vmem:[%s17001_s6 + $0x60] sm:$0xff] }
 0xfa8   :  { %10101 = vmatprep.mubr.f32.mxu0 %v14878_v3  ;;  %4369 = vmatprep.mubr.f32.mxu1 %v17020_v49 }
 0xfa9   :  { %11788 = vmatpush3.bf16.msra.mxu0 %v15394_v40 }
 0xfaa   :  { %11789 = vmatprep.subr.bf16.mxu0 %v17019_v1 }
 0xfab   :  { %4370 = vmatmul.mubr.f32.gmra.mrb[60].mxu1 %v14240_v24  ;;  %10102 = vmatmul.mubr.f32.gmra.mrb[44].mxu0 %v14926_v63  ;;  %v4638_v24 = vld [vmem:[%s17001_s6 + $0x78] sm:$0xff] }
 0xfac   :  { %10104 = vmatprep.mubr.f32.mxu0 %v15029_v38  ;;  %4375 = vmatprep.mubr.f32.mxu1 %v17020_v49 }
 0xfaf   :  { %4376 = vmatmul.mubr.f32.gmra.mrb[62].mxu1 %v14441_v48  ;;  %v15244_v48 = vpack.c.bf16 %v4638_v24, %v4635_v35  ;;  %v4661_v35 = vld [vmem:[%s17001_s6 + $0x130] sm:$0xff]  ;;  %v4664_v24 = vld [vmem:[%s17001_s6 + $0x148] sm:$0xff] }
 0xfb0   :  { %4381 = vmatprep.mubr.f32.mxu1 %v17020_v49 }
 0xfb1   :  { %11750 = vmatpush1.bf16.msra.mxu1 %v15244_v48 }
 0xfb3   :  { %4382 = vmatmul.mubr.f32.gmra.mrb[64].mxu1 %v14490_v45  ;;  %v4642_v45 = vld [vmem:[%s17001_s6 + $0x98] sm:$0xff] }
 0xfb4   :  { %4387 = vmatprep.mubr.f32.mxu1 %v17020_v49 }
 0xfb7   :  { %4388 = vmatmul.mubr.f32.gmra.mrb[66].mxu1 %v14538_v53  ;;  %v4645_v53 = vld [vmem:[%s17001_s6 + $0xb0] sm:$0xff] }
 0xfb8   :  { %4393 = vmatprep.mubr.f32.mxu1 %v17020_v49 }
 0xfbb   :  { %4394 = vmatmul.mubr.f32.gmra.mrb[68].mxu1 %v14628_v0  ;;  %v15254_v0 = vpack.c.bf16 %v4645_v53, %v4642_v45  ;;  %v15404_v45 = vpack.c.bf16 %v4664_v24, %v4661_v35  ;;  %v4667_v53 = vld [vmem:[%s17001_s6 + $0x160] sm:$0xff] }
 0xfbc   :  { %4399 = vmatprep.mubr.f32.mxu1 %v17020_v49 }
 0xfbd   :  { %11752 = vmatprep.subr.bf16.mxu1 %v15254_v0  ;;  %11791 = vmatpush3.bf16.msra.mxu0 %v15404_v45 }
 0xfbe   :  { %11792 = vmatprep.subr.bf16.mxu0 %v17019_v1 }
 0xfbf   :  { %4400 = vmatmul.mubr.f32.gmra.mrb[70].mxu1 %v14829_v61  ;;  %v4641_v61 = vld [vmem:[%s17001_s6 + $0x90] sm:$0xff] }
 0xfc0   :  { %4405 = vmatprep.mubr.f32.mxu1 %v17020_v49 }
 0xfc3   :  { %4406 = vmatmul.mubr.f32.gmra.mrb[72].mxu1 %v14878_v3  ;;  %v4644_v3 = vld [vmem:[%s17001_s6 + $0xa8] sm:$0xff] }
 0xfc4   :  { %4411 = vmatprep.mubr.f32.mxu1 %v17020_v49 }
 0xfc7   :  { %4412 = vmatmul.mubr.f32.gmra.mrb[74].mxu1 %v14926_v63  ;;  %v15262_v63 = vpack.c.bf16 %v4644_v3, %v4641_v61  ;;  %v4670_v61 = vld [vmem:[%s17001_s6 + $0x178] sm:$0xff] }
 0xfc8   :  { %4417 = vmatprep.mubr.f32.mxu1 %v17020_v49  ;;  %v15414_v3 = vpack.c.bf16 %v4670_v61, %v4667_v53 }
 0xfc9   :  { %11754 = vmatpush1.bf16.msra.mxu1 %v15262_v63 }
 0xfca   :  { %11756 = vmatprep.subr.bf16.mxu1 %v15275_v36  ;;  %11794 = vmatpush3.bf16.msra.mxu0 %v15414_v3 }
 0xfcb   :  { %4418 = vmatmul.mubr.f32.gmra.mrb[76].mxu1 %v15029_v38  ;;  %11827 = vmatprep.subr.bf16.mxu0 %v17019_v1 }
 0xfcc   :  { %4423 = vmatprep.mubr.f32.mxu1 %v17020_v49 }
 0xfcd   :  { %11758 = vmatpush1.bf16.msra.mxu1 %v15286_v14 }
 0xfce   :  { %11760 = vmatprep.subr.bf16.mxu1 %v15288_v19 }
 0xfd1   :  { %11762 = vmatpush1.bf16.msra.mxu1 %v15298_v39 }
 0xfd2   :  { %11764 = vmatprep.subr.bf16.mxu1 %v15307_v27 }
 0xfd5   :  { %11766 = vmatpush1.bf16.msra.mxu1 %v15316_v16 }
 0xfd6   :  { %11768 = vmatprep.subr.bf16.mxu1 %v15337_v7 }
 0xfd9   :  { %11770 = vmatpush1.bf16.msra.mxu1 %v15343_v23 }
 0xfda   :  { %11796 = vmatprep.subr.bf16.mxu1 %v15155_v44 }
0x1046   :  { %v4088_v6 = vpop.f32.mrb[30].mxu0  ;;  %v4159_v34 = vpop.f32.mrb[46].mxu1 }
0x1047   :  { %v12760_v9 = vadd.f32 %v12759_v22, %v4088_v6  ;;  %v4090_v28 = vpop.f32.mrb[31].mxu0  ;;  %v10050_v54 = vpop.f32.mrb[47].mxu1  ;;  %v4160_v51 = vadd.f32 %v4159_v34, %v4018_v32 }
0x1048   :  { %v12762_v43 = vadd.f32 %v12761_v33, %v4090_v28  ;;  %v4671_v28 = vld [vmem:[%s17002_s8] sm:$0x7] }
0x1049   :  { %v8772_v15 = vmul.f32 -1.442695, %v12760_v9  ;;  %v4252_v54 = vld [vmem:[%s17003_s7] sm:$0x7] }
0x104a   :  { %v8773_v13 = vmul.f32 -1.442695, %v12762_v43  ;;  %v4676_v43 = vrot.slane %v4671_v28, %v13696_v37 }
0x104b   :  { %13045 = vpow2.f32 %v8772_v15  ;;  %v15504_v15 = vrot.slane %v4252_v54, %v13696_v37 }
0x104c   :  { %13047 = vpow2.f32 %v8773_v13 }
0x104d   :  { %v12763_v32 = vadd.f32 %v4676_v43, %v15504_v15  ;;  %v15519_v43 = vrot.slane %v4252_v54, %v13660_v42 }
0x1055   :  { %v13046_v11 = vpop.eup %13045 }
0x1056   :  { %v4170_v59 = vadd.f32 1.0, %v13046_v11  ;;  %v13048_v55 = vpop.eup %13047  ;;  %v15510_v11 = vrot.slane %v4252_v54, %v13701_v47 }
0x1057   :  { %v4177_v21 = vadd.f32 1.0, %v13048_v55 }
0x1058   :  { %13049 = vrcp.f32 %v4170_v59  ;;  %v4680_v59 = vrot.slane %v4671_v28, %v13701_v47 }
0x1059   :  { %13051 = vrcp.f32 %v4177_v21 }
0x1062   :  { %v13050_v30 = vpop.eup %13049 }
0x1063   :  { %v4180_v31 = vmul.f32 %v13050_v30, %v4160_v51  ;;  %v13052_v29 = vpop.eup %13051  ;;  %v12765_v51 = vadd.f32 %v4680_v59, %v15510_v11 }
0x1064   :  { %v4183_v35 = vsub.f32 1.0, %v13052_v29  ;;  %v4185_v17 = vmul.f32 %v13052_v29, %v15029_v38 }
0x1065   :  { %v4181_v57 = vadd.f32 %v4180_v31, %v17024_v8 }
0x1066   :  { %v15428_v5 = vpop.f32.mrb[32].mxu0 }
0x1067   :  { %13053 = vtanh.f32 %v4181_v57  ;;  %v15430_v2 = vpop.f32.mrb[33].mxu0 }
0x106a   :  { %v15432_v4 = vpop.f32.mrb[34].mxu0 }
0x106b   :  { %v15434_v52 = vpop.f32.mrb[35].mxu0 }
0x106e   :  { %v15436_v46 = vpop.f32.mrb[36].mxu0 }
0x106f   :  { %v15438_v41 = vpop.f32.mrb[37].mxu0 }
0x1071   :  { %v13054_v24 = vpop.eup %13053 }
0x1072   :  { %v15440_v53 = vpop.f32.mrb[38].mxu0  ;;  %v4184_v61 = vmul.f32 %v13054_v24, %v4183_v35 }
0x1073   :  { %v15443_v60 = vpop.f32.mrb[39].mxu0 }
0x1074   :  { %v4186_v25 = vadd.f32 %v4185_v17, %v4184_v61 }
0x1076   :  { %v15445_v22 = vpop.f32.mrb[40].mxu0  ;;  %4424 = vmatmul.mubr.f32.gmra.mrb[78].mxu1 %v4186_v25  ;;  %10105 = vmatmul.mubr.f32.gmra.mrb[46].mxu0 %v4186_v25  ;;  %v4684_v25 = vrot.slane %v4671_v28, %v13660_v42 }
0x1077   :  { %v15447_v6 = vpop.f32.mrb[41].mxu0  ;;  %4752 = vmatprep.mubr.f32.mxu1 %v17020_v49  ;;  %10139 = vmatprep.mubr.msk.f32.mxu0 %vm13217_vm2, %v17020_v49 }
0x107a   :  { %v15452_v34 = vpop.f32.mrb[42].mxu0  ;;  %4753 = vmatmul.mubr.f32.vlgmr.msra.gmra.mrb[48].mxu1 %v17020_v49  ;;  %10140 = vmatmul.mubr.f32.vlgmr.msra.gmra.mrb[48].mxu0 %v17020_v49 }
0x107b   :  { %v15456_v38 = vpop.f32.mrb[43].mxu0  ;;  %11798 = vmatpush1.bf16.msra.mxu1 %v15170_v20  ;;  %11829 = vmatpush3.bf16.msra.mxu0 %v15325_v26 }
0x107c   :  { %11800 = vmatprep.subr.bf16.mxu1 %v15173_v18  ;;  %11830 = vmatprep.subr.bf16.mxu0 %v17019_v1 }
0x107d   :  { %4983 = vmatprep.mubr.f32.mxu1 %v17020_v49  ;;  %10174 = vmatprep.mubr.msk.f32.mxu0 %vm13217_vm2, %v17020_v49 }
0x107e   :  { %v15465_v33 = vpop.f32.mrb[44].mxu0 }
0x107f   :  { %17025 = vst [vmem:[#allocation5_spill] sm:$0xff] %v15465_v33  ;;  %v15467_v9 = vpop.f32.mrb[45].mxu0  ;;  %11802 = vmatpush1.bf16.msra.mxu1 %v15186_v62  ;;  %11832 = vmatpush3.bf16.msra.mxu0 %v15353_v50 }
0x1080   :  { %11804 = vmatprep.subr.bf16.mxu1 %v15236_v56  ;;  %11833 = vmatprep.subr.bf16.mxu0 %v17019_v1 }
0x1083   :  { %11806 = vmatpush1.bf16.msra.mxu1 %v15244_v48  ;;  %11835 = vmatpush3.bf16.msra.mxu0 %v15365_v12 }
0x1084   :  { %11808 = vmatprep.subr.bf16.mxu1 %v15254_v0  ;;  %11836 = vmatprep.subr.bf16.mxu0 %v17019_v1 }
0x1087   :  { %11810 = vmatpush1.bf16.msra.mxu1 %v15262_v63  ;;  %11838 = vmatpush3.bf16.msra.mxu0 %v15375_v10 }
0x1088   :  { %11812 = vmatprep.subr.bf16.mxu1 %v15275_v36  ;;  %11839 = vmatprep.subr.bf16.mxu0 %v17019_v1 }
0x108b   :  { %11814 = vmatpush1.bf16.msra.mxu1 %v15286_v14  ;;  %11841 = vmatpush3.bf16.msra.mxu0 %v15384_v58 }
0x108c   :  { %11816 = vmatprep.subr.bf16.mxu1 %v15288_v19  ;;  %11842 = vmatprep.subr.bf16.mxu0 %v17019_v1 }
0x108f   :  { %11818 = vmatpush1.bf16.msra.mxu1 %v15298_v39  ;;  %11844 = vmatpush3.bf16.msra.mxu0 %v15394_v40 }
0x1090   :  { %11820 = vmatprep.subr.bf16.mxu1 %v15307_v27  ;;  %11845 = vmatprep.subr.bf16.mxu0 %v17019_v1 }
0x1093   :  { %11822 = vmatpush1.bf16.msra.mxu1 %v15316_v16  ;;  %11847 = vmatpush3.bf16.msra.mxu0 %v15404_v45 }
0x1094   :  { %11824 = vmatprep.subr.bf16.mxu1 %v15337_v7  ;;  %11848 = vmatprep.subr.bf16.mxu0 %v17019_v1 }
0x1097   :  { %11826 = vmatpush1.bf16.msra.mxu1 %v15343_v23  ;;  %11850 = vmatpush3.bf16.msra.mxu0 %v15414_v3 }
0x1098   :  { %11852 = vmatprep.subr.bf16.mxu1 %v15155_v44  ;;  %11883 = vmatprep.subr.bf16.mxu0 %v17019_v1 }
0x1149   :  { %v15507_v13 = vpop.f32.mrb[46].mxu0 }
0x114a   :  { %17026 = vst [vmem:[#allocation6_spill] sm:$0xff] %v15507_v13  ;;  %v15513_v55 = vpop.f32.mrb[47].mxu0 }
0x114b   :  { %17027 = vst [vmem:[#allocation4_spill] sm:$0xff] %v15513_v55 }
0x114d   :  { %v4754_v21 = vpop.f32.mrb[48].mxu1  ;;  %v4825_v30 = vpop.f32.mrb[48].mxu0 }
0x114e   :  { %v12764_v31 = vadd.f32 %v12763_v32, %v4754_v21  ;;  %v4756_v8 = vpop.f32.mrb[49].mxu1  ;;  %v10141_v57 = vpop.f32.mrb[49].mxu0  ;;  %v4826_v59 = vadd.f32 %v4825_v30, %v4684_v25  ;;  %v4497_v32 = vadd.f32 %v15430_v2, %v15519_v43  ;;  %v4902_v2 = vld [vmem:[%s17002_s8] sm:$0x7] }
0x114f   :  { %v12766_v35 = vadd.f32 %v12765_v51, %v4756_v8  ;;  %v4911_v54 = vrot.slane %v4902_v2, %v13701_v47 }
0x1150   :  { %v8774_v29 = vmul.f32 -1.442695, %v12764_v31 }
0x1151   :  { %v8775_v24 = vmul.f32 -1.442695, %v12766_v35 }
0x1152   :  { %13055 = vpow2.f32 %v8774_v29 }
0x1153   :  { %13057 = vpow2.f32 %v8775_v24  ;;  %v12769_v24 = vadd.f32 %v4911_v54, %v15510_v11 }
0x115c   :  { %v13056_v61 = vpop.eup %13055 }
0x115d   :  { %v4836_v17 = vadd.f32 1.0, %v13056_v61  ;;  %v13058_v13 = vpop.eup %13057 }
0x115e   :  { %v4843_v55 = vadd.f32 1.0, %v13058_v13 }
0x115f   :  { %13059 = vrcp.f32 %v4836_v17 }
0x1160   :  { %13061 = vrcp.f32 %v4843_v55 }
0x1169   :  { %v13060_v33 = vpop.eup %13059 }
0x116a   :  { %v4846_v21 = vmul.f32 %v13060_v33, %v4826_v59  ;;  %v13062_v31 = vpop.eup %13061  ;;  %v4907_v33 = vrot.slane %v4902_v2, %v13696_v37 }
0x116b   :  { %v4849_v8 = vsub.f32 1.0, %v13062_v31  ;;  %v4851_v35 = vmul.f32 0.0, %v13062_v31 }
0x116c   :  { %v4847_v51 = vadd.f32 %v4846_v21, %v4497_v32  ;;  %v12767_v13 = vadd.f32 %v4907_v33, %v15504_v15  ;;  %v4502_v33 = vadd.f32 %v15428_v5, %v15519_v43  ;;  %v4507_v5 = vadd.f32 %v15434_v52, %v15519_v43  ;;  %v5548_v52 = vld [vmem:[%s17001_s6 + $0x8] sm:$0xff] }
0x116e   :  { %13063 = vtanh.f32 %v4847_v51 }
0x1178   :  { %v13064_v57 = vpop.eup %13063 }
0x1179   :  { %v4850_v29 = vmul.f32 %v13064_v57, %v4849_v8  ;;  %v4915_v8 = vrot.slane %v4902_v2, %v13660_v42 }
0x117b   :  { %v15523_v28 = vadd.f32 %v4851_v35, %v4850_v29 }
0x117d   :  { %4984 = vmatmul.mubr.f32.vlgmr.msra.gmra.mrb[50].mxu1 %v15523_v28  ;;  %10175 = vmatmul.mubr.f32.vlgmr.msra.gmra.mrb[50].mxu0 %v15523_v28 }
0x117e   :  { %11854 = vmatpush1.bf16.msra.mxu1 %v15170_v20  ;;  %11885 = vmatpush3.bf16.msra.mxu0 %v15325_v26 }
0x117f   :  { %11856 = vmatprep.subr.bf16.mxu1 %v15173_v18  ;;  %11886 = vmatprep.subr.bf16.mxu0 %v17019_v1 }
0x1180   :  { %5214 = vmatprep.mubr.f32.mxu1 %v17020_v49  ;;  %10209 = vmatprep.mubr.msk.f32.mxu0 %vm13217_vm2, %v17020_v49 }
0x1182   :  { %11858 = vmatpush1.bf16.msra.mxu1 %v15186_v62  ;;  %11888 = vmatpush3.bf16.msra.mxu0 %v15353_v50 }
0x1183   :  { %11860 = vmatprep.subr.bf16.mxu1 %v15236_v56  ;;  %11889 = vmatprep.subr.bf16.mxu0 %v17019_v1 }
0x1186   :  { %11862 = vmatpush1.bf16.msra.mxu1 %v15244_v48  ;;  %11891 = vmatpush3.bf16.msra.mxu0 %v15365_v12 }
0x1187   :  { %11864 = vmatprep.subr.bf16.mxu1 %v15254_v0  ;;  %11892 = vmatprep.subr.bf16.mxu0 %v17019_v1 }
0x118a   :  { %11866 = vmatpush1.bf16.msra.mxu1 %v15262_v63  ;;  %11894 = vmatpush3.bf16.msra.mxu0 %v15375_v10 }
0x118b   :  { %11868 = vmatprep.subr.bf16.mxu1 %v15275_v36  ;;  %11895 = vmatprep.subr.bf16.mxu0 %v17019_v1 }
0x118e   :  { %11870 = vmatpush1.bf16.msra.mxu1 %v15286_v14  ;;  %11897 = vmatpush3.bf16.msra.mxu0 %v15384_v58 }
0x118f   :  { %11872 = vmatprep.subr.bf16.mxu1 %v15288_v19  ;;  %11898 = vmatprep.subr.bf16.mxu0 %v17019_v1 }
0x1192   :  { %11874 = vmatpush1.bf16.msra.mxu1 %v15298_v39  ;;  %11900 = vmatpush3.bf16.msra.mxu0 %v15394_v40 }
0x1193   :  { %11876 = vmatprep.subr.bf16.mxu1 %v15307_v27  ;;  %11901 = vmatprep.subr.bf16.mxu0 %v17019_v1 }
0x1196   :  { %11878 = vmatpush1.bf16.msra.mxu1 %v15316_v16  ;;  %11903 = vmatpush3.bf16.msra.mxu0 %v15404_v45 }
0x1197   :  { %11880 = vmatprep.subr.bf16.mxu1 %v15337_v7  ;;  %11904 = vmatprep.subr.bf16.mxu0 %v17019_v1 }
0x119a   :  { %11882 = vmatpush1.bf16.msra.mxu1 %v15343_v23  ;;  %11906 = vmatpush3.bf16.msra.mxu0 %v15414_v3 }
0x119b   :  { %11908 = vmatprep.subr.bf16.mxu1 %v15155_v44  ;;  %11939 = vmatprep.subr.bf16.mxu0 %v17019_v1 }
0x1250   :  { %v4985_v55 = vpop.f32.mrb[50].mxu1  ;;  %v5056_v30 = vpop.f32.mrb[50].mxu0 }
0x1251   :  { %v12768_v61 = vadd.f32 %v12767_v13, %v4985_v55  ;;  %v4987_v17 = vpop.f32.mrb[51].mxu1  ;;  %v10176_v25 = vpop.f32.mrb[51].mxu0  ;;  %v5057_v29 = vadd.f32 %v5056_v30, %v4915_v8 }
0x1252   :  { %v12770_v59 = vadd.f32 %v12769_v24, %v4987_v17 }
0x1253   :  { %v8776_v44 = vmul.f32 -1.442695, %v12768_v61 }
0x1254   :  { %v8777_v32 = vmul.f32 -1.442695, %v12770_v59 }
0x1255   :  { %13065 = vpow2.f32 %v8776_v44 }
0x1256   :  { %13067 = vpow2.f32 %v8777_v32 }
0x125f   :  { %v13066_v21 = vpop.eup %13065 }
0x1260   :  { %v5067_v51 = vadd.f32 1.0, %v13066_v21  ;;  %v13068_v31 = vpop.eup %13067 }
0x1261   :  { %v5074_v57 = vadd.f32 1.0, %v13068_v31 }
0x1262   :  { %13069 = vrcp.f32 %v5067_v51 }
0x1263   :  { %13071 = vrcp.f32 %v5074_v57 }
0x126c   :  { %v13070_v35 = vpop.eup %13069 }
0x126d   :  { %v5077_v54 = vmul.f32 %v13070_v35, %v5057_v29  ;;  %v13072_v55 = vpop.eup %13071  ;;  %v5554_v35 = vld [vmem:[%s17001_s6 + $0x38] sm:$0xff] }
0x126e   :  { %v5080_v24 = vsub.f32 1.0, %v13072_v55  ;;  %v5082_v25 = vmul.f32 %v13072_v55, %v15523_v28  ;;  %v5556_v55 = vld [vmem:[%s17001_s6 + $0x48] sm:$0xff] }
0x126f   :  { %v5078_v13 = vadd.f32 %v5077_v54, %v4502_v33  ;;  %v5557_v33 = vld [vmem:[%s17001_s6 + $0x50] sm:$0xff] }
0x1270   :  { %v15659_v54 = vpack.c.bf16 %v5557_v33, %v5554_v35  ;;  %v5583_v35 = vld [vmem:[%s17001_s6 + $0x120] sm:$0xff] }
0x1271   :  { %13073 = vtanh.f32 %v5078_v13  ;;  %v5553_v13 = vld [vmem:[%s17001_s6 + $0x30] sm:$0xff] }
0x127b   :  { %v13074_v61 = vpop.eup %13073 }
0x127c   :  { %v5081_v17 = vmul.f32 %v13074_v61, %v5080_v24  ;;  %v15667_v24 = vpack.c.bf16 %v5556_v55, %v5553_v13  ;;  %v5560_v61 = vld [vmem:[%s17001_s6 + $0x68] sm:$0xff]  ;;  %v5586_v13 = vld [vmem:[%s17001_s6 + $0x138] sm:$0xff]  ;;  %v5585_v55 = vld [vmem:[%s17001_s6 + $0x130] sm:$0xff] }
0x127e   :  { %v15573_v44 = vadd.f32 %v5082_v25, %v5081_v17  ;;  %v5563_v17 = vld [vmem:[%s17001_s6 + $0x80] sm:$0xff] }
0x127f   :  { %v15677_v25 = vpack.c.bf16 %v5563_v17, %v5560_v61  ;;  %v5588_v61 = vld [vmem:[%s17001_s6 + $0x148] sm:$0xff]  ;;  %v5590_v17 = vld [vmem:[%s17001_s6 + $0x158] sm:$0xff] }
0x1280   :  { %5215 = vmatmul.mubr.f32.vlgmr.msra.gmra.mrb[52].mxu1 %v15573_v44  ;;  %10210 = vmatmul.mubr.f32.vlgmr.msra.gmra.mrb[52].mxu0 %v15573_v44 }
0x1281   :  { %11910 = vmatpush1.bf16.msra.mxu1 %v15170_v20  ;;  %11941 = vmatpush3.bf16.msra.mxu0 %v15325_v26  ;;  %v5133_v20 = vld [vmem:[%s17002_s8] sm:$0x7] }
0x1282   :  { %11912 = vmatprep.subr.bf16.mxu1 %v15173_v18  ;;  %11942 = vmatprep.subr.bf16.mxu0 %v17019_v1  ;;  %v5138_v18 = vrot.slane %v5133_v20, %v13696_v37 }
0x1283   :  { %5445 = vmatprep.mubr.f32.mxu1 %v17020_v49  ;;  %10244 = vmatprep.mubr.msk.f32.mxu0 %vm13217_vm2, %v17020_v49 }
0x1285   :  { %11914 = vmatpush1.bf16.msra.mxu1 %v15186_v62  ;;  %11944 = vmatpush3.bf16.msra.mxu0 %v15353_v50  ;;  %v5142_v62 = vrot.slane %v5133_v20, %v13701_v47 }
0x1286   :  { %11916 = vmatprep.subr.bf16.mxu1 %v15236_v56  ;;  %11945 = vmatprep.subr.bf16.mxu0 %v17019_v1  ;;  %v12771_v56 = vadd.f32 %v5138_v18, %v15504_v15  ;;  %v5562_v18 = vld [vmem:[%s17001_s6 + $0x78] sm:$0xff] }
0x1289   :  { %11918 = vmatpush1.bf16.msra.mxu1 %v15244_v48  ;;  %11947 = vmatpush3.bf16.msra.mxu0 %v15365_v12 }
0x128a   :  { %11920 = vmatprep.subr.bf16.mxu1 %v15254_v0  ;;  %11948 = vmatprep.subr.bf16.mxu0 %v17019_v1 }
0x128d   :  { %11922 = vmatpush1.bf16.msra.mxu1 %v15262_v63  ;;  %11950 = vmatpush3.bf16.msra.mxu0 %v15375_v10  ;;  %v12773_v63 = vadd.f32 %v5142_v62, %v15510_v11 }
0x128e   :  { %11924 = vmatprep.subr.bf16.mxu1 %v15275_v36  ;;  %11951 = vmatprep.subr.bf16.mxu0 %v17019_v1 }
0x1291   :  { %11926 = vmatpush1.bf16.msra.mxu1 %v15286_v14  ;;  %11953 = vmatpush3.bf16.msra.mxu0 %v15384_v58  ;;  %v5146_v58 = vrot.slane %v5133_v20, %v13660_v42  ;;  %v5559_v20 = vld [vmem:[%s17001_s6 + $0x60] sm:$0xff] }
0x1292   :  { %11928 = vmatprep.subr.bf16.mxu1 %v15288_v19  ;;  %11954 = vmatprep.subr.bf16.mxu0 %v17019_v1  ;;  %v15685_v62 = vpack.c.bf16 %v5562_v18, %v5559_v20  ;;  %v5593_v20 = vld [vmem:[%s17001_s6 + $0x170] sm:$0xff]  ;;  %v15797_v18 = vpack.c.bf16 %v5586_v13, %v5583_v35 }
0x1295   :  { %11930 = vmatpush1.bf16.msra.mxu1 %v15298_v39  ;;  %11956 = vmatpush3.bf16.msra.mxu0 %v15394_v40 }
0x1296   :  { %11932 = vmatprep.subr.bf16.mxu1 %v15307_v27  ;;  %11957 = vmatprep.subr.bf16.mxu0 %v17019_v1 }
0x1299   :  { %11934 = vmatpush1.bf16.msra.mxu1 %v15316_v16  ;;  %11959 = vmatpush3.bf16.msra.mxu0 %v15404_v45 }
0x129a   :  { %11936 = vmatprep.subr.bf16.mxu1 %v15337_v7  ;;  %11960 = vmatprep.subr.bf16.mxu0 %v17019_v1 }
0x129d   :  { %11938 = vmatpush1.bf16.msra.mxu1 %v15343_v23  ;;  %11962 = vmatpush3.bf16.msra.mxu0 %v15414_v3 }
0x129e   :  { %11995 = vmatprep.subr.bf16.mxu0 %v17019_v1 }
0x1353   :  { %v5216_v48 = vpop.f32.mrb[52].mxu1  ;;  %v5287_v0 = vpop.f32.mrb[52].mxu0 }
0x1354   :  { %v12772_v36 = vadd.f32 %v12771_v56, %v5216_v48  ;;  %v5218_v14 = vpop.f32.mrb[53].mxu1  ;;  %v10211_v19 = vpop.f32.mrb[53].mxu0  ;;  %v5288_v45 = vadd.f32 %v5287_v0, %v5146_v58  ;;  %v5566_v56 = vld [vmem:[%s17001_s6 + $0x98] sm:$0xff]  ;;  %v5569_v48 = vld [vmem:[%s17001_s6 + $0xb0] sm:$0xff] }
0x1355   :  { %v12774_v27 = vadd.f32 %v12773_v63, %v5218_v14  ;;  %v15695_v0 = vpack.c.bf16 %v5569_v48, %v5566_v56  ;;  %v5565_v63 = vld [vmem:[%s17001_s6 + $0x90] sm:$0xff]  ;;  %v5567_v14 = vld [vmem:[%s17001_s6 + $0xa0] sm:$0xff]  ;;  %v5574_v58 = vld [vmem:[%s17001_s6 + $0xd8] sm:$0xff]  ;;  %v15801_v56 = vpack.c.bf16 %v5588_v61, %v5585_v55  ;;  %v15803_v48 = vpack.c.bf16 %v5593_v20, %v5590_v17 }
0x1356   :  { %v8778_v39 = vmul.f32 -1.442695, %v12772_v36  ;;  %v5568_v36 = vld [vmem:[%s17001_s6 + $0xa8] sm:$0xff] }
0x1357   :  { %v8779_v16 = vmul.f32 -1.442695, %v12774_v27  ;;  %v15706_v19 = vpack.c.bf16 %v5568_v36, %v5565_v63  ;;  %v5589_v63 = vld [vmem:[%s17001_s6 + $0x150] sm:$0xff]  ;;  %v5592_v36 = vld [vmem:[%s17001_s6 + $0x168] sm:$0xff] }
0x1358   :  { %13075 = vpow2.f32 %v8778_v39  ;;  %v5570_v39 = vld [vmem:[%s17001_s6 + $0xb8] sm:$0xff] }
0x1359   :  { %13077 = vpow2.f32 %v8779_v16  ;;  %v15712_v27 = vpack.c.bf16 %v5570_v39, %v5567_v14  ;;  %v5572_v16 = vld [vmem:[%s17001_s6 + $0xc8] sm:$0xff]  ;;  %v5591_v14 = vld [vmem:[%s17001_s6 + $0x160] sm:$0xff]  ;;  %v5594_v39 = vld [vmem:[%s17001_s6 + $0x178] sm:$0xff] }
0x1362   :  { %v13076_v7 = vpop.eup %13075 }
0x1363   :  { %v5298_v23 = vadd.f32 1.0, %v13076_v7  ;;  %v13078_v10 = vpop.eup %13077  ;;  %v5575_v7 = vld [vmem:[%s17001_s6 + $0xe0] sm:$0xff] }
0x1364   :  { %v5305_v40 = vadd.f32 1.0, %v13078_v10  ;;  %v5571_v10 = vld [vmem:[%s17001_s6 + $0xc0] sm:$0xff] }
0x1365   :  { %13079 = vrcp.f32 %v5298_v23  ;;  %v15722_v23 = vpack.c.bf16 %v5575_v7, %v5572_v16  ;;  %v15819_v16 = vpack.c.bf16 %v5592_v36, %v5589_v63  ;;  %v15823_v7 = vpack.c.bf16 %v5594_v39, %v5591_v14 }
0x1366   :  { %13081 = vrcp.f32 %v5305_v40  ;;  %v5573_v40 = vld [vmem:[%s17001_s6 + $0xd0] sm:$0xff]  ;;  %v4512_v14 = vadd.f32 %v15432_v4, %v15519_v43 }
0x1367   :  { %v5780_v4 = vld [vmem:[%s17001_s6 + $0x10] sm:$0xff] }
0x136f   :  { %v13080_v3 = vpop.eup %13079 }
0x1370   :  { %v5308_v2 = vmul.f32 %v13080_v3, %v5288_v45  ;;  %v13082_v59 = vpop.eup %13081  ;;  %v15734_v45 = vpack.c.bf16 %v5574_v58, %v5571_v10  ;;  %v5576_v3 = vld [vmem:[%s17001_s6 + $0xe8] sm:$0xff]  ;;  %v5364_v10 = vld [vmem:[%s17002_s8] sm:$0x7] }
0x1371   :  { %v5311_v32 = vsub.f32 1.0, %v13082_v59  ;;  %v5313_v31 = vmul.f32 %v13082_v59, %v15573_v44  ;;  %v5577_v59 = vld [vmem:[%s17001_s6 + $0xf0] sm:$0xff]  ;;  %v5369_v58 = vrot.slane %v5364_v10, %v13696_v37  ;;  %v5377_v17 = vrot.slane %v5364_v10, %v13660_v42 }
0x1372   :  { %v5309_v30 = vadd.f32 %v5308_v2, %v4507_v5  ;;  %v15740_v5 = vpack.c.bf16 %v5576_v3, %v5573_v40  ;;  %v5578_v2 = vld [vmem:[%s17001_s6 + $0xf8] sm:$0xff]  ;;  %v5373_v40 = vrot.slane %v5364_v10, %v13701_v47  ;;  %v5783_v10 = vld [vmem:[%s17001_s6 + $0x28] sm:$0xff] }
0x1373   :  { %v12775_v3 = vadd.f32 %v5369_v58, %v15504_v15 }
0x1374   :  { %13083 = vtanh.f32 %v5309_v30  ;;  %v5581_v30 = vld [vmem:[%s17001_s6 + $0x110] sm:$0xff] }
0x137e   :  { %v13084_v21 = vpop.eup %13083 }
0x137f   :  { %v5312_v51 = vmul.f32 %v13084_v21, %v5311_v32  ;;  %v15752_v32 = vpack.c.bf16 %v5581_v30, %v5578_v2  ;;  %v5580_v21 = vld [vmem:[%s17001_s6 + $0x108] sm:$0xff] }
0x1381   :  { %v15622_v8 = vadd.f32 %v5313_v31, %v5312_v51  ;;  %v5579_v51 = vld [vmem:[%s17001_s6 + $0x100] sm:$0xff]  ;;  %v5582_v31 = vld [vmem:[%s17001_s6 + $0x118] sm:$0xff] }
0x1383   :  { %5446 = vmatmul.mubr.f32.vlgmr.msra.gmra.mrb[54].mxu1 %v15622_v8  ;;  %10245 = vmatmul.mubr.f32.vlgmr.msra.gmra.mrb[54].mxu0 %v15622_v8 }
0x1384   :  { %11997 = vmatpush3.bf16.msra.mxu0 %v15325_v26  ;;  %5676 = vmatprep.mubr.f32.mxu1 %v17020_v49  ;;  %v5551_v26 = vld [vmem:[%s17001_s6 + $0x20] sm:$0xff] }
0x1385   :  { %11998 = vmatprep.subr.bf16.mxu0 %v17019_v1  ;;  %10279 = vmatprep.mubr.msk.f32.mxu0 %vm13217_vm2, %v17020_v49  ;;  %v15641_v57 = vpack.c.bf16 %v5551_v26, %v5548_v52  ;;  %v15764_v52 = vpack.c.bf16 %v5580_v21, %v5577_v59  ;;  %v15766_v26 = vpack.c.bf16 %v5582_v31, %v5579_v51 }
0x1386   :  { %v12777_v59 = vadd.f32 %v5373_v40, %v15510_v11 }
0x1387   :  { %11964 = vmatprep.subr.bf16.mxu1 %v15641_v57 }
0x1388   :  { %12000 = vmatpush3.bf16.msra.mxu0 %v15353_v50  ;;  %v5547_v50 = vld [vmem:[%s17001_s6] sm:$0xff] }
0x1389   :  { %12001 = vmatprep.subr.bf16.mxu0 %v17019_v1 }
0x138c   :  { %12003 = vmatpush3.bf16.msra.mxu0 %v15365_v12  ;;  %v5550_v12 = vld [vmem:[%s17001_s6 + $0x18] sm:$0xff] }
0x138d   :  { %12004 = vmatprep.subr.bf16.mxu0 %v17019_v1  ;;  %v15649_v29 = vpack.c.bf16 %v5550_v12, %v5547_v50  ;;  %v5584_v50 = vld [vmem:[%s17001_s6 + $0x128] sm:$0xff]  ;;  %v5587_v12 = vld [vmem:[%s17001_s6 + $0x140] sm:$0xff] }
0x138e   :  { %v15779_v33 = vpack.c.bf16 %v5587_v12, %v5584_v50 }
0x138f   :  { %11966 = vmatpush1.bf16.msra.mxu1 %v15649_v29 }
0x1390   :  { %11968 = vmatprep.subr.bf16.mxu1 %v15659_v54  ;;  %12006 = vmatpush3.bf16.msra.mxu0 %v15712_v27 }
0x1391   :  { %12007 = vmatprep.subr.bf16.mxu0 %v17019_v1 }
0x1393   :  { %11970 = vmatpush1.bf16.msra.mxu1 %v15667_v24 }
0x1394   :  { %11972 = vmatprep.subr.bf16.mxu1 %v15677_v25  ;;  %12009 = vmatpush3.bf16.msra.mxu0 %v15740_v5 }
0x1395   :  { %12010 = vmatprep.subr.bf16.mxu0 %v17019_v1 }
0x1397   :  { %11974 = vmatpush1.bf16.msra.mxu1 %v15685_v62 }
0x1398   :  { %11976 = vmatprep.subr.bf16.mxu1 %v15695_v0  ;;  %12012 = vmatpush3.bf16.msra.mxu0 %v15766_v26 }
0x1399   :  { %12013 = vmatprep.subr.bf16.mxu0 %v17019_v1 }
0x139b   :  { %11978 = vmatpush1.bf16.msra.mxu1 %v15706_v19 }
0x139c   :  { %11980 = vmatprep.subr.bf16.mxu1 %v15722_v23  ;;  %12015 = vmatpush3.bf16.msra.mxu0 %v15801_v56 }
0x139d   :  { %12016 = vmatprep.subr.bf16.mxu0 %v17019_v1 }
0x139f   :  { %11982 = vmatpush1.bf16.msra.mxu1 %v15734_v45 }
0x13a0   :  { %11984 = vmatprep.subr.bf16.mxu1 %v15752_v32  ;;  %12018 = vmatpush3.bf16.msra.mxu0 %v15823_v7 }
0x13a1   :  { %12051 = vmatprep.subr.bf16.mxu0 %v17019_v1 }
0x13a3   :  { %11986 = vmatpush1.bf16.msra.mxu1 %v15764_v52 }
0x13a4   :  { %11988 = vmatprep.subr.bf16.mxu1 %v15779_v33 }
0x13a7   :  { %11990 = vmatpush1.bf16.msra.mxu1 %v15797_v18 }
0x13a8   :  { %11992 = vmatprep.subr.bf16.mxu1 %v15803_v48 }
0x13ab   :  { %11994 = vmatpush1.bf16.msra.mxu1 %v15819_v16 }
0x13ac   :  { %12020 = vmatprep.subr.bf16.mxu1 %v15641_v57 }
0x1456   :  { %v5447_v2 = vpop.f32.mrb[54].mxu1  ;;  %v5518_v30 = vpop.f32.mrb[54].mxu0 }
0x1457   :  { %v12776_v21 = vadd.f32 %v12775_v3, %v5447_v2  ;;  %v5449_v51 = vpop.f32.mrb[55].mxu1  ;;  %v10246_v31 = vpop.f32.mrb[55].mxu0  ;;  %v5519_v63 = vadd.f32 %v5518_v30, %v5377_v17  ;;  %v15870_v30 = vpack.c.bf16 %v5783_v10, %v5780_v4 }
0x1458   :  { %v12778_v12 = vadd.f32 %v12777_v59, %v5449_v51  ;;  %v5786_v31 = vld [vmem:[%s17001_s6 + $0x40] sm:$0xff] }
0x1459   :  { %v8780_v50 = vmul.f32 -1.442695, %v12776_v21 }
0x145a   :  { %v8781_v35 = vmul.f32 -1.442695, %v12778_v12 }
0x145b   :  { %13085 = vpow2.f32 %v8780_v50  ;;  %v5789_v50 = vld [vmem:[%s17001_s6 + $0x58] sm:$0xff] }
0x145c   :  { %13087 = vpow2.f32 %v8781_v35  ;;  %v15880_v12 = vpack.c.bf16 %v5789_v50, %v5786_v31  ;;  %v5792_v35 = vld [vmem:[%s17001_s6 + $0x70] sm:$0xff] }
0x1465   :  { %v13086_v13 = vpop.eup %13085 }
0x1466   :  { %v5529_v55 = vadd.f32 1.0, %v13086_v13  ;;  %v13088_v61 = vpop.eup %13087  ;;  %v5795_v13 = vld [vmem:[%s17001_s6 + $0x88] sm:$0xff] }
0x1467   :  { %v5536_v20 = vadd.f32 1.0, %v13088_v61  ;;  %v5595_v61 = vld [vmem:[%s17002_s8] sm:$0x7] }
0x1468   :  { %13089 = vrcp.f32 %v5529_v55  ;;  %v15890_v55 = vpack.c.bf16 %v5795_v13, %v5792_v35  ;;  %v5600_v17 = vrot.slane %v5595_v61, %v13696_v37  ;;  %v5608_v50 = vrot.slane %v5595_v61, %v13660_v42 }
0x1469   :  { %13091 = vrcp.f32 %v5536_v20  ;;  %v5604_v20 = vrot.slane %v5595_v61, %v13701_v47 }
0x1472   :  { %v13090_v36 = vpop.eup %13089 }
0x1473   :  { %v5539_v39 = vmul.f32 %v13090_v36, %v5519_v63  ;;  %v13092_v40 = vpop.eup %13091  ;;  %v12779_v63 = vadd.f32 %v5600_v17, %v15504_v15 }
0x1474   :  { %v5542_v3 = vsub.f32 1.0, %v13092_v40  ;;  %v5544_v21 = vmul.f32 %v13092_v40, %v15622_v8 }
0x1475   :  { %v5540_v58 = vadd.f32 %v5539_v39, %v4512_v14  ;;  %v12781_v39 = vadd.f32 %v5604_v20, %v15510_v11  ;;  %v4517_v20 = vadd.f32 %v15438_v41, %v15519_v43  ;;  %v5826_v41 = vld [vmem:[%s17002_s8] sm:$0x7] }
0x1476   :  { %v5831_v61 = vrot.slane %v5826_v41, %v13696_v37 }
0x1477   :  { %13093 = vtanh.f32 %v5540_v58 }
0x1481   :  { %v13094_v2 = vpop.eup %13093 }
0x1482   :  { %v5543_v59 = vmul.f32 %v13094_v2, %v5542_v3 }
0x1484   :  { %v15841_v51 = vadd.f32 %v5544_v21, %v5543_v59 }
0x1486   :  { %5677 = vmatmul.mubr.f32.vlgmr.msra.gmra.mrb[56].mxu1 %v15841_v51  ;;  %10280 = vmatmul.mubr.f32.vlgmr.msra.gmra.mrb[56].mxu0 %v15841_v51 }
0x1487   :  { %12022 = vmatpush1.bf16.msra.mxu1 %v15649_v29  ;;  %5907 = vmatprep.mubr.f32.mxu1 %v17020_v49 }
0x1488   :  { %12024 = vmatprep.subr.bf16.mxu1 %v15659_v54  ;;  %10314 = vmatprep.mubr.msk.f32.mxu0 %vm13217_vm2, %v17020_v49 }
0x1489   :  { %12053 = vmatpush3.bf16.msra.mxu0 %v15870_v30 }
0x148a   :  { %12054 = vmatprep.subr.bf16.mxu0 %v17019_v1 }
0x148b   :  { %12026 = vmatpush1.bf16.msra.mxu1 %v15667_v24 }
0x148c   :  { %12028 = vmatprep.subr.bf16.mxu1 %v15677_v25 }
0x148d   :  { %12056 = vmatpush3.bf16.msra.mxu0 %v15880_v12 }
0x148e   :  { %12057 = vmatprep.subr.bf16.mxu0 %v17019_v1 }
0x148f   :  { %12030 = vmatpush1.bf16.msra.mxu1 %v15685_v62 }
0x1490   :  { %12032 = vmatprep.subr.bf16.mxu1 %v15695_v0 }
0x1491   :  { %12059 = vmatpush3.bf16.msra.mxu0 %v15890_v55 }
0x1492   :  { %12060 = vmatprep.subr.bf16.mxu0 %v17019_v1 }
0x1493   :  { %12034 = vmatpush1.bf16.msra.mxu1 %v15706_v19 }
0x1494   :  { %12036 = vmatprep.subr.bf16.mxu1 %v15722_v23 }
0x1495   :  { %12062 = vmatpush3.bf16.msra.mxu0 %v15712_v27 }
0x1496   :  { %12063 = vmatprep.subr.bf16.mxu0 %v17019_v1 }
0x1497   :  { %12038 = vmatpush1.bf16.msra.mxu1 %v15734_v45 }
0x1498   :  { %12040 = vmatprep.subr.bf16.mxu1 %v15752_v32 }
0x1499   :  { %12065 = vmatpush3.bf16.msra.mxu0 %v15740_v5 }
0x149a   :  { %12066 = vmatprep.subr.bf16.mxu0 %v17019_v1 }
0x149b   :  { %12042 = vmatpush1.bf16.msra.mxu1 %v15764_v52 }
0x149c   :  { %12044 = vmatprep.subr.bf16.mxu1 %v15779_v33 }
0x149d   :  { %12068 = vmatpush3.bf16.msra.mxu0 %v15766_v26 }
0x149e   :  { %12069 = vmatprep.subr.bf16.mxu0 %v17019_v1 }
0x149f   :  { %12046 = vmatpush1.bf16.msra.mxu1 %v15797_v18 }
0x14a0   :  { %12048 = vmatprep.subr.bf16.mxu1 %v15803_v48 }
0x14a1   :  { %12071 = vmatpush3.bf16.msra.mxu0 %v15801_v56 }
0x14a2   :  { %12072 = vmatprep.subr.bf16.mxu0 %v17019_v1 }
0x14a3   :  { %12050 = vmatpush1.bf16.msra.mxu1 %v15819_v16 }
0x14a4   :  { %12076 = vmatprep.subr.bf16.mxu1 %v15641_v57 }
0x14a5   :  { %12074 = vmatpush3.bf16.msra.mxu0 %v15823_v7 }
0x14a6   :  { %12107 = vmatprep.subr.bf16.mxu0 %v17019_v1 }
0x1559   :  { %v5678_v36 = vpop.f32.mrb[56].mxu1  ;;  %v5749_v14 = vpop.f32.mrb[56].mxu0 }
0x155a   :  { %v12780_v58 = vadd.f32 %v12779_v63, %v5678_v36  ;;  %v5680_v40 = vpop.f32.mrb[57].mxu1  ;;  %v10281_v3 = vpop.f32.mrb[57].mxu0  ;;  %v5750_v13 = vadd.f32 %v5749_v14, %v5608_v50  ;;  %v5835_v14 = vrot.slane %v5826_v41, %v13701_v47 }
0x155b   :  { %v12782_v59 = vadd.f32 %v12781_v39, %v5680_v40 }
0x155c   :  { %v8782_v2 = vmul.f32 -1.442695, %v12780_v58 }
0x155d   :  { %v8783_v21 = vmul.f32 -1.442695, %v12782_v59 }
0x155e   :  { %13095 = vpow2.f32 %v8782_v2 }
0x155f   :  { %13097 = vpow2.f32 %v8783_v21  ;;  %v12783_v21 = vadd.f32 %v5831_v61, %v15504_v15  ;;  %v4522_v61 = vadd.f32 %v15436_v46, %v15519_v43  ;;  %v6057_v46 = vld [vmem:[%s17002_s8] sm:$0x7] }
0x1568   :  { %v13096_v4 = vpop.eup %13095 }
0x1569   :  { %v5760_v10 = vadd.f32 1.0, %v13096_v4  ;;  %v13098_v31 = vpop.eup %13097 }
0x156a   :  { %v5767_v35 = vadd.f32 1.0, %v13098_v31  ;;  %v12785_v31 = vadd.f32 %v5835_v14, %v15510_v11 }
0x156b   :  { %13099 = vrcp.f32 %v5760_v10 }
0x156c   :  { %13101 = vrcp.f32 %v5767_v35 }
0x1575   :  { %v13100_v17 = vpop.eup %13099 }
0x1576   :  { %v5770_v63 = vmul.f32 %v13100_v17, %v5750_v13  ;;  %v13102_v39 = vpop.eup %13101 }
0x1577   :  { %v5773_v58 = vsub.f32 1.0, %v13102_v39  ;;  %v5775_v2 = vmul.f32 %v13102_v39, %v15841_v51 }
0x1578   :  { %v5771_v36 = vadd.f32 %v5770_v63, %v4517_v20 }
0x157a   :  { %13103 = vtanh.f32 %v5771_v36 }
0x1584   :  { %v13104_v40 = vpop.eup %13103 }
0x1585   :  { %v5774_v3 = vmul.f32 %v13104_v40, %v5773_v58  ;;  %v5839_v58 = vrot.slane %v5826_v41, %v13660_v42 }
0x1587   :  { %v15915_v59 = vadd.f32 %v5775_v2, %v5774_v3 }
0x1589   :  { %5908 = vmatmul.mubr.f32.vlgmr.msra.gmra.mrb[58].mxu1 %v15915_v59  ;;  %10315 = vmatmul.mubr.f32.vlgmr.msra.gmra.mrb[58].mxu0 %v15915_v59 }
0x158a   :  { %12078 = vmatpush1.bf16.msra.mxu1 %v15649_v29  ;;  %12109 = vmatpush3.bf16.msra.mxu0 %v15870_v30 }
0x158b   :  { %12080 = vmatprep.subr.bf16.mxu1 %v15659_v54  ;;  %12110 = vmatprep.subr.bf16.mxu0 %v17019_v1 }
0x158c   :  { %6138 = vmatprep.mubr.f32.mxu1 %v17020_v49  ;;  %10349 = vmatprep.mubr.msk.f32.mxu0 %vm13217_vm2, %v17020_v49 }
0x158e   :  { %12082 = vmatpush1.bf16.msra.mxu1 %v15667_v24  ;;  %12112 = vmatpush3.bf16.msra.mxu0 %v15880_v12 }
0x158f   :  { %12084 = vmatprep.subr.bf16.mxu1 %v15677_v25  ;;  %12113 = vmatprep.subr.bf16.mxu0 %v17019_v1 }
0x1592   :  { %12086 = vmatpush1.bf16.msra.mxu1 %v15685_v62  ;;  %12115 = vmatpush3.bf16.msra.mxu0 %v15890_v55 }
0x1593   :  { %12088 = vmatprep.subr.bf16.mxu1 %v15695_v0  ;;  %12116 = vmatprep.subr.bf16.mxu0 %v17019_v1 }
0x1596   :  { %12090 = vmatpush1.bf16.msra.mxu1 %v15706_v19  ;;  %12118 = vmatpush3.bf16.msra.mxu0 %v15712_v27 }
0x1597   :  { %12092 = vmatprep.subr.bf16.mxu1 %v15722_v23  ;;  %12119 = vmatprep.subr.bf16.mxu0 %v17019_v1 }
0x159a   :  { %12094 = vmatpush1.bf16.msra.mxu1 %v15734_v45  ;;  %12121 = vmatpush3.bf16.msra.mxu0 %v15740_v5 }
0x159b   :  { %12096 = vmatprep.subr.bf16.mxu1 %v15752_v32  ;;  %12122 = vmatprep.subr.bf16.mxu0 %v17019_v1 }
0x159e   :  { %12098 = vmatpush1.bf16.msra.mxu1 %v15764_v52  ;;  %12124 = vmatpush3.bf16.msra.mxu0 %v15766_v26 }
0x159f   :  { %12100 = vmatprep.subr.bf16.mxu1 %v15779_v33  ;;  %12125 = vmatprep.subr.bf16.mxu0 %v17019_v1 }
0x15a2   :  { %12102 = vmatpush1.bf16.msra.mxu1 %v15797_v18  ;;  %12127 = vmatpush3.bf16.msra.mxu0 %v15801_v56 }
0x15a3   :  { %12104 = vmatprep.subr.bf16.mxu1 %v15803_v48  ;;  %12128 = vmatprep.subr.bf16.mxu0 %v17019_v1 }
0x15a6   :  { %12106 = vmatpush1.bf16.msra.mxu1 %v15819_v16  ;;  %12130 = vmatpush3.bf16.msra.mxu0 %v15823_v7 }
0x15a7   :  { %12132 = vmatprep.subr.bf16.mxu1 %v15641_v57  ;;  %12163 = vmatprep.subr.bf16.mxu0 %v17019_v1 }
0x165c   :  { %v5909_v4 = vpop.f32.mrb[58].mxu1  ;;  %v5980_v10 = vpop.f32.mrb[58].mxu0 }
0x165d   :  { %v12784_v50 = vadd.f32 %v12783_v21, %v5909_v4  ;;  %v5911_v35 = vpop.f32.mrb[59].mxu1  ;;  %v10316_v13 = vpop.f32.mrb[59].mxu0  ;;  %v5981_v3 = vadd.f32 %v5980_v10, %v5839_v58 }
0x165e   :  { %v12786_v17 = vadd.f32 %v12785_v31, %v5911_v35 }
0x165f   :  { %v8784_v57 = vmul.f32 -1.442695, %v12784_v50 }
0x1660   :  { %v8785_v20 = vmul.f32 -1.442695, %v12786_v17 }
0x1661   :  { %13105 = vpow2.f32 %v8784_v57 }
0x1662   :  { %13107 = vpow2.f32 %v8785_v20 }
0x166b   :  { %v13106_v63 = vpop.eup %13105 }
0x166c   :  { %v5991_v36 = vadd.f32 1.0, %v13106_v63  ;;  %v13108_v39 = vpop.eup %13107 }
0x166d   :  { %v5998_v40 = vadd.f32 1.0, %v13108_v39 }
0x166e   :  { %13109 = vrcp.f32 %v5991_v36 }
0x166f   :  { %13111 = vrcp.f32 %v5998_v40 }
0x1678   :  { %v13110_v2 = vpop.eup %13109 }
0x1679   :  { %v6001_v14 = vmul.f32 %v13110_v2, %v5981_v3  ;;  %v13112_v4 = vpop.eup %13111  ;;  %v6478_v2 = vld [vmem:[%s17001_s6 + $0x38] sm:$0xff] }
0x167a   :  { %v6004_v31 = vsub.f32 1.0, %v13112_v4  ;;  %v6006_v13 = vmul.f32 %v13112_v4, %v15915_v59  ;;  %v6480_v4 = vld [vmem:[%s17001_s6 + $0x48] sm:$0xff] }
0x167b   :  { %v6002_v21 = vadd.f32 %v6001_v14, %v4522_v61  ;;  %v6481_v61 = vld [vmem:[%s17001_s6 + $0x50] sm:$0xff] }
0x167c   :  { %v16051_v14 = vpack.c.bf16 %v6481_v61, %v6478_v2  ;;  %v6507_v2 = vld [vmem:[%s17001_s6 + $0x120] sm:$0xff] }
0x167d   :  { %13113 = vtanh.f32 %v6002_v21  ;;  %v6477_v21 = vld [vmem:[%s17001_s6 + $0x30] sm:$0xff] }
0x1687   :  { %v13114_v50 = vpop.eup %13113 }
0x1688   :  { %v6005_v35 = vmul.f32 %v13114_v50, %v6004_v31  ;;  %v16059_v31 = vpack.c.bf16 %v6480_v4, %v6477_v21  ;;  %v6484_v50 = vld [vmem:[%s17001_s6 + $0x68] sm:$0xff]  ;;  %v6510_v21 = vld [vmem:[%s17001_s6 + $0x138] sm:$0xff]  ;;  %v6509_v4 = vld [vmem:[%s17001_s6 + $0x130] sm:$0xff] }
0x168a   :  { %v15965_v57 = vadd.f32 %v6006_v13, %v6005_v35  ;;  %v6487_v35 = vld [vmem:[%s17001_s6 + $0x80] sm:$0xff] }
0x168b   :  { %v16069_v13 = vpack.c.bf16 %v6487_v35, %v6484_v50  ;;  %v6512_v50 = vld [vmem:[%s17001_s6 + $0x148] sm:$0xff]  ;;  %v6514_v35 = vld [vmem:[%s17001_s6 + $0x158] sm:$0xff] }
0x168c   :  { %6139 = vmatmul.mubr.f32.vlgmr.msra.gmra.mrb[60].mxu1 %v15965_v57  ;;  %10350 = vmatmul.mubr.f32.vlgmr.msra.gmra.mrb[60].mxu0 %v15965_v57 }
0x168d   :  { %12134 = vmatpush1.bf16.msra.mxu1 %v15649_v29  ;;  %12165 = vmatpush3.bf16.msra.mxu0 %v15870_v30  ;;  %v6062_v29 = vrot.slane %v6057_v46, %v13696_v37 }
0x168e   :  { %12136 = vmatprep.subr.bf16.mxu1 %v15659_v54  ;;  %12166 = vmatprep.subr.bf16.mxu0 %v17019_v1  ;;  %v6066_v54 = vrot.slane %v6057_v46, %v13701_v47 }
0x168f   :  { %6369 = vmatprep.mubr.f32.mxu1 %v17020_v49  ;;  %10384 = vmatprep.mubr.msk.f32.mxu0 %vm13217_vm2, %v17020_v49 }
0x1691   :  { %12138 = vmatpush1.bf16.msra.mxu1 %v15667_v24  ;;  %12168 = vmatpush3.bf16.msra.mxu0 %v15880_v12  ;;  %v12787_v24 = vadd.f32 %v6062_v29, %v15504_v15  ;;  %v6486_v29 = vld [vmem:[%s17001_s6 + $0x78] sm:$0xff] }
0x1692   :  { %12140 = vmatprep.subr.bf16.mxu1 %v15677_v25  ;;  %12169 = vmatprep.subr.bf16.mxu0 %v17019_v1 }
0x1695   :  { %12142 = vmatpush1.bf16.msra.mxu1 %v15685_v62  ;;  %12171 = vmatpush3.bf16.msra.mxu0 %v15890_v55 }
0x1696   :  { %12144 = vmatprep.subr.bf16.mxu1 %v15695_v0  ;;  %12172 = vmatprep.subr.bf16.mxu0 %v17019_v1  ;;  %v12789_v0 = vadd.f32 %v6066_v54, %v15510_v11 }
0x1699   :  { %12146 = vmatpush1.bf16.msra.mxu1 %v15706_v19  ;;  %12174 = vmatpush3.bf16.msra.mxu0 %v15712_v27 }
0x169a   :  { %12148 = vmatprep.subr.bf16.mxu1 %v15722_v23  ;;  %12175 = vmatprep.subr.bf16.mxu0 %v17019_v1 }
0x169d   :  { %12150 = vmatpush1.bf16.msra.mxu1 %v15734_v45  ;;  %12177 = vmatpush3.bf16.msra.mxu0 %v15740_v5 }
0x169e   :  { %12152 = vmatprep.subr.bf16.mxu1 %v15752_v32  ;;  %12178 = vmatprep.subr.bf16.mxu0 %v17019_v1 }
0x16a1   :  { %12154 = vmatpush1.bf16.msra.mxu1 %v15764_v52  ;;  %12180 = vmatpush3.bf16.msra.mxu0 %v15766_v26 }
0x16a2   :  { %12156 = vmatprep.subr.bf16.mxu1 %v15779_v33  ;;  %12181 = vmatprep.subr.bf16.mxu0 %v17019_v1 }
0x16a5   :  { %12158 = vmatpush1.bf16.msra.mxu1 %v15797_v18  ;;  %12183 = vmatpush3.bf16.msra.mxu0 %v15801_v56  ;;  %v6070_v18 = vrot.slane %v6057_v46, %v13660_v42  ;;  %v6483_v46 = vld [vmem:[%s17001_s6 + $0x60] sm:$0xff] }
0x16a6   :  { %12160 = vmatprep.subr.bf16.mxu1 %v15803_v48  ;;  %12184 = vmatprep.subr.bf16.mxu0 %v17019_v1  ;;  %v16077_v54 = vpack.c.bf16 %v6486_v29, %v6483_v46  ;;  %v6517_v46 = vld [vmem:[%s17001_s6 + $0x170] sm:$0xff]  ;;  %v16189_v29 = vpack.c.bf16 %v6510_v21, %v6507_v2 }
0x16a9   :  { %12162 = vmatpush1.bf16.msra.mxu1 %v15819_v16  ;;  %12186 = vmatpush3.bf16.msra.mxu0 %v15823_v7  ;;  %v4527_v7 = vadd.f32 %v15443_v60, %v15519_v43  ;;  %v6472_v60 = vld [vmem:[%s17001_s6 + $0x8] sm:$0xff] }
0x16aa   :  { %12219 = vmatprep.subr.bf16.mxu0 %v17019_v1 }
0x175f   :  { %v6140_v25 = vpop.f32.mrb[60].mxu1  ;;  %v6211_v62 = vpop.f32.mrb[60].mxu0 }
0x1760   :  { %v12788_v19 = vadd.f32 %v12787_v24, %v6140_v25  ;;  %v6142_v27 = vpop.f32.mrb[61].mxu1  ;;  %v10351_v23 = vpop.f32.mrb[61].mxu0  ;;  %v6212_v48 = vadd.f32 %v6211_v62, %v6070_v18  ;;  %v6490_v24 = vld [vmem:[%s17001_s6 + $0x98] sm:$0xff]  ;;  %v6493_v25 = vld [vmem:[%s17001_s6 + $0xb0] sm:$0xff] }
0x1761   :  { %v12790_v5 = vadd.f32 %v12789_v0, %v6142_v27  ;;  %v16087_v62 = vpack.c.bf16 %v6493_v25, %v6490_v24  ;;  %v6489_v0 = vld [vmem:[%s17001_s6 + $0x90] sm:$0xff]  ;;  %v6491_v27 = vld [vmem:[%s17001_s6 + $0xa0] sm:$0xff]  ;;  %v6498_v18 = vld [vmem:[%s17001_s6 + $0xd8] sm:$0xff]  ;;  %v16193_v24 = vpack.c.bf16 %v6512_v50, %v6509_v4  ;;  %v16195_v25 = vpack.c.bf16 %v6517_v46, %v6514_v35 }
0x1762   :  { %v8786_v45 = vmul.f32 -1.442695, %v12788_v19  ;;  %v6492_v19 = vld [vmem:[%s17001_s6 + $0xa8] sm:$0xff] }
0x1763   :  { %v8787_v32 = vmul.f32 -1.442695, %v12790_v5  ;;  %v16098_v23 = vpack.c.bf16 %v6492_v19, %v6489_v0  ;;  %v6513_v0 = vld [vmem:[%s17001_s6 + $0x150] sm:$0xff]  ;;  %v6516_v19 = vld [vmem:[%s17001_s6 + $0x168] sm:$0xff] }
0x1764   :  { %13115 = vpow2.f32 %v8786_v45  ;;  %v6494_v45 = vld [vmem:[%s17001_s6 + $0xb8] sm:$0xff] }
0x1765   :  { %13117 = vpow2.f32 %v8787_v32  ;;  %v16104_v5 = vpack.c.bf16 %v6494_v45, %v6491_v27  ;;  %v6496_v32 = vld [vmem:[%s17001_s6 + $0xc8] sm:$0xff]  ;;  %v6515_v27 = vld [vmem:[%s17001_s6 + $0x160] sm:$0xff]  ;;  %v6518_v45 = vld [vmem:[%s17001_s6 + $0x178] sm:$0xff] }
0x176e   :  { %v13116_v52 = vpop.eup %13115 }
0x176f   :  { %v6222_v26 = vadd.f32 1.0, %v13116_v52  ;;  %v13118_v33 = vpop.eup %13117  ;;  %v6499_v52 = vld [vmem:[%s17001_s6 + $0xe0] sm:$0xff] }
0x1770   :  { %v6229_v56 = vadd.f32 1.0, %v13118_v33  ;;  %v6495_v33 = vld [vmem:[%s17001_s6 + $0xc0] sm:$0xff] }
0x1771   :  { %13119 = vrcp.f32 %v6222_v26  ;;  %v16114_v26 = vpack.c.bf16 %v6499_v52, %v6496_v32  ;;  %v16211_v32 = vpack.c.bf16 %v6516_v19, %v6513_v0  ;;  %v16215_v52 = vpack.c.bf16 %v6518_v45, %v6515_v27 }
0x1772   :  { %13121 = vrcp.f32 %v6229_v56  ;;  %v6497_v56 = vld [vmem:[%s17001_s6 + $0xd0] sm:$0xff]  ;;  %v4532_v27 = vadd.f32 %v15440_v53, %v15519_v43 }
0x1773   :  { %v6704_v53 = vld [vmem:[%s17001_s6 + $0x10] sm:$0xff] }
0x177b   :  { %v13120_v16 = vpop.eup %13119 }
0x177c   :  { %v6232_v41 = vmul.f32 %v13120_v16, %v6212_v48  ;;  %v13122_v17 = vpop.eup %13121  ;;  %v16126_v48 = vpack.c.bf16 %v6498_v18, %v6495_v33  ;;  %v6500_v16 = vld [vmem:[%s17001_s6 + $0xe8] sm:$0xff]  ;;  %v6288_v33 = vld [vmem:[%s17002_s8] sm:$0x7] }
0x177d   :  { %v6235_v20 = vsub.f32 1.0, %v13122_v17  ;;  %v6237_v39 = vmul.f32 %v13122_v17, %v15965_v57  ;;  %v6501_v17 = vld [vmem:[%s17001_s6 + $0xf0] sm:$0xff]  ;;  %v6293_v18 = vrot.slane %v6288_v33, %v13696_v37  ;;  %v6301_v35 = vrot.slane %v6288_v33, %v13660_v42 }
0x177e   :  { %v6233_v10 = vadd.f32 %v6232_v41, %v4527_v7  ;;  %v16132_v7 = vpack.c.bf16 %v6500_v16, %v6497_v56  ;;  %v6502_v41 = vld [vmem:[%s17001_s6 + $0xf8] sm:$0xff]  ;;  %v6297_v56 = vrot.slane %v6288_v33, %v13701_v47  ;;  %v6707_v33 = vld [vmem:[%s17001_s6 + $0x28] sm:$0xff] }
0x177f   :  { %v12791_v16 = vadd.f32 %v6293_v18, %v15504_v15 }
0x1780   :  { %13123 = vtanh.f32 %v6233_v10  ;;  %v6505_v10 = vld [vmem:[%s17001_s6 + $0x110] sm:$0xff] }
0x178a   :  { %v13124_v63 = vpop.eup %13123 }
0x178b   :  { %v6236_v36 = vmul.f32 %v13124_v63, %v6235_v20  ;;  %v16144_v20 = vpack.c.bf16 %v6505_v10, %v6502_v41  ;;  %v6504_v63 = vld [vmem:[%s17001_s6 + $0x108] sm:$0xff] }
0x178d   :  { %v16014_v58 = vadd.f32 %v6237_v39, %v6236_v36  ;;  %v6503_v36 = vld [vmem:[%s17001_s6 + $0x100] sm:$0xff]  ;;  %v6506_v39 = vld [vmem:[%s17001_s6 + $0x118] sm:$0xff] }
0x178f   :  { %6370 = vmatmul.mubr.f32.vlgmr.msra.gmra.mrb[62].mxu1 %v16014_v58  ;;  %10385 = vmatmul.mubr.f32.vlgmr.msra.gmra.mrb[62].mxu0 %v16014_v58 }
0x1790   :  { %12221 = vmatpush3.bf16.msra.mxu0 %v15870_v30  ;;  %6600 = vmatprep.mubr.f32.mxu1 %v17020_v49  ;;  %v6475_v30 = vld [vmem:[%s17001_s6 + $0x20] sm:$0xff] }
0x1791   :  { %12222 = vmatprep.subr.bf16.mxu0 %v17019_v1  ;;  %10419 = vmatprep.mubr.msk.f32.mxu0 %vm13217_vm2, %v17020_v49  ;;  %v16033_v40 = vpack.c.bf16 %v6475_v30, %v6472_v60  ;;  %v16156_v60 = vpack.c.bf16 %v6504_v63, %v6501_v17  ;;  %v16158_v30 = vpack.c.bf16 %v6506_v39, %v6503_v36 }
0x1792   :  { %v12793_v17 = vadd.f32 %v6297_v56, %v15510_v11 }
0x1793   :  { %12188 = vmatprep.subr.bf16.mxu1 %v16033_v40 }
0x1794   :  { %12224 = vmatpush3.bf16.msra.mxu0 %v15880_v12  ;;  %v6471_v12 = vld [vmem:[%s17001_s6] sm:$0xff] }
0x1795   :  { %12225 = vmatprep.subr.bf16.mxu0 %v17019_v1 }
0x1798   :  { %12227 = vmatpush3.bf16.msra.mxu0 %v15890_v55  ;;  %v6474_v55 = vld [vmem:[%s17001_s6 + $0x18] sm:$0xff] }
0x1799   :  { %12228 = vmatprep.subr.bf16.mxu0 %v17019_v1  ;;  %v16041_v3 = vpack.c.bf16 %v6474_v55, %v6471_v12  ;;  %v6508_v12 = vld [vmem:[%s17001_s6 + $0x128] sm:$0xff]  ;;  %v6511_v55 = vld [vmem:[%s17001_s6 + $0x140] sm:$0xff] }
0x179a   :  { %v16171_v61 = vpack.c.bf16 %v6511_v55, %v6508_v12 }
0x179b   :  { %12190 = vmatpush1.bf16.msra.mxu1 %v16041_v3 }
0x179c   :  { %12192 = vmatprep.subr.bf16.mxu1 %v16051_v14  ;;  %12230 = vmatpush3.bf16.msra.mxu0 %v16104_v5 }
0x179d   :  { %12231 = vmatprep.subr.bf16.mxu0 %v17019_v1 }
0x179f   :  { %12194 = vmatpush1.bf16.msra.mxu1 %v16059_v31 }
0x17a0   :  { %12196 = vmatprep.subr.bf16.mxu1 %v16069_v13  ;;  %12233 = vmatpush3.bf16.msra.mxu0 %v16132_v7 }
0x17a1   :  { %12234 = vmatprep.subr.bf16.mxu0 %v17019_v1 }
0x17a3   :  { %12198 = vmatpush1.bf16.msra.mxu1 %v16077_v54 }
0x17a4   :  { %12200 = vmatprep.subr.bf16.mxu1 %v16087_v62  ;;  %12236 = vmatpush3.bf16.msra.mxu0 %v16158_v30 }
0x17a5   :  { %12237 = vmatprep.subr.bf16.mxu0 %v17019_v1 }
0x17a7   :  { %12202 = vmatpush1.bf16.msra.mxu1 %v16098_v23 }
0x17a8   :  { %12204 = vmatprep.subr.bf16.mxu1 %v16114_v26  ;;  %12239 = vmatpush3.bf16.msra.mxu0 %v16193_v24 }
0x17a9   :  { %12240 = vmatprep.subr.bf16.mxu0 %v17019_v1 }
0x17ab   :  { %12206 = vmatpush1.bf16.msra.mxu1 %v16126_v48 }
0x17ac   :  { %12208 = vmatprep.subr.bf16.mxu1 %v16144_v20  ;;  %12242 = vmatpush3.bf16.msra.mxu0 %v16215_v52 }
0x17ad   :  { %12275 = vmatprep.subr.bf16.mxu0 %v17019_v1 }
0x17af   :  { %12210 = vmatpush1.bf16.msra.mxu1 %v16156_v60 }
0x17b0   :  { %12212 = vmatprep.subr.bf16.mxu1 %v16171_v61 }
0x17b3   :  { %12214 = vmatpush1.bf16.msra.mxu1 %v16189_v29 }
0x17b4   :  { %12216 = vmatprep.subr.bf16.mxu1 %v16195_v25 }
0x17b7   :  { %12218 = vmatpush1.bf16.msra.mxu1 %v16211_v32 }
0x17b8   :  { %12244 = vmatprep.subr.bf16.mxu1 %v16033_v40 }
0x1862   :  { %v6371_v41 = vpop.f32.mrb[62].mxu1  ;;  %v6442_v10 = vpop.f32.mrb[62].mxu0 }
0x1863   :  { %v12792_v63 = vadd.f32 %v12791_v16, %v6371_v41  ;;  %v6373_v36 = vpop.f32.mrb[63].mxu1  ;;  %v10386_v39 = vpop.f32.mrb[63].mxu0  ;;  %v6443_v0 = vadd.f32 %v6442_v10, %v6301_v35  ;;  %v16262_v10 = vpack.c.bf16 %v6707_v33, %v6704_v53 }
0x1864   :  { %v12794_v55 = vadd.f32 %v12793_v17, %v6373_v36  ;;  %v6710_v39 = vld [vmem:[%s17001_s6 + $0x40] sm:$0xff] }
0x1865   :  { %v8788_v12 = vmul.f32 -1.442695, %v12792_v63 }
0x1866   :  { %v8789_v2 = vmul.f32 -1.442695, %v12794_v55 }
0x1867   :  { %13125 = vpow2.f32 %v8788_v12  ;;  %v6713_v12 = vld [vmem:[%s17001_s6 + $0x58] sm:$0xff] }
0x1868   :  { %13127 = vpow2.f32 %v8789_v2  ;;  %v16272_v55 = vpack.c.bf16 %v6713_v12, %v6710_v39  ;;  %v6716_v2 = vld [vmem:[%s17001_s6 + $0x70] sm:$0xff] }
0x1871   :  { %v13126_v21 = vpop.eup %13125 }
0x1872   :  { %v6453_v4 = vadd.f32 1.0, %v13126_v21  ;;  %v13128_v50 = vpop.eup %13127  ;;  %v6719_v21 = vld [vmem:[%s17001_s6 + $0x88] sm:$0xff] }
0x1873   :  { %v6460_v46 = vadd.f32 1.0, %v13128_v50  ;;  %v6519_v50 = vld [vmem:[%s17002_s8] sm:$0x7] }
0x1874   :  { %13129 = vrcp.f32 %v6453_v4  ;;  %v16282_v4 = vpack.c.bf16 %v6719_v21, %v6716_v2  ;;  %v6524_v35 = vrot.slane %v6519_v50, %v13696_v37  ;;  %v6532_v12 = vrot.slane %v6519_v50, %v13660_v42 }
0x1875   :  { %13131 = vrcp.f32 %v6460_v46  ;;  %v6528_v46 = vrot.slane %v6519_v50, %v13701_v47 }
0x187e   :  { %v13130_v19 = vpop.eup %13129 }
0x187f   :  { %v6463_v45 = vmul.f32 %v13130_v19, %v6443_v0  ;;  %v13132_v56 = vpop.eup %13131  ;;  %v12795_v0 = vadd.f32 %v6524_v35, %v15504_v15 }
0x1880   :  { %v6466_v16 = vsub.f32 1.0, %v13132_v56  ;;  %v6468_v63 = vmul.f32 %v13132_v56, %v16014_v58 }
0x1881   :  { %v6464_v18 = vadd.f32 %v6463_v45, %v4532_v27  ;;  %v12797_v45 = vadd.f32 %v6528_v46, %v15510_v11  ;;  %v4537_v46 = vadd.f32 %v15447_v6, %v15519_v43  ;;  %v6750_v6 = vld [vmem:[%s17002_s8] sm:$0x7] }
0x1882   :  { %v6755_v50 = vrot.slane %v6750_v6, %v13696_v37 }
0x1883   :  { %13133 = vtanh.f32 %v6464_v18 }
0x188d   :  { %v13134_v41 = vpop.eup %13133 }
0x188e   :  { %v6467_v17 = vmul.f32 %v13134_v41, %v6466_v16 }
0x1890   :  { %v16233_v36 = vadd.f32 %v6468_v63, %v6467_v17 }
0x1892   :  { %6601 = vmatmul.mubr.f32.vlgmr.msra.gmra.mrb[64].mxu1 %v16233_v36  ;;  %10420 = vmatmul.mubr.f32.vlgmr.msra.gmra.mrb[64].mxu0 %v16233_v36 }
0x1893   :  { %12246 = vmatpush1.bf16.msra.mxu1 %v16041_v3  ;;  %6831 = vmatprep.mubr.f32.mxu1 %v17020_v49 }
0x1894   :  { %12248 = vmatprep.subr.bf16.mxu1 %v16051_v14  ;;  %10454 = vmatprep.mubr.msk.f32.mxu0 %vm13217_vm2, %v17020_v49 }
0x1895   :  { %12277 = vmatpush3.bf16.msra.mxu0 %v16262_v10 }
0x1896   :  { %12278 = vmatprep.subr.bf16.mxu0 %v17019_v1 }
0x1897   :  { %12250 = vmatpush1.bf16.msra.mxu1 %v16059_v31 }
0x1898   :  { %12252 = vmatprep.subr.bf16.mxu1 %v16069_v13 }
0x1899   :  { %12280 = vmatpush3.bf16.msra.mxu0 %v16272_v55 }
0x189a   :  { %12281 = vmatprep.subr.bf16.mxu0 %v17019_v1 }
0x189b   :  { %12254 = vmatpush1.bf16.msra.mxu1 %v16077_v54 }
0x189c   :  { %12256 = vmatprep.subr.bf16.mxu1 %v16087_v62 }
0x189d   :  { %12283 = vmatpush3.bf16.msra.mxu0 %v16282_v4 }
0x189e   :  { %12284 = vmatprep.subr.bf16.mxu0 %v17019_v1 }
0x189f   :  { %12258 = vmatpush1.bf16.msra.mxu1 %v16098_v23 }
0x18a0   :  { %12260 = vmatprep.subr.bf16.mxu1 %v16114_v26 }
0x18a1   :  { %12286 = vmatpush3.bf16.msra.mxu0 %v16104_v5 }
0x18a2   :  { %12287 = vmatprep.subr.bf16.mxu0 %v17019_v1 }
0x18a3   :  { %12262 = vmatpush1.bf16.msra.mxu1 %v16126_v48 }
0x18a4   :  { %12264 = vmatprep.subr.bf16.mxu1 %v16144_v20 }
0x18a5   :  { %12289 = vmatpush3.bf16.msra.mxu0 %v16132_v7 }
0x18a6   :  { %12290 = vmatprep.subr.bf16.mxu0 %v17019_v1 }
0x18a7   :  { %12266 = vmatpush1.bf16.msra.mxu1 %v16156_v60 }
0x18a8   :  { %12268 = vmatprep.subr.bf16.mxu1 %v16171_v61 }
0x18a9   :  { %12292 = vmatpush3.bf16.msra.mxu0 %v16158_v30 }
0x18aa   :  { %12293 = vmatprep.subr.bf16.mxu0 %v17019_v1 }
0x18ab   :  { %12270 = vmatpush1.bf16.msra.mxu1 %v16189_v29 }
0x18ac   :  { %12272 = vmatprep.subr.bf16.mxu1 %v16195_v25 }
0x18ad   :  { %12295 = vmatpush3.bf16.msra.mxu0 %v16193_v24 }
0x18ae   :  { %12296 = vmatprep.subr.bf16.mxu0 %v17019_v1 }
0x18af   :  { %12274 = vmatpush1.bf16.msra.mxu1 %v16211_v32 }
0x18b0   :  { %12300 = vmatprep.subr.bf16.mxu1 %v16033_v40 }
0x18b1   :  { %12298 = vmatpush3.bf16.msra.mxu0 %v16215_v52 }
0x18b2   :  { %12331 = vmatprep.subr.bf16.mxu0 %v17019_v1 }
0x1965   :  { %v6602_v19 = vpop.f32.mrb[64].mxu1  ;;  %v6673_v27 = vpop.f32.mrb[64].mxu0 }
0x1966   :  { %v12796_v18 = vadd.f32 %v12795_v0, %v6602_v19  ;;  %v6604_v56 = vpop.f32.mrb[65].mxu1  ;;  %v10421_v16 = vpop.f32.mrb[65].mxu0  ;;  %v6674_v21 = vadd.f32 %v6673_v27, %v6532_v12  ;;  %v6759_v27 = vrot.slane %v6750_v6, %v13701_v47 }
0x1967   :  { %v12798_v17 = vadd.f32 %v12797_v45, %v6604_v56 }
0x1968   :  { %v8790_v41 = vmul.f32 -1.442695, %v12796_v18 }
0x1969   :  { %v8791_v63 = vmul.f32 -1.442695, %v12798_v17 }
0x196a   :  { %13135 = vpow2.f32 %v8790_v41 }
0x196b   :  { %13137 = vpow2.f32 %v8791_v63  ;;  %v12799_v63 = vadd.f32 %v6755_v50, %v15504_v15  ;;  %v4542_v50 = vadd.f32 %v15445_v22, %v15519_v43  ;;  %v6981_v22 = vld [vmem:[%s17002_s8] sm:$0x7] }
0x1974   :  { %v13136_v53 = vpop.eup %13135 }
0x1975   :  { %v6684_v33 = vadd.f32 1.0, %v13136_v53  ;;  %v13138_v39 = vpop.eup %13137 }
0x1976   :  { %v6691_v2 = vadd.f32 1.0, %v13138_v39  ;;  %v12801_v39 = vadd.f32 %v6759_v27, %v15510_v11 }
0x1977   :  { %13139 = vrcp.f32 %v6684_v33 }
0x1978   :  { %13141 = vrcp.f32 %v6691_v2 }
0x1981   :  { %v13140_v35 = vpop.eup %13139 }
0x1982   :  { %v6694_v0 = vmul.f32 %v13140_v35, %v6674_v21  ;;  %v13142_v45 = vpop.eup %13141 }
0x1983   :  { %v6697_v18 = vsub.f32 1.0, %v13142_v45  ;;  %v6699_v41 = vmul.f32 %v13142_v45, %v16233_v36 }
0x1984   :  { %v6695_v19 = vadd.f32 %v6694_v0, %v4537_v46 }
0x1986   :  { %13143 = vtanh.f32 %v6695_v19 }
0x1990   :  { %v13144_v56 = vpop.eup %13143 }
0x1991   :  { %v6698_v16 = vmul.f32 %v13144_v56, %v6697_v18  ;;  %v6763_v18 = vrot.slane %v6750_v6, %v13660_v42 }
0x1993   :  { %v16307_v17 = vadd.f32 %v6699_v41, %v6698_v16 }
0x1995   :  { %6832 = vmatmul.mubr.f32.vlgmr.msra.gmra.mrb[66].mxu1 %v16307_v17  ;;  %10455 = vmatmul.mubr.f32.vlgmr.msra.gmra.mrb[66].mxu0 %v16307_v17 }
0x1996   :  { %12302 = vmatpush1.bf16.msra.mxu1 %v16041_v3  ;;  %12333 = vmatpush3.bf16.msra.mxu0 %v16262_v10 }
0x1997   :  { %12304 = vmatprep.subr.bf16.mxu1 %v16051_v14  ;;  %12334 = vmatprep.subr.bf16.mxu0 %v17019_v1 }
0x1998   :  { %7062 = vmatprep.mubr.f32.mxu1 %v17020_v49  ;;  %10489 = vmatprep.mubr.msk.f32.mxu0 %vm13217_vm2, %v17020_v49 }
0x199a   :  { %12306 = vmatpush1.bf16.msra.mxu1 %v16059_v31  ;;  %12336 = vmatpush3.bf16.msra.mxu0 %v16272_v55 }
0x199b   :  { %12308 = vmatprep.subr.bf16.mxu1 %v16069_v13  ;;  %12337 = vmatprep.subr.bf16.mxu0 %v17019_v1 }
0x199e   :  { %12310 = vmatpush1.bf16.msra.mxu1 %v16077_v54  ;;  %12339 = vmatpush3.bf16.msra.mxu0 %v16282_v4 }
0x199f   :  { %12312 = vmatprep.subr.bf16.mxu1 %v16087_v62  ;;  %12340 = vmatprep.subr.bf16.mxu0 %v17019_v1 }
0x19a2   :  { %12314 = vmatpush1.bf16.msra.mxu1 %v16098_v23  ;;  %12342 = vmatpush3.bf16.msra.mxu0 %v16104_v5 }
0x19a3   :  { %12316 = vmatprep.subr.bf16.mxu1 %v16114_v26  ;;  %12343 = vmatprep.subr.bf16.mxu0 %v17019_v1 }
0x19a6   :  { %12318 = vmatpush1.bf16.msra.mxu1 %v16126_v48  ;;  %12345 = vmatpush3.bf16.msra.mxu0 %v16132_v7 }
0x19a7   :  { %12320 = vmatprep.subr.bf16.mxu1 %v16144_v20  ;;  %12346 = vmatprep.subr.bf16.mxu0 %v17019_v1 }
0x19aa   :  { %12322 = vmatpush1.bf16.msra.mxu1 %v16156_v60  ;;  %12348 = vmatpush3.bf16.msra.mxu0 %v16158_v30 }
0x19ab   :  { %12324 = vmatprep.subr.bf16.mxu1 %v16171_v61  ;;  %12349 = vmatprep.subr.bf16.mxu0 %v17019_v1 }
0x19ae   :  { %12326 = vmatpush1.bf16.msra.mxu1 %v16189_v29  ;;  %12351 = vmatpush3.bf16.msra.mxu0 %v16193_v24 }
0x19af   :  { %12328 = vmatprep.subr.bf16.mxu1 %v16195_v25  ;;  %12352 = vmatprep.subr.bf16.mxu0 %v17019_v1 }
0x19b2   :  { %12330 = vmatpush1.bf16.msra.mxu1 %v16211_v32  ;;  %12354 = vmatpush3.bf16.msra.mxu0 %v16215_v52 }
0x19b3   :  { %12356 = vmatprep.subr.bf16.mxu1 %v16033_v40  ;;  %12387 = vmatprep.subr.bf16.mxu0 %v17019_v1 }
0x1a68   :  { %v6833_v53 = vpop.f32.mrb[66].mxu1  ;;  %v6904_v33 = vpop.f32.mrb[66].mxu0 }
0x1a69   :  { %v12800_v12 = vadd.f32 %v12799_v63, %v6833_v53  ;;  %v6835_v2 = vpop.f32.mrb[67].mxu1  ;;  %v10456_v21 = vpop.f32.mrb[67].mxu0  ;;  %v6905_v16 = vadd.f32 %v6904_v33, %v6763_v18 }
0x1a6a   :  { %v12802_v35 = vadd.f32 %v12801_v39, %v6835_v2 }
0x1a6b   :  { %v8792_v40 = vmul.f32 -1.442695, %v12800_v12 }
0x1a6c   :  { %v8793_v46 = vmul.f32 -1.442695, %v12802_v35 }
0x1a6d   :  { %13145 = vpow2.f32 %v8792_v40 }
0x1a6e   :  { %13147 = vpow2.f32 %v8793_v46 }
0x1a77   :  { %v13146_v0 = vpop.eup %13145 }
0x1a78   :  { %v6915_v19 = vadd.f32 1.0, %v13146_v0  ;;  %v13148_v45 = vpop.eup %13147 }
0x1a79   :  { %v6922_v56 = vadd.f32 1.0, %v13148_v45 }
0x1a7a   :  { %13149 = vrcp.f32 %v6915_v19 }
0x1a7b   :  { %13151 = vrcp.f32 %v6922_v56 }
0x1a84   :  { %v13150_v41 = vpop.eup %13149 }
0x1a85   :  { %v6925_v27 = vmul.f32 %v13150_v41, %v6905_v16  ;;  %v13152_v53 = vpop.eup %13151  ;;  %v7402_v41 = vld [vmem:[%s17001_s6 + $0x38] sm:$0xff] }
0x1a86   :  { %v6928_v39 = vsub.f32 1.0, %v13152_v53  ;;  %v6930_v21 = vmul.f32 %v13152_v53, %v16307_v17  ;;  %v7404_v53 = vld [vmem:[%s17001_s6 + $0x48] sm:$0xff] }
0x1a87   :  { %v6926_v63 = vadd.f32 %v6925_v27, %v4542_v50  ;;  %v7405_v50 = vld [vmem:[%s17001_s6 + $0x50] sm:$0xff] }
0x1a88   :  { %v16443_v27 = vpack.c.bf16 %v7405_v50, %v7402_v41  ;;  %v7431_v41 = vld [vmem:[%s17001_s6 + $0x120] sm:$0xff] }
0x1a89   :  { %13153 = vtanh.f32 %v6926_v63  ;;  %v7401_v63 = vld [vmem:[%s17001_s6 + $0x30] sm:$0xff] }
0x1a93   :  { %v13154_v12 = vpop.eup %13153 }
0x1a94   :  { %v6929_v2 = vmul.f32 %v13154_v12, %v6928_v39  ;;  %v16451_v39 = vpack.c.bf16 %v7404_v53, %v7401_v63  ;;  %v7408_v12 = vld [vmem:[%s17001_s6 + $0x68] sm:$0xff]  ;;  %v7434_v63 = vld [vmem:[%s17001_s6 + $0x138] sm:$0xff]  ;;  %v7433_v53 = vld [vmem:[%s17001_s6 + $0x130] sm:$0xff] }
0x1a96   :  { %v16357_v40 = vadd.f32 %v6930_v21, %v6929_v2  ;;  %v7411_v2 = vld [vmem:[%s17001_s6 + $0x80] sm:$0xff] }
0x1a97   :  { %v16461_v21 = vpack.c.bf16 %v7411_v2, %v7408_v12  ;;  %v7436_v12 = vld [vmem:[%s17001_s6 + $0x148] sm:$0xff]  ;;  %v7438_v2 = vld [vmem:[%s17001_s6 + $0x158] sm:$0xff] }
0x1a98   :  { %7063 = vmatmul.mubr.f32.vlgmr.msra.gmra.mrb[68].mxu1 %v16357_v40  ;;  %10490 = vmatmul.mubr.f32.vlgmr.msra.gmra.mrb[68].mxu0 %v16357_v40 }
0x1a99   :  { %12358 = vmatpush1.bf16.msra.mxu1 %v16041_v3  ;;  %12389 = vmatpush3.bf16.msra.mxu0 %v16262_v10  ;;  %v6986_v3 = vrot.slane %v6981_v22, %v13696_v37 }
0x1a9a   :  { %12360 = vmatprep.subr.bf16.mxu1 %v16051_v14  ;;  %12390 = vmatprep.subr.bf16.mxu0 %v17019_v1  ;;  %v6990_v14 = vrot.slane %v6981_v22, %v13701_v47 }
0x1a9b   :  { %7293 = vmatprep.mubr.f32.mxu1 %v17020_v49  ;;  %10524 = vmatprep.mubr.msk.f32.mxu0 %vm13217_vm2, %v17020_v49 }
0x1a9d   :  { %12362 = vmatpush1.bf16.msra.mxu1 %v16059_v31  ;;  %12392 = vmatpush3.bf16.msra.mxu0 %v16272_v55  ;;  %v12803_v31 = vadd.f32 %v6986_v3, %v15504_v15  ;;  %v7410_v3 = vld [vmem:[%s17001_s6 + $0x78] sm:$0xff] }
0x1a9e   :  { %12364 = vmatprep.subr.bf16.mxu1 %v16069_v13  ;;  %12393 = vmatprep.subr.bf16.mxu0 %v17019_v1 }
0x1aa1   :  { %12366 = vmatpush1.bf16.msra.mxu1 %v16077_v54  ;;  %12395 = vmatpush3.bf16.msra.mxu0 %v16282_v4 }
0x1aa2   :  { %12368 = vmatprep.subr.bf16.mxu1 %v16087_v62  ;;  %12396 = vmatprep.subr.bf16.mxu0 %v17019_v1  ;;  %v12805_v62 = vadd.f32 %v6990_v14, %v15510_v11 }
0x1aa5   :  { %12370 = vmatpush1.bf16.msra.mxu1 %v16098_v23  ;;  %12398 = vmatpush3.bf16.msra.mxu0 %v16104_v5 }
0x1aa6   :  { %12372 = vmatprep.subr.bf16.mxu1 %v16114_v26  ;;  %12399 = vmatprep.subr.bf16.mxu0 %v17019_v1 }
0x1aa9   :  { %12374 = vmatpush1.bf16.msra.mxu1 %v16126_v48  ;;  %12401 = vmatpush3.bf16.msra.mxu0 %v16132_v7 }
0x1aaa   :  { %12376 = vmatprep.subr.bf16.mxu1 %v16144_v20  ;;  %12402 = vmatprep.subr.bf16.mxu0 %v17019_v1 }
0x1aad   :  { %12378 = vmatpush1.bf16.msra.mxu1 %v16156_v60  ;;  %12404 = vmatpush3.bf16.msra.mxu0 %v16158_v30 }
0x1aae   :  { %12380 = vmatprep.subr.bf16.mxu1 %v16171_v61  ;;  %12405 = vmatprep.subr.bf16.mxu0 %v17019_v1 }
0x1ab1   :  { %12382 = vmatpush1.bf16.msra.mxu1 %v16189_v29  ;;  %12407 = vmatpush3.bf16.msra.mxu0 %v16193_v24  ;;  %v6994_v29 = vrot.slane %v6981_v22, %v13660_v42  ;;  %v7407_v22 = vld [vmem:[%s17001_s6 + $0x60] sm:$0xff] }
0x1ab2   :  { %12384 = vmatprep.subr.bf16.mxu1 %v16195_v25  ;;  %12408 = vmatprep.subr.bf16.mxu0 %v17019_v1  ;;  %v16469_v14 = vpack.c.bf16 %v7410_v3, %v7407_v22  ;;  %v7441_v22 = vld [vmem:[%s17001_s6 + $0x170] sm:$0xff]  ;;  %v16581_v3 = vpack.c.bf16 %v7434_v63, %v7431_v41 }
0x1ab5   :  { %12386 = vmatpush1.bf16.msra.mxu1 %v16211_v32  ;;  %12410 = vmatpush3.bf16.msra.mxu0 %v16215_v52  ;;  %v4547_v52 = vadd.f32 %v15456_v38, %v15519_v43  ;;  %v7396_v38 = vld [vmem:[%s17001_s6 + $0x8] sm:$0xff] }
0x1ab6   :  { %12443 = vmatprep.subr.bf16.mxu0 %v17019_v1 }
0x1b6b   :  { %v7064_v13 = vpop.f32.mrb[68].mxu1  ;;  %v7135_v54 = vpop.f32.mrb[68].mxu0 }
0x1b6c   :  { %v12804_v23 = vadd.f32 %v12803_v31, %v7064_v13  ;;  %v7066_v5 = vpop.f32.mrb[69].mxu1  ;;  %v10491_v26 = vpop.f32.mrb[69].mxu0  ;;  %v7136_v25 = vadd.f32 %v7135_v54, %v6994_v29  ;;  %v7414_v31 = vld [vmem:[%s17001_s6 + $0x98] sm:$0xff]  ;;  %v7417_v13 = vld [vmem:[%s17001_s6 + $0xb0] sm:$0xff] }
0x1b6d   :  { %v12806_v7 = vadd.f32 %v12805_v62, %v7066_v5  ;;  %v16479_v54 = vpack.c.bf16 %v7417_v13, %v7414_v31  ;;  %v7413_v62 = vld [vmem:[%s17001_s6 + $0x90] sm:$0xff]  ;;  %v7415_v5 = vld [vmem:[%s17001_s6 + $0xa0] sm:$0xff]  ;;  %v7422_v29 = vld [vmem:[%s17001_s6 + $0xd8] sm:$0xff]  ;;  %v16585_v31 = vpack.c.bf16 %v7436_v12, %v7433_v53  ;;  %v16587_v13 = vpack.c.bf16 %v7441_v22, %v7438_v2 }
0x1b6e   :  { %v8794_v48 = vmul.f32 -1.442695, %v12804_v23  ;;  %v7416_v23 = vld [vmem:[%s17001_s6 + $0xa8] sm:$0xff] }
0x1b6f   :  { %v8795_v20 = vmul.f32 -1.442695, %v12806_v7  ;;  %v16490_v26 = vpack.c.bf16 %v7416_v23, %v7413_v62  ;;  %v7437_v62 = vld [vmem:[%s17001_s6 + $0x150] sm:$0xff]  ;;  %v7440_v23 = vld [vmem:[%s17001_s6 + $0x168] sm:$0xff] }
0x1b70   :  { %13155 = vpow2.f32 %v8794_v48  ;;  %v7418_v48 = vld [vmem:[%s17001_s6 + $0xb8] sm:$0xff] }
0x1b71   :  { %13157 = vpow2.f32 %v8795_v20  ;;  %v16496_v7 = vpack.c.bf16 %v7418_v48, %v7415_v5  ;;  %v7420_v20 = vld [vmem:[%s17001_s6 + $0xc8] sm:$0xff]  ;;  %v7439_v5 = vld [vmem:[%s17001_s6 + $0x160] sm:$0xff]  ;;  %v7442_v48 = vld [vmem:[%s17001_s6 + $0x178] sm:$0xff] }
0x1b7a   :  { %v13156_v60 = vpop.eup %13155 }
0x1b7b   :  { %v7146_v30 = vadd.f32 1.0, %v13156_v60  ;;  %v13158_v61 = vpop.eup %13157  ;;  %v7423_v60 = vld [vmem:[%s17001_s6 + $0xe0] sm:$0xff] }
0x1b7c   :  { %v7153_v24 = vadd.f32 1.0, %v13158_v61  ;;  %v7419_v61 = vld [vmem:[%s17001_s6 + $0xc0] sm:$0xff] }
0x1b7d   :  { %13159 = vrcp.f32 %v7146_v30  ;;  %v16506_v30 = vpack.c.bf16 %v7423_v60, %v7420_v20  ;;  %v16603_v20 = vpack.c.bf16 %v7440_v23, %v7437_v62  ;;  %v16607_v60 = vpack.c.bf16 %v7442_v48, %v7439_v5 }
0x1b7e   :  { %13161 = vrcp.f32 %v7153_v24  ;;  %v7421_v24 = vld [vmem:[%s17001_s6 + $0xd0] sm:$0xff]  ;;  %v4552_v5 = vadd.f32 %v15452_v34, %v15519_v43 }
0x1b7f   :  { %v7628_v34 = vld [vmem:[%s17001_s6 + $0x10] sm:$0xff] }
0x1b87   :  { %v13160_v32 = vpop.eup %13159 }
0x1b88   :  { %v7156_v6 = vmul.f32 %v13160_v32, %v7136_v25  ;;  %v13162_v35 = vpop.eup %13161  ;;  %v16518_v25 = vpack.c.bf16 %v7422_v29, %v7419_v61  ;;  %v7424_v32 = vld [vmem:[%s17001_s6 + $0xe8] sm:$0xff]  ;;  %v7212_v61 = vld [vmem:[%s17002_s8] sm:$0x7] }
0x1b89   :  { %v7159_v46 = vsub.f32 1.0, %v13162_v35  ;;  %v7161_v45 = vmul.f32 %v13162_v35, %v16357_v40  ;;  %v7425_v35 = vld [vmem:[%s17001_s6 + $0xf0] sm:$0xff]  ;;  %v7217_v29 = vrot.slane %v7212_v61, %v13696_v37  ;;  %v7225_v2 = vrot.slane %v7212_v61, %v13660_v42 }
0x1b8a   :  { %v7157_v33 = vadd.f32 %v7156_v6, %v4547_v52  ;;  %v16524_v52 = vpack.c.bf16 %v7424_v32, %v7421_v24  ;;  %v7426_v6 = vld [vmem:[%s17001_s6 + $0xf8] sm:$0xff]  ;;  %v7221_v24 = vrot.slane %v7212_v61, %v13701_v47  ;;  %v7631_v61 = vld [vmem:[%s17001_s6 + $0x28] sm:$0xff] }
0x1b8b   :  { %v12807_v32 = vadd.f32 %v7217_v29, %v15504_v15 }
0x1b8c   :  { %13163 = vtanh.f32 %v7157_v33  ;;  %v7429_v33 = vld [vmem:[%s17001_s6 + $0x110] sm:$0xff] }
0x1b96   :  { %v13164_v0 = vpop.eup %13163 }
0x1b97   :  { %v7160_v19 = vmul.f32 %v13164_v0, %v7159_v46  ;;  %v16536_v46 = vpack.c.bf16 %v7429_v33, %v7426_v6  ;;  %v7428_v0 = vld [vmem:[%s17001_s6 + $0x108] sm:$0xff] }
0x1b99   :  { %v16406_v18 = vadd.f32 %v7161_v45, %v7160_v19  ;;  %v7427_v19 = vld [vmem:[%s17001_s6 + $0x100] sm:$0xff]  ;;  %v7430_v45 = vld [vmem:[%s17001_s6 + $0x118] sm:$0xff] }
0x1b9b   :  { %7294 = vmatmul.mubr.f32.vlgmr.msra.gmra.mrb[70].mxu1 %v16406_v18  ;;  %10525 = vmatmul.mubr.f32.vlgmr.msra.gmra.mrb[70].mxu0 %v16406_v18 }
0x1b9c   :  { %12445 = vmatpush3.bf16.msra.mxu0 %v16262_v10  ;;  %7524 = vmatprep.mubr.f32.mxu1 %v17020_v49  ;;  %v7399_v10 = vld [vmem:[%s17001_s6 + $0x20] sm:$0xff] }
0x1b9d   :  { %12446 = vmatprep.subr.bf16.mxu0 %v17019_v1  ;;  %10559 = vmatprep.mubr.msk.f32.mxu0 %vm13217_vm2, %v17020_v49  ;;  %v16425_v56 = vpack.c.bf16 %v7399_v10, %v7396_v38  ;;  %v16548_v38 = vpack.c.bf16 %v7428_v0, %v7425_v35  ;;  %v16550_v10 = vpack.c.bf16 %v7430_v45, %v7427_v19 }
0x1b9e   :  { %v12809_v35 = vadd.f32 %v7221_v24, %v15510_v11 }
0x1b9f   :  { %12412 = vmatprep.subr.bf16.mxu1 %v16425_v56 }
0x1ba0   :  { %12448 = vmatpush3.bf16.msra.mxu0 %v16272_v55  ;;  %v7395_v55 = vld [vmem:[%s17001_s6] sm:$0xff] }
0x1ba1   :  { %12449 = vmatprep.subr.bf16.mxu0 %v17019_v1 }
0x1ba4   :  { %12451 = vmatpush3.bf16.msra.mxu0 %v16282_v4  ;;  %v7398_v4 = vld [vmem:[%s17001_s6 + $0x18] sm:$0xff] }
0x1ba5   :  { %12452 = vmatprep.subr.bf16.mxu0 %v17019_v1  ;;  %v16433_v16 = vpack.c.bf16 %v7398_v4, %v7395_v55  ;;  %v7432_v55 = vld [vmem:[%s17001_s6 + $0x128] sm:$0xff]  ;;  %v7435_v4 = vld [vmem:[%s17001_s6 + $0x140] sm:$0xff] }
0x1ba6   :  { %v16563_v50 = vpack.c.bf16 %v7435_v4, %v7432_v55 }
0x1ba7   :  { %12414 = vmatpush1.bf16.msra.mxu1 %v16433_v16 }
0x1ba8   :  { %12416 = vmatprep.subr.bf16.mxu1 %v16443_v27  ;;  %12454 = vmatpush3.bf16.msra.mxu0 %v16496_v7 }
0x1ba9   :  { %12455 = vmatprep.subr.bf16.mxu0 %v17019_v1 }
0x1bab   :  { %12418 = vmatpush1.bf16.msra.mxu1 %v16451_v39 }
0x1bac   :  { %12420 = vmatprep.subr.bf16.mxu1 %v16461_v21  ;;  %12457 = vmatpush3.bf16.msra.mxu0 %v16524_v52 }
0x1bad   :  { %12458 = vmatprep.subr.bf16.mxu0 %v17019_v1 }
0x1baf   :  { %12422 = vmatpush1.bf16.msra.mxu1 %v16469_v14 }
0x1bb0   :  { %12424 = vmatprep.subr.bf16.mxu1 %v16479_v54  ;;  %12460 = vmatpush3.bf16.msra.mxu0 %v16550_v10 }
0x1bb1   :  { %12461 = vmatprep.subr.bf16.mxu0 %v17019_v1 }
0x1bb3   :  { %12426 = vmatpush1.bf16.msra.mxu1 %v16490_v26 }
0x1bb4   :  { %12428 = vmatprep.subr.bf16.mxu1 %v16506_v30  ;;  %12463 = vmatpush3.bf16.msra.mxu0 %v16585_v31 }
0x1bb5   :  { %12464 = vmatprep.subr.bf16.mxu0 %v17019_v1 }
0x1bb7   :  { %12430 = vmatpush1.bf16.msra.mxu1 %v16518_v25 }
0x1bb8   :  { %12432 = vmatprep.subr.bf16.mxu1 %v16536_v46  ;;  %12466 = vmatpush3.bf16.msra.mxu0 %v16607_v60 }
0x1bb9   :  { %12499 = vmatprep.subr.bf16.mxu0 %v17019_v1 }
0x1bbb   :  { %12434 = vmatpush1.bf16.msra.mxu1 %v16548_v38 }
0x1bbc   :  { %12436 = vmatprep.subr.bf16.mxu1 %v16563_v50 }
0x1bbf   :  { %12438 = vmatpush1.bf16.msra.mxu1 %v16581_v3 }
0x1bc0   :  { %12440 = vmatprep.subr.bf16.mxu1 %v16587_v13 }
0x1bc3   :  { %12442 = vmatpush1.bf16.msra.mxu1 %v16603_v20 }
0x1bc4   :  { %12468 = vmatprep.subr.bf16.mxu1 %v16425_v56 }
0x1c6e   :  { %v7295_v6 = vpop.f32.mrb[70].mxu1  ;;  %v7366_v33 = vpop.f32.mrb[70].mxu0 }
0x1c6f   :  { %v12808_v0 = vadd.f32 %v12807_v32, %v7295_v6  ;;  %v7297_v19 = vpop.f32.mrb[71].mxu1  ;;  %v10526_v45 = vpop.f32.mrb[71].mxu0  ;;  %v7367_v62 = vadd.f32 %v7366_v33, %v7225_v2  ;;  %v16654_v33 = vpack.c.bf16 %v7631_v61, %v7628_v34 }
0x1c70   :  { %v12810_v4 = vadd.f32 %v12809_v35, %v7297_v19  ;;  %v7634_v45 = vld [vmem:[%s17001_s6 + $0x40] sm:$0xff] }
0x1c71   :  { %v8796_v55 = vmul.f32 -1.442695, %v12808_v0 }
0x1c72   :  { %v8797_v41 = vmul.f32 -1.442695, %v12810_v4 }
0x1c73   :  { %13165 = vpow2.f32 %v8796_v55  ;;  %v7637_v55 = vld [vmem:[%s17001_s6 + $0x58] sm:$0xff] }
0x1c74   :  { %13167 = vpow2.f32 %v8797_v41  ;;  %v16664_v4 = vpack.c.bf16 %v7637_v55, %v7634_v45  ;;  %v7640_v41 = vld [vmem:[%s17001_s6 + $0x70] sm:$0xff] }
0x1c7d   :  { %v13166_v63 = vpop.eup %13165 }
0x1c7e   :  { %v7377_v53 = vadd.f32 1.0, %v13166_v63  ;;  %v13168_v12 = vpop.eup %13167  ;;  %v7643_v63 = vld [vmem:[%s17001_s6 + $0x88] sm:$0xff] }
0x1c7f   :  { %v7384_v22 = vadd.f32 1.0, %v13168_v12  ;;  %v7443_v12 = vld [vmem:[%s17002_s8] sm:$0x7] }
0x1c80   :  { %13169 = vrcp.f32 %v7377_v53  ;;  %v16674_v53 = vpack.c.bf16 %v7643_v63, %v7640_v41  ;;  %v7448_v2 = vrot.slane %v7443_v12, %v13696_v37  ;;  %v7456_v55 = vrot.slane %v7443_v12, %v13660_v42 }
0x1c81   :  { %13171 = vrcp.f32 %v7384_v22  ;;  %v7452_v22 = vrot.slane %v7443_v12, %v13701_v47 }
0x1c8a   :  { %v13170_v23 = vpop.eup %13169 }
0x1c8b   :  { %v7387_v48 = vmul.f32 %v13170_v23, %v7367_v62  ;;  %v13172_v24 = vpop.eup %13171  ;;  %v12811_v62 = vadd.f32 %v7448_v2, %v15504_v15 }
0x1c8c   :  { %v7390_v32 = vsub.f32 1.0, %v13172_v24  ;;  %v7392_v0 = vmul.f32 %v13172_v24, %v16406_v18 }
0x1c8d   :  { %v7388_v29 = vadd.f32 %v7387_v48, %v4552_v5  ;;  %v12813_v48 = vadd.f32 %v7452_v22, %v15510_v11  ;;  %v4557_v22 = vadd.f32 %v15467_v9, %v15519_v43  ;;  %v7674_v9 = vld [vmem:[%s17002_s8] sm:$0x7] }
0x1c8e   :  { %v7679_v12 = vrot.slane %v7674_v9, %v13696_v37 }
0x1c8f   :  { %13173 = vtanh.f32 %v7388_v29 }
0x1c99   :  { %v13174_v6 = vpop.eup %13173 }
0x1c9a   :  { %v7391_v35 = vmul.f32 %v13174_v6, %v7390_v32 }
0x1c9c   :  { %v16625_v19 = vadd.f32 %v7392_v0, %v7391_v35 }
0x1c9e   :  { %7525 = vmatmul.mubr.f32.vlgmr.msra.gmra.mrb[72].mxu1 %v16625_v19  ;;  %10560 = vmatmul.mubr.f32.vlgmr.msra.gmra.mrb[72].mxu0 %v16625_v19 }
0x1c9f   :  { %12470 = vmatpush1.bf16.msra.mxu1 %v16433_v16  ;;  %7755 = vmatprep.mubr.f32.mxu1 %v17020_v49 }
0x1ca0   :  { %12472 = vmatprep.subr.bf16.mxu1 %v16443_v27  ;;  %10594 = vmatprep.mubr.msk.f32.mxu0 %vm13217_vm2, %v17020_v49 }
0x1ca1   :  { %12501 = vmatpush3.bf16.msra.mxu0 %v16654_v33 }
0x1ca2   :  { %12502 = vmatprep.subr.bf16.mxu0 %v17019_v1 }
0x1ca3   :  { %12474 = vmatpush1.bf16.msra.mxu1 %v16451_v39 }
0x1ca4   :  { %12476 = vmatprep.subr.bf16.mxu1 %v16461_v21 }
0x1ca5   :  { %12504 = vmatpush3.bf16.msra.mxu0 %v16664_v4 }
0x1ca6   :  { %12505 = vmatprep.subr.bf16.mxu0 %v17019_v1 }
0x1ca7   :  { %12478 = vmatpush1.bf16.msra.mxu1 %v16469_v14 }
0x1ca8   :  { %12480 = vmatprep.subr.bf16.mxu1 %v16479_v54 }
0x1ca9   :  { %12507 = vmatpush3.bf16.msra.mxu0 %v16674_v53 }
0x1caa   :  { %12508 = vmatprep.subr.bf16.mxu0 %v17019_v1 }
0x1cab   :  { %12482 = vmatpush1.bf16.msra.mxu1 %v16490_v26 }
0x1cac   :  { %12484 = vmatprep.subr.bf16.mxu1 %v16506_v30 }
0x1cad   :  { %12510 = vmatpush3.bf16.msra.mxu0 %v16496_v7 }
0x1cae   :  { %12511 = vmatprep.subr.bf16.mxu0 %v17019_v1 }
0x1caf   :  { %12486 = vmatpush1.bf16.msra.mxu1 %v16518_v25 }
0x1cb0   :  { %12488 = vmatprep.subr.bf16.mxu1 %v16536_v46 }
0x1cb1   :  { %12513 = vmatpush3.bf16.msra.mxu0 %v16524_v52 }
0x1cb2   :  { %12514 = vmatprep.subr.bf16.mxu0 %v17019_v1 }
0x1cb3   :  { %12490 = vmatpush1.bf16.msra.mxu1 %v16548_v38 }
0x1cb4   :  { %12492 = vmatprep.subr.bf16.mxu1 %v16563_v50 }
0x1cb5   :  { %12516 = vmatpush3.bf16.msra.mxu0 %v16550_v10 }
0x1cb6   :  { %12517 = vmatprep.subr.bf16.mxu0 %v17019_v1 }
0x1cb7   :  { %12494 = vmatpush1.bf16.msra.mxu1 %v16581_v3 }
0x1cb8   :  { %12496 = vmatprep.subr.bf16.mxu1 %v16587_v13 }
0x1cb9   :  { %12519 = vmatpush3.bf16.msra.mxu0 %v16585_v31 }
0x1cba   :  { %12520 = vmatprep.subr.bf16.mxu0 %v17019_v1 }
0x1cbb   :  { %12498 = vmatpush1.bf16.msra.mxu1 %v16603_v20 }
0x1cbc   :  { %12524 = vmatprep.subr.bf16.mxu1 %v16425_v56 }
0x1cbd   :  { %12522 = vmatpush3.bf16.msra.mxu0 %v16607_v60 }
0x1cbe   :  { %12555 = vmatprep.subr.bf16.mxu0 %v17019_v1 }
0x1d71   :  { %v7526_v23 = vpop.f32.mrb[72].mxu1  ;;  %v7597_v5 = vpop.f32.mrb[72].mxu0 }
0x1d72   :  { %v12812_v29 = vadd.f32 %v12811_v62, %v7526_v23  ;;  %v7528_v24 = vpop.f32.mrb[73].mxu1  ;;  %v10561_v32 = vpop.f32.mrb[73].mxu0  ;;  %v7598_v63 = vadd.f32 %v7597_v5, %v7456_v55  ;;  %v7683_v5 = vrot.slane %v7674_v9, %v13701_v47 }
0x1d73   :  { %v12814_v35 = vadd.f32 %v12813_v48, %v7528_v24 }
0x1d74   :  { %v8798_v6 = vmul.f32 -1.442695, %v12812_v29 }
0x1d75   :  { %v8799_v0 = vmul.f32 -1.442695, %v12814_v35 }
0x1d76   :  { %13175 = vpow2.f32 %v8798_v6 }
0x1d77   :  { %13177 = vpow2.f32 %v8799_v0  ;;  %v12815_v0 = vadd.f32 %v7679_v12, %v15504_v15  ;;  %v17028_v12 = vld [vmem:[#allocation5_spill] sm:$0xff] }
0x1d80   :  { %v13176_v34 = vpop.eup %13175 }
0x1d81   :  { %v7608_v61 = vadd.f32 1.0, %v13176_v34  ;;  %v13178_v45 = vpop.eup %13177 }
0x1d82   :  { %v7615_v41 = vadd.f32 1.0, %v13178_v45  ;;  %v12817_v45 = vadd.f32 %v7683_v5, %v15510_v11  ;;  %v4562_v5 = vadd.f32 %v17028_v12, %v15519_v43 }
0x1d83   :  { %13179 = vrcp.f32 %v7608_v61 }
0x1d84   :  { %13181 = vrcp.f32 %v7615_v41 }
0x1d8d   :  { %v13180_v2 = vpop.eup %13179 }
0x1d8e   :  { %v7618_v62 = vmul.f32 %v13180_v2, %v7598_v63  ;;  %v13182_v48 = vpop.eup %13181 }
0x1d8f   :  { %v7621_v29 = vsub.f32 1.0, %v13182_v48  ;;  %v7623_v6 = vmul.f32 %v13182_v48, %v16625_v19 }
0x1d90   :  { %v7619_v23 = vadd.f32 %v7618_v62, %v4557_v22 }
0x1d92   :  { %13183 = vtanh.f32 %v7619_v23 }
0x1d9c   :  { %v13184_v24 = vpop.eup %13183 }
0x1d9d   :  { %v7622_v32 = vmul.f32 %v13184_v24, %v7621_v29  ;;  %v7687_v29 = vrot.slane %v7674_v9, %v13660_v42 }
0x1d9f   :  { %v16699_v35 = vadd.f32 %v7623_v6, %v7622_v32 }
0x1da1   :  { %7756 = vmatmul.mubr.f32.vlgmr.msra.gmra.mrb[74].mxu1 %v16699_v35  ;;  %10595 = vmatmul.mubr.f32.vlgmr.msra.gmra.mrb[74].mxu0 %v16699_v35 }
0x1da2   :  { %12526 = vmatpush1.bf16.msra.mxu1 %v16433_v16  ;;  %12557 = vmatpush3.bf16.msra.mxu0 %v16654_v33 }
0x1da3   :  { %12528 = vmatprep.subr.bf16.mxu1 %v16443_v27  ;;  %12558 = vmatprep.subr.bf16.mxu0 %v17019_v1 }
0x1da4   :  { %7986 = vmatprep.mubr.f32.mxu1 %v17020_v49  ;;  %10629 = vmatprep.mubr.msk.f32.mxu0 %vm13217_vm2, %v17020_v49 }
0x1da6   :  { %12530 = vmatpush1.bf16.msra.mxu1 %v16451_v39  ;;  %12560 = vmatpush3.bf16.msra.mxu0 %v16664_v4 }
0x1da7   :  { %12532 = vmatprep.subr.bf16.mxu1 %v16461_v21  ;;  %12561 = vmatprep.subr.bf16.mxu0 %v17019_v1 }
0x1daa   :  { %12534 = vmatpush1.bf16.msra.mxu1 %v16469_v14  ;;  %12563 = vmatpush3.bf16.msra.mxu0 %v16674_v53 }
0x1dab   :  { %12536 = vmatprep.subr.bf16.mxu1 %v16479_v54  ;;  %12564 = vmatprep.subr.bf16.mxu0 %v17019_v1 }
0x1dae   :  { %12538 = vmatpush1.bf16.msra.mxu1 %v16490_v26  ;;  %12566 = vmatpush3.bf16.msra.mxu0 %v16496_v7 }
0x1daf   :  { %12540 = vmatprep.subr.bf16.mxu1 %v16506_v30  ;;  %12567 = vmatprep.subr.bf16.mxu0 %v17019_v1 }
0x1db2   :  { %12542 = vmatpush1.bf16.msra.mxu1 %v16518_v25  ;;  %12569 = vmatpush3.bf16.msra.mxu0 %v16524_v52 }
0x1db3   :  { %12544 = vmatprep.subr.bf16.mxu1 %v16536_v46  ;;  %12570 = vmatprep.subr.bf16.mxu0 %v17019_v1 }
0x1db6   :  { %12546 = vmatpush1.bf16.msra.mxu1 %v16548_v38  ;;  %12572 = vmatpush3.bf16.msra.mxu0 %v16550_v10 }
0x1db7   :  { %12548 = vmatprep.subr.bf16.mxu1 %v16563_v50  ;;  %12573 = vmatprep.subr.bf16.mxu0 %v17019_v1 }
0x1dba   :  { %12550 = vmatpush1.bf16.msra.mxu1 %v16581_v3  ;;  %12575 = vmatpush3.bf16.msra.mxu0 %v16585_v31 }
0x1dbb   :  { %12552 = vmatprep.subr.bf16.mxu1 %v16587_v13  ;;  %12576 = vmatprep.subr.bf16.mxu0 %v17019_v1 }
0x1dbe   :  { %12554 = vmatpush1.bf16.msra.mxu1 %v16603_v20  ;;  %12578 = vmatpush3.bf16.msra.mxu0 %v16607_v60 }
0x1dbf   :  { %12611 = vmatprep.subr.bf16.mxu0 %v17019_v1  ;;  %12580 = vmatprep.subr.bf16.mxu1 %v16425_v56 }
0x1e74   :  { %v7757_v34 = vpop.f32.mrb[74].mxu1  ;;  %v7828_v61 = vpop.f32.mrb[74].mxu0 }
0x1e75   :  { %v12816_v55 = vadd.f32 %v12815_v0, %v7757_v34  ;;  %v7759_v41 = vpop.f32.mrb[75].mxu1  ;;  %v10596_v63 = vpop.f32.mrb[75].mxu0  ;;  %v7829_v32 = vadd.f32 %v7828_v61, %v7687_v29  ;;  %v8338_v29 = vld [vmem:[%s17004_s9 + $0x18] sm:$0xff] }
0x1e76   :  { %v12818_v22 = vadd.f32 %v12817_v45, %v7759_v41 }
0x1e77   :  { %v8800_v2 = vmul.f32 -1.442695, %v12816_v55 }
0x1e78   :  { %v8801_v56 = vmul.f32 -1.442695, %v12818_v22 }
0x1e79   :  { %13185 = vpow2.f32 %v8800_v2 }
0x1e7a   :  { %13187 = vpow2.f32 %v8801_v56 }
0x1e83   :  { %v13186_v62 = vpop.eup %13185 }
0x1e84   :  { %v7839_v23 = vadd.f32 1.0, %v13186_v62  ;;  %v13188_v48 = vpop.eup %13187 }
0x1e85   :  { %v7846_v24 = vadd.f32 1.0, %v13188_v48  ;;  %v8337_v48 = vld [vmem:[%s17004_s9 + $0x10] sm:$0xff] }
0x1e86   :  { %13189 = vrcp.f32 %v7839_v23  ;;  %v12639_v12 = vpack.c.bf16 %v8338_v29, %v8337_v48 }
0x1e87   :  { %13191 = vrcp.f32 %v7846_v24 }
0x1e90   :  { %v13190_v6 = vpop.eup %13189 }
0x1e91   :  { %v7849_v0 = vmul.f32 %v13190_v6, %v7829_v32  ;;  %v13192_v45 = vpop.eup %13191 }
0x1e92   :  { %v7852_v55 = vsub.f32 1.0, %v13192_v45  ;;  %v7854_v2 = vmul.f32 %v13192_v45, %v16699_v35  ;;  %v8341_v45 = vld [vmem:[%s17004_s9 + $0x30] sm:$0xff] }
0x1e93   :  { %v7850_v34 = vadd.f32 %v7849_v0, %v4562_v5  ;;  %v8339_v5 = vld [vmem:[%s17004_s9 + $0x20] sm:$0xff]  ;;  %v8340_v0 = vld [vmem:[%s17004_s9 + $0x28] sm:$0xff] }
0x1e95   :  { %13193 = vtanh.f32 %v7850_v34  ;;  %v12643_v34 = vpack.c.bf16 %v8340_v0, %v8339_v5 }
0x1e9f   :  { %v13194_v41 = vpop.eup %13193 }
0x1ea0   :  { %v7853_v63 = vmul.f32 %v13194_v41, %v7852_v55  ;;  %v8342_v55 = vld [vmem:[%s17004_s9 + $0x38] sm:$0xff] }
0x1ea1   :  { %v12647_v41 = vpack.c.bf16 %v8342_v55, %v8341_v45  ;;  %v16925_v55 = vld [vmem:[%s17006_s10] ss:$0 sm:$0xff] }
0x1ea2   :  { %v16749_v22 = vadd.f32 %v7854_v2, %v7853_v63  ;;  %v8343_v63 = vld [vmem:[%s17004_s9 + $0x40] sm:$0xff] }
0x1ea4   :  { %7987 = vmatmul.mubr.f32.vlgmr.msra.gmra.mrb[76].mxu1 %v16749_v22  ;;  %10630 = vmatmul.mubr.f32.vlgmr.msra.gmra.mrb[76].mxu0 %v16749_v22 }
0x1ea5   :  { %12613 = vmatpush3.bf16.msra.mxu0 %v16654_v33  ;;  %12582 = vmatpush1.bf16.msra.mxu1 %v16433_v16  ;;  %v8336_v16 = vld [vmem:[%s17004_s9 + $0x8] sm:$0xff] }
0x1ea6   :  { %12614 = vmatprep.subr.bf16.mxu0 %v17019_v1  ;;  %12584 = vmatprep.subr.bf16.mxu1 %v16443_v27 }
0x1ea7   :  { %8217 = vmatprep.mubr.f32.mxu1 %v17020_v49  ;;  %10664 = vmatprep.mubr.msk.f32.mxu0 %vm13217_vm2, %v17020_v49  ;;  %v8335_v49 = vld [vmem:[%s17004_s9] sm:$0xff] }
0x1ea8   :  { %v12635_v27 = vpack.c.bf16 %v8336_v16, %v8335_v49  ;;  %v8345_v49 = vld [vmem:[%s17004_s9 + $0x50] sm:$0xff]  ;;  %v8346_v16 = vld [vmem:[%s17004_s9 + $0x58] sm:$0xff] }
0x1ea9   :  { %12616 = vmatpush3.bf16.msra.mxu0 %v16664_v4  ;;  %12586 = vmatpush1.bf16.msra.mxu1 %v16451_v39  ;;  %v17029_v4 = vld [vmem:[#allocation4_spill] sm:$0xff] }
0x1eaa   :  { %12617 = vmatprep.subr.bf16.mxu0 %v17019_v1  ;;  %12588 = vmatprep.subr.bf16.mxu1 %v16461_v21 }
0x1ead   :  { %12619 = vmatpush3.bf16.msra.mxu0 %v16674_v53  ;;  %12590 = vmatpush1.bf16.msra.mxu1 %v16469_v14  ;;  %v4567_v53 = vadd.f32 %v17029_v4, %v15519_v43 }
0x1eae   :  { %12620 = vmatprep.subr.bf16.mxu0 %v17019_v1  ;;  %12592 = vmatprep.subr.bf16.mxu1 %v16479_v54 }
0x1eb1   :  { %12622 = vmatpush3.bf16.msra.mxu0 %v16496_v7  ;;  %12594 = vmatpush1.bf16.msra.mxu1 %v16490_v26 }
0x1eb2   :  { %12623 = vmatprep.subr.bf16.mxu0 %v17019_v1  ;;  %12596 = vmatprep.subr.bf16.mxu1 %v16506_v30 }
0x1eb5   :  { %12625 = vmatpush3.bf16.msra.mxu0 %v16524_v52  ;;  %12598 = vmatpush1.bf16.msra.mxu1 %v16518_v25 }
0x1eb6   :  { %12626 = vmatprep.subr.bf16.mxu0 %v17019_v1  ;;  %12600 = vmatprep.subr.bf16.mxu1 %v16536_v46 }
0x1eb9   :  { %12628 = vmatpush3.bf16.msra.mxu0 %v16550_v10  ;;  %12602 = vmatpush1.bf16.msra.mxu1 %v16548_v38 }
0x1eba   :  { %12629 = vmatprep.subr.bf16.mxu0 %v17019_v1  ;;  %12604 = vmatprep.subr.bf16.mxu1 %v16563_v50 }
0x1ebd   :  { %12631 = vmatpush3.bf16.msra.mxu0 %v16585_v31  ;;  %12606 = vmatpush1.bf16.msra.mxu1 %v16581_v3 }
0x1ebe   :  { %12632 = vmatprep.subr.bf16.mxu0 %v17019_v1  ;;  %12608 = vmatprep.subr.bf16.mxu1 %v16587_v13  ;;  %v7905_v1 = vld [vmem:[%s17002_s8] sm:$0x7] }
0x1ebf   :  { %v7910_v39 = vrot.slane %v7905_v1, %v13696_v37  ;;  %v7914_v21 = vrot.slane %v7905_v1, %v13701_v47  ;;  %v7918_v13 = vrot.slane %v7905_v1, %v13660_v42  ;;  %v8347_v1 = vld [vmem:[%s17004_s9 + $0x60] sm:$0xff] }
0x1ec1   :  { %12634 = vmatpush3.bf16.msra.mxu0 %v16607_v60  ;;  %12610 = vmatpush1.bf16.msra.mxu1 %v16603_v20  ;;  %v12819_v14 = vadd.f32 %v7910_v39, %v15504_v15  ;;  %v12821_v7 = vadd.f32 %v7914_v21, %v15510_v11  ;;  %v8348_v39 = vld [vmem:[%s17004_s9 + $0x68] sm:$0xff] }
0x1ec2   :  { %12636 = vmatprep.subr.bf16.mxu0 %v12635_v27  ;;  %v12659_v21 = vpack.c.bf16 %v8348_v39, %v8347_v1 }
0x1f77   :  { %v7988_v54 = vpop.f32.mrb[76].mxu1  ;;  %v8059_v26 = vpop.f32.mrb[76].mxu0 }
0x1f78   :  { %v12820_v30 = vadd.f32 %v12819_v14, %v7988_v54  ;;  %v7990_v25 = vpop.f32.mrb[77].mxu1  ;;  %v10631_v52 = vpop.f32.mrb[77].mxu0  ;;  %v8060_v60 = vadd.f32 %v8059_v26, %v7918_v13  ;;  %v8349_v14 = vld [vmem:[%s17004_s9 + $0x70] sm:$0xff]  ;;  %v8350_v54 = vld [vmem:[%s17004_s9 + $0x78] sm:$0xff] }
0x1f79   :  { %v12822_v38 = vadd.f32 %v12821_v7, %v7990_v25  ;;  %v12663_v26 = vpack.c.bf16 %v8350_v54, %v8349_v14  ;;  %v8528_v7 = vld [vmem:[%s17005_s11 + $0x48] sm:$0xff]  ;;  %v8529_v25 = vld [vmem:[%s17005_s11 + $0x50] sm:$0xff]  ;;  %v8530_v52 = vld [vmem:[%s17005_s11 + $0x58] sm:$0xff] }
0x1f7a   :  { %v8802_v46 = vmul.f32 -1.442695, %v12820_v30 }
0x1f7b   :  { %v8803_v10 = vmul.f32 -1.442695, %v12822_v38  ;;  %v8531_v38 = vld [vmem:[%s17005_s11 + $0x60] sm:$0xff] }
0x1f7c   :  { %13195 = vpow2.f32 %v8802_v46  ;;  %v12687_v46 = vpack.c.bf16 %v8530_v52, %v8529_v25 }
0x1f7d   :  { %13197 = vpow2.f32 %v8803_v10  ;;  %v8532_v10 = vld [vmem:[%s17005_s11 + $0x68] sm:$0xff] }
0x1f86   :  { %v13196_v50 = vpop.eup %13195 }
0x1f87   :  { %v8070_v3 = vadd.f32 1.0, %v13196_v50  ;;  %v13198_v31 = vpop.eup %13197  ;;  %v12691_v50 = vpack.c.bf16 %v8532_v10, %v8531_v38 }
0x1f88   :  { %v8077_v20 = vadd.f32 1.0, %v13198_v31  ;;  %v8534_v31 = vld [vmem:[%s17005_s11 + $0x78] sm:$0xff] }
0x1f89   :  { %13199 = vrcp.f32 %v8070_v3  ;;  %v8533_v3 = vld [vmem:[%s17005_s11 + $0x70] sm:$0xff] }
0x1f8a   :  { %13201 = vrcp.f32 %v8077_v20  ;;  %v12695_v13 = vpack.c.bf16 %v8534_v31, %v8533_v3  ;;  %v8136_v20 = vld [vmem:[%s17002_s8] sm:$0x7] }
0x1f93   :  { %v13200_v33 = vpop.eup %13199 }
0x1f94   :  { %v8080_v9 = vmul.f32 %v13200_v33, %v8060_v60  ;;  %v13202_v56 = vpop.eup %13201  ;;  %v8141_v60 = vrot.slane %v8136_v20, %v13696_v37  ;;  %v8145_v33 = vrot.slane %v8136_v20, %v13701_v47  ;;  %v8149_v47 = vrot.slane %v8136_v20, %v13660_v42 }
0x1f95   :  { %v8083_v62 = vsub.f32 1.0, %v13202_v56  ;;  %v8085_v32 = vmul.f32 %v13202_v56, %v16749_v22 }
0x1f96   :  { %v8081_v61 = vadd.f32 %v8080_v9, %v4567_v53  ;;  %v12823_v4 = vadd.f32 %v8141_v60, %v15504_v15 }
0x1f98   :  { %13203 = vtanh.f32 %v8081_v61  ;;  %v12825_v61 = vadd.f32 %v8145_v33, %v15510_v11 }
0x1fa2   :  { %v13204_v23 = vpop.eup %13203 }
0x1fa3   :  { %v8084_v24 = vmul.f32 %v13204_v23, %v8083_v62 }
0x1fa5   :  { %v16809_v6 = vadd.f32 %v8085_v32, %v8084_v24 }
0x1fa7   :  { %8218 = vmatmul.mubr.f32.vlgmr.msra.gmra.mrb[78].mxu1 %v16809_v6  ;;  %10665 = vmatmul.mubr.f32.vlgmr.msra.gmra.mrb[78].mxu0 %v16809_v6 }
0x1fa8   :  { %12638 = vmatpush3.bf16.msra.mxu0 %v12635_v27  ;;  %10699 = vmatprep.mubr.f32.mxu0 %v15523_v28  ;;  %v8344_v28 = vld [vmem:[%s17004_s9 + $0x48] sm:$0xff]  ;;  %v12655_v27 = vpack.c.bf16 %v8346_v16, %v8345_v49 }
0x1fa9   :  { %12640 = vmatprep.subr.bf16.mxu0 %v12639_v12  ;;  %v12651_v2 = vpack.c.bf16 %v8344_v28, %v8343_v63 }
0x1fac   :  { %12642 = vmatpush3.bf16.msra.mxu0 %v12639_v12 }
0x1fad   :  { %12644 = vmatprep.subr.bf16.mxu0 %v12643_v34 }
0x1fb0   :  { %12646 = vmatpush3.bf16.msra.mxu0 %v12643_v34  ;;  %v17030_v34 = vld [vmem:[#allocation6_spill] sm:$0xff] }
0x1fb1   :  { %12648 = vmatprep.subr.bf16.mxu0 %v12647_v41  ;;  %v4572_v11 = vadd.f32 %v17030_v34, %v15519_v43 }
0x1fb4   :  { %12650 = vmatpush3.bf16.msra.mxu0 %v12647_v41 }
0x1fb5   :  { %12652 = vmatprep.subr.bf16.mxu0 %v12651_v2 }
0x1fb8   :  { %12654 = vmatpush3.bf16.msra.mxu0 %v12651_v2 }
0x1fb9   :  { %12656 = vmatprep.subr.bf16.mxu0 %v12655_v27 }
0x1fbc   :  { %12658 = vmatpush3.bf16.msra.mxu0 %v12655_v27 }
0x1fbd   :  { %12660 = vmatprep.subr.bf16.mxu0 %v12659_v21 }
0x1fc0   :  { %12662 = vmatpush3.bf16.msra.mxu0 %v12659_v21 }
0x1fc1   :  { %12664 = vmatprep.subr.bf16.mxu0 %v12663_v26 }
0x1fc4   :  { %12666 = vmatpush3.bf16.msra.mxu0 %v12663_v26 }
0x1fc7   :  { %10700 = vmatmul.mubr.f32.vlgmr.msra.gmra.mrb[80].mxu0 %v15573_v44  ;;  %v8519_v44 = vld [vmem:[%s17005_s11] sm:$0xff] }
0x1fc8   :  { %10702 = vmatprep.mubr.f32.mxu0 %v15622_v8  ;;  %v8520_v8 = vld [vmem:[%s17005_s11 + $0x8] sm:$0xff] }
0x1fcb   :  { %10703 = vmatmul.mubr.f32.gmra.mrb[82].mxu0 %v15841_v51  ;;  %v12667_v51 = vpack.c.bf16 %v8520_v8, %v8519_v44 }
0x1fcc   :  { %10705 = vmatprep.mubr.f32.mxu0 %v15915_v59  ;;  %v8521_v59 = vld [vmem:[%s17005_s11 + $0x10] sm:$0xff] }
0x1fcd   :  { %12668 = vmatprep.subr.bf16.mxu1 %v12667_v51 }
0x1fce   :  { %12670 = vmatpush3.bf16.msra.mxu1 %v12667_v51 }
0x1fcf   :  { %10706 = vmatmul.mubr.f32.gmra.mrb[84].mxu0 %v15965_v57  ;;  %v8522_v57 = vld [vmem:[%s17005_s11 + $0x18] sm:$0xff] }
0x1fd0   :  { %10708 = vmatprep.mubr.f32.mxu0 %v16014_v58  ;;  %v12671_v58 = vpack.c.bf16 %v8522_v57, %v8521_v59 }
0x1fd2   :  { %12672 = vmatprep.subr.bf16.mxu1 %v12671_v58 }
0x1fd3   :  { %10709 = vmatmul.mubr.f32.gmra.mrb[86].mxu0 %v16233_v36  ;;  %12674 = vmatpush3.bf16.msra.mxu1 %v12671_v58  ;;  %v8523_v36 = vld [vmem:[%s17005_s11 + $0x20] sm:$0xff] }
0x1fd4   :  { %10711 = vmatprep.mubr.f32.mxu0 %v16307_v17  ;;  %v8524_v17 = vld [vmem:[%s17005_s11 + $0x28] sm:$0xff] }
0x1fd7   :  { %10712 = vmatmul.mubr.f32.gmra.mrb[88].mxu0 %v16357_v40  ;;  %v12675_v40 = vpack.c.bf16 %v8524_v17, %v8523_v36 }
0x1fd8   :  { %10714 = vmatprep.mubr.f32.mxu0 %v16406_v18  ;;  %v8525_v18 = vld [vmem:[%s17005_s11 + $0x30] sm:$0xff] }
0x1fd9   :  { %12676 = vmatprep.subr.bf16.mxu1 %v12675_v40 }
0x1fda   :  { %12678 = vmatpush3.bf16.msra.mxu1 %v12675_v40 }
0x1fdb   :  { %10715 = vmatmul.mubr.f32.gmra.mrb[90].mxu0 %v16625_v19  ;;  %v8526_v19 = vld [vmem:[%s17005_s11 + $0x38] sm:$0xff] }
0x1fdc   :  { %10717 = vmatprep.mubr.f32.mxu0 %v16699_v35  ;;  %v12679_v35 = vpack.c.bf16 %v8526_v19, %v8525_v18 }
0x1fde   :  { %12680 = vmatprep.subr.bf16.mxu1 %v12679_v35 }
0x1fdf   :  { %10718 = vmatmul.mubr.f32.gmra.mrb[92].mxu0 %v16749_v22  ;;  %12682 = vmatpush3.bf16.msra.mxu1 %v12679_v35  ;;  %v8527_v22 = vld [vmem:[%s17005_s11 + $0x40] sm:$0xff] }
0x1fe0   :  { %10720 = vmatprep.mubr.f32.mxu0 %v16809_v6  ;;  %v12683_v30 = vpack.c.bf16 %v8528_v7, %v8527_v22 }
0x1fe2   :  { %12684 = vmatprep.subr.bf16.mxu1 %v12683_v30 }
0x1fe3   :  { %12686 = vmatpush3.bf16.msra.mxu1 %v12683_v30 }
0x1fe4   :  { %12688 = vmatprep.subr.bf16.mxu1 %v12687_v46 }
0x1fe7   :  { %12690 = vmatpush3.bf16.msra.mxu1 %v12687_v46 }
0x1fe8   :  { %12692 = vmatprep.subr.bf16.mxu1 %v12691_v50 }
0x1feb   :  { %12694 = vmatpush3.bf16.msra.mxu1 %v12691_v50 }
0x1fec   :  { %12696 = vmatprep.subr.bf16.mxu1 %v12695_v13 }
0x1fef   :  { %12698 = vmatpush3.bf16.msra.mxu1 %v12695_v13 }
0x207a   :  { %v8219_v53 = vpop.f32.mrb[78].mxu1  ;;  %v8290_v9 = vpop.f32.mrb[78].mxu0 }
0x207b   :  { %v12824_v56 = vadd.f32 %v12823_v4, %v8219_v53  ;;  %v8221_v62 = vpop.f32.mrb[79].mxu1  ;;  %v10666_v23 = vpop.f32.mrb[79].mxu0  ;;  %v8291_v15 = vadd.f32 %v8290_v9, %v8149_v47 }
0x207c   :  { %v12826_v29 = vadd.f32 %v12825_v61, %v8221_v62  ;;  %v8807_v23 = vld [vmem:[%s17007_s12] ss:$0 sm:$0xff] }
0x207d   :  { %v8804_v48 = vmul.f32 -1.442695, %v12824_v56 }
0x207e   :  { %v8805_v24 = vmul.f32 -1.442695, %v12826_v29 }
0x207f   :  { %13205 = vpow2.f32 %v8804_v48 }
0x2080   :  { %13207 = vpow2.f32 %v8805_v24 }
0x2089   :  { %v13206_v32 = vpop.eup %13205 }
0x208a   :  { %v8301_v12 = vadd.f32 1.0, %v13206_v32  ;;  %v13208_v37 = vpop.eup %13207 }
0x208b   :  { %v8308_v5 = vadd.f32 1.0, %v13208_v37 }
0x208c   :  { %13209 = vrcp.f32 %v8301_v12 }
0x208d   :  { %13211 = vrcp.f32 %v8308_v5 }
0x2096   :  { %v13210_v0 = vpop.eup %13209 }
0x2097   :  { %v8311_v45 = vmul.f32 %v13210_v0, %v8291_v15  ;;  %v13212_v21 = vpop.eup %13211 }
0x2098   :  { %v8314_v59 = vsub.f32 1.0, %v13212_v21  ;;  %v8316_v40 = vmul.f32 %v13212_v21, %v16809_v6 }
0x2099   :  { %v8312_v41 = vadd.f32 %v8311_v45, %v4572_v11 }
0x209a   :  { %v10701_v63 = vpop.f32.mrb[80].mxu0 }
0x209b   :  { %13213 = vtanh.f32 %v8312_v41  ;;  %v8430_v28 = vadd.f32 %v10701_v63, %v16925_v55  ;;  %v8424_v2 = vpop.f32.mrb[81].mxu0 }
0x209c   :  { %v8425_v42 = vadd.f32 %v16925_v55, %v8424_v2 }
0x209d   :  { %v8504_v27 = vmax.f32 %v8430_v28, 0.0 }
0x209e   :  { %v8503_v49 = vmax.f32 %v8425_v42, 0.0  ;;  %v10704_v16 = vpop.f32.mrb[82].mxu0 }
0x209f   :  { %v8440_v43 = vadd.f32 %v10704_v16, %v16925_v55  ;;  %v8434_v1 = vpop.f32.mrb[83].mxu0 }
0x20a0   :  { %v8435_v39 = vadd.f32 %v16925_v55, %v8434_v1  ;;  %10755 = vmatprep.mubr.f32.mxu1 %v8503_v49 }
0x20a1   :  { %10756 = vmatmul.mubr.f32.vlgmr.msra.gmra.mrb[80].mxu1 %v8504_v27  ;;  %v8506_v26 = vmax.f32 %v8440_v43, 0.0 }
0x20a2   :  { %v8505_v14 = vmax.f32 %v8435_v39, 0.0  ;;  %v10707_v54 = vpop.f32.mrb[84].mxu0 }
0x20a3   :  { %v8450_v44 = vadd.f32 %v10707_v54, %v16925_v55  ;;  %v8444_v8 = vpop.f32.mrb[85].mxu0 }
0x20a4   :  { %v8445_v51 = vadd.f32 %v16925_v55, %v8444_v8  ;;  %10758 = vmatprep.mubr.f32.mxu1 %v8505_v14 }
0x20a5   :  { %v13214_v57 = vpop.eup %13213  ;;  %10759 = vmatmul.mubr.f32.gmra.mrb[82].mxu1 %v8506_v26  ;;  %v8508_v18 = vmax.f32 %v8450_v44, 0.0 }
0x20a6   :  { %v8507_v58 = vmax.f32 %v8445_v51, 0.0  ;;  %v10710_v36 = vpop.f32.mrb[86].mxu0  ;;  %v8315_v17 = vmul.f32 %v13214_v57, %v8314_v59 }
0x20a7   :  { %v8460_v19 = vadd.f32 %v10710_v36, %v16925_v55  ;;  %v8454_v35 = vpop.f32.mrb[87].mxu0 }
0x20a8   :  { %v8455_v22 = vadd.f32 %v16925_v55, %v8454_v35  ;;  %10761 = vmatprep.mubr.f32.mxu1 %v8507_v58  ;;  %v8317_v7 = vadd.f32 %v8316_v40, %v8315_v17 }
0x20a9   :  { %10762 = vmatmul.mubr.f32.gmra.mrb[84].mxu1 %v8508_v18  ;;  %v8510_v52 = vmax.f32 %v8460_v19, 0.0 }
0x20aa   :  { %v8509_v30 = vmax.f32 %v8455_v22, 0.0  ;;  %v10713_v25 = vpop.f32.mrb[88].mxu0  ;;  %10721 = vmatmul.mubr.f32.gmra.mrb[94].mxu0 %v8317_v7 }
0x20ab   :  { %v8470_v46 = vadd.f32 %v10713_v25, %v16925_v55  ;;  %v8464_v38 = vpop.f32.mrb[89].mxu0 }
0x20ac   :  { %v8465_v10 = vadd.f32 %v16925_v55, %v8464_v38  ;;  %10764 = vmatprep.mubr.f32.mxu1 %v8509_v30 }
0x20ad   :  { %10765 = vmatmul.mubr.f32.gmra.mrb[86].mxu1 %v8510_v52  ;;  %v8512_v3 = vmax.f32 %v8470_v46, 0.0 }
0x20ae   :  { %v8511_v6 = vmax.f32 %v8465_v10, 0.0  ;;  %v10716_v50 = vpop.f32.mrb[90].mxu0 }
0x20af   :  { %v8480_v31 = vadd.f32 %v10716_v50, %v16925_v55  ;;  %v8474_v13 = vpop.f32.mrb[91].mxu0 }
0x20b0   :  { %v8475_v20 = vadd.f32 %v16925_v55, %v8474_v13  ;;  %10767 = vmatprep.mubr.f32.mxu1 %v8511_v6 }
0x20b1   :  { %10768 = vmatmul.mubr.f32.gmra.mrb[88].mxu1 %v8512_v3  ;;  %v8514_v4 = vmax.f32 %v8480_v31, 0.0 }
0x20b2   :  { %v8513_v60 = vmax.f32 %v8475_v20, 0.0  ;;  %v10719_v33 = vpop.f32.mrb[92].mxu0 }
0x20b3   :  { %v8490_v53 = vadd.f32 %v10719_v33, %v16925_v55  ;;  %v8484_v9 = vpop.f32.mrb[93].mxu0 }
0x20b4   :  { %v8485_v61 = vadd.f32 %v16925_v55, %v8484_v9  ;;  %10770 = vmatprep.mubr.f32.mxu1 %v8513_v60 }
0x20b5   :  { %10771 = vmatmul.mubr.f32.gmra.mrb[90].mxu1 %v8514_v4  ;;  %v8516_v62 = vmax.f32 %v8490_v53, 0.0 }
0x20b6   :  { %v8515_v56 = vmax.f32 %v8485_v61, 0.0 }
0x20b8   :  { %10773 = vmatprep.mubr.f32.mxu1 %v8515_v56 }
0x20b9   :  { %10774 = vmatmul.mubr.f32.gmra.mrb[92].mxu1 %v8516_v62 }
0x2174   :  { %v10757_v48 = vpop.f32.mrb[80].mxu1 }
0x2175   :  { %v8614_v29 = vadd.f32 %v10757_v48, %v8807_v23  ;;  %v8608_v24 = vpop.f32.mrb[81].mxu1 }
0x2176   :  { %v8609_v32 = vadd.f32 %v8807_v23, %v8608_v24 }
0x2177   :  { %8688 = vst [vmem:[%s17008_s13 + $0x8] sm:$0xff] %v8614_v29 }
0x2178   :  { %8687 = vst [vmem:[%s17008_s13] sm:$0xff] %v8609_v32  ;;  %v10760_v12 = vpop.f32.mrb[82].mxu1 }
0x2179   :  { %v8624_v37 = vadd.f32 %v10760_v12, %v8807_v23  ;;  %v8618_v47 = vpop.f32.mrb[83].mxu1 }
0x217a   :  { %v8619_v5 = vadd.f32 %v8807_v23, %v8618_v47 }
0x217b   :  { %8690 = vst [vmem:[%s17008_s13 + $0x18] sm:$0xff] %v8624_v37 }
0x217c   :  { %8689 = vst [vmem:[%s17008_s13 + $0x10] sm:$0xff] %v8619_v5  ;;  %v10763_v15 = vpop.f32.mrb[84].mxu1 }
0x217d   :  { %v8634_v0 = vadd.f32 %v10763_v15, %v8807_v23  ;;  %v8628_v34 = vpop.f32.mrb[85].mxu1  ;;  %v10722_v11 = vpop.f32.mrb[94].mxu0 }
0x217e   :  { %v8629_v45 = vadd.f32 %v8807_v23, %v8628_v34  ;;  %v8500_v41 = vadd.f32 %v10722_v11, %v16925_v55  ;;  %v8494_v63 = vpop.f32.mrb[95].mxu0 }
0x217f   :  { %8692 = vst [vmem:[%s17008_s13 + $0x28] sm:$0xff] %v8634_v0  ;;  %v8495_v28 = vadd.f32 %v16925_v55, %v8494_v63 }
0x2180   :  { %8691 = vst [vmem:[%s17008_s13 + $0x20] sm:$0xff] %v8629_v45  ;;  %v10766_v2 = vpop.f32.mrb[86].mxu1  ;;  %v8518_v27 = vmax.f32 %v8500_v41, 0.0 }
0x2181   :  { %v8517_v42 = vmax.f32 %v8495_v28, 0.0  ;;  %v8644_v49 = vadd.f32 %v10766_v2, %v8807_v23  ;;  %v8638_v16 = vpop.f32.mrb[87].mxu1 }
0x2182   :  { %v8639_v43 = vadd.f32 %v8807_v23, %v8638_v16 }
0x2183   :  { %8694 = vst [vmem:[%s17008_s13 + $0x38] sm:$0xff] %v8644_v49  ;;  %10776 = vmatprep.mubr.f32.mxu1 %v8517_v42 }
0x2184   :  { %8693 = vst [vmem:[%s17008_s13 + $0x30] sm:$0xff] %v8639_v43  ;;  %v10769_v55 = vpop.f32.mrb[88].mxu1  ;;  %10777 = vmatmul.mubr.f32.gmra.mrb[94].mxu1 %v8518_v27 }
0x2185   :  { %v8654_v1 = vadd.f32 %v10769_v55, %v8807_v23  ;;  %v8648_v39 = vpop.f32.mrb[89].mxu1 }
0x2186   :  { %v8649_v21 = vadd.f32 %v8807_v23, %v8648_v39 }
0x2187   :  { %8696 = vst [vmem:[%s17008_s13 + $0x48] sm:$0xff] %v8654_v1 }
0x2188   :  { %8695 = vst [vmem:[%s17008_s13 + $0x40] sm:$0xff] %v8649_v21  ;;  %v10772_v14 = vpop.f32.mrb[90].mxu1 }
0x2189   :  { %v8664_v54 = vadd.f32 %v10772_v14, %v8807_v23  ;;  %v8658_v26 = vpop.f32.mrb[91].mxu1 }
0x218a   :  { %v8659_v44 = vadd.f32 %v8807_v23, %v8658_v26 }
0x218b   :  { %8698 = vst [vmem:[%s17008_s13 + $0x58] sm:$0xff] %v8664_v54 }
0x218c   :  { %8697 = vst [vmem:[%s17008_s13 + $0x50] sm:$0xff] %v8659_v44  ;;  %v10775_v8 = vpop.f32.mrb[92].mxu1 }
0x218d   :  { %v8674_v51 = vadd.f32 %v10775_v8, %v8807_v23  ;;  %v8668_v59 = vpop.f32.mrb[93].mxu1 }
0x218e   :  { %v8669_v57 = vadd.f32 %v8807_v23, %v8668_v59 }
0x218f   :  { %8700 = vst [vmem:[%s17008_s13 + $0x68] sm:$0xff] %v8674_v51 }
0x2190   :  { %8699 = vst [vmem:[%s17008_s13 + $0x60] sm:$0xff] %v8669_v57 }
0x2257   :  { %v10778_v58 = vpop.f32.mrb[94].mxu1 }
0x2258   :  { %v8684_v36 = vadd.f32 %v10778_v58, %v8807_v23  ;;  %v8678_v17 = vpop.f32.mrb[95].mxu1 }
0x2259   :  { %v8679_v40 = vadd.f32 %v8807_v23, %v8678_v17 }
0x225a   :  { %8702 = vst [vmem:[%s17008_s13 + $0x78] sm:$0xff] %v8684_v36 }
0x225b   :  { %8701 = vst [vmem:[%s17008_s13 + $0x70] sm:$0xff] %v8679_v40 }

</bundles_post_ra>
